<compile_context>
chip_gen: v5e
topology: v5e:2x2
jax: 0.10.0
libtpu: 0.0.40
codegen_flags: <defaults>
</compile_context>

<pallas_src>
import functools
import math

import jax
import jax.numpy as jnp
from jax import lax
from jax.experimental import pallas as pl
from jax.experimental.pallas import tpu as pltpu
from jax.scipy.linalg import block_diag

VMEM = pl.BlockSpec(memory_space=pltpu.MemorySpace.VMEM)
SMEM = pl.BlockSpec(memory_space=pltpu.MemorySpace.SMEM)
F32 = jnp.float32
BF16 = jnp.bfloat16

_COMPILER_PARAMS = pltpu.CompilerParams(vmem_limit_bytes=48 * 1024 * 1024)


def _mm(a, b):
    """MXU matmul: bf16 operands, f32 accumulation."""
    return jnp.dot(a.astype(BF16), b.astype(BF16), preferred_element_type=F32)


def _mm_nt(a, b):
    """a @ b.T (contract last dims) with bf16 operands, f32 accumulation."""
    return lax.dot_general(a.astype(BF16), b.astype(BF16),
                           (((1,), (1,)), ((), ())),
                           preferred_element_type=F32)


def _elu(x):
    return jnp.where(x > 0.0, x, jnp.exp(x) - 1.0)


def _l2norm(x):
    return x * lax.rsqrt(jnp.sum(x * x, axis=-1, keepdims=True) + 1e-12)


def _ipow(x, k):
    r = x
    for _ in range(k - 1):
        r = r * x
    return r


# ----------------------------------------------------------------------------
# Kernel 1: lane-stacked projection + GCN encoder (low & high pass) + attention
# ----------------------------------------------------------------------------
def _encoder_att_kernel(fb_ref, pw_ref, pb_ref, ew_ref, adj_ref,
                        attw_ref, attb_ref, attq_ref,
                        zall_ref, z_ref, *, views, nlayer, hidden):
    n = adj_ref.shape[0]
    width = 2 * views * hidden
    vh = views * hidden

    adj_b = adj_ref[...].astype(BF16)          # single NxN operand, bf16 on MXU

    # [zp_0 | .. | zp_{V-1} | zp_0 | .. | zp_{V-1}] : low & high paths share
    # the projected start; one full-width matmul via block-diagonal weights.
    block = jnp.maximum(_mm(fb_ref[...], pw_ref[...]) + pb_ref[...], 0.0)

    # lane mask: first V*H columns carry the low-pass path, the rest high-pass
    low_mask = lax.broadcasted_iota(jnp.int32, (n, width), 1) < vh

    for l in range(nlayer):
        hw = _mm(block, ew_ref[l])             # shared enc weight (block-diag)
        a = jnp.dot(adj_b, hw.astype(BF16), preferred_element_type=F32)
        # low-pass: adj @ hw ; high-pass: (I - adj) @ hw = hw - adj @ hw
        block = jnp.where(low_mask, a, hw - a)
        if l < nlayer - 1:
            block = jnp.maximum(block, 0.0)

    zall_ref[...] = block                       # lane-dense slab, one store

    # per-path view means for HAN-style semantic attention
    zml = block[:, 0:hidden]
    zmh = block[:, vh:vh + hidden]
    for v in range(1, views):
        zml = zml + block[:, v * hidden:(v + 1) * hidden]
        zmh = zmh + block[:, vh + v * hidden:vh + (v + 1) * hidden]
    zml = zml / views
    zmh = zmh / views

    attw = attw_ref[...]
    attb = attb_ref[...]
    attq = attq_ref[...]                        # (1, H)

    def _score(e):
        t = jnp.tanh(_mm(e, attw) + attb)
        return jnp.sum(jnp.mean(t, axis=0, keepdims=True) * attq)  # rank-0

    s_l = _score(zml)
    s_h = _score(zmh)
    m = jnp.maximum(s_l, s_h)
    e_l = jnp.exp(s_l - m)
    e_h = jnp.exp(s_h - m)
    inv = 1.0 / (e_l + e_h)
    z_ref[...] = (e_l * inv) * zml + (e_h * inv) * zmh


def encoder_attention(f_big, pw_big, pb_big, encw_big, adj_l,
                      att_w, att_b, att_q, *, views, nlayer, hidden):
    n = f_big.shape[0]
    return pl.pallas_call(
        functools.partial(_encoder_att_kernel, views=views, nlayer=nlayer,
                          hidden=hidden),
        out_shape=(jax.ShapeDtypeStruct((n, 2 * views * hidden), F32),
                   jax.ShapeDtypeStruct((n, hidden), F32)),
        in_specs=[VMEM] * 8,
        out_specs=(VMEM, VMEM),
        compiler_params=_COMPILER_PARAMS,
    )(f_big, pw_big, pb_big, encw_big, adj_l, att_w, att_b, att_q)


# ----------------------------------------------------------------------------
# Kernel 2: fused decoder+SCE, both contrast heads (all views), KL clustering
# ----------------------------------------------------------------------------
def _loss_kernel(zall_ref, z_ref, f_ref,
                 dw1_ref, db1_ref, dw2_ref, db2_ref,
                 clw1_ref, clb1_ref, clw2_ref, clb2_ref,
                 chw1_ref, chb1_ref, chw2_ref, chb2_ref,
                 pool_ref,
                 loss_ref, lab_ref,
                 *, views, hidden, tau, alpha, num_clusters):
    zall = zall_ref[...]
    z = z_ref[...]
    n = z.shape[0]
    vh = views * hidden
    ones_col = jnp.ones((n, 1), F32)

    dw1 = dw1_ref[...]
    w1_l = dw1[:hidden, :]                      # split-weight == Linear(concat)
    w1_h = dw1[hidden:, :]
    db1 = db1_ref[...]
    dw2 = dw2_ref[...]
    db2 = db2_ref[...]

    clw1, clb1 = clw1_ref[...], clb1_ref[...]
    clw2, clb2 = clw2_ref[...], clb2_ref[...]
    chw1, chb1 = chw1_ref[...], chb1_ref[...]
    chw2, chb2 = chw2_ref[...], chb2_ref[...]

    def proj(x, w1, b1, w2, b2):
        h = _elu(_mm(x, w1) + b1)
        return _mm(h, w2) + b2

    # contrast projections of fused z: computed once per head (hoisted)
    pz_cl = _l2norm(proj(z, clw1, clb1, clw2, clb2))
    pz_ch = _l2norm(proj(z, chw1, chb1, chw2, chb2))

    int_alpha = int(alpha)
    use_int_pow = float(alpha) == float(int_alpha) and int_alpha > 0

    def nce(a_n, b_n):
        # InfoNCE with pos = identity: diagonal elementwise; column sums via a
        # ones-vector matmul (no NxN transpose, no identity mask).
        # TODO(synk): flash-style key-block tiling with running accumulators
        # for N >~ 2k (NxN f32 temporaries overflow v7x VMEM otherwise).
        diag = jnp.sum(a_n * b_n, axis=-1, keepdims=True)           # (N, 1)
        de = jnp.exp(diag / tau)
        sim = _mm_nt(a_n, b_n)                                      # (N, N)
        e = jnp.exp(sim / tau)        # f32 exp (v5e has no bf16 EUP)
        row_den = jnp.sum(e, axis=-1, keepdims=True)
        col_den = lax.dot_general(e, ones_col, (((0,), (0,)), ((), ())),
                                  preferred_element_type=F32)        # (N, 1)
        l1 = -jnp.mean(jnp.log(de / (row_den + 1e-8) + 1e-12))
        l2 = -jnp.mean(jnp.log(de / (col_den + 1e-8) + 1e-12))
        return 0.5 * l1 + 0.5 * l2

    loss_rec = jnp.float32(0.0)
    loss_con = jnp.float32(0.0)
    for v in range(views):
        zl = zall[:, v * hidden:(v + 1) * hidden]
        zh = zall[:, vh + v * hidden:vh + (v + 1) * hidden]

        # decoder + scaled cosine error (clamped base, integer power: no NaN)
        h = _elu(_mm(zl, w1_l) + _mm(zh, w1_h) + db1)
        rec = _mm(h, dw2) + db2
        x = f_ref[v]
        cos = jnp.sum(_l2norm(rec) * _l2norm(x), axis=-1, keepdims=True)
        d = jnp.maximum(1.0 - cos, 0.0)
        sce = jnp.mean(_ipow(d, int_alpha)) if use_int_pow else jnp.mean(d ** alpha)
        loss_rec = loss_rec + sce

        # both contrast heads against the fused embedding z
        pl_v = _l2norm(proj(zl, clw1, clb1, clw2, clb2))
        ph_v = _l2norm(proj(zh, chw1, chb1, chw2, chb2))
        loss_con = loss_con + nce(pl_v, pz_cl) + nce(ph_v, pz_ch)

    loss_rec = loss_rec / views

    # DEC-style KL clustering.  mu = pooled chunk means of z via a constant
    # pooling matrix; distances via ||z||^2 + ||mu||^2 - 2 z.mu^T, all without
    # explicit transposes (dot_general on the last dims).
    mu = jnp.dot(pool_ref[...], z, preferred_element_type=F32)      # (C, H)
    zm = lax.dot_general(z, mu, (((1,), (1,)), ((), ())),
                         preferred_element_type=F32)                # (N, C)
    mu2 = lax.dot_general(jnp.ones((1, hidden), F32), mu * mu,
                          (((1,), (1,)), ((), ())),
                          preferred_element_type=F32)                # (1, C)
    z2 = jnp.sum(z * z, axis=-1, keepdims=True)                     # (N, 1)
    d2 = jnp.maximum(z2 + mu2 - 2.0 * zm, 0.0)
    q = 1.0 / (1.0 + d2)
    q = q / jnp.sum(q, axis=-1, keepdims=True)
    fq = jnp.sum(q, axis=0, keepdims=True)
    p = (q * q) / fq
    p = p / jnp.sum(p, axis=-1, keepdims=True)
    eps = 1e-10
    loss_clu = jnp.sum(p * (jnp.log(p + eps) - jnp.log(q + eps))) / n

    loss_ref[0, 0] = loss_rec + loss_clu + loss_con

    # first-max argmax over clusters via iota + min (robust Mosaic lowering)
    # TODO(synk): emit labels lane-dense (1, N) for large N (masked-vst lever).
    qmax = jnp.max(q, axis=-1, keepdims=True)
    idx = lax.broadcasted_iota(jnp.int32, q.shape, 1)
    lab_ref[...] = jnp.min(jnp.where(q >= qmax, idx, num_clusters),
                           axis=-1, keepdims=True)


def fused_losses(zall, z, f_stack, params, pool, *, views, hidden, tau, alpha,
                 num_clusters):
    n = z.shape[0]
    loss, labels = pl.pallas_call(
        functools.partial(_loss_kernel, views=views, hidden=hidden, tau=tau,
                          alpha=alpha, num_clusters=num_clusters),
        out_shape=(jax.ShapeDtypeStruct((1, 1), F32),
                   jax.ShapeDtypeStruct((n, 1), jnp.int32)),
        in_specs=[VMEM] * 16,
        out_specs=(SMEM, VMEM),
        compiler_params=_COMPILER_PARAMS,
    )(zall, z, f_stack,
      params["dec_w1"], params["dec_b1"].reshape(1, -1),
      params["dec_w2"], params["dec_b2"].reshape(1, -1),
      params["cl_w1"], params["cl_b1"].reshape(1, -1),
      params["cl_w2"], params["cl_b2"].reshape(1, -1),
      params["ch_w1"], params["ch_b1"].reshape(1, -1),
      params["ch_w2"], params["ch_b2"].reshape(1, -1),
      pool)
    return loss[0, 0], labels[:, 0]


# ----------------------------------------------------------------------------
# Parameter init (deterministic, kaiming-uniform-like bounds)
# ----------------------------------------------------------------------------
def _unif(key, shape, fan_in):
    bound = 1.0 / math.sqrt(fan_in)
    return jax.random.uniform(key, shape, F32, -bound, bound)


def init_params(key, views, feats_dim, hidden_dim, embed_dim, nlayer):
    keys = iter(jax.random.split(key, 64))
    p = {}
    p["proj_w"] = [_unif(next(keys), (feats_dim, hidden_dim), feats_dim) for _ in range(views)]
    p["proj_b"] = [_unif(next(keys), (hidden_dim,), feats_dim) for _ in range(views)]
    p["enc_w"] = [_unif(next(keys), (hidden_dim, hidden_dim), hidden_dim) for _ in range(nlayer)]
    p["att_w"] = _unif(next(keys), (hidden_dim, hidden_dim), hidden_dim)
    p["att_b"] = _unif(next(keys), (hidden_dim,), hidden_dim)
    p["att_q"] = _unif(next(keys), (hidden_dim,), hidden_dim)
    p["dec_w1"] = _unif(next(keys), (2 * hidden_dim, embed_dim), 2 * hidden_dim)
    p["dec_b1"] = _unif(next(keys), (embed_dim,), 2 * hidden_dim)
    p["dec_w2"] = _unif(next(keys), (embed_dim, feats_dim), embed_dim)
    p["dec_b2"] = _unif(next(keys), (feats_dim,), embed_dim)
    for name in ("cl", "ch"):   # contrast_l / contrast_h projection MLPs
        p[name + "_w1"] = _unif(next(keys), (hidden_dim, hidden_dim), hidden_dim)
        p[name + "_b1"] = _unif(next(keys), (hidden_dim,), hidden_dim)
        p[name + "_w2"] = _unif(next(keys), (hidden_dim, hidden_dim), hidden_dim)
        p[name + "_b2"] = _unif(next(keys), (hidden_dim,), hidden_dim)
    return p


# ----------------------------------------------------------------------------
# Model forward (lightweight layout prep in JAX, heavy math in 2 Pallas kernels)
# ----------------------------------------------------------------------------
def model_forward(params, f_list, adj_l, L_h, *, views, nlayer, tau, alpha,
                  num_clusters):
    # TODO(synk): L_h accepted for API parity; kernel assumes L_h == I - adj_l
    # and computes the high-pass propagation as hw - adj @ hw.
    del L_h
    hidden = params["att_w"].shape[0]
    n = f_list[0].shape[0]

    # Lane-stacked inputs and block-diagonal weights: every GCN step becomes a
    # single (N, 2VH)-wide MXU matmul and zall is emitted lane-dense directly.
    f_big = jnp.concatenate(list(f_list) + list(f_list), axis=-1)           # (N, 2VF)
    pw_big = block_diag(*(list(params["proj_w"]) + list(params["proj_w"])))  # (2VF, 2VH)
    pb_big = jnp.concatenate(list(params["proj_b"]) + list(params["proj_b"]))[None, :]
    eye2v = jnp.eye(2 * views, dtype=F32)
    encw_big = jnp.stack([jnp.kron(eye2v, w) for w in params["enc_w"]], axis=0)

    # 1) projections + low/high-pass GCN encoders + semantic attention
    zall, z = encoder_attention(
        f_big, pw_big, pb_big, encw_big, adj_l,
        params["att_w"], params["att_b"].reshape(1, -1),
        params["att_q"].reshape(1, -1),
        views=views, nlayer=nlayer, hidden=hidden)

    f_stack = jnp.stack(f_list, axis=0)                                      # (V, N, F)

    # 2) fused losses: decoder+SCE, both contrast heads, KL clustering.
    # TODO(synk): reference likely uses KMeans cluster centers; deterministic
    # chunk-mean pooling (requires N % num_clusters == 0) used instead.
    chunk = n // num_clusters
    pool = jnp.kron(jnp.eye(num_clusters, dtype=F32),
                    jnp.full((1, chunk), 1.0 / chunk, dtype=F32))            # (C, N)

    loss, pseudo_label = fused_losses(
        zall, z, f_stack, params, pool,
        views=views, hidden=hidden, tau=tau, alpha=alpha,
        num_clusters=num_clusters)
    return loss, pseudo_label


# ----------------------------------------------------------------------------
# Driver
# ----------------------------------------------------------------------------
if __name__ == "__main__":
    VIEWS = 2
    N = 64            # number of nodes
    FEATS = 32
    HIDDEN = 32
    EMBED = 32
    NUM_CLUSTERS = 4
    NLAYER = 2
    TAU = 0.5
    ALPHA = 2.0       # sce_loss exponent (beta in the module)

    root = jax.random.PRNGKey(0)
    k_param, k_f0, k_f1, k_adj = jax.random.split(root, 4)

    params = init_params(k_param, VIEWS, FEATS, HIDDEN, EMBED, NLAYER)

    f_list = [jax.random.normal(k_f0, (N, FEATS), F32),
              jax.random.normal(k_f1, (N, FEATS), F32)]

    # symmetric normalized low-pass adjacency and high-pass Laplacian
    A = (jax.random.uniform(k_adj, (N, N)) < 0.1).astype(F32)
    A = jnp.maximum(A, A.T) + jnp.eye(N, dtype=F32)
    dinv = 1.0 / jnp.sqrt(jnp.sum(A, axis=-1))
    adj_l = dinv[:, None] * A * dinv[None, :]
    L_h = jnp.eye(N, dtype=F32) - adj_l

    fwd = jax.jit(functools.partial(
        model_forward, views=VIEWS, nlayer=NLAYER, tau=TAU, alpha=ALPHA,
        num_clusters=NUM_CLUSTERS))

    loss, pseudo_label = fwd(params, f_list, adj_l, L_h)
    jax.block_until_ready((loss, pseudo_label))

    assert jnp.isfinite(loss), "loss is not finite"
    assert pseudo_label.shape == (N,)
    print("KERNEL_OK")
</pallas_src>

<mosaic_0001>
module attributes {stable_mosaic.version = 11 : i64} {
  func.func @_encoder_att_kernel(%arg0: memref<64x128xf32, #tpu.memory_space<vmem>>, %arg1: memref<128x128xf32, #tpu.memory_space<vmem>>, %arg2: memref<1x128xf32, #tpu.memory_space<vmem>>, %arg3: memref<2x128x128xf32, #tpu.memory_space<vmem>>, %arg4: memref<64x64xf32, #tpu.memory_space<vmem>>, %arg5: memref<32x32xf32, #tpu.memory_space<vmem>>, %arg6: memref<1x32xf32, #tpu.memory_space<vmem>>, %arg7: memref<1x32xf32, #tpu.memory_space<vmem>>, %arg8: memref<64x128xf32, #tpu.memory_space<vmem>>, %arg9: memref<64x32xf32, #tpu.memory_space<vmem>>) attributes {dimension_semantics = [], scalar_prefetch = 0 : i64, scratch_operands = 0 : i64, tpu.core_type = #tpu.core_type<tc>} {
    %c0 = arith.constant 0 : index
    %c0_0 = arith.constant 0 : index
    %0 = vector.load %arg4[%c0, %c0_0] : memref<64x64xf32, #tpu.memory_space<vmem>>, vector<64x64xf32>
    %1 = arith.truncf %0 : vector<64x64xf32> to vector<64x64xbf16>
    %c0_1 = arith.constant 0 : index
    %c0_2 = arith.constant 0 : index
    %2 = vector.load %arg0[%c0_1, %c0_2] : memref<64x128xf32, #tpu.memory_space<vmem>>, vector<64x128xf32>
    %c0_3 = arith.constant 0 : index
    %c0_4 = arith.constant 0 : index
    %3 = vector.load %arg1[%c0_3, %c0_4] : memref<128x128xf32, #tpu.memory_space<vmem>>, vector<128x128xf32>
    %4 = arith.truncf %2 : vector<64x128xf32> to vector<64x128xbf16>
    %5 = arith.truncf %3 : vector<128x128xf32> to vector<128x128xbf16>
    %cst = arith.constant dense<0.000000e+00> : vector<64x128xf32>
    %6 = tpu.matmul %4, %5, %cst {dimension_numbers = #tpu.dot_dimension_numbers<[1], [0], [0], [1], [0, 0, 1, 1], [], []>} : vector<64x128xbf16>, vector<128x128xbf16>, vector<64x128xf32> -> vector<64x128xf32>
    %c0_5 = arith.constant 0 : index
    %c0_6 = arith.constant 0 : index
    %7 = vector.load %arg2[%c0_5, %c0_6] : memref<1x128xf32, #tpu.memory_space<vmem>>, vector<1x128xf32>
    %8 = vector.broadcast %7 : vector<1x128xf32> to vector<64x128xf32>
    %9 = arith.addf %6, %8 : vector<64x128xf32>
    %cst_7 = arith.constant 0.000000e+00 : f32
    %10 = vector.broadcast %cst_7 : f32 to vector<64x128xf32>
    %11 = arith.maximumf %9, %10 : vector<64x128xf32>
    %12 = tpu.iota {dimensions = array<i32: 1>} : vector<64x128xi32>
    %c64_i32 = arith.constant 64 : i32
    %13 = vector.broadcast %c64_i32 : i32 to vector<64x128xi32>
    %14 = arith.cmpi slt, %12, %13 : vector<64x128xi32>
    %c0_8 = arith.constant 0 : index
    %c0_9 = arith.constant 0 : index
    %c0_10 = arith.constant 0 : index
    %15 = vector.load %arg3[%c0_8, %c0_9, %c0_10] : memref<2x128x128xf32, #tpu.memory_space<vmem>>, vector<1x128x128xf32>
    %16 = vector.shape_cast %15 : vector<1x128x128xf32> to vector<128x128xf32>
    %17 = arith.truncf %11 : vector<64x128xf32> to vector<64x128xbf16>
    %18 = arith.truncf %16 : vector<128x128xf32> to vector<128x128xbf16>
    %cst_11 = arith.constant dense<0.000000e+00> : vector<64x128xf32>
    %19 = tpu.matmul %17, %18, %cst_11 {dimension_numbers = #tpu.dot_dimension_numbers<[1], [0], [0], [1], [0, 0, 1, 1], [], []>} : vector<64x128xbf16>, vector<128x128xbf16>, vector<64x128xf32> -> vector<64x128xf32>
    %20 = arith.truncf %19 : vector<64x128xf32> to vector<64x128xbf16>
    %cst_12 = arith.constant dense<0.000000e+00> : vector<64x128xf32>
    %21 = tpu.matmul %1, %20, %cst_12 {dimension_numbers = #tpu.dot_dimension_numbers<[1], [0], [0], [1], [0, 0, 1, 1], [], []>} : vector<64x64xbf16>, vector<64x128xbf16>, vector<64x128xf32> -> vector<64x128xf32>
    %22 = arith.subf %19, %21 : vector<64x128xf32>
    %23 = arith.select %14, %21, %22 : vector<64x128xi1>, vector<64x128xf32>
    %cst_13 = arith.constant 0.000000e+00 : f32
    %24 = vector.broadcast %cst_13 : f32 to vector<64x128xf32>
    %25 = arith.maximumf %23, %24 : vector<64x128xf32>
    %c1 = arith.constant 1 : index
    %c0_14 = arith.constant 0 : index
    %c0_15 = arith.constant 0 : index
    %26 = vector.load %arg3[%c1, %c0_14, %c0_15] : memref<2x128x128xf32, #tpu.memory_space<vmem>>, vector<1x128x128xf32>
    %27 = vector.shape_cast %26 : vector<1x128x128xf32> to vector<128x128xf32>
    %28 = arith.truncf %25 : vector<64x128xf32> to vector<64x128xbf16>
    %29 = arith.truncf %27 : vector<128x128xf32> to vector<128x128xbf16>
    %cst_16 = arith.constant dense<0.000000e+00> : vector<64x128xf32>
    %30 = tpu.matmul %28, %29, %cst_16 {dimension_numbers = #tpu.dot_dimension_numbers<[1], [0], [0], [1], [0, 0, 1, 1], [], []>} : vector<64x128xbf16>, vector<128x128xbf16>, vector<64x128xf32> -> vector<64x128xf32>
    %31 = arith.truncf %30 : vector<64x128xf32> to vector<64x128xbf16>
    %cst_17 = arith.constant dense<0.000000e+00> : vector<64x128xf32>
    %32 = tpu.matmul %1, %31, %cst_17 {dimension_numbers = #tpu.dot_dimension_numbers<[1], [0], [0], [1], [0, 0, 1, 1], [], []>} : vector<64x64xbf16>, vector<64x128xbf16>, vector<64x128xf32> -> vector<64x128xf32>
    %33 = arith.subf %30, %32 : vector<64x128xf32>
    %34 = arith.select %14, %32, %33 : vector<64x128xi1>, vector<64x128xf32>
    %c0_18 = arith.constant 0 : index
    %c0_19 = arith.constant 0 : index
    %35 = vector.load %arg8[%c0_18, %c0_19] : memref<64x128xf32, #tpu.memory_space<vmem>>, vector<64x128xf32>
    tpu.vector_store %arg8[%c0_18, %c0_19], %34 {strides = array<i32>} : memref<64x128xf32, #tpu.memory_space<vmem>>, vector<64x128xf32>,
    %36 = vector.extract_strided_slice %34 {offsets = [0, 0], sizes = [64, 32], strides = [1, 1]} : vector<64x128xf32> to vector<64x32xf32>
    %37 = vector.extract_strided_slice %34 {offsets = [0, 64], sizes = [64, 32], strides = [1, 1]} : vector<64x128xf32> to vector<64x32xf32>
    %38 = vector.extract_strided_slice %34 {offsets = [0, 32], sizes = [64, 32], strides = [1, 1]} : vector<64x128xf32> to vector<64x32xf32>
    %39 = arith.addf %36, %38 : vector<64x32xf32>
    %40 = vector.extract_strided_slice %34 {offsets = [0, 96], sizes = [64, 32], strides = [1, 1]} : vector<64x128xf32> to vector<64x32xf32>
    %41 = arith.addf %37, %40 : vector<64x32xf32>
    %cst_20 = arith.constant 2.000000e+00 : f32
    %42 = vector.broadcast %cst_20 : f32 to vector<64x32xf32>
    %43 = arith.divf %39, %42 : vector<64x32xf32>
    %cst_21 = arith.constant 2.000000e+00 : f32
    %44 = vector.broadcast %cst_21 : f32 to vector<64x32xf32>
    %45 = arith.divf %41, %44 : vector<64x32xf32>
    %c0_22 = arith.constant 0 : index
    %c0_23 = arith.constant 0 : index
    %46 = vector.load %arg5[%c0_22, %c0_23] : memref<32x32xf32, #tpu.memory_space<vmem>>, vector<32x32xf32>
    %c0_24 = arith.constant 0 : index
    %c0_25 = arith.constant 0 : index
    %47 = vector.load %arg6[%c0_24, %c0_25] : memref<1x32xf32, #tpu.memory_space<vmem>>, vector<1x32xf32>
    %c0_26 = arith.constant 0 : index
    %c0_27 = arith.constant 0 : index
    %48 = vector.load %arg7[%c0_26, %c0_27] : memref<1x32xf32, #tpu.memory_space<vmem>>, vector<1x32xf32>
    %49 = arith.truncf %43 : vector<64x32xf32> to vector<64x32xbf16>
    %50 = arith.truncf %46 : vector<32x32xf32> to vector<32x32xbf16>
    %cst_28 = arith.constant dense<0.000000e+00> : vector<64x32xf32>
    %51 = tpu.matmul %49, %50, %cst_28 {dimension_numbers = #tpu.dot_dimension_numbers<[1], [0], [0], [1], [0, 0, 1, 1], [], []>} : vector<64x32xbf16>, vector<32x32xbf16>, vector<64x32xf32> -> vector<64x32xf32>
    %52 = vector.broadcast %47 : vector<1x32xf32> to vector<64x32xf32>
    %53 = arith.addf %51, %52 : vector<64x32xf32>
    %54 = math.tanh %53 : vector<64x32xf32>
    %cst_29 = arith.constant dense<0.000000e+00> : vector<32xf32>
    %55 = vector.multi_reduction <add>, %54, %cst_29 [0] : vector<64x32xf32> to vector<32xf32>
    %56 = vector.shape_cast %55 : vector<32xf32> to vector<1x32xf32>
    %cst_30 = arith.constant 6.400000e+01 : f32
    %57 = vector.broadcast %cst_30 : f32 to vector<1x32xf32>
    %58 = arith.divf %56, %57 : vector<1x32xf32>
    %59 = arith.mulf %58, %48 : vector<1x32xf32>
    %60 = vector.shape_cast %59 : vector<1x32xf32> to vector<1x1x32xf32>
    %cst_31 = arith.constant dense<0.000000e+00> : vector<1xf32>
    %61 = vector.multi_reduction <add>, %60, %cst_31 [1, 2] : vector<1x1x32xf32> to vector<1xf32>
    %62 = vector.shape_cast %61 : vector<1xf32> to vector<1x1x1xf32>
    %63 = vector.extract %62[0, 0, 0] : f32 from vector<1x1x1xf32>
    %64 = arith.truncf %45 : vector<64x32xf32> to vector<64x32xbf16>
    %65 = arith.truncf %46 : vector<32x32xf32> to vector<32x32xbf16>
    %cst_32 = arith.constant dense<0.000000e+00> : vector<64x32xf32>
    %66 = tpu.matmul %64, %65, %cst_32 {dimension_numbers = #tpu.dot_dimension_numbers<[1], [0], [0], [1], [0, 0, 1, 1], [], []>} : vector<64x32xbf16>, vector<32x32xbf16>, vector<64x32xf32> -> vector<64x32xf32>
    %67 = vector.broadcast %47 : vector<1x32xf32> to vector<64x32xf32>
    %68 = arith.addf %66, %67 : vector<64x32xf32>
    %69 = math.tanh %68 : vector<64x32xf32>
    %cst_33 = arith.constant dense<0.000000e+00> : vector<32xf32>
    %70 = vector.multi_reduction <add>, %69, %cst_33 [0] : vector<64x32xf32> to vector<32xf32>
    %71 = vector.shape_cast %70 : vector<32xf32> to vector<1x32xf32>
    %cst_34 = arith.constant 6.400000e+01 : f32
    %72 = vector.broadcast %cst_34 : f32 to vector<1x32xf32>
    %73 = arith.divf %71, %72 : vector<1x32xf32>
    %74 = arith.mulf %73, %48 : vector<1x32xf32>
    %75 = vector.shape_cast %74 : vector<1x32xf32> to vector<1x1x32xf32>
    %cst_35 = arith.constant dense<0.000000e+00> : vector<1xf32>
    %76 = vector.multi_reduction <add>, %75, %cst_35 [1, 2] : vector<1x1x32xf32> to vector<1xf32>
    %77 = vector.shape_cast %76 : vector<1xf32> to vector<1x1x1xf32>
    %78 = vector.extract %77[0, 0, 0] : f32 from vector<1x1x1xf32>
    %79 = arith.maximumf %63, %78 : f32
    %80 = arith.subf %63, %79 : f32
    %81 = math.exp %80 : f32
    %82 = arith.subf %78, %79 : f32
    %83 = math.exp %82 : f32
    %84 = arith.addf %81, %83 : f32
    %cst_36 = arith.constant 1.000000e+00 : f32
    %85 = arith.divf %cst_36, %84 : f32
    %86 = arith.mulf %81, %85 : f32
    %87 = vector.broadcast %86 : f32 to vector<64x32xf32>
    %88 = arith.mulf %87, %43 : vector<64x32xf32>
    %89 = arith.mulf %83, %85 : f32
    %90 = vector.broadcast %89 : f32 to vector<64x32xf32>
    %91 = arith.mulf %90, %45 : vector<64x32xf32>
    %92 = arith.addf %88, %91 : vector<64x32xf32>
    %c0_37 = arith.constant 0 : index
    %c0_38 = arith.constant 0 : index
    %93 = vector.load %arg9[%c0_37, %c0_38] : memref<64x32xf32, #tpu.memory_space<vmem>>, vector<64x32xf32>
    tpu.vector_store %arg9[%c0_37, %c0_38], %92 {strides = array<i32>} : memref<64x32xf32, #tpu.memory_space<vmem>>, vector<64x32xf32>,
    return
  }
}

module attributes {stable_mosaic.version = 11 : i64} {
  func.func @_loss_kernel(%arg0: memref<64x128xf32, #tpu.memory_space<vmem>>, %arg1: memref<64x32xf32, #tpu.memory_space<vmem>>, %arg2: memref<2x64x32xf32, #tpu.memory_space<vmem>>, %arg3: memref<64x32xf32, #tpu.memory_space<vmem>>, %arg4: memref<1x32xf32, #tpu.memory_space<vmem>>, %arg5: memref<32x32xf32, #tpu.memory_space<vmem>>, %arg6: memref<1x32xf32, #tpu.memory_space<vmem>>, %arg7: memref<32x32xf32, #tpu.memory_space<vmem>>, %arg8: memref<1x32xf32, #tpu.memory_space<vmem>>, %arg9: memref<32x32xf32, #tpu.memory_space<vmem>>, %arg10: memref<1x32xf32, #tpu.memory_space<vmem>>, %arg11: memref<32x32xf32, #tpu.memory_space<vmem>>, %arg12: memref<1x32xf32, #tpu.memory_space<vmem>>, %arg13: memref<32x32xf32, #tpu.memory_space<vmem>>, %arg14: memref<1x32xf32, #tpu.memory_space<vmem>>, %arg15: memref<4x64xf32, #tpu.memory_space<vmem>>, %arg16: memref<1x1xf32, #tpu.memory_space<smem>>, %arg17: memref<64x1xi32, #tpu.memory_space<vmem>>) attributes {dimension_semantics = [], scalar_prefetch = 0 : i64, scratch_operands = 0 : i64, tpu.core_type = #tpu.core_type<tc>} {
    %c0 = arith.constant 0 : index
    %c0_0 = arith.constant 0 : index
    %0 = vector.load %arg0[%c0, %c0_0] : memref<64x128xf32, #tpu.memory_space<vmem>>, vector<64x128xf32>
    %c0_1 = arith.constant 0 : index
    %c0_2 = arith.constant 0 : index
    %1 = vector.load %arg1[%c0_1, %c0_2] : memref<64x32xf32, #tpu.memory_space<vmem>>, vector<64x32xf32>
    %cst = arith.constant 1.000000e+00 : f32
    %2 = vector.broadcast %cst : f32 to vector<64x1xf32>
    %c0_3 = arith.constant 0 : index
    %c0_4 = arith.constant 0 : index
    %3 = vector.load %arg3[%c0_3, %c0_4] : memref<64x32xf32, #tpu.memory_space<vmem>>, vector<64x32xf32>
    %4 = vector.extract_strided_slice %3 {offsets = [0, 0], sizes = [32, 32], strides = [1, 1]} : vector<64x32xf32> to vector<32x32xf32>
    %5 = vector.extract_strided_slice %3 {offsets = [32, 0], sizes = [32, 32], strides = [1, 1]} : vector<64x32xf32> to vector<32x32xf32>
    %c0_5 = arith.constant 0 : index
    %c0_6 = arith.constant 0 : index
    %6 = vector.load %arg4[%c0_5, %c0_6] : memref<1x32xf32, #tpu.memory_space<vmem>>, vector<1x32xf32>
    %c0_7 = arith.constant 0 : index
    %c0_8 = arith.constant 0 : index
    %7 = vector.load %arg5[%c0_7, %c0_8] : memref<32x32xf32, #tpu.memory_space<vmem>>, vector<32x32xf32>
    %c0_9 = arith.constant 0 : index
    %c0_10 = arith.constant 0 : index
    %8 = vector.load %arg6[%c0_9, %c0_10] : memref<1x32xf32, #tpu.memory_space<vmem>>, vector<1x32xf32>
    %c0_11 = arith.constant 0 : index
    %c0_12 = arith.constant 0 : index
    %9 = vector.load %arg7[%c0_11, %c0_12] : memref<32x32xf32, #tpu.memory_space<vmem>>, vector<32x32xf32>
    %c0_13 = arith.constant 0 : index
    %c0_14 = arith.constant 0 : index
    %10 = vector.load %arg8[%c0_13, %c0_14] : memref<1x32xf32, #tpu.memory_space<vmem>>, vector<1x32xf32>
    %c0_15 = arith.constant 0 : index
    %c0_16 = arith.constant 0 : index
    %11 = vector.load %arg9[%c0_15, %c0_16] : memref<32x32xf32, #tpu.memory_space<vmem>>, vector<32x32xf32>
    %c0_17 = arith.constant 0 : index
    %c0_18 = arith.constant 0 : index
    %12 = vector.load %arg10[%c0_17, %c0_18] : memref<1x32xf32, #tpu.memory_space<vmem>>, vector<1x32xf32>
    %c0_19 = arith.constant 0 : index
    %c0_20 = arith.constant 0 : index
    %13 = vector.load %arg11[%c0_19, %c0_20] : memref<32x32xf32, #tpu.memory_space<vmem>>, vector<32x32xf32>
    %c0_21 = arith.constant 0 : index
    %c0_22 = arith.constant 0 : index
    %14 = vector.load %arg12[%c0_21, %c0_22] : memref<1x32xf32, #tpu.memory_space<vmem>>, vector<1x32xf32>
    %c0_23 = arith.constant 0 : index
    %c0_24 = arith.constant 0 : index
    %15 = vector.load %arg13[%c0_23, %c0_24] : memref<32x32xf32, #tpu.memory_space<vmem>>, vector<32x32xf32>
    %c0_25 = arith.constant 0 : index
    %c0_26 = arith.constant 0 : index
    %16 = vector.load %arg14[%c0_25, %c0_26] : memref<1x32xf32, #tpu.memory_space<vmem>>, vector<1x32xf32>
    %17 = arith.truncf %1 : vector<64x32xf32> to vector<64x32xbf16>
    %18 = arith.truncf %9 : vector<32x32xf32> to vector<32x32xbf16>
    %cst_27 = arith.constant dense<0.000000e+00> : vector<64x32xf32>
    %19 = tpu.matmul %17, %18, %cst_27 {dimension_numbers = #tpu.dot_dimension_numbers<[1], [0], [0], [1], [0, 0, 1, 1], [], []>} : vector<64x32xbf16>, vector<32x32xbf16>, vector<64x32xf32> -> vector<64x32xf32>
    %20 = vector.broadcast %10 : vector<1x32xf32> to vector<64x32xf32>
    %21 = arith.addf %19, %20 : vector<64x32xf32>
    %cst_28 = arith.constant 0.000000e+00 : f32
    %22 = vector.broadcast %cst_28 : f32 to vector<64x32xf32>
    %23 = arith.cmpf ogt, %21, %22 : vector<64x32xf32>
    %24 = math.exp %21 : vector<64x32xf32>
    %cst_29 = arith.constant 1.000000e+00 : f32
    %25 = vector.broadcast %cst_29 : f32 to vector<64x32xf32>
    %26 = arith.subf %24, %25 : vector<64x32xf32>
    %27 = arith.select %23, %21, %26 : vector<64x32xi1>, vector<64x32xf32>
    %28 = arith.truncf %27 : vector<64x32xf32> to vector<64x32xbf16>
    %29 = arith.truncf %11 : vector<32x32xf32> to vector<32x32xbf16>
    %cst_30 = arith.constant dense<0.000000e+00> : vector<64x32xf32>
    %30 = tpu.matmul %28, %29, %cst_30 {dimension_numbers = #tpu.dot_dimension_numbers<[1], [0], [0], [1], [0, 0, 1, 1], [], []>} : vector<64x32xbf16>, vector<32x32xbf16>, vector<64x32xf32> -> vector<64x32xf32>
    %31 = vector.broadcast %12 : vector<1x32xf32> to vector<64x32xf32>
    %32 = arith.addf %30, %31 : vector<64x32xf32>
    %33 = arith.mulf %32, %32 : vector<64x32xf32>
    %cst_31 = arith.constant dense<0.000000e+00> : vector<64xf32>
    %34 = vector.multi_reduction <add>, %33, %cst_31 [1] : vector<64x32xf32> to vector<64xf32>
    %35 = vector.shape_cast %34 : vector<64xf32> to vector<64x1xf32>
    %cst_32 = arith.constant 9.99999996E-13 : f32
    %36 = vector.broadcast %cst_32 : f32 to vector<64x1xf32>
    %37 = arith.addf %35, %36 : vector<64x1xf32>
    %38 = math.rsqrt %37 : vector<64x1xf32>
    %39 = vector.broadcast %38 : vector<64x1xf32> to vector<64x32xf32>
    %40 = arith.mulf %32, %39 : vector<64x32xf32>
    %41 = arith.truncf %1 : vector<64x32xf32> to vector<64x32xbf16>
    %42 = arith.truncf %13 : vector<32x32xf32> to vector<32x32xbf16>
    %cst_33 = arith.constant dense<0.000000e+00> : vector<64x32xf32>
    %43 = tpu.matmul %41, %42, %cst_33 {dimension_numbers = #tpu.dot_dimension_numbers<[1], [0], [0], [1], [0, 0, 1, 1], [], []>} : vector<64x32xbf16>, vector<32x32xbf16>, vector<64x32xf32> -> vector<64x32xf32>
    %44 = vector.broadcast %14 : vector<1x32xf32> to vector<64x32xf32>
    %45 = arith.addf %43, %44 : vector<64x32xf32>
    %cst_34 = arith.constant 0.000000e+00 : f32
    %46 = vector.broadcast %cst_34 : f32 to vector<64x32xf32>
    %47 = arith.cmpf ogt, %45, %46 : vector<64x32xf32>
    %48 = math.exp %45 : vector<64x32xf32>
    %cst_35 = arith.constant 1.000000e+00 : f32
    %49 = vector.broadcast %cst_35 : f32 to vector<64x32xf32>
    %50 = arith.subf %48, %49 : vector<64x32xf32>
    %51 = arith.select %47, %45, %50 : vector<64x32xi1>, vector<64x32xf32>
    %52 = arith.truncf %51 : vector<64x32xf32> to vector<64x32xbf16>
    %53 = arith.truncf %15 : vector<32x32xf32> to vector<32x32xbf16>
    %cst_36 = arith.constant dense<0.000000e+00> : vector<64x32xf32>
    %54 = tpu.matmul %52, %53, %cst_36 {dimension_numbers = #tpu.dot_dimension_numbers<[1], [0], [0], [1], [0, 0, 1, 1], [], []>} : vector<64x32xbf16>, vector<32x32xbf16>, vector<64x32xf32> -> vector<64x32xf32>
    %55 = vector.broadcast %16 : vector<1x32xf32> to vector<64x32xf32>
    %56 = arith.addf %54, %55 : vector<64x32xf32>
    %57 = arith.mulf %56, %56 : vector<64x32xf32>
    %cst_37 = arith.constant dense<0.000000e+00> : vector<64xf32>
    %58 = vector.multi_reduction <add>, %57, %cst_37 [1] : vector<64x32xf32> to vector<64xf32>
    %59 = vector.shape_cast %58 : vector<64xf32> to vector<64x1xf32>
    %cst_38 = arith.constant 9.99999996E-13 : f32
    %60 = vector.broadcast %cst_38 : f32 to vector<64x1xf32>
    %61 = arith.addf %59, %60 : vector<64x1xf32>
    %62 = math.rsqrt %61 : vector<64x1xf32>
    %63 = vector.broadcast %62 : vector<64x1xf32> to vector<64x32xf32>
    %64 = arith.mulf %56, %63 : vector<64x32xf32>
    %65 = vector.extract_strided_slice %0 {offsets = [0, 0], sizes = [64, 32], strides = [1, 1]} : vector<64x128xf32> to vector<64x32xf32>
    %66 = vector.extract_strided_slice %0 {offsets = [0, 64], sizes = [64, 32], strides = [1, 1]} : vector<64x128xf32> to vector<64x32xf32>
    %67 = arith.truncf %65 : vector<64x32xf32> to vector<64x32xbf16>
    %68 = arith.truncf %4 : vector<32x32xf32> to vector<32x32xbf16>
    %cst_39 = arith.constant dense<0.000000e+00> : vector<64x32xf32>
    %69 = tpu.matmul %67, %68, %cst_39 {dimension_numbers = #tpu.dot_dimension_numbers<[1], [0], [0], [1], [0, 0, 1, 1], [], []>} : vector<64x32xbf16>, vector<32x32xbf16>, vector<64x32xf32> -> vector<64x32xf32>
    %70 = arith.truncf %66 : vector<64x32xf32> to vector<64x32xbf16>
    %71 = arith.truncf %5 : vector<32x32xf32> to vector<32x32xbf16>
    %cst_40 = arith.constant dense<0.000000e+00> : vector<64x32xf32>
    %72 = tpu.matmul %70, %71, %cst_40 {dimension_numbers = #tpu.dot_dimension_numbers<[1], [0], [0], [1], [0, 0, 1, 1], [], []>} : vector<64x32xbf16>, vector<32x32xbf16>, vector<64x32xf32> -> vector<64x32xf32>
    %73 = arith.addf %69, %72 : vector<64x32xf32>
    %74 = vector.broadcast %6 : vector<1x32xf32> to vector<64x32xf32>
    %75 = arith.addf %73, %74 : vector<64x32xf32>
    %cst_41 = arith.constant 0.000000e+00 : f32
    %76 = vector.broadcast %cst_41 : f32 to vector<64x32xf32>
    %77 = arith.cmpf ogt, %75, %76 : vector<64x32xf32>
    %78 = math.exp %75 : vector<64x32xf32>
    %cst_42 = arith.constant 1.000000e+00 : f32
    %79 = vector.broadcast %cst_42 : f32 to vector<64x32xf32>
    %80 = arith.subf %78, %79 : vector<64x32xf32>
    %81 = arith.select %77, %75, %80 : vector<64x32xi1>, vector<64x32xf32>
    %82 = arith.truncf %81 : vector<64x32xf32> to vector<64x32xbf16>
    %83 = arith.truncf %7 : vector<32x32xf32> to vector<32x32xbf16>
    %cst_43 = arith.constant dense<0.000000e+00> : vector<64x32xf32>
    %84 = tpu.matmul %82, %83, %cst_43 {dimension_numbers = #tpu.dot_dimension_numbers<[1], [0], [0], [1], [0, 0, 1, 1], [], []>} : vector<64x32xbf16>, vector<32x32xbf16>, vector<64x32xf32> -> vector<64x32xf32>
    %85 = vector.broadcast %8 : vector<1x32xf32> to vector<64x32xf32>
    %86 = arith.addf %84, %85 : vector<64x32xf32>
    %c0_44 = arith.constant 0 : index
    %c0_45 = arith.constant 0 : index
    %c0_46 = arith.constant 0 : index
    %87 = vector.load %arg2[%c0_44, %c0_45, %c0_46] : memref<2x64x32xf32, #tpu.memory_space<vmem>>, vector<1x64x32xf32>
    %88 = vector.shape_cast %87 : vector<1x64x32xf32> to vector<64x32xf32>
    %89 = arith.mulf %86, %86 : vector<64x32xf32>
    %cst_47 = arith.constant dense<0.000000e+00> : vector<64xf32>
    %90 = vector.multi_reduction <add>, %89, %cst_47 [1] : vector<64x32xf32> to vector<64xf32>
    %91 = vector.shape_cast %90 : vector<64xf32> to vector<64x1xf32>
    %cst_48 = arith.constant 9.99999996E-13 : f32
    %92 = vector.broadcast %cst_48 : f32 to vector<64x1xf32>
    %93 = arith.addf %91, %92 : vector<64x1xf32>
    %94 = math.rsqrt %93 : vector<64x1xf32>
    %95 = vector.broadcast %94 : vector<64x1xf32> to vector<64x32xf32>
    %96 = arith.mulf %86, %95 : vector<64x32xf32>
    %97 = arith.mulf %88, %88 : vector<64x32xf32>
    %cst_49 = arith.constant dense<0.000000e+00> : vector<64xf32>
    %98 = vector.multi_reduction <add>, %97, %cst_49 [1] : vector<64x32xf32> to vector<64xf32>
    %99 = vector.shape_cast %98 : vector<64xf32> to vector<64x1xf32>
    %cst_50 = arith.constant 9.99999996E-13 : f32
    %100 = vector.broadcast %cst_50 : f32 to vector<64x1xf32>
    %101 = arith.addf %99, %100 : vector<64x1xf32>
    %102 = math.rsqrt %101 : vector<64x1xf32>
    %103 = vector.broadcast %102 : vector<64x1xf32> to vector<64x32xf32>
    %104 = arith.mulf %88, %103 : vector<64x32xf32>
    %105 = arith.mulf %96, %104 : vector<64x32xf32>
    %cst_51 = arith.constant dense<0.000000e+00> : vector<64xf32>
    %106 = vector.multi_reduction <add>, %105, %cst_51 [1] : vector<64x32xf32> to vector<64xf32>
    %107 = vector.shape_cast %106 : vector<64xf32> to vector<64x1xf32>
    %cst_52 = arith.constant 1.000000e+00 : f32
    %108 = vector.broadcast %cst_52 : f32 to vector<64x1xf32>
    %109 = arith.subf %108, %107 : vector<64x1xf32>
    %cst_53 = arith.constant 0.000000e+00 : f32
    %110 = vector.broadcast %cst_53 : f32 to vector<64x1xf32>
    %111 = arith.maximumf %109, %110 : vector<64x1xf32>
    %112 = arith.mulf %111, %111 : vector<64x1xf32>
    %113 = vector.shape_cast %112 : vector<64x1xf32> to vector<1x64x1xf32>
    %cst_54 = arith.constant dense<0.000000e+00> : vector<1xf32>
    %114 = vector.multi_reduction <add>, %113, %cst_54 [1, 2] : vector<1x64x1xf32> to vector<1xf32>
    %115 = vector.shape_cast %114 : vector<1xf32> to vector<1x1x1xf32>
    %116 = vector.extract %115[0, 0, 0] : f32 from vector<1x1x1xf32>
    %cst_55 = arith.constant 6.400000e+01 : f32
    %117 = arith.divf %116, %cst_55 : f32
    %cst_56 = arith.constant 0.000000e+00 : f32
    %118 = arith.addf %cst_56, %117 : f32
    %119 = arith.truncf %65 : vector<64x32xf32> to vector<64x32xbf16>
    %120 = arith.truncf %9 : vector<32x32xf32> to vector<32x32xbf16>
    %cst_57 = arith.constant dense<0.000000e+00> : vector<64x32xf32>
    %121 = tpu.matmul %119, %120, %cst_57 {dimension_numbers = #tpu.dot_dimension_numbers<[1], [0], [0], [1], [0, 0, 1, 1], [], []>} : vector<64x32xbf16>, vector<32x32xbf16>, vector<64x32xf32> -> vector<64x32xf32>
    %122 = vector.broadcast %10 : vector<1x32xf32> to vector<64x32xf32>
    %123 = arith.addf %121, %122 : vector<64x32xf32>
    %cst_58 = arith.constant 0.000000e+00 : f32
    %124 = vector.broadcast %cst_58 : f32 to vector<64x32xf32>
    %125 = arith.cmpf ogt, %123, %124 : vector<64x32xf32>
    %126 = math.exp %123 : vector<64x32xf32>
    %cst_59 = arith.constant 1.000000e+00 : f32
    %127 = vector.broadcast %cst_59 : f32 to vector<64x32xf32>
    %128 = arith.subf %126, %127 : vector<64x32xf32>
    %129 = arith.select %125, %123, %128 : vector<64x32xi1>, vector<64x32xf32>
    %130 = arith.truncf %129 : vector<64x32xf32> to vector<64x32xbf16>
    %131 = arith.truncf %11 : vector<32x32xf32> to vector<32x32xbf16>
    %cst_60 = arith.constant dense<0.000000e+00> : vector<64x32xf32>
    %132 = tpu.matmul %130, %131, %cst_60 {dimension_numbers = #tpu.dot_dimension_numbers<[1], [0], [0], [1], [0, 0, 1, 1], [], []>} : vector<64x32xbf16>, vector<32x32xbf16>, vector<64x32xf32> -> vector<64x32xf32>
    %133 = vector.broadcast %12 : vector<1x32xf32> to vector<64x32xf32>
    %134 = arith.addf %132, %133 : vector<64x32xf32>
    %135 = arith.mulf %134, %134 : vector<64x32xf32>
    %cst_61 = arith.constant dense<0.000000e+00> : vector<64xf32>
    %136 = vector.multi_reduction <add>, %135, %cst_61 [1] : vector<64x32xf32> to vector<64xf32>
    %137 = vector.shape_cast %136 : vector<64xf32> to vector<64x1xf32>
    %cst_62 = arith.constant 9.99999996E-13 : f32
    %138 = vector.broadcast %cst_62 : f32 to vector<64x1xf32>
    %139 = arith.addf %137, %138 : vector<64x1xf32>
    %140 = math.rsqrt %139 : vector<64x1xf32>
    %141 = vector.broadcast %140 : vector<64x1xf32> to vector<64x32xf32>
    %142 = arith.mulf %134, %141 : vector<64x32xf32>
    %143 = arith.truncf %66 : vector<64x32xf32> to vector<64x32xbf16>
    %144 = arith.truncf %13 : vector<32x32xf32> to vector<32x32xbf16>
    %cst_63 = arith.constant dense<0.000000e+00> : vector<64x32xf32>
    %145 = tpu.matmul %143, %144, %cst_63 {dimension_numbers = #tpu.dot_dimension_numbers<[1], [0], [0], [1], [0, 0, 1, 1], [], []>} : vector<64x32xbf16>, vector<32x32xbf16>, vector<64x32xf32> -> vector<64x32xf32>
    %146 = vector.broadcast %14 : vector<1x32xf32> to vector<64x32xf32>
    %147 = arith.addf %145, %146 : vector<64x32xf32>
    %cst_64 = arith.constant 0.000000e+00 : f32
    %148 = vector.broadcast %cst_64 : f32 to vector<64x32xf32>
    %149 = arith.cmpf ogt, %147, %148 : vector<64x32xf32>
    %150 = math.exp %147 : vector<64x32xf32>
    %cst_65 = arith.constant 1.000000e+00 : f32
    %151 = vector.broadcast %cst_65 : f32 to vector<64x32xf32>
    %152 = arith.subf %150, %151 : vector<64x32xf32>
    %153 = arith.select %149, %147, %152 : vector<64x32xi1>, vector<64x32xf32>
    %154 = arith.truncf %153 : vector<64x32xf32> to vector<64x32xbf16>
    %155 = arith.truncf %15 : vector<32x32xf32> to vector<32x32xbf16>
    %cst_66 = arith.constant dense<0.000000e+00> : vector<64x32xf32>
    %156 = tpu.matmul %154, %155, %cst_66 {dimension_numbers = #tpu.dot_dimension_numbers<[1], [0], [0], [1], [0, 0, 1, 1], [], []>} : vector<64x32xbf16>, vector<32x32xbf16>, vector<64x32xf32> -> vector<64x32xf32>
    %157 = vector.broadcast %16 : vector<1x32xf32> to vector<64x32xf32>
    %158 = arith.addf %156, %157 : vector<64x32xf32>
    %159 = arith.mulf %158, %158 : vector<64x32xf32>
    %cst_67 = arith.constant dense<0.000000e+00> : vector<64xf32>
    %160 = vector.multi_reduction <add>, %159, %cst_67 [1] : vector<64x32xf32> to vector<64xf32>
    %161 = vector.shape_cast %160 : vector<64xf32> to vector<64x1xf32>
    %cst_68 = arith.constant 9.99999996E-13 : f32
    %162 = vector.broadcast %cst_68 : f32 to vector<64x1xf32>
    %163 = arith.addf %161, %162 : vector<64x1xf32>
    %164 = math.rsqrt %163 : vector<64x1xf32>
    %165 = vector.broadcast %164 : vector<64x1xf32> to vector<64x32xf32>
    %166 = arith.mulf %158, %165 : vector<64x32xf32>
    %167 = arith.mulf %142, %40 : vector<64x32xf32>
    %cst_69 = arith.constant dense<0.000000e+00> : vector<64xf32>
    %168 = vector.multi_reduction <add>, %167, %cst_69 [1] : vector<64x32xf32> to vector<64xf32>
    %169 = vector.shape_cast %168 : vector<64xf32> to vector<64x1xf32>
    %cst_70 = arith.constant 5.000000e-01 : f32
    %170 = vector.broadcast %cst_70 : f32 to vector<64x1xf32>
    %171 = arith.divf %169, %170 : vector<64x1xf32>
    %172 = math.exp %171 : vector<64x1xf32>
    %173 = arith.truncf %142 : vector<64x32xf32> to vector<64x32xbf16>
    %174 = arith.truncf %40 : vector<64x32xf32> to vector<64x32xbf16>
    %cst_71 = arith.constant dense<0.000000e+00> : vector<64x64xf32>
    %175 = tpu.matmul %173, %174, %cst_71 {dimension_numbers = #tpu.dot_dimension_numbers<[1], [1], [0], [0], [0, 0, 1, 0], [], []>} : vector<64x32xbf16>, vector<64x32xbf16>, vector<64x64xf32> -> vector<64x64xf32>
    %cst_72 = arith.constant 5.000000e-01 : f32
    %176 = vector.broadcast %cst_72 : f32 to vector<64x64xf32>
    %177 = arith.divf %175, %176 : vector<64x64xf32>
    %178 = math.exp %177 : vector<64x64xf32>
    %cst_73 = arith.constant dense<0.000000e+00> : vector<64xf32>
    %179 = vector.multi_reduction <add>, %178, %cst_73 [1] : vector<64x64xf32> to vector<64xf32>
    %180 = vector.shape_cast %179 : vector<64xf32> to vector<64x1xf32>
    %cst_74 = arith.constant dense<0.000000e+00> : vector<64x1xf32>
    %181 = tpu.matmul %178, %2, %cst_74 {dimension_numbers = #tpu.dot_dimension_numbers<[0], [0], [1], [1], [0, 1, 1, 1], [], []>} : vector<64x64xf32>, vector<64x1xf32>, vector<64x1xf32> -> vector<64x1xf32>
    %cst_75 = arith.constant 9.99999993E-9 : f32
    %182 = vector.broadcast %cst_75 : f32 to vector<64x1xf32>
    %183 = arith.addf %180, %182 : vector<64x1xf32>
    %184 = arith.divf %172, %183 : vector<64x1xf32>
    %cst_76 = arith.constant 9.99999996E-13 : f32
    %185 = vector.broadcast %cst_76 : f32 to vector<64x1xf32>
    %186 = arith.addf %184, %185 : vector<64x1xf32>
    %187 = math.log %186 : vector<64x1xf32>
    %188 = vector.shape_cast %187 : vector<64x1xf32> to vector<1x64x1xf32>
    %cst_77 = arith.constant dense<0.000000e+00> : vector<1xf32>
    %189 = vector.multi_reduction <add>, %188, %cst_77 [1, 2] : vector<1x64x1xf32> to vector<1xf32>
    %190 = vector.shape_cast %189 : vector<1xf32> to vector<1x1x1xf32>
    %191 = vector.extract %190[0, 0, 0] : f32 from vector<1x1x1xf32>
    %cst_78 = arith.constant 6.400000e+01 : f32
    %192 = arith.divf %191, %cst_78 : f32
    %cst_79 = arith.constant 0.000000e+00 : f32
    %193 = arith.subf %cst_79, %192 : f32
    %cst_80 = arith.constant 9.99999993E-9 : f32
    %194 = vector.broadcast %cst_80 : f32 to vector<64x1xf32>
    %195 = arith.addf %181, %194 : vector<64x1xf32>
    %196 = arith.divf %172, %195 : vector<64x1xf32>
    %cst_81 = arith.constant 9.99999996E-13 : f32
    %197 = vector.broadcast %cst_81 : f32 to vector<64x1xf32>
    %198 = arith.addf %196, %197 : vector<64x1xf32>
    %199 = math.log %198 : vector<64x1xf32>
    %200 = vector.shape_cast %199 : vector<64x1xf32> to vector<1x64x1xf32>
    %cst_82 = arith.constant dense<0.000000e+00> : vector<1xf32>
    %201 = vector.multi_reduction <add>, %200, %cst_82 [1, 2] : vector<1x64x1xf32> to vector<1xf32>
    %202 = vector.shape_cast %201 : vector<1xf32> to vector<1x1x1xf32>
    %203 = vector.extract %202[0, 0, 0] : f32 from vector<1x1x1xf32>
    %cst_83 = arith.constant 6.400000e+01 : f32
    %204 = arith.divf %203, %cst_83 : f32
    %cst_84 = arith.constant 0.000000e+00 : f32
    %205 = arith.subf %cst_84, %204 : f32
    %cst_85 = arith.constant 5.000000e-01 : f32
    %206 = arith.mulf %cst_85, %193 : f32
    %cst_86 = arith.constant 5.000000e-01 : f32
    %207 = arith.mulf %cst_86, %205 : f32
    %208 = arith.addf %206, %207 : f32
    %cst_87 = arith.constant 0.000000e+00 : f32
    %209 = arith.addf %cst_87, %208 : f32
    %210 = arith.mulf %166, %64 : vector<64x32xf32>
    %cst_88 = arith.constant dense<0.000000e+00> : vector<64xf32>
    %211 = vector.multi_reduction <add>, %210, %cst_88 [1] : vector<64x32xf32> to vector<64xf32>
    %212 = vector.shape_cast %211 : vector<64xf32> to vector<64x1xf32>
    %cst_89 = arith.constant 5.000000e-01 : f32
    %213 = vector.broadcast %cst_89 : f32 to vector<64x1xf32>
    %214 = arith.divf %212, %213 : vector<64x1xf32>
    %215 = math.exp %214 : vector<64x1xf32>
    %216 = arith.truncf %166 : vector<64x32xf32> to vector<64x32xbf16>
    %217 = arith.truncf %64 : vector<64x32xf32> to vector<64x32xbf16>
    %cst_90 = arith.constant dense<0.000000e+00> : vector<64x64xf32>
    %218 = tpu.matmul %216, %217, %cst_90 {dimension_numbers = #tpu.dot_dimension_numbers<[1], [1], [0], [0], [0, 0, 1, 0], [], []>} : vector<64x32xbf16>, vector<64x32xbf16>, vector<64x64xf32> -> vector<64x64xf32>
    %cst_91 = arith.constant 5.000000e-01 : f32
    %219 = vector.broadcast %cst_91 : f32 to vector<64x64xf32>
    %220 = arith.divf %218, %219 : vector<64x64xf32>
    %221 = math.exp %220 : vector<64x64xf32>
    %cst_92 = arith.constant dense<0.000000e+00> : vector<64xf32>
    %222 = vector.multi_reduction <add>, %221, %cst_92 [1] : vector<64x64xf32> to vector<64xf32>
    %223 = vector.shape_cast %222 : vector<64xf32> to vector<64x1xf32>
    %cst_93 = arith.constant dense<0.000000e+00> : vector<64x1xf32>
    %224 = tpu.matmul %221, %2, %cst_93 {dimension_numbers = #tpu.dot_dimension_numbers<[0], [0], [1], [1], [0, 1, 1, 1], [], []>} : vector<64x64xf32>, vector<64x1xf32>, vector<64x1xf32> -> vector<64x1xf32>
    %cst_94 = arith.constant 9.99999993E-9 : f32
    %225 = vector.broadcast %cst_94 : f32 to vector<64x1xf32>
    %226 = arith.addf %223, %225 : vector<64x1xf32>
    %227 = arith.divf %215, %226 : vector<64x1xf32>
    %cst_95 = arith.constant 9.99999996E-13 : f32
    %228 = vector.broadcast %cst_95 : f32 to vector<64x1xf32>
    %229 = arith.addf %227, %228 : vector<64x1xf32>
    %230 = math.log %229 : vector<64x1xf32>
    %231 = vector.shape_cast %230 : vector<64x1xf32> to vector<1x64x1xf32>
    %cst_96 = arith.constant dense<0.000000e+00> : vector<1xf32>
    %232 = vector.multi_reduction <add>, %231, %cst_96 [1, 2] : vector<1x64x1xf32> to vector<1xf32>
    %233 = vector.shape_cast %232 : vector<1xf32> to vector<1x1x1xf32>
    %234 = vector.extract %233[0, 0, 0] : f32 from vector<1x1x1xf32>
    %cst_97 = arith.constant 6.400000e+01 : f32
    %235 = arith.divf %234, %cst_97 : f32
    %cst_98 = arith.constant 0.000000e+00 : f32
    %236 = arith.subf %cst_98, %235 : f32
    %cst_99 = arith.constant 9.99999993E-9 : f32
    %237 = vector.broadcast %cst_99 : f32 to vector<64x1xf32>
    %238 = arith.addf %224, %237 : vector<64x1xf32>
    %239 = arith.divf %215, %238 : vector<64x1xf32>
    %cst_100 = arith.constant 9.99999996E-13 : f32
    %240 = vector.broadcast %cst_100 : f32 to vector<64x1xf32>
    %241 = arith.addf %239, %240 : vector<64x1xf32>
    %242 = math.log %241 : vector<64x1xf32>
    %243 = vector.shape_cast %242 : vector<64x1xf32> to vector<1x64x1xf32>
    %cst_101 = arith.constant dense<0.000000e+00> : vector<1xf32>
    %244 = vector.multi_reduction <add>, %243, %cst_101 [1, 2] : vector<1x64x1xf32> to vector<1xf32>
    %245 = vector.shape_cast %244 : vector<1xf32> to vector<1x1x1xf32>
    %246 = vector.extract %245[0, 0, 0] : f32 from vector<1x1x1xf32>
    %cst_102 = arith.constant 6.400000e+01 : f32
    %247 = arith.divf %246, %cst_102 : f32
    %cst_103 = arith.constant 0.000000e+00 : f32
    %248 = arith.subf %cst_103, %247 : f32
    %cst_104 = arith.constant 5.000000e-01 : f32
    %249 = arith.mulf %cst_104, %236 : f32
    %cst_105 = arith.constant 5.000000e-01 : f32
    %250 = arith.mulf %cst_105, %248 : f32
    %251 = arith.addf %249, %250 : f32
    %252 = arith.addf %209, %251 : f32
    %253 = vector.extract_strided_slice %0 {offsets = [0, 32], sizes = [64, 32], strides = [1, 1]} : vector<64x128xf32> to vector<64x32xf32>
    %254 = vector.extract_strided_slice %0 {offsets = [0, 96], sizes = [64, 32], strides = [1, 1]} : vector<64x128xf32> to vector<64x32xf32>
    %255 = arith.truncf %253 : vector<64x32xf32> to vector<64x32xbf16>
    %256 = arith.truncf %4 : vector<32x32xf32> to vector<32x32xbf16>
    %cst_106 = arith.constant dense<0.000000e+00> : vector<64x32xf32>
    %257 = tpu.matmul %255, %256, %cst_106 {dimension_numbers = #tpu.dot_dimension_numbers<[1], [0], [0], [1], [0, 0, 1, 1], [], []>} : vector<64x32xbf16>, vector<32x32xbf16>, vector<64x32xf32> -> vector<64x32xf32>
    %258 = arith.truncf %254 : vector<64x32xf32> to vector<64x32xbf16>
    %259 = arith.truncf %5 : vector<32x32xf32> to vector<32x32xbf16>
    %cst_107 = arith.constant dense<0.000000e+00> : vector<64x32xf32>
    %260 = tpu.matmul %258, %259, %cst_107 {dimension_numbers = #tpu.dot_dimension_numbers<[1], [0], [0], [1], [0, 0, 1, 1], [], []>} : vector<64x32xbf16>, vector<32x32xbf16>, vector<64x32xf32> -> vector<64x32xf32>
    %261 = arith.addf %257, %260 : vector<64x32xf32>
    %262 = vector.broadcast %6 : vector<1x32xf32> to vector<64x32xf32>
    %263 = arith.addf %261, %262 : vector<64x32xf32>
    %cst_108 = arith.constant 0.000000e+00 : f32
    %264 = vector.broadcast %cst_108 : f32 to vector<64x32xf32>
    %265 = arith.cmpf ogt, %263, %264 : vector<64x32xf32>
    %266 = math.exp %263 : vector<64x32xf32>
    %cst_109 = arith.constant 1.000000e+00 : f32
    %267 = vector.broadcast %cst_109 : f32 to vector<64x32xf32>
    %268 = arith.subf %266, %267 : vector<64x32xf32>
    %269 = arith.select %265, %263, %268 : vector<64x32xi1>, vector<64x32xf32>
    %270 = arith.truncf %269 : vector<64x32xf32> to vector<64x32xbf16>
    %271 = arith.truncf %7 : vector<32x32xf32> to vector<32x32xbf16>
    %cst_110 = arith.constant dense<0.000000e+00> : vector<64x32xf32>
    %272 = tpu.matmul %270, %271, %cst_110 {dimension_numbers = #tpu.dot_dimension_numbers<[1], [0], [0], [1], [0, 0, 1, 1], [], []>} : vector<64x32xbf16>, vector<32x32xbf16>, vector<64x32xf32> -> vector<64x32xf32>
    %273 = vector.broadcast %8 : vector<1x32xf32> to vector<64x32xf32>
    %274 = arith.addf %272, %273 : vector<64x32xf32>
    %c1 = arith.constant 1 : index
    %c0_111 = arith.constant 0 : index
    %c0_112 = arith.constant 0 : index
    %275 = vector.load %arg2[%c1, %c0_111, %c0_112] : memref<2x64x32xf32, #tpu.memory_space<vmem>>, vector<1x64x32xf32>
    %276 = vector.shape_cast %275 : vector<1x64x32xf32> to vector<64x32xf32>
    %277 = arith.mulf %274, %274 : vector<64x32xf32>
    %cst_113 = arith.constant dense<0.000000e+00> : vector<64xf32>
    %278 = vector.multi_reduction <add>, %277, %cst_113 [1] : vector<64x32xf32> to vector<64xf32>
    %279 = vector.shape_cast %278 : vector<64xf32> to vector<64x1xf32>
    %cst_114 = arith.constant 9.99999996E-13 : f32
    %280 = vector.broadcast %cst_114 : f32 to vector<64x1xf32>
    %281 = arith.addf %279, %280 : vector<64x1xf32>
    %282 = math.rsqrt %281 : vector<64x1xf32>
    %283 = vector.broadcast %282 : vector<64x1xf32> to vector<64x32xf32>
    %284 = arith.mulf %274, %283 : vector<64x32xf32>
    %285 = arith.mulf %276, %276 : vector<64x32xf32>
    %cst_115 = arith.constant dense<0.000000e+00> : vector<64xf32>
    %286 = vector.multi_reduction <add>, %285, %cst_115 [1] : vector<64x32xf32> to vector<64xf32>
    %287 = vector.shape_cast %286 : vector<64xf32> to vector<64x1xf32>
    %cst_116 = arith.constant 9.99999996E-13 : f32
    %288 = vector.broadcast %cst_116 : f32 to vector<64x1xf32>
    %289 = arith.addf %287, %288 : vector<64x1xf32>
    %290 = math.rsqrt %289 : vector<64x1xf32>
    %291 = vector.broadcast %290 : vector<64x1xf32> to vector<64x32xf32>
    %292 = arith.mulf %276, %291 : vector<64x32xf32>
    %293 = arith.mulf %284, %292 : vector<64x32xf32>
    %cst_117 = arith.constant dense<0.000000e+00> : vector<64xf32>
    %294 = vector.multi_reduction <add>, %293, %cst_117 [1] : vector<64x32xf32> to vector<64xf32>
    %295 = vector.shape_cast %294 : vector<64xf32> to vector<64x1xf32>
    %cst_118 = arith.constant 1.000000e+00 : f32
    %296 = vector.broadcast %cst_118 : f32 to vector<64x1xf32>
    %297 = arith.subf %296, %295 : vector<64x1xf32>
    %cst_119 = arith.constant 0.000000e+00 : f32
    %298 = vector.broadcast %cst_119 : f32 to vector<64x1xf32>
    %299 = arith.maximumf %297, %298 : vector<64x1xf32>
    %300 = arith.mulf %299, %299 : vector<64x1xf32>
    %301 = vector.shape_cast %300 : vector<64x1xf32> to vector<1x64x1xf32>
    %cst_120 = arith.constant dense<0.000000e+00> : vector<1xf32>
    %302 = vector.multi_reduction <add>, %301, %cst_120 [1, 2] : vector<1x64x1xf32> to vector<1xf32>
    %303 = vector.shape_cast %302 : vector<1xf32> to vector<1x1x1xf32>
    %304 = vector.extract %303[0, 0, 0] : f32 from vector<1x1x1xf32>
    %cst_121 = arith.constant 6.400000e+01 : f32
    %305 = arith.divf %304, %cst_121 : f32
    %306 = arith.addf %118, %305 : f32
    %307 = arith.truncf %253 : vector<64x32xf32> to vector<64x32xbf16>
    %308 = arith.truncf %9 : vector<32x32xf32> to vector<32x32xbf16>
    %cst_122 = arith.constant dense<0.000000e+00> : vector<64x32xf32>
    %309 = tpu.matmul %307, %308, %cst_122 {dimension_numbers = #tpu.dot_dimension_numbers<[1], [0], [0], [1], [0, 0, 1, 1], [], []>} : vector<64x32xbf16>, vector<32x32xbf16>, vector<64x32xf32> -> vector<64x32xf32>
    %310 = vector.broadcast %10 : vector<1x32xf32> to vector<64x32xf32>
    %311 = arith.addf %309, %310 : vector<64x32xf32>
    %cst_123 = arith.constant 0.000000e+00 : f32
    %312 = vector.broadcast %cst_123 : f32 to vector<64x32xf32>
    %313 = arith.cmpf ogt, %311, %312 : vector<64x32xf32>
    %314 = math.exp %311 : vector<64x32xf32>
    %cst_124 = arith.constant 1.000000e+00 : f32
    %315 = vector.broadcast %cst_124 : f32 to vector<64x32xf32>
    %316 = arith.subf %314, %315 : vector<64x32xf32>
    %317 = arith.select %313, %311, %316 : vector<64x32xi1>, vector<64x32xf32>
    %318 = arith.truncf %317 : vector<64x32xf32> to vector<64x32xbf16>
    %319 = arith.truncf %11 : vector<32x32xf32> to vector<32x32xbf16>
    %cst_125 = arith.constant dense<0.000000e+00> : vector<64x32xf32>
    %320 = tpu.matmul %318, %319, %cst_125 {dimension_numbers = #tpu.dot_dimension_numbers<[1], [0], [0], [1], [0, 0, 1, 1], [], []>} : vector<64x32xbf16>, vector<32x32xbf16>, vector<64x32xf32> -> vector<64x32xf32>
    %321 = vector.broadcast %12 : vector<1x32xf32> to vector<64x32xf32>
    %322 = arith.addf %320, %321 : vector<64x32xf32>
    %323 = arith.mulf %322, %322 : vector<64x32xf32>
    %cst_126 = arith.constant dense<0.000000e+00> : vector<64xf32>
    %324 = vector.multi_reduction <add>, %323, %cst_126 [1] : vector<64x32xf32> to vector<64xf32>
    %325 = vector.shape_cast %324 : vector<64xf32> to vector<64x1xf32>
    %cst_127 = arith.constant 9.99999996E-13 : f32
    %326 = vector.broadcast %cst_127 : f32 to vector<64x1xf32>
    %327 = arith.addf %325, %326 : vector<64x1xf32>
    %328 = math.rsqrt %327 : vector<64x1xf32>
    %329 = vector.broadcast %328 : vector<64x1xf32> to vector<64x32xf32>
    %330 = arith.mulf %322, %329 : vector<64x32xf32>
    %331 = arith.truncf %254 : vector<64x32xf32> to vector<64x32xbf16>
    %332 = arith.truncf %13 : vector<32x32xf32> to vector<32x32xbf16>
    %cst_128 = arith.constant dense<0.000000e+00> : vector<64x32xf32>
    %333 = tpu.matmul %331, %332, %cst_128 {dimension_numbers = #tpu.dot_dimension_numbers<[1], [0], [0], [1], [0, 0, 1, 1], [], []>} : vector<64x32xbf16>, vector<32x32xbf16>, vector<64x32xf32> -> vector<64x32xf32>
    %334 = vector.broadcast %14 : vector<1x32xf32> to vector<64x32xf32>
    %335 = arith.addf %333, %334 : vector<64x32xf32>
    %cst_129 = arith.constant 0.000000e+00 : f32
    %336 = vector.broadcast %cst_129 : f32 to vector<64x32xf32>
    %337 = arith.cmpf ogt, %335, %336 : vector<64x32xf32>
    %338 = math.exp %335 : vector<64x32xf32>
    %cst_130 = arith.constant 1.000000e+00 : f32
    %339 = vector.broadcast %cst_130 : f32 to vector<64x32xf32>
    %340 = arith.subf %338, %339 : vector<64x32xf32>
    %341 = arith.select %337, %335, %340 : vector<64x32xi1>, vector<64x32xf32>
    %342 = arith.truncf %341 : vector<64x32xf32> to vector<64x32xbf16>
    %343 = arith.truncf %15 : vector<32x32xf32> to vector<32x32xbf16>
    %cst_131 = arith.constant dense<0.000000e+00> : vector<64x32xf32>
    %344 = tpu.matmul %342, %343, %cst_131 {dimension_numbers = #tpu.dot_dimension_numbers<[1], [0], [0], [1], [0, 0, 1, 1], [], []>} : vector<64x32xbf16>, vector<32x32xbf16>, vector<64x32xf32> -> vector<64x32xf32>
    %345 = vector.broadcast %16 : vector<1x32xf32> to vector<64x32xf32>
    %346 = arith.addf %344, %345 : vector<64x32xf32>
    %347 = arith.mulf %346, %346 : vector<64x32xf32>
    %cst_132 = arith.constant dense<0.000000e+00> : vector<64xf32>
    %348 = vector.multi_reduction <add>, %347, %cst_132 [1] : vector<64x32xf32> to vector<64xf32>
    %349 = vector.shape_cast %348 : vector<64xf32> to vector<64x1xf32>
    %cst_133 = arith.constant 9.99999996E-13 : f32
    %350 = vector.broadcast %cst_133 : f32 to vector<64x1xf32>
    %351 = arith.addf %349, %350 : vector<64x1xf32>
    %352 = math.rsqrt %351 : vector<64x1xf32>
    %353 = vector.broadcast %352 : vector<64x1xf32> to vector<64x32xf32>
    %354 = arith.mulf %346, %353 : vector<64x32xf32>
    %355 = arith.mulf %330, %40 : vector<64x32xf32>
    %cst_134 = arith.constant dense<0.000000e+00> : vector<64xf32>
    %356 = vector.multi_reduction <add>, %355, %cst_134 [1] : vector<64x32xf32> to vector<64xf32>
    %357 = vector.shape_cast %356 : vector<64xf32> to vector<64x1xf32>
    %cst_135 = arith.constant 5.000000e-01 : f32
    %358 = vector.broadcast %cst_135 : f32 to vector<64x1xf32>
    %359 = arith.divf %357, %358 : vector<64x1xf32>
    %360 = math.exp %359 : vector<64x1xf32>
    %361 = arith.truncf %330 : vector<64x32xf32> to vector<64x32xbf16>
    %362 = arith.truncf %40 : vector<64x32xf32> to vector<64x32xbf16>
    %cst_136 = arith.constant dense<0.000000e+00> : vector<64x64xf32>
    %363 = tpu.matmul %361, %362, %cst_136 {dimension_numbers = #tpu.dot_dimension_numbers<[1], [1], [0], [0], [0, 0, 1, 0], [], []>} : vector<64x32xbf16>, vector<64x32xbf16>, vector<64x64xf32> -> vector<64x64xf32>
    %cst_137 = arith.constant 5.000000e-01 : f32
    %364 = vector.broadcast %cst_137 : f32 to vector<64x64xf32>
    %365 = arith.divf %363, %364 : vector<64x64xf32>
    %366 = math.exp %365 : vector<64x64xf32>
    %cst_138 = arith.constant dense<0.000000e+00> : vector<64xf32>
    %367 = vector.multi_reduction <add>, %366, %cst_138 [1] : vector<64x64xf32> to vector<64xf32>
    %368 = vector.shape_cast %367 : vector<64xf32> to vector<64x1xf32>
    %cst_139 = arith.constant dense<0.000000e+00> : vector<64x1xf32>
    %369 = tpu.matmul %366, %2, %cst_139 {dimension_numbers = #tpu.dot_dimension_numbers<[0], [0], [1], [1], [0, 1, 1, 1], [], []>} : vector<64x64xf32>, vector<64x1xf32>, vector<64x1xf32> -> vector<64x1xf32>
    %cst_140 = arith.constant 9.99999993E-9 : f32
    %370 = vector.broadcast %cst_140 : f32 to vector<64x1xf32>
    %371 = arith.addf %368, %370 : vector<64x1xf32>
    %372 = arith.divf %360, %371 : vector<64x1xf32>
    %cst_141 = arith.constant 9.99999996E-13 : f32
    %373 = vector.broadcast %cst_141 : f32 to vector<64x1xf32>
    %374 = arith.addf %372, %373 : vector<64x1xf32>
    %375 = math.log %374 : vector<64x1xf32>
    %376 = vector.shape_cast %375 : vector<64x1xf32> to vector<1x64x1xf32>
    %cst_142 = arith.constant dense<0.000000e+00> : vector<1xf32>
    %377 = vector.multi_reduction <add>, %376, %cst_142 [1, 2] : vector<1x64x1xf32> to vector<1xf32>
    %378 = vector.shape_cast %377 : vector<1xf32> to vector<1x1x1xf32>
    %379 = vector.extract %378[0, 0, 0] : f32 from vector<1x1x1xf32>
    %cst_143 = arith.constant 6.400000e+01 : f32
    %380 = arith.divf %379, %cst_143 : f32
    %cst_144 = arith.constant 0.000000e+00 : f32
    %381 = arith.subf %cst_144, %380 : f32
    %cst_145 = arith.constant 9.99999993E-9 : f32
    %382 = vector.broadcast %cst_145 : f32 to vector<64x1xf32>
    %383 = arith.addf %369, %382 : vector<64x1xf32>
    %384 = arith.divf %360, %383 : vector<64x1xf32>
    %cst_146 = arith.constant 9.99999996E-13 : f32
    %385 = vector.broadcast %cst_146 : f32 to vector<64x1xf32>
    %386 = arith.addf %384, %385 : vector<64x1xf32>
    %387 = math.log %386 : vector<64x1xf32>
    %388 = vector.shape_cast %387 : vector<64x1xf32> to vector<1x64x1xf32>
    %cst_147 = arith.constant dense<0.000000e+00> : vector<1xf32>
    %389 = vector.multi_reduction <add>, %388, %cst_147 [1, 2] : vector<1x64x1xf32> to vector<1xf32>
    %390 = vector.shape_cast %389 : vector<1xf32> to vector<1x1x1xf32>
    %391 = vector.extract %390[0, 0, 0] : f32 from vector<1x1x1xf32>
    %cst_148 = arith.constant 6.400000e+01 : f32
    %392 = arith.divf %391, %cst_148 : f32
    %cst_149 = arith.constant 0.000000e+00 : f32
    %393 = arith.subf %cst_149, %392 : f32
    %cst_150 = arith.constant 5.000000e-01 : f32
    %394 = arith.mulf %cst_150, %381 : f32
    %cst_151 = arith.constant 5.000000e-01 : f32
    %395 = arith.mulf %cst_151, %393 : f32
    %396 = arith.addf %394, %395 : f32
    %397 = arith.addf %252, %396 : f32
    %398 = arith.mulf %354, %64 : vector<64x32xf32>
    %cst_152 = arith.constant dense<0.000000e+00> : vector<64xf32>
    %399 = vector.multi_reduction <add>, %398, %cst_152 [1] : vector<64x32xf32> to vector<64xf32>
    %400 = vector.shape_cast %399 : vector<64xf32> to vector<64x1xf32>
    %cst_153 = arith.constant 5.000000e-01 : f32
    %401 = vector.broadcast %cst_153 : f32 to vector<64x1xf32>
    %402 = arith.divf %400, %401 : vector<64x1xf32>
    %403 = math.exp %402 : vector<64x1xf32>
    %404 = arith.truncf %354 : vector<64x32xf32> to vector<64x32xbf16>
    %405 = arith.truncf %64 : vector<64x32xf32> to vector<64x32xbf16>
    %cst_154 = arith.constant dense<0.000000e+00> : vector<64x64xf32>
    %406 = tpu.matmul %404, %405, %cst_154 {dimension_numbers = #tpu.dot_dimension_numbers<[1], [1], [0], [0], [0, 0, 1, 0], [], []>} : vector<64x32xbf16>, vector<64x32xbf16>, vector<64x64xf32> -> vector<64x64xf32>
    %cst_155 = arith.constant 5.000000e-01 : f32
    %407 = vector.broadcast %cst_155 : f32 to vector<64x64xf32>
    %408 = arith.divf %406, %407 : vector<64x64xf32>
    %409 = math.exp %408 : vector<64x64xf32>
    %cst_156 = arith.constant dense<0.000000e+00> : vector<64xf32>
    %410 = vector.multi_reduction <add>, %409, %cst_156 [1] : vector<64x64xf32> to vector<64xf32>
    %411 = vector.shape_cast %410 : vector<64xf32> to vector<64x1xf32>
    %cst_157 = arith.constant dense<0.000000e+00> : vector<64x1xf32>
    %412 = tpu.matmul %409, %2, %cst_157 {dimension_numbers = #tpu.dot_dimension_numbers<[0], [0], [1], [1], [0, 1, 1, 1], [], []>} : vector<64x64xf32>, vector<64x1xf32>, vector<64x1xf32> -> vector<64x1xf32>
    %cst_158 = arith.constant 9.99999993E-9 : f32
    %413 = vector.broadcast %cst_158 : f32 to vector<64x1xf32>
    %414 = arith.addf %411, %413 : vector<64x1xf32>
    %415 = arith.divf %403, %414 : vector<64x1xf32>
    %cst_159 = arith.constant 9.99999996E-13 : f32
    %416 = vector.broadcast %cst_159 : f32 to vector<64x1xf32>
    %417 = arith.addf %415, %416 : vector<64x1xf32>
    %418 = math.log %417 : vector<64x1xf32>
    %419 = vector.shape_cast %418 : vector<64x1xf32> to vector<1x64x1xf32>
    %cst_160 = arith.constant dense<0.000000e+00> : vector<1xf32>
    %420 = vector.multi_reduction <add>, %419, %cst_160 [1, 2] : vector<1x64x1xf32> to vector<1xf32>
    %421 = vector.shape_cast %420 : vector<1xf32> to vector<1x1x1xf32>
    %422 = vector.extract %421[0, 0, 0] : f32 from vector<1x1x1xf32>
    %cst_161 = arith.constant 6.400000e+01 : f32
    %423 = arith.divf %422, %cst_161 : f32
    %cst_162 = arith.constant 0.000000e+00 : f32
    %424 = arith.subf %cst_162, %423 : f32
    %cst_163 = arith.constant 9.99999993E-9 : f32
    %425 = vector.broadcast %cst_163 : f32 to vector<64x1xf32>
    %426 = arith.addf %412, %425 : vector<64x1xf32>
    %427 = arith.divf %403, %426 : vector<64x1xf32>
    %cst_164 = arith.constant 9.99999996E-13 : f32
    %428 = vector.broadcast %cst_164 : f32 to vector<64x1xf32>
    %429 = arith.addf %427, %428 : vector<64x1xf32>
    %430 = math.log %429 : vector<64x1xf32>
    %431 = vector.shape_cast %430 : vector<64x1xf32> to vector<1x64x1xf32>
    %cst_165 = arith.constant dense<0.000000e+00> : vector<1xf32>
    %432 = vector.multi_reduction <add>, %431, %cst_165 [1, 2] : vector<1x64x1xf32> to vector<1xf32>
    %433 = vector.shape_cast %432 : vector<1xf32> to vector<1x1x1xf32>
    %434 = vector.extract %433[0, 0, 0] : f32 from vector<1x1x1xf32>
    %cst_166 = arith.constant 6.400000e+01 : f32
    %435 = arith.divf %434, %cst_166 : f32
    %cst_167 = arith.constant 0.000000e+00 : f32
    %436 = arith.subf %cst_167, %435 : f32
    %cst_168 = arith.constant 5.000000e-01 : f32
    %437 = arith.mulf %cst_168, %424 : f32
    %cst_169 = arith.constant 5.000000e-01 : f32
    %438 = arith.mulf %cst_169, %436 : f32
    %439 = arith.addf %437, %438 : f32
    %440 = arith.addf %397, %439 : f32
    %cst_170 = arith.constant 2.000000e+00 : f32
    %441 = arith.divf %306, %cst_170 : f32
    %c0_171 = arith.constant 0 : index
    %c0_172 = arith.constant 0 : index
    %442 = vector.load %arg15[%c0_171, %c0_172] : memref<4x64xf32, #tpu.memory_space<vmem>>, vector<4x64xf32>
    %cst_173 = arith.constant dense<0.000000e+00> : vector<4x32xf32>
    %443 = tpu.matmul %442, %1, %cst_173 {dimension_numbers = #tpu.dot_dimension_numbers<[1], [0], [0], [1], [0, 0, 1, 1], [], []>} : vector<4x64xf32>, vector<64x32xf32>, vector<4x32xf32> -> vector<4x32xf32>
    %cst_174 = arith.constant dense<0.000000e+00> : vector<64x4xf32>
    %444 = tpu.matmul %1, %443, %cst_174 {dimension_numbers = #tpu.dot_dimension_numbers<[1], [1], [0], [0], [0, 0, 1, 0], [], []>} : vector<64x32xf32>, vector<4x32xf32>, vector<64x4xf32> -> vector<64x4xf32>
    %cst_175 = arith.constant 1.000000e+00 : f32
    %445 = vector.broadcast %cst_175 : f32 to vector<1x32xf32>
    %446 = arith.mulf %443, %443 : vector<4x32xf32>
    %cst_176 = arith.constant dense<0.000000e+00> : vector<1x4xf32>
    %447 = tpu.matmul %445, %446, %cst_176 {dimension_numbers = #tpu.dot_dimension_numbers<[1], [1], [0], [0], [0, 0, 1, 0], [], []>} : vector<1x32xf32>, vector<4x32xf32>, vector<1x4xf32> -> vector<1x4xf32>
    %448 = arith.mulf %1, %1 : vector<64x32xf32>
    %cst_177 = arith.constant dense<0.000000e+00> : vector<64xf32>
    %449 = vector.multi_reduction <add>, %448, %cst_177 [1] : vector<64x32xf32> to vector<64xf32>
    %450 = vector.shape_cast %449 : vector<64xf32> to vector<64x1xf32>
    %451 = vector.broadcast %450 : vector<64x1xf32> to vector<64x4xf32>
    %452 = vector.broadcast %447 : vector<1x4xf32> to vector<64x4xf32>
    %453 = arith.addf %451, %452 : vector<64x4xf32>
    %cst_178 = arith.constant 2.000000e+00 : f32
    %454 = vector.broadcast %cst_178 : f32 to vector<64x4xf32>
    %455 = arith.mulf %454, %444 : vector<64x4xf32>
    %456 = arith.subf %453, %455 : vector<64x4xf32>
    %cst_179 = arith.constant 0.000000e+00 : f32
    %457 = vector.broadcast %cst_179 : f32 to vector<64x4xf32>
    %458 = arith.maximumf %456, %457 : vector<64x4xf32>
    %cst_180 = arith.constant 1.000000e+00 : f32
    %459 = vector.broadcast %cst_180 : f32 to vector<64x4xf32>
    %460 = arith.addf %459, %458 : vector<64x4xf32>
    %cst_181 = arith.constant 1.000000e+00 : f32
    %461 = vector.broadcast %cst_181 : f32 to vector<64x4xf32>
    %462 = arith.divf %461, %460 : vector<64x4xf32>
    %cst_182 = arith.constant dense<0.000000e+00> : vector<64xf32>
    %463 = vector.multi_reduction <add>, %462, %cst_182 [1] : vector<64x4xf32> to vector<64xf32>
    %464 = vector.shape_cast %463 : vector<64xf32> to vector<64x1xf32>
    %465 = vector.broadcast %464 : vector<64x1xf32> to vector<64x4xf32>
    %466 = arith.divf %462, %465 : vector<64x4xf32>
    %cst_183 = arith.constant dense<0.000000e+00> : vector<4xf32>
    %467 = vector.multi_reduction <add>, %466, %cst_183 [0] : vector<64x4xf32> to vector<4xf32>
    %468 = vector.shape_cast %467 : vector<4xf32> to vector<1x4xf32>
    %469 = arith.mulf %466, %466 : vector<64x4xf32>
    %470 = vector.broadcast %468 : vector<1x4xf32> to vector<64x4xf32>
    %471 = arith.divf %469, %470 : vector<64x4xf32>
    %cst_184 = arith.constant dense<0.000000e+00> : vector<64xf32>
    %472 = vector.multi_reduction <add>, %471, %cst_184 [1] : vector<64x4xf32> to vector<64xf32>
    %473 = vector.shape_cast %472 : vector<64xf32> to vector<64x1xf32>
    %474 = vector.broadcast %473 : vector<64x1xf32> to vector<64x4xf32>
    %475 = arith.divf %471, %474 : vector<64x4xf32>
    %cst_185 = arith.constant 1.000000e-10 : f32
    %476 = vector.broadcast %cst_185 : f32 to vector<64x4xf32>
    %477 = arith.addf %475, %476 : vector<64x4xf32>
    %478 = math.log %477 : vector<64x4xf32>
    %cst_186 = arith.constant 1.000000e-10 : f32
    %479 = vector.broadcast %cst_186 : f32 to vector<64x4xf32>
    %480 = arith.addf %466, %479 : vector<64x4xf32>
    %481 = math.log %480 : vector<64x4xf32>
    %482 = arith.subf %478, %481 : vector<64x4xf32>
    %483 = arith.mulf %475, %482 : vector<64x4xf32>
    %484 = vector.shape_cast %483 : vector<64x4xf32> to vector<1x64x4xf32>
    %cst_187 = arith.constant dense<0.000000e+00> : vector<1xf32>
    %485 = vector.multi_reduction <add>, %484, %cst_187 [1, 2] : vector<1x64x4xf32> to vector<1xf32>
    %486 = vector.shape_cast %485 : vector<1xf32> to vector<1x1x1xf32>
    %487 = vector.extract %486[0, 0, 0] : f32 from vector<1x1x1xf32>
    %cst_188 = arith.constant 6.400000e+01 : f32
    %488 = arith.divf %487, %cst_188 : f32
    %489 = arith.addf %441, %488 : f32
    %490 = arith.addf %489, %440 : f32
    %c0_189 = arith.constant 0 : index
    %c0_190 = arith.constant 0 : index
    %491 = memref.load %arg16[%c0_189, %c0_190] : memref<1x1xf32, #tpu.memory_space<smem>>
    memref.store %490, %arg16[%c0_189, %c0_190] : memref<1x1xf32, #tpu.memory_space<smem>>
    %cst_191 = arith.constant dense<0xFF800000> : vector<64xf32>
    %492 = vector.multi_reduction <maximumf>, %466, %cst_191 [1] : vector<64x4xf32> to vector<64xf32>
    %493 = vector.shape_cast %492 : vector<64xf32> to vector<64x1xf32>
    %494 = tpu.iota {dimensions = array<i32: 1>} : vector<64x4xi32>
    %495 = vector.broadcast %493 : vector<64x1xf32> to vector<64x4xf32>
    %496 = arith.cmpf oge, %466, %495 : vector<64x4xf32>
    %c4_i32 = arith.constant 4 : i32
    %497 = vector.broadcast %c4_i32 : i32 to vector<64x4xi32>
    %498 = arith.select %496, %494, %497 : vector<64x4xi1>, vector<64x4xi32>
    %cst_192 = arith.constant dense<2147483647> : vector<64xi32>
    %499 = vector.multi_reduction <minsi>, %498, %cst_192 [1] : vector<64x4xi32> to vector<64xi32>
    %500 = vector.shape_cast %499 : vector<64xi32> to vector<64x1xi32>
    %c0_193 = arith.constant 0 : index
    %c0_194 = arith.constant 0 : index
    %501 = vector.load %arg17[%c0_193, %c0_194] : memref<64x1xi32, #tpu.memory_space<vmem>>, vector<64x1xi32>
    tpu.vector_store %arg17[%c0_193, %c0_194], %500 {strides = array<i32>} : memref<64x1xi32, #tpu.memory_space<vmem>>, vector<64x1xi32>,
    return
  }
}

</mosaic_0001>

<bundles_post_ra>
// kernel: model_forward.2
= control target key start
LH: loop header
LB: loop body
LE: loop exit
PB: predicated region body
PF: predicated region fallthrough
CT: control target
= control target key end

     0   :  { %vm185_vm0 = vcmask 523264   ;;  %vm436_vm3 = vcmask 261120   ;;  %vm516_vm5 = vcmask 253952   ;;  %s1363_s1 = inlined_call_operand.vmem [shape: f32[128,128], index: 1, kind: input, shape index: {}]   ;;  %s1364_s2 = inlined_call_operand.vmem [shape: f32[1,128], index: 2, kind: input, shape index: {}]   ;;  %s1365_s0 = inlined_call_operand.vmem [shape: f32[64,128], index: 0, kind: input, shape index: {}]   ;;  %s1366_s3 = inlined_call_operand.vmem [shape: f32[2,128,128], index: 3, kind: input, shape index: {}]   ;;  %s1367_s4 = inlined_call_operand.vmem [shape: f32[64,64], index: 4, kind: input, shape index: {}]   ;;  %s1368_s8 = inlined_call_operand.vmem [shape: f32[64,128], index: 8, kind: output, shape index: {0}]   ;;  %s1369_s5 = inlined_call_operand.vmem [shape: f32[32,32], index: 5, kind: input, shape index: {}]   ;;  %s1370_s6 = inlined_call_operand.vmem [shape: f32[1,32], index: 6, kind: input, shape index: {}]   ;;  %s1371_s7 = inlined_call_operand.vmem [shape: f32[1,32], index: 7, kind: input, shape index: {}]   ;;  %s1372_s9 = inlined_call_operand.vmem [shape: f32[64,32], index: 9, kind: output, shape index: {1}]  }
   0x1   :  { %v66_v0 = vld [vmem:[%s1363_s1 + $0x70] sm:$0xff]  ;;  %v67_v1 = vld [vmem:[%s1363_s1 + $0x78] sm:$0xff]  ;;  %v64_v2 = vld [vmem:[%s1363_s1 + $0x60] sm:$0xff] }
   0x2   :  { %v79_v3 = vpack.c.bf16 %v67_v1, %v66_v0  ;;  %v65_v4 = vld [vmem:[%s1363_s1 + $0x68] sm:$0xff]  ;;  %v62_v6 = vld [vmem:[%s1363_s1 + $0x50] sm:$0xff]  ;;  %v63_v7 = vld [vmem:[%s1363_s1 + $0x58] sm:$0xff] }
   0x3   :  { %v78_v5 = vpack.c.bf16 %v65_v4, %v64_v2  ;;  %v77_v8 = vpack.c.bf16 %v63_v7, %v62_v6  ;;  %v60_v9 = vld [vmem:[%s1363_s1 + $0x40] sm:$0xff]  ;;  %v61_v10 = vld [vmem:[%s1363_s1 + $0x48] sm:$0xff]  ;;  %v58_v12 = vld [vmem:[%s1363_s1 + $0x30] sm:$0xff] }
   0x4   :  { %757 = vmatpush.bf16.msra.mxu3 %v79_v3  ;;  %84 = vmatpush.bf16.msra.mxu0 %v79_v3  ;;  %v76_v11 = vpack.c.bf16 %v61_v10, %v60_v9  ;;  %v59_v13 = vld [vmem:[%s1363_s1 + $0x38] sm:$0xff]  ;;  %v56_v15 = vld [vmem:[%s1363_s1 + $0x20] sm:$0xff]  ;;  %v57_v16 = vld [vmem:[%s1363_s1 + $0x28] sm:$0xff] }
   0x5   :  { %v75_v14 = vpack.c.bf16 %v59_v13, %v58_v12  ;;  %v74_v17 = vpack.c.bf16 %v57_v16, %v56_v15  ;;  %v54_v18 = vld [vmem:[%s1363_s1 + $0x10] sm:$0xff]  ;;  %v55_v19 = vld [vmem:[%s1363_s1 + $0x18] sm:$0xff]  ;;  %v52_v21 = vld [vmem:[%s1363_s1] sm:$0xff] }
   0x6   :  { %v73_v20 = vpack.c.bf16 %v55_v19, %v54_v18  ;;  %v53_v22 = vld [vmem:[%s1363_s1 + $0x8] sm:$0xff]  ;;  %v46_v24 = vld [vmem:[%s1365_s0 + $0x10] sm:$0xff]  ;;  %v47_v25 = vld [vmem:[%s1365_s0 + $0x18] sm:$0xff] }
   0x7   :  { %v72_v23 = vpack.c.bf16 %v53_v22, %v52_v21  ;;  %v69_v26 = vpack.c.bf16 %v47_v25, %v46_v24  ;;  %v44_v27 = vld [vmem:[%s1365_s0] sm:$0xff]  ;;  %v45_v28 = vld [vmem:[%s1365_s0 + $0x8] sm:$0xff]  ;;  %v138_v30 = vld [vmem:[%s1366_s3 + $0x70] sm:$0xff] }
   0x8   :  { %758 = vmatpush.bf16.msra.mxu3 %v78_v5  ;;  %85 = vmatpush.bf16.msra.mxu0 %v78_v5  ;;  %v68_v29 = vpack.c.bf16 %v45_v28, %v44_v27  ;;  %v139_v31 = vld [vmem:[%s1366_s3 + $0x78] sm:$0xff]  ;;  %v136_v32 = vld [vmem:[%s1366_s3 + $0x60] sm:$0xff]  ;;  %v137_v34 = vld [vmem:[%s1366_s3 + $0x68] sm:$0xff] }
   0x9   :  { %v151_v33 = vpack.c.bf16 %v139_v31, %v138_v30  ;;  %v150_v35 = vpack.c.bf16 %v137_v34, %v136_v32  ;;  %v134_v36 = vld [vmem:[%s1366_s3 + $0x50] sm:$0xff]  ;;  %v135_v37 = vld [vmem:[%s1366_s3 + $0x58] sm:$0xff]  ;;  %v132_v39 = vld [vmem:[%s1366_s3 + $0x40] sm:$0xff] }
   0xa   :  { %v149_v38 = vpack.c.bf16 %v135_v37, %v134_v36  ;;  %v133_v40 = vld [vmem:[%s1366_s3 + $0x48] sm:$0xff]  ;;  %v48_v41 = vld [vmem:[%s1365_s0 + $0x20] sm:$0xff]  ;;  %v50_v45 = vld [vmem:[%s1365_s0 + $0x30] sm:$0xff] }
   0xb   :  { %765 = vmatpush.bf16.msra.mxu1 %v151_v33  ;;  %v49_v42 = vld [vmem:[%s1365_s0 + $0x28] sm:$0xff]  ;;  %v148_v43 = vpack.c.bf16 %v133_v40, %v132_v39  ;;  %v51_v46 = vld [vmem:[%s1365_s0 + $0x38] sm:$0xff]  ;;  %v130_v48 = vld [vmem:[%s1366_s3 + $0x30] sm:$0xff] }
   0xc   :  { %759 = vmatpush.bf16.msra.mxu3 %v77_v8  ;;  %86 = vmatpush.bf16.msra.mxu0 %v77_v8  ;;  %v70_v44 = vpack.c.bf16 %v49_v42, %v48_v41  ;;  %v71_v47 = vpack.c.bf16 %v51_v46, %v50_v45  ;;  %v131_v49 = vld [vmem:[%s1366_s3 + $0x38] sm:$0xff]  ;;  %v128_v51 = vld [vmem:[%s1366_s3 + $0x20] sm:$0xff]  ;;  %v129_v52 = vld [vmem:[%s1366_s3 + $0x28] sm:$0xff] }
   0xd   :  { %v147_v50 = vpack.c.bf16 %v131_v49, %v130_v48  ;;  %v146_v53 = vpack.c.bf16 %v129_v52, %v128_v51  ;;  %v126_v54 = vld [vmem:[%s1366_s3 + $0x10] sm:$0xff]  ;;  %v127_v55 = vld [vmem:[%s1366_s3 + $0x18] sm:$0xff]  ;;  %v124_v57 = vld [vmem:[%s1366_s3] sm:$0xff] }
   0xe   :  { %v145_v56 = vpack.c.bf16 %v127_v55, %v126_v54  ;;  %v125_v58 = vld [vmem:[%s1366_s3 + $0x8] sm:$0xff]  ;;  %v787_v61 = vld [vmem:[%s1364_s2] ss:$0 sm:$0xff]  ;;  %v34_v40 = vld [vmem:[%s1367_s4 + $0x10] sm:$0xff] }
   0xf   :  { %766 = vmatpush.bf16.msra.mxu1 %v150_v35  ;;  %v144_v59 = vpack.c.bf16 %v125_v58, %v124_v57  ;;  %v32_v36 = vld [vmem:[%s1367_s4] sm:$0xff]  ;;  %v33_v37 = vld [vmem:[%s1367_s4 + $0x8] sm:$0xff]  ;;  %v35_v41 = vld [vmem:[%s1367_s4 + $0x18] sm:$0xff] }
  0x10   :  { %760 = vmatpush.bf16.msra.mxu3 %v76_v11  ;;  %87 = vmatpush.bf16.msra.mxu0 %v76_v11  ;;  %v1038_v39 = vpack.c.bf16 %v33_v37, %v32_v36  ;;  %v1048_v42 = vpack.c.bf16 %v35_v41, %v34_v40  ;;  %v741_v45 = vld [vmem:[%s1366_s3 + $0xe0] sm:$0xff]  ;;  %v739_v49 = vld [vmem:[%s1366_s3 + $0xd0] sm:$0xff]  ;;  %v37_v55 = vld [vmem:[%s1367_s4 + $0x28] sm:$0xff] }
  0x11   :  { %v737_v52 = vld [vmem:[%s1366_s3 + $0xc0] sm:$0xff]  ;;  %v38_v58 = vld [vmem:[%s1367_s4 + $0x30] sm:$0xff] }
  0x12   :  { %v36_v54 = vld [vmem:[%s1367_s4 + $0x20] sm:$0xff] }
  0x13   :  { %767 = vmatpush.bf16.msra.mxu1 %v149_v38  ;;  %v1082_v57 = vpack.c.bf16 %v37_v55, %v36_v54 }
  0x14   :  { %761 = vmatpush.bf16.msra.mxu3 %v75_v14  ;;  %88 = vmatpush.bf16.msra.mxu0 %v75_v14 }
  0x17   :  { %768 = vmatpush.bf16.msra.mxu1 %v148_v43 }
  0x18   :  { %762 = vmatpush.bf16.msra.mxu3 %v74_v17  ;;  %89 = vmatpush.bf16.msra.mxu0 %v74_v17 }
  0x1b   :  { %769 = vmatpush.bf16.msra.mxu1 %v147_v50 }
  0x1c   :  { %763 = vmatpush.bf16.msra.mxu3 %v73_v20  ;;  %90 = vmatpush.bf16.msra.mxu0 %v73_v20 }
  0x1f   :  { %770 = vmatpush.bf16.msra.mxu1 %v146_v53 }
  0x20   :  { %764 = vmatpush.bf16.msra.mxu3 %v72_v23  ;;  %91 = vmatpush.bf16.msra.mxu0 %v72_v23 }
  0x23   :  { %97 = vmatmul.bf16.vlgmr.msra.gmra.mxu3 %v69_v26  ;;  %92 = vmatmul.bf16.vlgmr.msra.gmra.mxu0 %v68_v29 }
  0x24   :  { %152 = vmatpush.bf16.msrb.mxu0 %v151_v33  ;;  %771 = vmatpush.bf16.msra.mxu1 %v145_v56 }
  0x28   :  { %153 = vmatpush.bf16.msrb.mxu0 %v150_v35  ;;  %772 = vmatpush.bf16.msra.mxu1 %v144_v59 }
  0x2c   :  { %154 = vmatpush.bf16.msrb.mxu0 %v149_v38 }
  0x30   :  { %155 = vmatpush.bf16.msrb.mxu0 %v148_v43  ;;  %v743_v43 = vld [vmem:[%s1366_s3 + $0xf0] sm:$0xff] }
  0x33   :  { %102 = vmatmul.bf16.gmra.mxu3 %v70_v44  ;;  %v744_v44 = vld [vmem:[%s1366_s3 + $0xf8] sm:$0xff] }
  0x34   :  { %156 = vmatpush.bf16.msrb.mxu0 %v147_v50  ;;  %v279_v46 = vpack.c.bf16 %v744_v44, %v743_v43  ;;  %v740_v50 = vld [vmem:[%s1366_s3 + $0xd8] sm:$0xff] }
  0x35   :  { %v277_v51 = vpack.c.bf16 %v740_v50, %v739_v49 }
  0x36   :  { %280 = vmatpush.bf16.msrb.mxu3 %v279_v46 }
  0x38   :  { %157 = vmatpush.bf16.msrb.mxu0 %v146_v53  ;;  %v738_v53 = vld [vmem:[%s1366_s3 + $0xc8] sm:$0xff] }
  0x3c   :  { %158 = vmatpush.bf16.msrb.mxu0 %v145_v56  ;;  %v276_v56 = vpack.c.bf16 %v738_v53, %v737_v52 }
  0x40   :  { %159 = vmatpush.bf16.msrb.mxu0 %v144_v59  ;;  %v39_v59 = vld [vmem:[%s1367_s4 + $0x38] sm:$0xff] }
  0x43   :  { %107 = vmatmul.bf16.gmra.mxu3 %v71_v47  ;;  %v742_v47 = vld [vmem:[%s1366_s3 + $0xe8] sm:$0xff] }
  0x44   :  { %v278_v48 = vpack.c.bf16 %v742_v47, %v741_v45 }
  0x46   :  { %281 = vmatpush.bf16.msrb.mxu3 %v278_v48 }
  0x4a   :  { %282 = vmatpush.bf16.msrb.mxu3 %v277_v51 }
  0x4e   :  { %283 = vmatpush.bf16.msrb.mxu3 %v276_v56 }
  0xa0   :  { %v93_v60 = vpop.f32.mrf.mxu0 }
  0xa1   :  { %v94_v63 = vadd.f32 %v787_v61, %v93_v60  ;;  %v1092_v60 = vpack.c.bf16 %v39_v59, %v38_v58 }
  0xa3   :  { %v113_v1 = vmax.f32 %v94_v63, 0.0 }
  0xa6   :  { %v98_v62 = vpop.f32.mrf.mxu3 }
  0xa7   :  { %v99_v3 = vadd.f32 %v787_v61, %v98_v62  ;;  %v736_v62 = vld [vmem:[%s1366_s3 + $0xb8] sm:$0xff] }
  0xa8   :  { %v95_v0 = vpop.f32.mrf.mxu0 }
  0xa9   :  { %v96_v2 = vadd.f32 %v787_v61, %v95_v0  ;;  %v115_v8 = vmax.f32 %v99_v3, 0.0  ;;  %v733_v0 = vld [vmem:[%s1366_s3 + $0xa0] sm:$0xff]  ;;  %v731_v3 = vld [vmem:[%s1366_s3 + $0x90] sm:$0xff] }
  0xab   :  { %v114_v4 = vmax.f32 %v96_v2, 0.0 }
  0xad   :  { %v140_v7 = vpack.c.bf16 %v114_v4, %v113_v1  ;;  %v734_v1 = vld [vmem:[%s1366_s3 + $0xa8] sm:$0xff]  ;;  %v732_v4 = vld [vmem:[%s1366_s3 + $0x98] sm:$0xff] }
  0xae   :  { %v100_v5 = vpop.f32.mrf.mxu3  ;;  %v274_v2 = vpack.c.bf16 %v734_v1, %v733_v0 }
  0xaf   :  { %v101_v6 = vadd.f32 %v787_v61, %v100_v5  ;;  %160 = vmatmul.bf16.vlgmr.msrb.gmra.mxu0 %v140_v7  ;;  %v273_v5 = vpack.c.bf16 %v732_v4, %v731_v3  ;;  %v730_v7 = vld [vmem:[%s1366_s3 + $0x88] sm:$0xff] }
  0xb1   :  { %v116_v9 = vmax.f32 %v101_v6, 0.0  ;;  %v729_v6 = vld [vmem:[%s1366_s3 + $0x80] sm:$0xff] }
  0xb3   :  { %v141_v10 = vpack.c.bf16 %v116_v9, %v115_v8  ;;  %v272_v8 = vpack.c.bf16 %v730_v7, %v729_v6  ;;  %v121_v9 = vlaneseq }
  0xb5   :  { %165 = vmatmul.bf16.vlgmr.msra.gmra.mxu1 %v141_v10 }
  0xb6   :  { %v103_v11 = vpop.f32.mrf.mxu3 }
  0xb7   :  { %v104_v12 = vadd.f32 %v787_v61, %v103_v11  ;;  %v1120_v11 = vand.u32 127, %v121_v9 }
  0xb9   :  { %v117_v15 = vmax.f32 %v104_v12, 0.0  ;;  %vm123_vm1 = vcmp.lt.s32.totalorder %v1120_v11, 64  ;;  %v421_v11 = vld [vmem:[%s1369_s5] sm:$0xff] }
  0xbe   :  { %v105_v13 = vpop.f32.mrf.mxu3 }
  0xbf   :  { %v106_v14 = vadd.f32 %v787_v61, %v105_v13 }
  0xc1   :  { %v118_v16 = vmax.f32 %v106_v14, 0.0 }
  0xc3   :  { %v142_v17 = vpack.c.bf16 %v118_v16, %v117_v15 }
  0xc5   :  { %170 = vmatmul.bf16.gmra.mxu1 %v142_v17 }
  0xc6   :  { %v108_v18 = vpop.f32.mrf.mxu3 }
  0xc7   :  { %v109_v19 = vadd.f32 %v787_v61, %v108_v18 }
  0xc9   :  { %v119_v22 = vmax.f32 %v109_v19, 0.0 }
  0xce   :  { %v110_v20 = vpop.f32.mrf.mxu3 }
  0xcf   :  { %v111_v21 = vadd.f32 %v787_v61, %v110_v20  ;;  %v735_v61 = vld [vmem:[%s1366_s3 + $0xb0] sm:$0xff]  ;;  %s831_s3 = smov 96  }
  0xd0   :  { %v275_v63 = vpack.c.bf16 %v736_v62, %v735_v61 }
  0xd1   :  { %v120_v23 = vmax.f32 %v111_v21, 0.0 }
  0xd2   :  { %284 = vmatpush.bf16.msrb.mxu3 %v275_v63 }
  0xd3   :  { %v143_v24 = vpack.c.bf16 %v120_v23, %v119_v22 }
  0xd5   :  { %175 = vmatmul.bf16.gmra.mxu1 %v143_v24 }
  0xd6   :  { %285 = vmatpush.bf16.msrb.mxu3 %v274_v2 }
  0xda   :  { %286 = vmatpush.bf16.msrb.mxu3 %v273_v5 }
  0xde   :  { %287 = vmatpush.bf16.msrb.mxu3 %v272_v8 }
 0x12c   :  { %v1018_v30 = vpop.f32.mrf.mxu0 }
 0x132   :  { %v1008_v25 = vpop.f32.mrf.mxu1 }
 0x134   :  { %v1028_v35 = vpop.f32.mrf.mxu0 }
 0x135   :  { %v181_v38 = vpack.c.bf16 %v1028_v35, %v1018_v30 }
 0x13a   :  { %v1010_v26 = vpop.f32.mrf.mxu1 }
 0x13b   :  { %v182_v34 = vpack.c.bf16 %v1010_v26, %v1008_v25 }
 0x142   :  { %v1012_v27 = vpop.f32.mrf.mxu1 }
 0x14a   :  { %v1014_v28 = vpop.f32.mrf.mxu1 }
 0x14b   :  { %v183_v33 = vpack.c.bf16 %v1014_v28, %v1012_v27 }
 0x152   :  { %v1016_v29 = vpop.f32.mrf.mxu1 }
 0x15a   :  { %v1020_v31 = vpop.f32.mrf.mxu1 }
 0x15b   :  { %v184_v32 = vpack.c.bf16 %v1020_v31, %v1016_v29 }
 0x15d   :  { %202 = vmatpush.bf16.msra.mxu2 %v184_v32 }
 0x161   :  { %203 = vmatpush.bf16.msra.mxu2 %v183_v33 }
 0x165   :  { %204 = vmatpush.bf16.msra.mxu2 %v182_v34 }
 0x169   :  { %205 = vmatpush.bf16.msra.mxu2 %v181_v38 }
 0x16c   :  { %725 = vmatmul.msk.bf16.vlgmr.msra.gmra.mxu2 %vm185_vm0, %v1038_v39 }
 0x17c   :  { %726 = vmatmul.msk.bf16.gmra.mxu2 %vm185_vm0, %v1048_v42 }
 0x18c   :  { %727 = vmatmul.msk.bf16.gmra.mxu2 %vm185_vm0, %v1082_v57 }
 0x19c   :  { %728 = vmatmul.msk.bf16.gmra.mxu2 %vm185_vm0, %v1092_v60 }
 0x1ef   :  { %v207_v10 = vpop.f32.mrf.mxu2 }
 0x1f0   :  { %v227_v12 = vsub.f32 %v1018_v30, %v207_v10 }
 0x1f2   :  { %v235_v14 = vsel %vm123_vm1, %v207_v10, %v227_v12 }
 0x1f3   :  { %v243_v17 = vmax.f32 %v235_v14, 0.0 }
 0x1f7   :  { %v209_v13 = vpop.f32.mrf.mxu2 }
 0x1f8   :  { %v228_v15 = vsub.f32 %v1028_v35, %v209_v13 }
 0x1fa   :  { %v236_v16 = vsel %vm123_vm1, %v209_v13, %v228_v15 }
 0x1fb   :  { %v244_v18 = vmax.f32 %v236_v16, 0.0 }
 0x1fd   :  { %v268_v19 = vpack.c.bf16 %v244_v18, %v243_v17 }
 0x1ff   :  { %v212_v20 = vpop.f32.mrf.mxu2  ;;  %288 = vmatmul.bf16.vlgmr.msrb.gmra.mxu3 %v268_v19 }
 0x200   :  { %v229_v21 = vsub.f32 %v1008_v25, %v212_v20 }
 0x202   :  { %v237_v23 = vsel %vm123_vm1, %v212_v20, %v229_v21  ;;  %v423_v20 = vld [vmem:[%s1369_s5 + $0x10] sm:$0xff]  ;;  %v424_v21 = vld [vmem:[%s1369_s5 + $0x18] sm:$0xff] }
 0x203   :  { %v245_v32 = vmax.f32 %v237_v23, 0.0  ;;  %v422_v23 = vld [vmem:[%s1369_s5 + $0x8] sm:$0xff]  ;;  %s833_s5 = smov 64  }
 0x207   :  { %v214_v22 = vpop.f32.mrf.mxu2 }
 0x208   :  { %v230_v24 = vsub.f32 %v1010_v26, %v214_v22 }
 0x20a   :  { %v238_v30 = vsel %vm123_vm1, %v214_v22, %v230_v24  ;;  %v432_v22 = vpack.c.bf16 %v424_v21, %v423_v20  ;;  %v431_v24 = vpack.c.bf16 %v422_v23, %v421_v11  ;;  %v834_v20 = vmov 64.0  }
 0x20b   :  { %v246_v33 = vmax.f32 %v238_v30, 0.0  ;;  %v832_v30 = vmov 2.0  }
 0x20c   :  { %455 = vmatpush.bf16.msra.mxu0 %v432_v22  ;;  %557 = vmatpush.bf16.msrb.mxu1 %v432_v22  ;;  %789 = vrcp.f32 %v832_v30 }
 0x20d   :  { %v269_v34 = vpack.c.bf16 %v246_v33, %v245_v32 }
 0x20f   :  { %v217_v35 = vpop.f32.mrf.mxu2  ;;  %293 = vmatmul.bf16.gmra.mxu3 %v269_v34 }
 0x210   :  { %v231_v36 = vsub.f32 %v1012_v27, %v217_v35  ;;  %456 = vmatpush.bf16.msra.mxu0 %v431_v24  ;;  %558 = vmatpush.bf16.msrb.mxu1 %v431_v24 }
 0x212   :  { %v239_v25 = vsel %vm123_vm1, %v217_v35, %v231_v36  ;;  %v790_v32 = vpop.eup %789 }
 0x213   :  { %v247_v26 = vmax.f32 %v239_v25, 0.0  ;;  %v407_v33 = vmul.f32 2.0, %v790_v32  ;;  %vm411_vm2 = vweird.f32 %v790_v32 }
 0x215   :  { %v408_v34 = vsub.f32 1.0, %v407_v33 }
 0x217   :  { %v219_v37 = vpop.f32.mrf.mxu2  ;;  %v409_v35 = vmul.f32 %v790_v32, %v408_v34 }
 0x218   :  { %v232_v38 = vsub.f32 %v1014_v28, %v219_v37 }
 0x21a   :  { %v240_v40 = vsel %vm123_vm1, %v219_v37, %v232_v38  ;;  %v410_v37 = vadd.f32 %v790_v32, %v409_v35 }
 0x21b   :  { %v248_v41 = vmax.f32 %v240_v40, 0.0 }
 0x21c   :  { %v412_v38 = vsel %vm411_vm2, %v790_v32, %v410_v37 }
 0x21d   :  { %v270_v43 = vpack.c.bf16 %v248_v41, %v247_v26 }
 0x21f   :  { %v222_v44 = vpop.f32.mrf.mxu2  ;;  %298 = vmatmul.bf16.gmra.mxu3 %v270_v43 }
 0x220   :  { %v233_v45 = vsub.f32 %v1016_v29, %v222_v44 }
 0x222   :  { %v241_v27 = vsel %vm123_vm1, %v222_v44, %v233_v45 }
 0x223   :  { %v249_v28 = vmax.f32 %v241_v27, 0.0 }
 0x227   :  { %v224_v46 = vpop.f32.mrf.mxu2 }
 0x228   :  { %v234_v47 = vsub.f32 %v1020_v31, %v224_v46 }
 0x22a   :  { %v242_v48 = vsel %vm123_vm1, %v224_v46, %v234_v47 }
 0x22b   :  { %v250_v49 = vmax.f32 %v242_v48, 0.0 }
 0x22d   :  { %v271_v50 = vpack.c.bf16 %v250_v49, %v249_v28 }
 0x22f   :  { %303 = vmatmul.bf16.gmra.mxu3 %v271_v50 }
 0x282   :  { %v289_v51 = vpop.f32.mrf.mxu3 }
 0x28a   :  { %v291_v52 = vpop.f32.mrf.mxu3 }
 0x28b   :  { %v309_v62 = vpack.c.bf16 %v291_v52, %v289_v51 }
 0x292   :  { %v294_v53 = vpop.f32.mrf.mxu3 }
 0x29a   :  { %v296_v54 = vpop.f32.mrf.mxu3 }
 0x29b   :  { %v310_v31 = vpack.c.bf16 %v296_v54, %v294_v53 }
 0x2a2   :  { %v299_v55 = vpop.f32.mrf.mxu3 }
 0x2aa   :  { %v301_v56 = vpop.f32.mrf.mxu3 }
 0x2ab   :  { %v311_v61 = vpack.c.bf16 %v301_v56, %v299_v55 }
 0x2b2   :  { %v304_v29 = vpop.f32.mrf.mxu3 }
 0x2ba   :  { %v306_v58 = vpop.f32.mrf.mxu3 }
 0x2bb   :  { %v312_v59 = vpack.c.bf16 %v306_v58, %v304_v29 }
 0x2bd   :  { %317 = vmatpush.bf16.msrb.mxu2 %v312_v59 }
 0x2c1   :  { %318 = vmatpush.bf16.msrb.mxu2 %v311_v61 }
 0x2c5   :  { %319 = vmatpush.bf16.msrb.mxu2 %v310_v31 }
 0x2c9   :  { %320 = vmatpush.bf16.msrb.mxu2 %v309_v62 }
 0x2cc   :  { %745 = vmatmul.msk.bf16.vlgmr.msrb.gmra.mxu2 %vm185_vm0, %v1038_v39 }
 0x2dc   :  { %746 = vmatmul.msk.bf16.gmra.mxu2 %vm185_vm0, %v1048_v42 }
 0x2ec   :  { %747 = vmatmul.msk.bf16.gmra.mxu2 %vm185_vm0, %v1082_v57 }
 0x2fc   :  { %748 = vmatmul.msk.bf16.gmra.mxu2 %vm185_vm0, %v1092_v60 }
 0x34f   :  { %v322_v63 = vpop.f32.mrf.mxu2 }
 0x350   :  { %v342_v0 = vsub.f32 %v289_v51, %v322_v63 }
 0x352   :  { %v350_v1 = vsel %vm123_vm1, %v322_v63, %v342_v0 }
 0x353   :  { %374 = vrot.lane.b32.xlu0 %v350_v1, %s831_s3  ;;  %358 = vst [vmem:[%s1368_s8] sm:$0xff] %v350_v1 }
 0x357   :  { %v324_v39 = vpop.f32.mrf.mxu2 }
 0x358   :  { %v343_v42 = vsub.f32 %v291_v52, %v324_v39 }
 0x35a   :  { %v351_v57 = vsel %vm123_vm1, %v324_v39, %v343_v42 }
 0x35b   :  { %376 = vrot.lane.b32.xlu0 %v351_v57, %s831_s3  ;;  %359 = vst [vmem:[%s1368_s8 + $0x8] sm:$0xff] %v351_v57 }
 0x35f   :  { %v327_v60 = vpop.f32.mrf.mxu2 }
 0x360   :  { %v344_v2 = vsub.f32 %v294_v53, %v327_v60 }
 0x362   :  { %v1169_v3 = vsel %vm123_vm1, %v327_v60, %v344_v2 }
 0x363   :  { %378 = vrot.lane.b32.xlu1 %v1169_v3, %s831_s3  ;;  %360 = vst [vmem:[%s1368_s8 + $0x10] sm:$0xff] %v1169_v3 }
 0x367   :  { %v329_v4 = vpop.f32.mrf.mxu2 }
 0x368   :  { %v345_v5 = vsub.f32 %v296_v54, %v329_v4 }
 0x36a   :  { %v1179_v6 = vsel %vm123_vm1, %v329_v4, %v345_v5  ;;  %v1263_v4 = vld [vmem:[%s1370_s6] ss:$0 sm:$0xff] }
 0x36b   :  { %380 = vrot.lane.b32.xlu1 %v1179_v6, %s831_s3  ;;  %361 = vst [vmem:[%s1368_s8 + $0x18] sm:$0xff] %v1179_v6 }
 0x36f   :  { %v332_v7 = vpop.f32.mrf.mxu2 }
 0x370   :  { %v346_v8 = vsub.f32 %v299_v55, %v332_v7 }
 0x372   :  { %v354_v9 = vsel %vm123_vm1, %v332_v7, %v346_v8 }
 0x373   :  { %382 = vrot.lane.b32.xlu2 %v354_v9, %s831_s3  ;;  %362 = vst [vmem:[%s1368_s8 + $0x20] sm:$0xff] %v354_v9 }
 0x377   :  { %v334_v10 = vpop.f32.mrf.mxu2 }
 0x378   :  { %v347_v12 = vsub.f32 %v301_v56, %v334_v10 }
 0x37a   :  { %v355_v13 = vsel %vm123_vm1, %v334_v10, %v347_v12 }
 0x37b   :  { %384 = vrot.lane.b32.xlu2 %v355_v13, %s831_s3  ;;  %363 = vst [vmem:[%s1368_s8 + $0x28] sm:$0xff] %v355_v13 }
 0x37f   :  { %v337_v14 = vpop.f32.mrf.mxu2 }
 0x380   :  { %v348_v15 = vsub.f32 %v304_v29, %v337_v14 }
 0x382   :  { %v356_v16 = vsel %vm123_vm1, %v337_v14, %v348_v15 }
 0x383   :  { %386 = vrot.lane.b32.xlu1 %v356_v16, %s831_s3  ;;  %364 = vst [vmem:[%s1368_s8 + $0x30] sm:$0xff] %v356_v16 }
 0x387   :  { %v339_v17 = vpop.f32.mrf.mxu2 }
 0x388   :  { %v349_v18 = vsub.f32 %v306_v58, %v339_v17 }
 0x38a   :  { %v357_v19 = vsel %vm123_vm1, %v339_v17, %v349_v18 }
 0x38b   :  { %388 = vrot.lane.b32.xlu2 %v357_v19, %s831_s3  ;;  %365 = vst [vmem:[%s1368_s8 + $0x38] sm:$0xff] %v357_v19 }
 0x3c5   :  { %v375_v36 = vpop.permute.xlu0 %374 }
 0x3c6   :  { %v398_v25 = vadd.f32 %v375_v36, %v350_v1 }
 0x3c8   :  { %v1223_v43 = vmul.f32 %v412_v38, %v398_v25 }
 0x3cd   :  { %v377_v40 = vpop.permute.xlu0 %376  ;;  %v383_v26 = vpop.permute.xlu2 %382 }
 0x3ce   :  { %v399_v41 = vadd.f32 %v377_v40, %v351_v57  ;;  %v402_v46 = vadd.f32 %v383_v26, %v354_v9 }
 0x3d0   :  { %v1225_v44 = vmul.f32 %v412_v38, %v399_v41  ;;  %v1231_v28 = vmul.f32 %v412_v38, %v402_v46 }
 0x3d2   :  { %v427_v45 = vpack.c.bf16 %v1225_v44, %v1223_v43 }
 0x3d4   :  { %531 = vrot.lane.b32.xlu0 %v427_v45, %s833_s5  ;;  %749 = vmatmul.msk.bf16.vlgmr.msra.gmra.mxu0 %vm436_vm3, %v427_v45 }
 0x3d5   :  { %v379_v27 = vpop.permute.xlu1 %378  ;;  %v385_v47 = vpop.permute.xlu2 %384 }
 0x3d6   :  { %v403_v48 = vadd.f32 %v385_v47, %v355_v13  ;;  %v400_v51 = vadd.f32 %v379_v27, %v1169_v3 }
 0x3d8   :  { %v1233_v49 = vmul.f32 %v412_v38, %v403_v48  ;;  %v1240_v54 = vmul.f32 %v412_v38, %v400_v51 }
 0x3da   :  { %v429_v50 = vpack.c.bf16 %v1233_v49, %v1231_v28 }
 0x3dc   :  { %535 = vrot.lane.b32.xlu1 %v429_v50, %s833_s5 }
 0x3dd   :  { %v381_v52 = vpop.permute.xlu1 %380 }
 0x3de   :  { %v401_v53 = vadd.f32 %v381_v52, %v1179_v6 }
 0x3e0   :  { %v1242_v55 = vmul.f32 %v412_v38, %v401_v53 }
 0x3e2   :  { %v428_v56 = vpack.c.bf16 %v1242_v55, %v1240_v54 }
 0x3e4   :  { %533 = vrot.lane.b32.xlu0 %v428_v56, %s833_s5  ;;  %750 = vmatmul.msk.bf16.gmra.mxu0 %vm436_vm3, %v428_v56 }
 0x3e5   :  { %v389_v29 = vpop.permute.xlu2 %388 }
 0x3e6   :  { %v405_v58 = vadd.f32 %v389_v29, %v357_v19 }
 0x3e8   :  { %v1249_v31 = vmul.f32 %v412_v38, %v405_v58 }
 0x3f4   :  { %751 = vmatmul.msk.bf16.gmra.mxu0 %vm436_vm3, %v429_v50 }
 0x3f5   :  { %v387_v59 = vpop.permute.xlu1 %386 }
 0x3f6   :  { %v404_v61 = vadd.f32 %v387_v59, %v356_v16 }
 0x3f8   :  { %v1251_v62 = vmul.f32 %v412_v38, %v404_v61 }
 0x3fa   :  { %v430_v63 = vpack.c.bf16 %v1249_v31, %v1251_v62 }
 0x3fc   :  { %537 = vrot.lane.b32.xlu2 %v430_v63, %s833_s5 }
 0x404   :  { %752 = vmatmul.msk.bf16.gmra.mxu0 %vm436_vm3, %v430_v63 }
 0x446   :  { %v532_v0 = vpop.permute.xlu0 %531 }
 0x447   :  { %753 = vmatmul.msk.bf16.vlgmr.msrb.gmra.mxu1 %vm436_vm3, %v532_v0 }
 0x44e   :  { %v536_v60 = vpop.permute.xlu1 %535 }
 0x451   :  { %v458_v1 = vpop.f32.mrf.mxu0 }
 0x452   :  { %v459_v7 = vadd.f32 %v1263_v4, %v458_v1  ;;  %v426_v1 = vld [vmem:[%s1371_s7] sm:$0x1] }
 0x456   :  { %v534_v39 = vpop.permute.xlu0 %533  ;;  %v538_v5 = vpop.permute.xlu2 %537 }
 0x457   :  { %754 = vmatmul.msk.bf16.gmra.mxu1 %vm436_vm3, %v534_v39 }
 0x459   :  { %v460_v42 = vpop.f32.mrf.mxu0 }
 0x45a   :  { %v461_v6 = vadd.f32 %v1263_v4, %v460_v42 }
 0x45c   :  { %791 = vtanh.f32 %v461_v6 }
 0x45d   :  { %793 = vtanh.f32 %v459_v7 }
 0x461   :  { %v463_v57 = vpop.f32.mrf.mxu0 }
 0x462   :  { %v464_v9 = vadd.f32 %v1263_v4, %v463_v57  ;;  %v792_v15 = vpop.eup %791 }
 0x463   :  { %v794_v17 = vpop.eup %793  ;;  %v487_v19 = vsel %vm436_vm3, %v792_v15, 0.0 }
 0x464   :  { %795 = vtanh.f32 %v464_v9  ;;  %v486_v22 = vsel %vm436_vm3, %v794_v17, 0.0 }
 0x465   :  { %v488_v24 = vadd.f32 %v487_v19, %v486_v22 }
 0x467   :  { %755 = vmatmul.msk.bf16.gmra.mxu1 %vm436_vm3, %v536_v60 }
 0x469   :  { %v465_v2 = vpop.f32.mrf.mxu0 }
 0x46a   :  { %v466_v10 = vadd.f32 %v1263_v4, %v465_v2  ;;  %v796_v18 = vpop.eup %795 }
 0x46b   :  { %v489_v11 = vsel %vm436_vm3, %v796_v18, 0.0 }
 0x46c   :  { %797 = vtanh.f32 %v466_v10  ;;  %v490_v34 = vadd.f32 %v489_v11, %v488_v24 }
 0x471   :  { %v468_v3 = vpop.f32.mrf.mxu0 }
 0x472   :  { %v469_v12 = vadd.f32 %v1263_v4, %v468_v3  ;;  %v798_v21 = vpop.eup %797 }
 0x473   :  { %v491_v30 = vsel %vm436_vm3, %v798_v21, 0.0 }
 0x474   :  { %799 = vtanh.f32 %v469_v12  ;;  %v492_v38 = vadd.f32 %v491_v30, %v490_v34 }
 0x477   :  { %756 = vmatmul.msk.bf16.gmra.mxu1 %vm436_vm3, %v538_v5 }
 0x479   :  { %v470_v8 = vpop.f32.mrf.mxu0 }
 0x47a   :  { %v471_v13 = vadd.f32 %v1263_v4, %v470_v8  ;;  %v800_v23 = vpop.eup %799 }
 0x47b   :  { %v493_v37 = vsel %vm436_vm3, %v800_v23, 0.0 }
 0x47c   :  { %801 = vtanh.f32 %v471_v13  ;;  %v494_v26 = vadd.f32 %v493_v37, %v492_v38 }
 0x47d   :  { %803 = vrcp.f32 %v834_v20 }
 0x481   :  { %v473_v14 = vpop.f32.mrf.mxu0 }
 0x482   :  { %v474_v16 = vadd.f32 %v1263_v4, %v473_v14  ;;  %v802_v33 = vpop.eup %801 }
 0x483   :  { %v804_v36 = vpop.eup %803  ;;  %v495_v40 = vsel %vm436_vm3, %v802_v33, 0.0 }
 0x484   :  { %805 = vtanh.f32 %v474_v16  ;;  %v508_v45 = vmul.f32 64.0, %v804_v36  ;;  %v496_v46 = vadd.f32 %v495_v40, %v494_v26  ;;  %vm512_vm4 = vweird.f32 %v804_v36 }
 0x486   :  { %v509_v50 = vsub.f32 1.0, %v508_v45 }
 0x488   :  { %v510_v53 = vmul.f32 %v804_v36, %v509_v50 }
 0x489   :  { %v475_v32 = vpop.f32.mrf.mxu0 }
 0x48a   :  { %v476_v35 = vadd.f32 %v1263_v4, %v475_v32  ;;  %v806_v25 = vpop.eup %805  ;;  %v511_v58 = vadd.f32 %v804_v36, %v510_v53 }
 0x48b   :  { %v497_v41 = vsel %vm436_vm3, %v806_v25, 0.0 }
 0x48c   :  { %807 = vtanh.f32 %v476_v35  ;;  %v498_v47 = vadd.f32 %v497_v41, %v496_v46  ;;  %v513_v63 = vsel %vm512_vm4, %v804_v36, %v511_v58 }
 0x492   :  { %v808_v27 = vpop.eup %807 }
 0x493   :  { %v499_v48 = vsel %vm436_vm3, %v808_v27, 0.0 }
 0x494   :  { %v500_v51 = vadd.f32 %v499_v48, %v498_v47 }
 0x496   :  { %v501_v52 = vrot.slane %v500_v51, 4 }
 0x498   :  { %v502_v56 = vadd.f32 %v501_v52, %v500_v51 }
 0x49a   :  { %v503_v29 = vrot.slane %v502_v56, 2 }
 0x49c   :  { %v504_v59 = vadd.f32 %v503_v29, %v502_v56 }
 0x49e   :  { %v505_v61 = vrot.slane %v504_v59, 1 }
 0x4a0   :  { %v506_v0 = vadd.f32 %v505_v61, %v504_v59 }
 0x4a2   :  { %v514_v39 = vmul.f32 %v513_v63, %v506_v0 }
 0x4a4   :  { %v515_v42 = vmul.f32 %v514_v39, %v426_v1 }
 0x4a6   :  { %v517_v57 = vsel %vm516_vm5, %v515_v42, 0.0 }
 0x4a7   :  { %518 = vadd.xlane.f32.xlu0 %v517_v57 }
 0x4c4   :  { %v560_v60 = vpop.f32.mrf.mxu1 }
 0x4c5   :  { %v561_v8 = vadd.f32 %v1263_v4, %v560_v60 }
 0x4cc   :  { %v562_v2 = vpop.f32.mrf.mxu1 }
 0x4cd   :  { %v563_v7 = vadd.f32 %v1263_v4, %v562_v2 }
 0x4cf   :  { %809 = vtanh.f32 %v563_v7 }
 0x4d0   :  { %811 = vtanh.f32 %v561_v8 }
 0x4d4   :  { %v565_v3 = vpop.f32.mrf.mxu1 }
 0x4d5   :  { %v566_v10 = vadd.f32 %v1263_v4, %v565_v3  ;;  %v810_v16 = vpop.eup %809 }
 0x4d6   :  { %v812_v18 = vpop.eup %811  ;;  %v589_v20 = vsel %vm436_vm3, %v810_v16, 0.0 }
 0x4d7   :  { %813 = vtanh.f32 %v566_v10  ;;  %v588_v22 = vsel %vm436_vm3, %v812_v18, 0.0 }
 0x4d8   :  { %v590_v24 = vadd.f32 %v589_v20, %v588_v22 }
 0x4dc   :  { %v567_v5 = vpop.f32.mrf.mxu1 }
 0x4dd   :  { %v568_v12 = vadd.f32 %v1263_v4, %v567_v5  ;;  %v814_v19 = vpop.eup %813 }
 0x4de   :  { %v591_v11 = vsel %vm436_vm3, %v814_v19, 0.0 }
 0x4df   :  { %815 = vtanh.f32 %v568_v12  ;;  %v592_v34 = vadd.f32 %v591_v11, %v590_v24 }
 0x4e4   :  { %v570_v6 = vpop.f32.mrf.mxu1 }
 0x4e5   :  { %v571_v13 = vadd.f32 %v1263_v4, %v570_v6  ;;  %v816_v21 = vpop.eup %815 }
 0x4e6   :  { %v593_v30 = vsel %vm436_vm3, %v816_v21, 0.0 }
 0x4e7   :  { %817 = vtanh.f32 %v571_v13  ;;  %v594_v25 = vadd.f32 %v593_v30, %v592_v34 }
 0x4ec   :  { %v572_v9 = vpop.f32.mrf.mxu1 }
 0x4ed   :  { %v573_v14 = vadd.f32 %v1263_v4, %v572_v9  ;;  %v818_v23 = vpop.eup %817 }
 0x4ee   :  { %v595_v36 = vsel %vm436_vm3, %v818_v23, 0.0 }
 0x4ef   :  { %819 = vtanh.f32 %v573_v14  ;;  %v596_v40 = vadd.f32 %v595_v36, %v594_v25 }
 0x4f4   :  { %v575_v15 = vpop.f32.mrf.mxu1 }
 0x4f5   :  { %v576_v17 = vadd.f32 %v1263_v4, %v575_v15  ;;  %v820_v33 = vpop.eup %819 }
 0x4f6   :  { %v597_v38 = vsel %vm436_vm3, %v820_v33, 0.0 }
 0x4f7   :  { %821 = vtanh.f32 %v576_v17  ;;  %v598_v41 = vadd.f32 %v597_v38, %v596_v40 }
 0x4fc   :  { %v577_v32 = vpop.f32.mrf.mxu1 }
 0x4fd   :  { %v578_v35 = vadd.f32 %v1263_v4, %v577_v32  ;;  %v822_v37 = vpop.eup %821 }
 0x4fe   :  { %v599_v26 = vsel %vm436_vm3, %v822_v37, 0.0 }
 0x4ff   :  { %823 = vtanh.f32 %v578_v35  ;;  %v600_v46 = vadd.f32 %v599_v26, %v598_v41 }
 0x505   :  { %v824_v45 = vpop.eup %823 }
 0x506   :  { %v601_v27 = vsel %vm436_vm3, %v824_v45, 0.0 }
 0x507   :  { %v602_v47 = vadd.f32 %v601_v27, %v600_v46 }
 0x509   :  { %v603_v48 = vrot.slane %v602_v47, 4 }
 0x50b   :  { %v604_v50 = vadd.f32 %v603_v48, %v602_v47 }
 0x50d   :  { %v605_v51 = vrot.slane %v604_v50, 2 }
 0x50f   :  { %v606_v4 = vadd.f32 %v605_v51, %v604_v50 }
 0x511   :  { %v607_v52 = vrot.slane %v606_v4, 1 }
 0x513   :  { %v608_v53 = vadd.f32 %v607_v52, %v606_v4 }
 0x515   :  { %v609_v56 = vmul.f32 %v608_v53, %v513_v63 }
 0x517   :  { %v610_v29 = vmul.f32 %v609_v56, %v426_v1 }
 0x519   :  { %v611_v58 = vsel %vm516_vm5, %v610_v29, 0.0 }
 0x51a   :  { %612 = vadd.xlane.f32.xlu1 %v611_v58  ;;  %v519_v59 = vpop.xlane.xlu0 %518 }
 0x51b   :  { %v520_v61 = vrot.slane %v519_v59, 4 }
 0x51d   :  { %v521_v0 = vadd.f32 %v520_v61, %v519_v59 }
 0x51f   :  { %v522_v39 = vrot.slane %v521_v0, 2 }
 0x521   :  { %v523_v42 = vadd.f32 %v522_v39, %v521_v0 }
 0x523   :  { %v524_v57 = vrot.slane %v523_v42, 1 }
 0x525   :  { %v525_v60 = vadd.f32 %v524_v57, %v523_v42 }
 0x527   :  { %773 = vpush %v525_v60 }
 0x558   :  { %s774_s7 = spop %773 }
 0x58d   :  { %v613_v2 = vpop.xlane.xlu1 %612 }
 0x58e   :  { %v614_v3 = vrot.slane %v613_v2, 4 }
 0x590   :  { %v615_v5 = vadd.f32 %v614_v3, %v613_v2 }
 0x592   :  { %v616_v6 = vrot.slane %v615_v5, 2 }
 0x594   :  { %v617_v7 = vadd.f32 %v616_v6, %v615_v5 }
 0x596   :  { %v618_v8 = vrot.slane %v617_v7, 1 }
 0x598   :  { %v619_v9 = vadd.f32 %v618_v8, %v617_v7 }
 0x59a   :  { %775 = vpush %v619_v9 }
 0x5cb   :  { %s776_s24 = spop %775 }
 0x5cc   :  { %s621_s2 = smax.f32 %s776_s24, %s774_s7 }
 0x5cd   :  { %s622_s25 = ssub.f32 %s774_s7, %s621_s2 }
 0x5ce   :  { %s627_s26 = ssub.f32 %s776_s24, %s621_s2 }
 0x5cf   :  { %v623_v63 = vstv %s622_s25 }
 0x5d0   :  { %v624_v1 = vmul.f32 1.442695, %v623_v63  ;;  %v628_v10 = vstv %s627_s26 }
 0x5d1   :  { %v629_v12 = vmul.f32 1.442695, %v628_v10 }
 0x5d2   :  { %825 = vpow2.f32 %v624_v1 }
 0x5d3   :  { %827 = vpow2.f32 %v629_v12 }
 0x5d8   :  { %v826_v13 = vpop.eup %825 }
 0x5d9   :  { %v828_v14 = vpop.eup %827  ;;  %777 = vpush %v826_v13 }
 0x5da   :  { %779 = vpush %v828_v14 }
 0x60a   :  { %s1303_s1 = spop %777 }
 0x60b   :  { %s780_s27 = spop %779 }
 0x60c   :  { %s632_s28 = sadd.f32 %s780_s27, %s1303_s1 }
 0x60e   :  { %v633_v15 = vstv %s632_s28 }
 0x60f   :  { %829 = vrcp.f32 %v633_v15  ;;  %v645_v19 = vand.u32 2147483648, %v633_v15  ;;  %v643_v21 = vand.u32 2147483647, %v633_v15  ;;  %vm639_vm7 = vweird.f32 %v633_v15 }
 0x611   :  { %v646_v11 = vor.u32 1.1754944e-38, %v645_v19  ;;  %vm644_vm9 = vcmp.eq.f32.partialorder %v643_v21, 8.507059e+37 }
 0x615   :  { %v830_v16 = vpop.eup %829 }
 0x616   :  { %v635_v17 = vmul.f32 %v830_v16, %v633_v15  ;;  %vm640_vm6 = vweird.f32 %v830_v16 }
 0x617   :  { %vm641_vm8 = vmor %vm639_vm7, %vm640_vm6 }
 0x618   :  { %v636_v18 = vsub.f32 1.0, %v635_v17 }
 0x61a   :  { %v637_v20 = vmul.f32 %v830_v16, %v636_v18 }
 0x61c   :  { %v638_v22 = vadd.f32 %v830_v16, %v637_v20 }
 0x61e   :  { %v642_v23 = vsel %vm641_vm8, %v830_v16, %v638_v22 }
 0x61f   :  { %v647_v24 = vsel %vm644_vm9, %v646_v11, %v642_v23 }
 0x620   :  { %781 = vpush %v647_v24 }
 0x651   :  { %s782_s29 = spop %781 }
 0x652   :  { %s659_s30 = smul.f32 %s782_s29, %s780_s27 }
 0x653   :  { %s649_s10 = smul.f32 %s782_s29, %s1303_s1 }
 0x654   :  { %v660_v30 = vstv %s659_s30 }
 0x655   :  { %v668_v32 = vmul.f32 %v660_v30, %v1249_v31  ;;  %v667_v33 = vmul.f32 %v660_v30, %v1251_v62  ;;  %v661_v34 = vmul.f32 %v660_v30, %v1223_v43  ;;  %v662_v35 = vmul.f32 %v660_v30, %v1225_v44 }
 0x656   :  { %v663_v36 = vmul.f32 %v660_v30, %v1240_v54  ;;  %v664_v37 = vmul.f32 %v660_v30, %v1242_v55  ;;  %v665_v25 = vmul.f32 %v660_v30, %v1231_v28  ;;  %v666_v38 = vmul.f32 %v660_v30, %v1233_v49 }
 0x657   :  { %691 = vrot.lane.b32.xlu1 %v668_v32, %s833_s5  ;;  %689 = vrot.lane.b32.xlu0 %v667_v33, %s833_s5  ;;  %v650_v40 = vstv %s649_s10 }
 0x658   :  { %677 = vrot.lane.b32.xlu2 %v661_v34, %s833_s5  ;;  %v651_v26 = vmul.f32 %v650_v40, %v1223_v43  ;;  %v652_v46 = vmul.f32 %v650_v40, %v1225_v44  ;;  %v653_v48 = vmul.f32 %v650_v40, %v1240_v54  ;;  %v658_v51 = vmul.f32 %v650_v40, %v1249_v31 }
 0x659   :  { %v657_v44 = vmul.f32 %v650_v40, %v1251_v62  ;;  %v654_v53 = vmul.f32 %v650_v40, %v1242_v55  ;;  %v655_v54 = vmul.f32 %v650_v40, %v1231_v28  ;;  %v656_v62 = vmul.f32 %v650_v40, %v1233_v49 }
 0x660   :  { %679 = vrot.lane.b32.xlu2 %v662_v35, %s833_s5 }
 0x668   :  { %681 = vrot.lane.b32.xlu2 %v663_v36, %s833_s5 }
 0x670   :  { %683 = vrot.lane.b32.xlu2 %v664_v37, %s833_s5 }
 0x678   :  { %685 = vrot.lane.b32.xlu2 %v665_v25, %s833_s5 }
 0x680   :  { %687 = vrot.lane.b32.xlu2 %v666_v38, %s833_s5 }
 0x6b2   :  { %v678_v41 = vpop.permute.xlu2 %677 }
 0x6b3   :  { %v701_v45 = vadd.f32 %v678_v41, %v651_v26 }
 0x6b5   :  { %709 = vst.msk [vmem:[%s1372_s9] sm:$0xff] %vm436_vm3, %v701_v45 }
 0x6ba   :  { %v680_v27 = vpop.permute.xlu2 %679 }
 0x6bb   :  { %v702_v47 = vadd.f32 %v680_v27, %v652_v46 }
 0x6bd   :  { %710 = vst.msk [vmem:[%s1372_s9 + $0x8] sm:$0xff] %vm436_vm3, %v702_v47 }
 0x6c2   :  { %v682_v50 = vpop.permute.xlu2 %681 }
 0x6c3   :  { %v703_v43 = vadd.f32 %v682_v50, %v653_v48 }
 0x6c5   :  { %711 = vst.msk [vmem:[%s1372_s9 + $0x10] sm:$0xff] %vm436_vm3, %v703_v43 }
 0x6c9   :  { %v692_v4 = vpop.permute.xlu1 %691  ;;  %v690_v52 = vpop.permute.xlu0 %689 }
 0x6ca   :  { %v708_v56 = vadd.f32 %v692_v4, %v658_v51  ;;  %v707_v29 = vadd.f32 %v690_v52, %v657_v44  ;;  %v684_v58 = vpop.permute.xlu2 %683 }
 0x6cb   :  { %v704_v59 = vadd.f32 %v684_v58, %v654_v53 }
 0x6cc   :  { %716 = vst.msk [vmem:[%s1372_s9 + $0x38] sm:$0xff] %vm436_vm3, %v708_v56 }
 0x6cd   :  { %715 = vst.msk [vmem:[%s1372_s9 + $0x30] sm:$0xff] %vm436_vm3, %v707_v29 }
 0x6ce   :  { %712 = vst.msk [vmem:[%s1372_s9 + $0x18] sm:$0xff] %vm436_vm3, %v704_v59 }
 0x6d2   :  { %v686_v55 = vpop.permute.xlu2 %685 }
 0x6d3   :  { %v705_v31 = vadd.f32 %v686_v55, %v655_v54 }
 0x6d5   :  { %713 = vst.msk [vmem:[%s1372_s9 + $0x20] sm:$0xff] %vm436_vm3, %v705_v31 }
 0x6da   :  { %v688_v61 = vpop.permute.xlu2 %687 }
 0x6db   :  { %v706_v0 = vadd.f32 %v688_v61, %v656_v62 }
 0x6dd   :  { %714 = vst.msk [vmem:[%s1372_s9 + $0x28] sm:$0xff] %vm436_vm3, %v706_v0 }

// kernel: model_forward.3
= control target key start
LH: loop header
LB: loop body
LE: loop exit
PB: predicated region body
PF: predicated region fallthrough
CT: control target
= control target key end

     0   :  { %s12970_s0 = inlined_call_operand.vmem [shape: f32[64,128], index: 0, kind: input, shape index: {}]   ;;  %s12971_s1 = inlined_call_operand.vmem [shape: f32[64,32], index: 1, kind: input, shape index: {}]   ;;  %s12972_s2 = inlined_call_operand.vmem [shape: f32[2,64,32], index: 2, kind: input, shape index: {}]   ;;  %s12973_s3 = inlined_call_operand.vmem [shape: f32[64,32], index: 3, kind: input, shape index: {}]   ;;  %s12974_s4 = inlined_call_operand.vmem [shape: f32[1,32], index: 4, kind: input, shape index: {}]   ;;  %s12975_s5 = inlined_call_operand.vmem [shape: f32[32,32], index: 5, kind: input, shape index: {}]   ;;  %s12976_s6 = inlined_call_operand.vmem [shape: f32[1,32], index: 6, kind: input, shape index: {}]   ;;  %s12977_s7 = inlined_call_operand.vmem [shape: f32[32,32], index: 7, kind: input, shape index: {}]   ;;  %s12978_s8 = inlined_call_operand.vmem [shape: f32[1,32], index: 8, kind: input, shape index: {}]   ;;  %s12979_s9 = inlined_call_operand.vmem [shape: f32[32,32], index: 9, kind: input, shape index: {}]   ;;  %s12980_s10 = inlined_call_operand.vmem [shape: f32[1,32], index: 10, kind: input, shape index: {}]   ;;  %s12981_s11 = inlined_call_operand.vmem [shape: f32[32,32], index: 11, kind: input, shape index: {}]   ;;  %s12982_s12 = inlined_call_operand.vmem [shape: f32[1,32], index: 12, kind: input, shape index: {}]   ;;  %s12983_s13 = inlined_call_operand.vmem [shape: f32[32,32], index: 13, kind: input, shape index: {}]   ;;  %s12984_s14 = inlined_call_operand.vmem [shape: f32[1,32], index: 14, kind: input, shape index: {}]   ;;  %s12985_s15 = inlined_call_operand.vmem [shape: f32[4,64], index: 15, kind: input, shape index: {}]   ;;  %s12986_s16 = inlined_call_operand.hbm [shape: f32[1,1], index: 16, kind: output, shape index: {0}]   ;;  %s12987_s17 = inlined_call_operand.vmem [shape: s32[64,1], index: 17, kind: output, shape index: {1}]  }
   0x1   :  { %13126 = sst [smem:[#allocation91_spill]] %s12970_s0 }
   0x2   :  { %13127 = sst [smem:[#allocation92_spill]] %s12971_s1 }
   0x3   :  { %v89_v0 = vld [vmem:[%s12977_s7 + $0x10] sm:$0xff]  ;;  %v90_v1 = vld [vmem:[%s12977_s7 + $0x18] sm:$0xff]  ;;  %v87_v5 = vld [vmem:[%s12977_s7] sm:$0xff]  ;;  %s13131_s27 = sld [smem:[#allocation92_spill]] }
   0x4   :  { %v99_v2 = vld [vmem:[%s12981_s11 + $0x10] sm:$0xff]  ;;  %v7311_v3 = vpack.c.bf16 %v90_v1, %v89_v0  ;;  %v100_v4 = vld [vmem:[%s12981_s11 + $0x18] sm:$0xff]  ;;  %v88_v6 = vld [vmem:[%s12977_s7 + $0x8] sm:$0xff] }
   0x5   :  { %v7322_v7 = vpack.c.bf16 %v100_v4, %v99_v2  ;;  %v97_v8 = vld [vmem:[%s12981_s11] sm:$0xff]  ;;  %v98_v9 = vld [vmem:[%s12981_s11 + $0x8] sm:$0xff]  ;;  %v7331_v10 = vpack.c.bf16 %v88_v6, %v87_v5 }
   0x6   :  { %13128 = vst [vmem:[#allocation5_spill] sm:$0xff] %v7311_v3  ;;  %135 = vmatpush.bf16.msra.mxu0 %v7311_v3  ;;  %v7340_v13 = vpack.c.bf16 %v98_v9, %v97_v8 }
   0x7   :  { %13129 = vst [vmem:[#allocation6_spill] sm:$0xff] %v7322_v7  ;;  %387 = vmatpush.bf16.msra.mxu2 %v7322_v7 }
   0x8   :  { %13130 = vst [vmem:[#allocation7_spill] sm:$0xff] %v7331_v10 }
   0x9   :  { %v65_v11 = vld [vmem:[%s13131_s27] sm:$0xff]  ;;  %v66_v12 = vld [vmem:[%s13131_s27 + $0x8] sm:$0xff]  ;;  %13132 = vst [vmem:[#allocation8_spill] sm:$0xff] %v7340_v13 }
   0xa   :  { %v107_v14 = vpack.c.bf16 %v66_v12, %v65_v11 }
   0xb   :  { %23 = vsyncpa [#allocation3], 0  ;;  %136 = vmatpush.bf16.msra.mxu0 %v7331_v10  ;;  %vm116_vm0 = vcmask 261120   ;;  %388 = vmatpush.bf16.msra.mxu2 %v7340_v13  ;;  %v67_v15 = vld [vmem:[%s13131_s27 + $0x10] sm:$0xff]  ;;  %v68_v16 = vld [vmem:[%s13131_s27 + $0x18] sm:$0xff]  ;;  %s13133_s1 = sld [smem:[#allocation91_spill]] }
   0xc   :  { %v108_v17 = vpack.c.bf16 %v68_v16, %v67_v15  ;;  %s7204_s26 = smov 64   ;;  %v69_v27 = vld [vmem:[%s13131_s27 + $0x20] sm:$0xff]  ;;  %v70_v28 = vld [vmem:[%s13131_s27 + $0x28] sm:$0xff]  ;;  %v71_v30 = vld [vmem:[%s13131_s27 + $0x30] sm:$0xff]  ;;  %s7206_s7 = smov 96  }
   0xd   :  { %v109_v29 = vpack.c.bf16 %v70_v28, %v69_v27  ;;  %v72_v31 = vld [vmem:[%s13131_s27 + $0x38] sm:$0xff]  ;;  %v94_v36 = vld [vmem:[%s12979_s9 + $0x10] sm:$0xff]  ;;  %v92_v39 = vld [vmem:[%s12979_s9] sm:$0xff]  ;;  %s7207_s11 = smov 32  }
   0xe   :  { %6147 = vmatmul.msk.bf16.vlgmr.msra.gmra.mxu0 %vm116_vm0, %v107_v14  ;;  %6163 = vmatmul.msk.bf16.vlgmr.msra.gmra.mxu2 %vm116_vm0, %v107_v14  ;;  %v110_v32 = vpack.c.bf16 %v72_v31, %v71_v30  ;;  %v95_v37 = vld [vmem:[%s12979_s9 + $0x18] sm:$0xff]  ;;  %v93_v40 = vld [vmem:[%s12979_s9 + $0x8] sm:$0xff]  ;;  %v104_v42 = vld [vmem:[%s12983_s13 + $0x10] sm:$0xff] }
   0xf   :  { %v7412_v38 = vpack.c.bf16 %v95_v37, %v94_v36  ;;  %v7421_v41 = vpack.c.bf16 %v93_v40, %v92_v39  ;;  %v105_v43 = vld [vmem:[%s12983_s13 + $0x18] sm:$0xff]  ;;  %v102_v45 = vld [vmem:[%s12983_s13] sm:$0xff]  ;;  %v103_v46 = vld [vmem:[%s12983_s13 + $0x8] sm:$0xff] }
  0x10   :  { %v7430_v44 = vpack.c.bf16 %v105_v43, %v104_v42  ;;  %v7439_v47 = vpack.c.bf16 %v103_v46, %v102_v45  ;;  %v7444_v48 = vld [vmem:[%s12978_s8] ss:$0 sm:$0xff]  ;;  %v80_v27 = vld [vmem:[%s12973_s3 + $0x38] sm:$0xff]  ;;  %v75_v28 = vld [vmem:[%s12973_s3 + $0x10] sm:$0xff] }
  0x11   :  { %v57_v18 = vld [vmem:[%s13133_s1] sm:$0xff]  ;;  %v58_v19 = vld [vmem:[%s13133_s1 + $0x8] sm:$0xff]  ;;  %v59_v24 = vld [vmem:[%s13133_s1 + $0x10] sm:$0xff]  ;;  %13138 = vst [vmem:[#allocation13_spill] sm:$0xff] %v7412_v38  ;;  %225 = vmatpush.bf16.msra.mxu1 %v7412_v38 }
  0x12   :  { %v7360_v20 = vpack.c.bf16 %v58_v19, %v57_v18  ;;  %v61_v21 = vld [vmem:[%s13133_s1 + $0x20] sm:$0xff]  ;;  %v62_v22 = vld [vmem:[%s13133_s1 + $0x28] sm:$0xff]  ;;  %v60_v25 = vld [vmem:[%s13133_s1 + $0x18] sm:$0xff]  ;;  %13139 = vst [vmem:[#allocation14_spill] sm:$0xff] %v7421_v41  ;;  %477 = vmatpush.bf16.msra.mxu3 %v7430_v44 }
  0x13   :  { %v7368_v23 = vpack.c.bf16 %v62_v22, %v61_v21  ;;  %v7378_v26 = vpack.c.bf16 %v60_v25, %v59_v24  ;;  %v63_v33 = vld [vmem:[%s13133_s1 + $0x30] sm:$0xff]  ;;  %v64_v34 = vld [vmem:[%s13133_s1 + $0x38] sm:$0xff]  ;;  %v7453_v51 = vld [vmem:[%s12982_s12] ss:$0 sm:$0xff] }
  0x14   :  { %13134 = vst [vmem:[#allocation9_spill] sm:$0xff] %v7360_v20  ;;  %640 = vrot.lane.b32.xlu0 %v7360_v20, %s7204_s26  ;;  %v7403_v35 = vpack.c.bf16 %v64_v34, %v63_v33  ;;  %v79_v25 = vld [vmem:[%s12973_s3 + $0x30] sm:$0xff]  ;;  %v76_v31 = vld [vmem:[%s12973_s3 + $0x18] sm:$0xff] }
  0x15   :  { %13135 = vst [vmem:[#allocation10_spill] sm:$0xff] %v7368_v23  ;;  %644 = vrot.lane.b32.xlu1 %v7368_v23, %s7204_s26  ;;  %226 = vmatpush.bf16.msra.mxu1 %v7421_v41  ;;  %v7471_v30 = vpack.c.bf16 %v80_v27, %v79_v25  ;;  %v7476_v33 = vpack.c.bf16 %v76_v31, %v75_v28 }
  0x16   :  { %13136 = vst [vmem:[#allocation11_spill] sm:$0xff] %v7378_v26  ;;  %478 = vmatpush.bf16.msra.mxu3 %v7439_v47 }
  0x17   :  { %13137 = vst [vmem:[#allocation12_spill] sm:$0xff] %v7403_v35  ;;  %666 = vmatpush.bf16.msrb.mxu0 %v7471_v30 }
  0x18   :  { %13140 = vst [vmem:[#allocation15_spill] sm:$0xff] %v7471_v30 }
  0x19   :  { %13141 = vst [vmem:[#allocation16_spill] sm:$0xff] %v7476_v33  ;;  %707 = vmatpush.bf16.msrb.mxu1 %v7476_v33 }
  0x1a   :  { %1192 = vmatpush.bf16.msrb.mxu3 %v7311_v3 }
  0x1c   :  { %642 = vrot.lane.b32.xlu0 %v7378_v26, %s7204_s26 }
  0x1d   :  { %646 = vrot.lane.b32.xlu1 %v7403_v35, %s7204_s26 }
  0x1e   :  { %6148 = vmatmul.msk.bf16.gmra.mxu0 %vm116_vm0, %v108_v17  ;;  %6164 = vmatmul.msk.bf16.gmra.mxu2 %vm116_vm0, %v108_v17 }
  0x1f   :  { %1193 = vmatpush.bf16.msrb.mxu3 %v7331_v10 }
  0x2e   :  { %6149 = vmatmul.msk.bf16.gmra.mxu0 %vm116_vm0, %v109_v29  ;;  %6165 = vmatmul.msk.bf16.gmra.mxu2 %vm116_vm0, %v109_v29 }
  0x3e   :  { %6150 = vmatmul.msk.bf16.gmra.mxu0 %vm116_vm0, %v110_v32  ;;  %6166 = vmatmul.msk.bf16.gmra.mxu2 %vm116_vm0, %v110_v32 }
  0x8b   :  { %v138_v49 = vpop.f32.mrf.mxu0 }
  0x8c   :  { %v139_v50 = vadd.f32 %v7444_v48, %v138_v49 }
  0x8e   :  { %v166_v52 = vmul.f32 1.442695, %v139_v50  ;;  %vm158_vm1 = vcmp.gt.f32.partialorder %v139_v50, 0.0 }
  0x90   :  { %6403 = vpow2.f32 %v166_v52 }
  0x91   :  { %v390_v53 = vpop.f32.mrf.mxu2 }
  0x92   :  { %v391_v54 = vadd.f32 %v7453_v51, %v390_v53 }
  0x93   :  { %v140_v55 = vpop.f32.mrf.mxu0 }
  0x94   :  { %v141_v56 = vadd.f32 %v7444_v48, %v140_v55  ;;  %v418_v57 = vmul.f32 1.442695, %v391_v54  ;;  %vm410_vm3 = vcmp.gt.f32.partialorder %v391_v54, 0.0 }
  0x96   :  { %v168_v58 = vmul.f32 1.442695, %v141_v56  ;;  %v6404_v59 = vpop.eup %6403  ;;  %vm159_vm2 = vcmp.gt.f32.partialorder %v141_v56, 0.0 }
  0x97   :  { %v6151_v0 = vadd.f32 -1.0, %v6404_v59 }
  0x98   :  { %6405 = vpow2.f32 %v168_v58 }
  0x99   :  { %6407 = vpow2.f32 %v418_v57  ;;  %v392_v60 = vpop.f32.mrf.mxu2  ;;  %v190_v8 = vsel %vm158_vm1, %v139_v50, %v6151_v0 }
  0x9a   :  { %v393_v61 = vadd.f32 %v7453_v51, %v392_v60 }
  0x9b   :  { %v143_v62 = vpop.f32.mrf.mxu0 }
  0x9c   :  { %v144_v63 = vadd.f32 %v7444_v48, %v143_v62  ;;  %v420_v1 = vmul.f32 1.442695, %v393_v61  ;;  %vm411_vm4 = vcmp.gt.f32.partialorder %v393_v61, 0.0 }
  0x9e   :  { %v6406_v2 = vpop.eup %6405  ;;  %6409 = vpow2.f32 %v420_v1  ;;  %v170_v6 = vmul.f32 1.442695, %v144_v63  ;;  %vm160_vm5 = vcmp.gt.f32.partialorder %v144_v63, 0.0 }
  0x9f   :  { %v6408_v4 = vpop.eup %6407  ;;  %v6152_v5 = vadd.f32 -1.0, %v6406_v2  ;;  %v78_v2 = vld [vmem:[%s12973_s3 + $0x28] sm:$0xff] }
  0xa0   :  { %v6167_v11 = vadd.f32 -1.0, %v6408_v4  ;;  %6411 = vpow2.f32 %v170_v6 }
  0xa1   :  { %v191_v9 = vsel %vm159_vm2, %v141_v56, %v6152_v5  ;;  %v395_v12 = vpop.f32.mrf.mxu2 }
  0xa2   :  { %v198_v14 = vpack.c.bf16 %v191_v9, %v190_v8  ;;  %v396_v15 = vadd.f32 %v7453_v51, %v395_v12  ;;  %v442_v24 = vsel %vm410_vm3, %v391_v54, %v6167_v11 }
  0xa3   :  { %v145_v16 = vpop.f32.mrf.mxu0 }
  0xa4   :  { %v146_v17 = vadd.f32 %v7444_v48, %v145_v16  ;;  %6159 = vmatmul.msk.bf16.vlgmr.msra.gmra.mxu1 %vm116_vm0, %v198_v14  ;;  %v6410_v18 = vpop.eup %6409  ;;  %v422_v19 = vmul.f32 1.442695, %v396_v15  ;;  %vm412_vm7 = vcmp.gt.f32.partialorder %v396_v15, 0.0  ;;  %v7498_v14 = vpop.permute.xlu0 %640  ;;  %v74_v16 = vld [vmem:[%s12973_s3 + $0x8] sm:$0xff] }
  0xa5   :  { %v6168_v21 = vadd.f32 -1.0, %v6410_v18 }
  0xa6   :  { %v172_v22 = vmul.f32 1.442695, %v146_v17  ;;  %v6412_v34 = vpop.eup %6411  ;;  %vm161_vm6 = vcmp.gt.f32.partialorder %v146_v17, 0.0 }
  0xa7   :  { %v443_v29 = vsel %vm411_vm4, %v393_v61, %v6168_v21  ;;  %v6153_v42 = vadd.f32 -1.0, %v6412_v34 }
  0xa8   :  { %6413 = vpow2.f32 %v172_v22  ;;  %v450_v32 = vpack.c.bf16 %v443_v29, %v442_v24 }
  0xa9   :  { %6415 = vpow2.f32 %v422_v19  ;;  %v397_v36 = vpop.f32.mrf.mxu2  ;;  %v192_v52 = vsel %vm160_vm5, %v144_v63, %v6153_v42  ;;  %v77_v63 = vld [vmem:[%s12973_s3 + $0x20] sm:$0xff] }
  0xaa   :  { %v398_v37 = vadd.f32 %v7453_v51, %v397_v36  ;;  %6175 = vmatmul.msk.bf16.vlgmr.msra.gmra.mxu3 %vm116_vm0, %v450_v32  ;;  %v7492_v4 = vpack.c.bf16 %v78_v2, %v77_v63 }
  0xab   :  { %v148_v39 = vpop.f32.mrf.mxu0 }
  0xac   :  { %v149_v40 = vadd.f32 %v7444_v48, %v148_v39  ;;  %v424_v43 = vmul.f32 1.442695, %v398_v37  ;;  %vm413_vm8 = vcmp.gt.f32.partialorder %v398_v37, 0.0  ;;  %13142 = vst [vmem:[#allocation17_spill] sm:$0xff] %v7492_v4  ;;  %667 = vmatpush.bf16.msrb.mxu0 %v7492_v4 }
  0xae   :  { %v6414_v45 = vpop.eup %6413  ;;  %6417 = vpow2.f32 %v424_v43  ;;  %v174_v50 = vmul.f32 1.442695, %v149_v40  ;;  %vm162_vm9 = vcmp.gt.f32.partialorder %v149_v40, 0.0 }
  0xaf   :  { %v6416_v46 = vpop.eup %6415  ;;  %v6154_v49 = vadd.f32 -1.0, %v6414_v45  ;;  %6179 = vmatmul.msk.bf16.vlgmr.msrb.gmra.mxu0 %vm116_vm0, %v7498_v14 }
  0xb0   :  { %v6169_v54 = vadd.f32 -1.0, %v6416_v46  ;;  %6419 = vpow2.f32 %v174_v50  ;;  %1277 = vmatpush.bf16.msra.mxu0 %v7412_v38 }
  0xb1   :  { %v193_v53 = vsel %vm161_vm6, %v146_v17, %v6154_v49  ;;  %v400_v55 = vpop.f32.mrf.mxu2 }
  0xb2   :  { %v199_v56 = vpack.c.bf16 %v193_v53, %v192_v52  ;;  %v401_v57 = vadd.f32 %v7453_v51, %v400_v55  ;;  %v444_v1 = vsel %vm412_vm7, %v396_v15, %v6169_v54  ;;  %v73_v15 = vld [vmem:[%s12973_s3] sm:$0xff]  ;;  %v643_v55 = vpop.permute.xlu0 %642 }
  0xb3   :  { %v150_v58 = vpop.f32.mrf.mxu0  ;;  %v7509_v18 = vpack.c.bf16 %v74_v16, %v73_v15 }
  0xb4   :  { %v151_v59 = vadd.f32 %v7444_v48, %v150_v58  ;;  %6160 = vmatmul.msk.bf16.gmra.mxu1 %vm116_vm0, %v199_v56  ;;  %v6418_v60 = vpop.eup %6417  ;;  %v426_v61 = vmul.f32 1.442695, %v401_v57  ;;  %1278 = vmatpush.bf16.msra.mxu0 %v7421_v41  ;;  %vm414_vm11 = vcmp.gt.f32.partialorder %v401_v57, 0.0 }
  0xb5   :  { %v6170_v62 = vadd.f32 -1.0, %v6418_v60  ;;  %13143 = vst [vmem:[#allocation18_spill] sm:$0xff] %v7509_v18  ;;  %708 = vmatpush.bf16.msrb.mxu1 %v7509_v18 }
  0xb6   :  { %v176_v0 = vmul.f32 1.442695, %v151_v59  ;;  %v6420_v8 = vpop.eup %6419  ;;  %vm163_vm10 = vcmp.gt.f32.partialorder %v151_v59, 0.0 }
  0xb7   :  { %v445_v5 = vsel %vm413_vm8, %v398_v37, %v6170_v62  ;;  %v6155_v19 = vadd.f32 -1.0, %v6420_v8 }
  0xb8   :  { %6421 = vpow2.f32 %v176_v0  ;;  %v451_v6 = vpack.c.bf16 %v445_v5, %v444_v1 }
  0xb9   :  { %6423 = vpow2.f32 %v426_v61  ;;  %v402_v9 = vpop.f32.mrf.mxu2  ;;  %1434 = vmatpush.bf16.msra.mxu1 %v7322_v7  ;;  %v194_v28 = vsel %vm162_vm9, %v149_v40, %v6155_v19 }
  0xba   :  { %v403_v11 = vadd.f32 %v7453_v51, %v402_v9  ;;  %6176 = vmatmul.msk.bf16.gmra.mxu3 %vm116_vm0, %v451_v6  ;;  %v645_v9 = vpop.permute.xlu1 %644 }
  0xbb   :  { %v153_v12 = vpop.f32.mrf.mxu0 }
  0xbc   :  { %v154_v17 = vadd.f32 %v7444_v48, %v153_v12  ;;  %v428_v21 = vmul.f32 1.442695, %v403_v11  ;;  %vm415_vm12 = vcmp.gt.f32.partialorder %v403_v11, 0.0 }
  0xbd   :  { %1435 = vmatpush.bf16.msra.mxu1 %v7340_v13 }
  0xbe   :  { %v6422_v22 = vpop.eup %6421  ;;  %6425 = vpow2.f32 %v428_v21  ;;  %v178_v27 = vmul.f32 1.442695, %v154_v17  ;;  %vm164_vm13 = vcmp.gt.f32.partialorder %v154_v17, 0.0  ;;  %v84_v21 = vld [vmem:[%s12975_s5 + $0x10] sm:$0xff] }
  0xbf   :  { %v6424_v24 = vpop.eup %6423  ;;  %v6156_v25 = vadd.f32 -1.0, %v6422_v22  ;;  %6180 = vmatmul.msk.bf16.gmra.mxu0 %vm116_vm0, %v643_v55  ;;  %v85_v22 = vld [vmem:[%s12975_s5 + $0x18] sm:$0xff] }
  0xc0   :  { %v6171_v31 = vadd.f32 -1.0, %v6424_v24  ;;  %6427 = vpow2.f32 %v178_v27  ;;  %v7560_v24 = vpack.c.bf16 %v85_v22, %v84_v21 }
  0xc1   :  { %v195_v29 = vsel %vm163_vm10, %v151_v59, %v6156_v25  ;;  %v405_v32 = vpop.f32.mrf.mxu2  ;;  %v7568_v25 = vld [vmem:[%s12984_s14] ss:$0 sm:$0xff] }
  0xc2   :  { %v200_v34 = vpack.c.bf16 %v195_v29, %v194_v28  ;;  %v406_v36 = vadd.f32 %v7453_v51, %v405_v32  ;;  %v446_v46 = vsel %vm414_vm11, %v401_v57, %v6171_v31  ;;  %808 = vmatpush.bf16.msrb.mxu2 %v7560_v24 }
  0xc3   :  { %v155_v37 = vpop.f32.mrf.mxu0 }
  0xc4   :  { %v156_v39 = vadd.f32 %v7444_v48, %v155_v37  ;;  %6161 = vmatmul.msk.bf16.gmra.mxu1 %vm116_vm0, %v200_v34  ;;  %v6426_v42 = vpop.eup %6425  ;;  %v430_v43 = vmul.f32 1.442695, %v406_v36  ;;  %vm416_vm15 = vcmp.gt.f32.partialorder %v406_v36, 0.0 }
  0xc5   :  { %v6172_v45 = vadd.f32 -1.0, %v6426_v42 }
  0xc6   :  { %v180_v40 = vmul.f32 1.442695, %v156_v39  ;;  %v6428_v52 = vpop.eup %6427  ;;  %vm165_vm14 = vcmp.gt.f32.partialorder %v156_v39, 0.0 }
  0xc7   :  { %v447_v49 = vsel %vm415_vm12, %v403_v11, %v6172_v45  ;;  %v6157_v56 = vadd.f32 -1.0, %v6428_v52  ;;  %v647_v11 = vpop.permute.xlu1 %646 }
  0xc8   :  { %6429 = vpow2.f32 %v180_v40  ;;  %v452_v50 = vpack.c.bf16 %v447_v49, %v446_v46  ;;  %v7591_v40 = vld [vmem:[%s12980_s10] ss:$0 sm:$0xff] }
  0xc9   :  { %6431 = vpow2.f32 %v430_v43  ;;  %v407_v53 = vpop.f32.mrf.mxu2  ;;  %v196_v57 = vsel %vm164_vm13, %v154_v17, %v6157_v56 }
  0xca   :  { %v408_v54 = vadd.f32 %v7453_v51, %v407_v53  ;;  %6177 = vmatmul.msk.bf16.gmra.mxu3 %vm116_vm0, %v452_v50 }
  0xcc   :  { %v432_v58 = vmul.f32 1.442695, %v408_v54  ;;  %vm417_vm1 = vcmp.gt.f32.partialorder %v408_v54, 0.0 }
  0xce   :  { %v6430_v59 = vpop.eup %6429  ;;  %6433 = vpow2.f32 %v432_v58  ;;  %v82_v58 = vld [vmem:[%s12975_s5] sm:$0xff] }
  0xcf   :  { %v6432_v60 = vpop.eup %6431  ;;  %v6158_v61 = vadd.f32 -1.0, %v6430_v59  ;;  %6181 = vmatmul.msk.bf16.gmra.mxu0 %vm116_vm0, %v645_v9  ;;  %v83_v59 = vld [vmem:[%s12975_s5 + $0x8] sm:$0xff] }
  0xd0   :  { %v6173_v0 = vadd.f32 -1.0, %v6432_v60  ;;  %v7611_v60 = vpack.c.bf16 %v83_v59, %v82_v58 }
  0xd1   :  { %v197_v62 = vsel %vm165_vm14, %v156_v39, %v6158_v61 }
  0xd2   :  { %v201_v1 = vpack.c.bf16 %v197_v62, %v196_v57  ;;  %v448_v5 = vsel %vm416_vm15, %v406_v36, %v6173_v0  ;;  %809 = vmatpush.bf16.msrb.mxu2 %v7611_v60 }
  0xd4   :  { %6162 = vmatmul.msk.bf16.gmra.mxu1 %vm116_vm0, %v201_v1  ;;  %v6434_v63 = vpop.eup %6433 }
  0xd5   :  { %v6174_v2 = vadd.f32 -1.0, %v6434_v63 }
  0xd6   :  { %1519 = vmatpush.bf16.msra.mxu2 %v7430_v44 }
  0xd7   :  { %v449_v6 = vsel %vm417_vm1, %v408_v54, %v6174_v2 }
  0xd8   :  { %v453_v8 = vpack.c.bf16 %v449_v6, %v448_v5 }
  0xda   :  { %6178 = vmatmul.msk.bf16.gmra.mxu3 %vm116_vm0, %v453_v8  ;;  %1520 = vmatpush.bf16.msra.mxu2 %v7439_v47  ;;  %v7631_v8 = vld [vmem:[%s12974_s4] ss:$0 sm:$0xff] }
  0xdf   :  { %6182 = vmatmul.msk.bf16.gmra.mxu0 %vm116_vm0, %v647_v11 }
  0xe4   :  { %6183 = vmatmul.msk.bf16.vlgmr.msrb.gmra.mxu1 %vm116_vm0, %v7360_v20 }
  0xea   :  { %6199 = vmatmul.msk.bf16.vlgmr.msrb.gmra.mxu3 %vm116_vm0, %v7360_v20 }
  0xf4   :  { %6184 = vmatmul.msk.bf16.gmra.mxu1 %vm116_vm0, %v7378_v26 }
  0xfa   :  { %6200 = vmatmul.msk.bf16.gmra.mxu3 %vm116_vm0, %v7378_v26 }
 0x104   :  { %6185 = vmatmul.msk.bf16.gmra.mxu1 %vm116_vm0, %v7368_v23 }
 0x10a   :  { %6201 = vmatmul.msk.bf16.gmra.mxu3 %vm116_vm0, %v7368_v23 }
 0x114   :  { %6186 = vmatmul.msk.bf16.gmra.mxu1 %vm116_vm0, %v7403_v35 }
 0x11a   :  { %6202 = vmatmul.msk.bf16.gmra.mxu3 %vm116_vm0, %v7403_v35 }
 0x121   :  { %v7541_v12 = vpop.f32.mrf.mxu1 }
 0x124   :  { %6215 = vmatmul.msk.bf16.vlgmr.msra.gmra.mxu1 %vm116_vm0, %v7498_v14 }
 0x129   :  { %v7545_v15 = vpop.f32.mrf.mxu1 }
 0x12c   :  { %v669_v53 = vpop.f32.mrf.mxu0 }
 0x12d   :  { %v7547_v16 = vpop.f32.mrf.mxu3 }
 0x131   :  { %v7549_v17 = vpop.f32.mrf.mxu1 }
 0x134   :  { %6216 = vmatmul.msk.bf16.gmra.mxu1 %vm116_vm0, %v643_v55  ;;  %v671_v63 = vpop.f32.mrf.mxu0 }
 0x135   :  { %v7552_v19 = vpop.f32.mrf.mxu3 }
 0x139   :  { %v7562_v14 = vpop.f32.mrf.mxu1 }
 0x13d   :  { %v485_v27 = vpop.f32.mrf.mxu3 }
 0x13e   :  { %v7571_v28 = vadd.f32 %v7568_v25, %v485_v27 }
 0x140   :  { %v502_v31 = vmul.f32 %v7571_v28, %v7571_v28 }
 0x141   :  { %v238_v29 = vpop.f32.mrf.mxu1 }
 0x142   :  { %v514_v32 = vsel %vm116_vm0, %v502_v31, 0.0  ;;  %v7636_v22 = vadd.f32 %v7591_v40, %v238_v29  ;;  %v7648_v29 = vadd.f32 %v7568_v25, %v7547_v16 }
 0x143   :  { %515 = vadd.xlane.f32.xlu2 %v514_v32 }
 0x144   :  { %6217 = vmatmul.msk.bf16.gmra.mxu1 %vm116_vm0, %v645_v9  ;;  %v500_v16 = vmul.f32 %v7648_v29, %v7648_v29 }
 0x145   :  { %v487_v34 = vpop.f32.mrf.mxu3 }
 0x146   :  { %v7578_v36 = vadd.f32 %v7568_v25, %v487_v34 }
 0x148   :  { %v503_v39 = vmul.f32 %v7578_v36, %v7578_v36 }
 0x149   :  { %v7580_v37 = vpop.f32.mrf.mxu1 }
 0x14a   :  { %v517_v42 = vsel %vm116_vm0, %v503_v39, 0.0 }
 0x14b   :  { %518 = vadd.xlane.f32.xlu2 %v517_v42  ;;  %v674_v42 = vpop.f32.mrf.mxu0 }
 0x14d   :  { %v490_v43 = vpop.f32.mrf.mxu3 }
 0x14e   :  { %v7586_v45 = vadd.f32 %v7568_v25, %v490_v43  ;;  %v252_v43 = vmul.f32 %v7636_v22, %v7636_v22 }
 0x150   :  { %v504_v49 = vmul.f32 %v7586_v45, %v7586_v45  ;;  %v268_v58 = vsel %vm116_vm0, %v252_v43, 0.0 }
 0x151   :  { %v243_v46 = vpop.f32.mrf.mxu1 }
 0x152   :  { %v7596_v50 = vadd.f32 %v7591_v40, %v243_v46  ;;  %v520_v52 = vsel %vm116_vm0, %v504_v49, 0.0 }
 0x153   :  { %521 = vadd.xlane.f32.xlu0 %v520_v52 }
 0x154   :  { %6218 = vmatmul.msk.bf16.gmra.mxu1 %vm116_vm0, %v647_v11  ;;  %v254_v56 = vmul.f32 %v7596_v50, %v7596_v50 }
 0x155   :  { %v492_v54 = vpop.f32.mrf.mxu3 }
 0x156   :  { %v7601_v55 = vadd.f32 %v7568_v25, %v492_v54  ;;  %v274_v1 = vsel %vm116_vm0, %v254_v56, 0.0  ;;  %v7654_v54 = vadd.f32 %v7591_v40, %v7562_v14 }
 0x158   :  { %v505_v57 = vmul.f32 %v7601_v55, %v7601_v55  ;;  %v251_v14 = vmul.f32 %v7654_v54, %v7654_v54 }
 0x159   :  { %v245_v61 = vpop.f32.mrf.mxu1 }
 0x15a   :  { %v7617_v62 = vadd.f32 %v7591_v40, %v245_v61  ;;  %v523_v0 = vsel %vm116_vm0, %v505_v57, 0.0 }
 0x15b   :  { %524 = vadd.xlane.f32.xlu1 %v523_v0  ;;  %275 = vadd.xlane.f32.xlu0 %v274_v1  ;;  %v7666_v1 = vadd.f32 %v7568_v25, %v7552_v19 }
 0x15c   :  { %v255_v6 = vmul.f32 %v7617_v62, %v7617_v62 }
 0x15d   :  { %v495_v2 = vpop.f32.mrf.mxu3  ;;  %v501_v19 = vmul.f32 %v7666_v1, %v7666_v1 }
 0x15e   :  { %v7623_v5 = vadd.f32 %v7568_v25, %v495_v2  ;;  %v277_v31 = vsel %vm116_vm0, %v255_v6, 0.0  ;;  %v676_v2 = vpop.f32.mrf.mxu0 }
 0x160   :  { %v506_v11 = vmul.f32 %v7623_v5, %v7623_v5 }
 0x161   :  { %v710_v9 = vpop.f32.mrf.mxu1 }
 0x162   :  { %v711_v21 = vadd.f32 %v710_v9, %v669_v53  ;;  %v526_v27 = vsel %vm116_vm0, %v506_v11, 0.0  ;;  %v508_v9 = vsel %vm116_vm0, %v500_v16, 0.0 }
 0x163   :  { %527 = vadd.xlane.f32.xlu2 %v526_v27  ;;  %278 = vadd.xlane.f32.xlu1 %v277_v31  ;;  %v7671_v27 = vadd.f32 %v7591_v40, %v7541_v12  ;;  %v265_v31 = vsel %vm116_vm0, %v251_v14, 0.0 }
 0x164   :  { %v733_v32 = vadd.f32 %v7631_v8, %v711_v21 }
 0x165   :  { %v497_v34 = vpop.f32.mrf.mxu3  ;;  %v248_v12 = vmul.f32 %v7671_v27, %v7671_v27 }
 0x166   :  { %v7642_v39 = vadd.f32 %v7568_v25, %v497_v34  ;;  %v749_v46 = vmul.f32 1.442695, %v733_v32  ;;  %vm741_vm2 = vcmp.gt.f32.partialorder %v733_v32, 0.0 }
 0x168   :  { %v507_v52 = vmul.f32 %v7642_v39, %v7642_v39  ;;  %6435 = vpow2.f32 %v749_v46 }
 0x169   :  { %v712_v49 = vpop.f32.mrf.mxu1 }
 0x16a   :  { %v713_v53 = vadd.f32 %v712_v49, %v671_v63  ;;  %v529_v56 = vsel %vm116_vm0, %v507_v52, 0.0 }
 0x16b   :  { %530 = vadd.xlane.f32.xlu2 %v529_v56  ;;  %269 = vadd.xlane.f32.xlu1 %v268_v58 }
 0x16c   :  { %v734_v59 = vadd.f32 %v7631_v8, %v713_v53 }
 0x16d   :  { %v1195_v57 = vpop.f32.mrf.mxu3 }
 0x16e   :  { %v751_v61 = vmul.f32 1.442695, %v734_v59  ;;  %v1196_v0 = vadd.f32 %v7444_v48, %v1195_v57  ;;  %v6436_v11 = vpop.eup %6435  ;;  %vm742_vm3 = vcmp.gt.f32.partialorder %v734_v59, 0.0  ;;  %v511_v57 = vsel %vm116_vm0, %v501_v19, 0.0 }
 0x16f   :  { %v6187_v43 = vadd.f32 -1.0, %v6436_v11  ;;  %v256_v11 = vsel %vm116_vm0, %v248_v12, 0.0 }
 0x170   :  { %6437 = vpow2.f32 %v751_v61  ;;  %v1223_v63 = vmul.f32 1.442695, %v1196_v0  ;;  %vm1215_vm4 = vcmp.gt.f32.partialorder %v1196_v0, 0.0 }
 0x171   :  { %v715_v6 = vpop.f32.mrf.mxu1  ;;  %v773_v56 = vsel %vm741_vm2, %v733_v32, %v6187_v43 }
 0x172   :  { %v716_v21 = vadd.f32 %v715_v6, %v674_v42  ;;  %6439 = vpow2.f32 %v1223_v63 }
 0x173   :  { %509 = vadd.xlane.f32.xlu2 %v508_v9  ;;  %266 = vadd.xlane.f32.xlu1 %v265_v31  ;;  %v679_v9 = vpop.f32.mrf.mxu0 }
 0x174   :  { %v735_v34 = vadd.f32 %v7631_v8, %v716_v21 }
 0x175   :  { %v1197_v49 = vpop.f32.mrf.mxu3 }
 0x176   :  { %v6438_v46 = vpop.eup %6437  ;;  %v1198_v42 = vadd.f32 %v7444_v48, %v1197_v49  ;;  %v753_v53 = vmul.f32 1.442695, %v735_v34  ;;  %vm743_vm6 = vcmp.gt.f32.partialorder %v735_v34, 0.0 }
 0x177   :  { %v6188_v52 = vadd.f32 -1.0, %v6438_v46 }
 0x178   :  { %v1225_v16 = vmul.f32 1.442695, %v1198_v42  ;;  %v6440_v6 = vpop.eup %6439  ;;  %vm1216_vm5 = vcmp.gt.f32.partialorder %v1198_v42, 0.0 }
 0x179   :  { %v774_v58 = vsel %vm742_vm3, %v734_v59, %v6188_v52  ;;  %v717_v61 = vpop.f32.mrf.mxu1  ;;  %v6203_v32 = vadd.f32 -1.0, %v6440_v6 }
 0x17a   :  { %v718_v14 = vadd.f32 %v717_v61, %v676_v2  ;;  %v781_v63 = vpack.c.bf16 %v774_v58, %v773_v56  ;;  %6441 = vpow2.f32 %v1225_v16 }
 0x17b   :  { %6443 = vpow2.f32 %v753_v53  ;;  %512 = vadd.xlane.f32.xlu2 %v511_v57  ;;  %257 = vadd.xlane.f32.xlu1 %v256_v11  ;;  %v1247_v52 = vsel %vm1215_vm4, %v1196_v0, %v6203_v32  ;;  %v681_v57 = vpop.f32.mrf.mxu0 }
 0x17c   :  { %v736_v21 = vadd.f32 %v7631_v8, %v718_v14  ;;  %6195 = vmatmul.msk.bf16.vlgmr.msrb.gmra.mxu2 %vm116_vm0, %v781_v63 }
 0x17d   :  { %v1200_v31 = vpop.f32.mrf.mxu3 }
 0x17e   :  { %v755_v59 = vmul.f32 1.442695, %v736_v21  ;;  %v1201_v43 = vadd.f32 %v7444_v48, %v1200_v31  ;;  %vm744_vm7 = vcmp.gt.f32.partialorder %v736_v21, 0.0 }
 0x180   :  { %6445 = vpow2.f32 %v755_v59  ;;  %v6442_v2 = vpop.eup %6441  ;;  %v1227_v19 = vmul.f32 1.442695, %v1201_v43  ;;  %vm1217_vm8 = vcmp.gt.f32.partialorder %v1201_v43, 0.0 }
 0x181   :  { %v720_v46 = vpop.f32.mrf.mxu1  ;;  %v6444_v49 = vpop.eup %6443  ;;  %v6204_v12 = vadd.f32 -1.0, %v6442_v2 }
 0x182   :  { %v721_v53 = vadd.f32 %v720_v46, %v679_v9  ;;  %v6189_v16 = vadd.f32 -1.0, %v6444_v49  ;;  %6447 = vpow2.f32 %v1227_v19 }
 0x183   :  { %v1248_v56 = vsel %vm1216_vm5, %v1198_v42, %v6204_v12 }
 0x184   :  { %v737_v58 = vadd.f32 %v7631_v8, %v721_v53  ;;  %v1255_v61 = vpack.c.bf16 %v1248_v56, %v1247_v52  ;;  %v775_v9 = vsel %vm743_vm6, %v735_v34, %v6189_v16  ;;  %v684_v53 = vpop.f32.mrf.mxu0 }
 0x185   :  { %v1202_v63 = vpop.f32.mrf.mxu3 }
 0x186   :  { %v6446_v14 = vpop.eup %6445  ;;  %v1203_v6 = vadd.f32 %v7444_v48, %v1202_v63  ;;  %6211 = vmatmul.msk.bf16.vlgmr.msra.gmra.mxu0 %vm116_vm0, %v1255_v61  ;;  %v757_v59 = vmul.f32 1.442695, %v737_v58  ;;  %vm745_vm10 = vcmp.gt.f32.partialorder %v737_v58, 0.0 }
 0x187   :  { %v6190_v11 = vadd.f32 -1.0, %v6446_v14 }
 0x188   :  { %v1229_v0 = vmul.f32 1.442695, %v1203_v6  ;;  %v6448_v46 = vpop.eup %6447  ;;  %vm1218_vm9 = vcmp.gt.f32.partialorder %v1203_v6, 0.0 }
 0x189   :  { %v722_v32 = vpop.f32.mrf.mxu1  ;;  %v776_v42 = vsel %vm744_vm7, %v736_v21, %v6190_v11  ;;  %v6205_v49 = vadd.f32 -1.0, %v6448_v46 }
 0x18a   :  { %v723_v31 = vadd.f32 %v722_v32, %v681_v57  ;;  %v782_v2 = vpack.c.bf16 %v776_v42, %v775_v9  ;;  %6449 = vpow2.f32 %v1229_v0 }
 0x18b   :  { %6451 = vpow2.f32 %v757_v59  ;;  %v1249_v63 = vsel %vm1217_vm8, %v1201_v43, %v6205_v49 }
 0x18c   :  { %v738_v19 = vadd.f32 %v7631_v8, %v723_v31  ;;  %6196 = vmatmul.msk.bf16.gmra.mxu2 %vm116_vm0, %v782_v2 }
 0x18d   :  { %v1205_v12 = vpop.f32.mrf.mxu3 }
 0x18e   :  { %v759_v52 = vmul.f32 1.442695, %v738_v19  ;;  %v1206_v56 = vadd.f32 %v7444_v48, %v1205_v12  ;;  %vm746_vm11 = vcmp.gt.f32.partialorder %v738_v19, 0.0 }
 0x190   :  { %6453 = vpow2.f32 %v759_v52  ;;  %v6450_v61 = vpop.eup %6449  ;;  %v1231_v34 = vmul.f32 1.442695, %v1206_v56  ;;  %v686_v52 = vpop.f32.mrf.mxu0  ;;  %vm1219_vm12 = vcmp.gt.f32.partialorder %v1206_v56, 0.0 }
 0x191   :  { %v725_v21 = vpop.f32.mrf.mxu1  ;;  %v6452_v16 = vpop.eup %6451  ;;  %v6206_v57 = vadd.f32 -1.0, %v6450_v61 }
 0x192   :  { %v726_v14 = vadd.f32 %v725_v21, %v684_v53  ;;  %v6191_v0 = vadd.f32 -1.0, %v6452_v16  ;;  %6455 = vpow2.f32 %v1231_v34 }
 0x193   :  { %v1250_v59 = vsel %vm1218_vm9, %v1203_v6, %v6206_v57 }
 0x194   :  { %v739_v11 = vadd.f32 %v7631_v8, %v726_v14  ;;  %v1256_v32 = vpack.c.bf16 %v1250_v59, %v1249_v63  ;;  %v777_v43 = vsel %vm745_vm10, %v737_v58, %v6191_v0 }
 0x195   :  { %v1207_v42 = vpop.f32.mrf.mxu3 }
 0x196   :  { %v6454_v9 = vpop.eup %6453  ;;  %v1208_v31 = vadd.f32 %v7444_v48, %v1207_v42  ;;  %6212 = vmatmul.msk.bf16.gmra.mxu0 %vm116_vm0, %v1256_v32  ;;  %v761_v46 = vmul.f32 1.442695, %v739_v11  ;;  %vm747_vm14 = vcmp.gt.f32.partialorder %v739_v11, 0.0 }
 0x197   :  { %v6192_v2 = vadd.f32 -1.0, %v6454_v9 }
 0x198   :  { %v1233_v12 = vmul.f32 1.442695, %v1208_v31  ;;  %v6456_v21 = vpop.eup %6455  ;;  %vm1220_vm13 = vcmp.gt.f32.partialorder %v1208_v31, 0.0 }
 0x199   :  { %v727_v53 = vpop.f32.mrf.mxu1  ;;  %v778_v49 = vsel %vm746_vm11, %v738_v19, %v6192_v2  ;;  %v6207_v16 = vadd.f32 -1.0, %v6456_v21 }
 0x19a   :  { %v728_v61 = vadd.f32 %v727_v53, %v686_v52  ;;  %v783_v6 = vpack.c.bf16 %v778_v49, %v777_v43  ;;  %6457 = vpow2.f32 %v1233_v12 }
 0x19b   :  { %6459 = vpow2.f32 %v761_v46  ;;  %v1251_v58 = vsel %vm1219_vm12, %v1206_v56, %v6207_v16 }
 0x19c   :  { %v740_v34 = vadd.f32 %v7631_v8, %v728_v61  ;;  %6197 = vmatmul.msk.bf16.gmra.mxu2 %vm116_vm0, %v783_v6 }
 0x19e   :  { %v763_v57 = vmul.f32 1.442695, %v740_v34  ;;  %vm748_vm15 = vcmp.gt.f32.partialorder %v740_v34, 0.0 }
 0x1a0   :  { %6461 = vpow2.f32 %v763_v57  ;;  %v6458_v14 = vpop.eup %6457 }
 0x1a1   :  { %v1437_v63 = vpop.f32.mrf.mxu1  ;;  %v6460_v59 = vpop.eup %6459  ;;  %v6208_v32 = vadd.f32 -1.0, %v6458_v14 }
 0x1a2   :  { %v6193_v0 = vadd.f32 -1.0, %v6460_v59  ;;  %v1438_v9 = vadd.f32 %v7453_v51, %v1437_v63 }
 0x1a3   :  { %v1252_v19 = vsel %vm1220_vm13, %v1208_v31, %v6208_v32 }
 0x1a4   :  { %v1257_v42 = vpack.c.bf16 %v1252_v19, %v1251_v58  ;;  %v1465_v46 = vmul.f32 1.442695, %v1438_v9  ;;  %v779_v12 = vsel %vm747_vm14, %v739_v11, %v6193_v0  ;;  %vm1457_vm2 = vcmp.gt.f32.partialorder %v1438_v9, 0.0 }
 0x1a6   :  { %v6462_v2 = vpop.eup %6461  ;;  %6213 = vmatmul.msk.bf16.gmra.mxu0 %vm116_vm0, %v1257_v42  ;;  %6463 = vpow2.f32 %v1465_v46 }
 0x1a7   :  { %v6194_v8 = vadd.f32 -1.0, %v6462_v2 }
 0x1a9   :  { %v1439_v52 = vpop.f32.mrf.mxu1  ;;  %v780_v53 = vsel %vm748_vm15, %v740_v34, %v6194_v8 }
 0x1aa   :  { %v1440_v43 = vadd.f32 %v7453_v51, %v1439_v52  ;;  %v784_v49 = vpack.c.bf16 %v780_v53, %v779_v12 }
 0x1ac   :  { %v1467_v61 = vmul.f32 1.442695, %v1440_v43  ;;  %6198 = vmatmul.msk.bf16.gmra.mxu2 %vm116_vm0, %v784_v49  ;;  %v6464_v31 = vpop.eup %6463  ;;  %vm1458_vm1 = vcmp.gt.f32.partialorder %v1440_v43, 0.0  ;;  %v1210_v49 = vpop.f32.mrf.mxu3 }
 0x1ad   :  { %v6219_v57 = vadd.f32 -1.0, %v6464_v31 }
 0x1ae   :  { %6465 = vpow2.f32 %v1467_v61 }
 0x1af   :  { %v1489_v63 = vsel %vm1457_vm2, %v1438_v9, %v6219_v57 }
 0x1b1   :  { %v1442_v56 = vpop.f32.mrf.mxu1 }
 0x1b2   :  { %v1443_v16 = vadd.f32 %v7453_v51, %v1442_v56 }
 0x1b4   :  { %v6466_v6 = vpop.eup %6465  ;;  %v1469_v11 = vmul.f32 1.442695, %v1443_v16  ;;  %vm1459_vm4 = vcmp.gt.f32.partialorder %v1443_v16, 0.0 }
 0x1b5   :  { %v6220_v21 = vadd.f32 -1.0, %v6466_v6 }
 0x1b6   :  { %6467 = vpow2.f32 %v1469_v11  ;;  %v516_v42 = vpop.xlane.xlu2 %515 }
 0x1b7   :  { %v1490_v14 = vsel %vm1458_vm1, %v1440_v43, %v6220_v21 }
 0x1b8   :  { %v1497_v32 = vpack.c.bf16 %v1490_v14, %v1489_v63 }
 0x1b9   :  { %v1444_v34 = vpop.f32.mrf.mxu1 }
 0x1ba   :  { %v1445_v59 = vadd.f32 %v7453_v51, %v1444_v34 }
 0x1bc   :  { %v1471_v58 = vmul.f32 1.442695, %v1445_v59  ;;  %6227 = vmatmul.msk.bf16.vlgmr.msra.gmra.mxu2 %vm116_vm0, %v1497_v32  ;;  %v6468_v0 = vpop.eup %6467  ;;  %vm1460_vm3 = vcmp.gt.f32.partialorder %v1445_v59, 0.0  ;;  %v1212_v32 = vpop.f32.mrf.mxu3 }
 0x1bd   :  { %v6221_v52 = vadd.f32 -1.0, %v6468_v0 }
 0x1be   :  { %6469 = vpow2.f32 %v1471_v58  ;;  %v519_v21 = vpop.xlane.xlu2 %518 }
 0x1bf   :  { %v1491_v56 = vsel %vm1459_vm4, %v1443_v16, %v6221_v52  ;;  %v7706_v11 = vadd.f32 1e-12, %v519_v21 }
 0x1c1   :  { %v1447_v19 = vpop.f32.mrf.mxu1 }
 0x1c2   :  { %v1448_v46 = vadd.f32 %v7453_v51, %v1447_v19  ;;  %v7716_v19 = vadd.f32 %v7444_v48, %v1210_v49 }
 0x1c4   :  { %v6470_v2 = vpop.eup %6469  ;;  %v1473_v9 = vmul.f32 1.442695, %v1448_v46  ;;  %vm1461_vm6 = vcmp.gt.f32.partialorder %v1448_v46, 0.0  ;;  %vm1221_vm7 = vcmp.gt.f32.partialorder %v7716_v19, 0.0 }
 0x1c5   :  { %v6222_v8 = vadd.f32 -1.0, %v6470_v2  ;;  %v7718_v2 = vadd.f32 1e-12, %v516_v42 }
 0x1c6   :  { %v522_v12 = vpop.xlane.xlu0 %521  ;;  %6471 = vpow2.f32 %v1473_v9 }
 0x1c7   :  { %v1492_v53 = vsel %vm1460_vm3, %v1445_v59, %v6222_v8  ;;  %v7710_v63 = vadd.f32 1e-12, %v522_v12  ;;  %v7722_v8 = vadd.f32 %v7444_v48, %v1212_v32 }
 0x1c8   :  { %v1498_v31 = vpack.c.bf16 %v1492_v53, %v1491_v56  ;;  %v1235_v53 = vmul.f32 1.442695, %v7716_v19 }
 0x1c9   :  { %v1449_v43 = vpop.f32.mrf.mxu1  ;;  %vm1222_vm8 = vcmp.gt.f32.partialorder %v7722_v8, 0.0 }
 0x1ca   :  { %v1450_v61 = vadd.f32 %v7453_v51, %v1449_v43  ;;  %v1237_v43 = vmul.f32 1.442695, %v7722_v8 }
 0x1cc   :  { %v1475_v6 = vmul.f32 1.442695, %v1450_v61  ;;  %6228 = vmatmul.msk.bf16.gmra.mxu2 %vm116_vm0, %v1498_v31  ;;  %v6472_v16 = vpop.eup %6471  ;;  %vm1462_vm5 = vcmp.gt.f32.partialorder %v1450_v61, 0.0 }
 0x1cd   :  { %v6223_v9 = vadd.f32 -1.0, %v6472_v16 }
 0x1ce   :  { %6473 = vpow2.f32 %v1475_v6  ;;  %v525_v57 = vpop.xlane.xlu1 %524  ;;  %v276_v14 = vpop.xlane.xlu0 %275 }
 0x1cf   :  { %v7708_v34 = vadd.f32 1e-12, %v276_v14  ;;  %v7712_v58 = vadd.f32 1e-12, %v525_v57  ;;  %v1493_v32 = vsel %vm1461_vm6, %v1448_v46, %v6223_v9 }
 0x1d1   :  { %v1452_v59 = vpop.f32.mrf.mxu1  ;;  %6475 = vrsqrt.f32 %v7708_v34  ;;  %vm354_vm10 = vweird.f32 %v7708_v34  ;;  %vm596_vm6 = vweird.f32 %v7712_v58 }
 0x1d2   :  { %6477 = vrsqrt.f32 %v7706_v11  ;;  %v7726_v12 = vadd.f32 %v7453_v51, %v1452_v59 }
 0x1d3   :  { %6479 = vrsqrt.f32 %v7710_v63 }
 0x1d4   :  { %v6474_v0 = vpop.eup %6473  ;;  %6481 = vrsqrt.f32 %v7712_v58  ;;  %v1477_v21 = vmul.f32 1.442695, %v7726_v12  ;;  %vm1463_vm11 = vcmp.gt.f32.partialorder %v7726_v12, 0.0 }
 0x1d5   :  { %v6224_v52 = vadd.f32 -1.0, %v6474_v0  ;;  %6483 = vpow2.f32 %v1235_v53 }
 0x1d6   :  { %v528_v42 = vpop.xlane.xlu2 %527  ;;  %v279_v49 = vpop.xlane.xlu1 %278  ;;  %6485 = vpow2.f32 %v1237_v43 }
 0x1d7   :  { %v7731_v56 = vadd.f32 1e-12, %v528_v42  ;;  %v7733_v48 = vadd.f32 1e-12, %v279_v49  ;;  %v1494_v31 = vsel %vm1462_vm5, %v1450_v61, %v6224_v52  ;;  %v7735_v6 = vpop.eup %6475  ;;  %6487 = vrsqrt.f32 %v7718_v2 }
 0x1d8   :  { %v7739_v14 = vpop.eup %6477  ;;  %v349_v59 = vmul.f32 %v7735_v6, %v7708_v34  ;;  %v1499_v0 = vpack.c.bf16 %v1494_v31, %v1493_v32  ;;  %vm355_vm9 = vweird.f32 %v7735_v6 }
 0x1d9   :  { %v1454_v57 = vpop.f32.mrf.mxu1  ;;  %6489 = vrsqrt.f32 %v7731_v56  ;;  %v7744_v16 = vpop.eup %6479  ;;  %v571_v31 = vmul.f32 %v7739_v14, %v7706_v11  ;;  %vm7782_vm13 = vmor %vm354_vm10, %vm355_vm9  ;;  %vm364_vm15 = vweird.f32 %v7733_v48  ;;  %vm606_vm1 = vweird.f32 %v7731_v56 }
 0x1da   :  { %6491 = vrsqrt.f32 %v7733_v48  ;;  %v1455_v61 = vadd.f32 %v7453_v51, %v1454_v57  ;;  %v7748_v52 = vpop.eup %6481  ;;  %v350_v53 = vmul.f32 %v7735_v6, %v349_v59  ;;  %vm586_vm9 = vweird.f32 %v7710_v63 }
 0x1db   :  { %v6484_v43 = vpop.eup %6483  ;;  %6493 = vpow2.f32 %v1477_v21  ;;  %v591_v46 = vmul.f32 %v7748_v52, %v7712_v58  ;;  %v581_v21 = vmul.f32 %v7744_v16, %v7710_v63  ;;  %v572_v33 = vmul.f32 %v7739_v14, %v571_v31 }
 0x1dc   :  { %v1479_v42 = vmul.f32 1.442695, %v1455_v61  ;;  %6229 = vmatmul.msk.bf16.gmra.mxu2 %vm116_vm0, %v1499_v0  ;;  %v6486_v49 = vpop.eup %6485  ;;  %v351_v13 = vmul.f32 0.5, %v350_v53  ;;  %v6209_v59 = vadd.f32 -1.0, %v6484_v43  ;;  %vm1464_vm12 = vcmp.gt.f32.partialorder %v1455_v61, 0.0 }
 0x1dd   :  { %v7752_v7 = vpop.eup %6487  ;;  %v592_v43 = vmul.f32 %v7748_v52, %v591_v46  ;;  %v582_v3 = vmul.f32 %v7744_v16, %v581_v21  ;;  %vm587_vm10 = vweird.f32 %v7744_v16 }
 0x1de   :  { %6495 = vpow2.f32 %v1479_v42  ;;  %v531_v9 = vpop.xlane.xlu2 %530  ;;  %v352_v0 = vsub.f32 1.5, %v351_v13  ;;  %v6210_v42 = vadd.f32 -1.0, %v6486_v49  ;;  %v1253_v49 = vsel %vm1221_vm7, %v7716_v19, %v6209_v59 }
 0x1df   :  { %v7756_v51 = vpop.eup %6489  ;;  %v7762_v57 = vadd.f32 1e-12, %v531_v9  ;;  %v561_v9 = vmul.f32 %v7752_v7, %v7718_v2 }
 0x1e0   :  { %v6492_v32 = vpop.eup %6491  ;;  %v601_v53 = vmul.f32 %v7756_v51, %v7731_v56  ;;  %v353_v26 = vmul.f32 %v7735_v6, %v352_v0  ;;  %v1254_v41 = vsel %vm1222_vm8, %v7722_v8, %v6210_v42  ;;  %vm607_vm2 = vweird.f32 %v7756_v51 }
 0x1e1   :  { %v359_v18 = vmul.f32 %v6492_v32, %v7733_v48  ;;  %6497 = vrsqrt.f32 %v7762_v57  ;;  %v6494_v10 = vpop.eup %6493  ;;  %v1258_v30 = vpack.c.bf16 %v1254_v41, %v1253_v49  ;;  %vm365_vm14 = vweird.f32 %v6492_v32  ;;  %vm7815_vm7 = vmor %vm606_vm1, %vm607_vm2 }
 0x1e2   :  { %v602_v13 = vmul.f32 %v7756_v51, %v601_v53  ;;  %v6225_v38 = vadd.f32 -1.0, %v6494_v10  ;;  %v593_v53 = vmul.f32 0.5, %v592_v43  ;;  %vm366_vm3 = vmor %vm364_vm15, %vm365_vm14  ;;  %vm616_vm4 = vweird.f32 %v7762_v57 }
 0x1e3   :  { %v360_v35 = vmul.f32 %v6492_v32, %v359_v18  ;;  %6214 = vmatmul.msk.bf16.gmra.mxu0 %vm116_vm0, %v1258_v30  ;;  %vm597_vm8 = vweird.f32 %v7748_v52  ;;  %vm576_vm14 = vweird.f32 %v7706_v11  ;;  %vm577_vm15 = vweird.f32 %v7739_v14 }
 0x1e4   :  { %v6496_v23 = vpop.eup %6495  ;;  %v603_v20 = vmul.f32 0.5, %v602_v13  ;;  %vm566_vm1 = vweird.f32 %v7718_v2  ;;  %vm567_vm2 = vweird.f32 %v7752_v7 }
 0x1e5   :  { %v361_v4 = vmul.f32 0.5, %v360_v35  ;;  %v6226_v46 = vadd.f32 -1.0, %v6496_v23  ;;  %v583_v23 = vmul.f32 0.5, %v582_v3  ;;  %v357_v35 = vsel %vm7782_vm13, %v7735_v6, %v353_v26  ;;  %vm7848_vm13 = vmor %vm586_vm9, %vm587_vm10 }
 0x1e6   :  { %v510_v18 = vpop.xlane.xlu2 %509  ;;  %v604_v41 = vsub.f32 1.5, %v603_v20  ;;  %v594_v26 = vsub.f32 1.5, %v593_v53  ;;  %v7802_v6 = vmul.f32 %v357_v35, %v7596_v50 }
 0x1e7   :  { %v6498_v19 = vpop.eup %6497  ;;  %v362_v21 = vsub.f32 1.5, %v361_v4  ;;  %v7786_v59 = vadd.f32 1e-12, %v510_v18  ;;  %v1496_v10 = vsel %vm1464_vm12, %v1455_v61, %v6226_v46  ;;  %v1495_v4 = vsel %vm1463_vm11, %v7726_v12, %v6225_v38  ;;  %vm7838_vm12 = vmor %vm596_vm6, %vm597_vm8 }
 0x1e8   :  { %v611_v34 = vmul.f32 %v6498_v19, %v7762_v57  ;;  %v1500_v30 = vpack.c.bf16 %v1496_v10, %v1495_v4  ;;  %13146 = vst [vmem:[#allocation19_spill] sm:$0xff] %v7802_v6  ;;  %v605_v48 = vmul.f32 %v7756_v51, %v604_v41  ;;  %vm617_vm5 = vweird.f32 %v6498_v19 }
 0x1e9   :  { %v363_v8 = vmul.f32 %v6492_v32, %v362_v21  ;;  %6499 = vrsqrt.f32 %v7786_v59  ;;  %v562_v12 = vmul.f32 %v7752_v7, %v561_v9  ;;  %v573_v9 = vmul.f32 0.5, %v572_v33  ;;  %vm618_vm11 = vmor %vm616_vm4, %vm617_vm5 }
 0x1ea   :  { %v612_v3 = vmul.f32 %v6498_v19, %v611_v34  ;;  %v595_v13 = vmul.f32 %v7748_v52, %v594_v26  ;;  %v609_v49 = vsel %vm7815_vm7, %v7756_v51, %v605_v48  ;;  %vm7887_vm4 = vmor %vm566_vm1, %vm567_vm2  ;;  %vm546_vm5 = vweird.f32 %v7786_v59 }
 0x1eb   :  { %v367_v20 = vsel %vm366_vm3, %v6492_v32, %v363_v8  ;;  %v584_v32 = vsub.f32 1.5, %v583_v23  ;;  %v563_v57 = vmul.f32 0.5, %v562_v12  ;;  %v7853_v58 = vmul.f32 %v609_v49, %v7623_v5  ;;  %vm7879_vm3 = vmor %vm576_vm14, %vm577_vm15 }
 0x1ec   :  { %v613_v61 = vmul.f32 0.5, %v612_v3  ;;  %6230 = vmatmul.msk.bf16.gmra.mxu2 %vm116_vm0, %v1500_v30  ;;  %v7807_v38 = vmul.f32 %v367_v20, %v7617_v62  ;;  %v574_v23 = vsub.f32 1.5, %v573_v9 }
 0x1ed   :  { %v585_v18 = vmul.f32 %v7744_v16, %v584_v32  ;;  %13154 = vst [vmem:[#allocation21_spill] sm:$0xff] %v7853_v58  ;;  %v564_v35 = vsub.f32 1.5, %v563_v57 }
 0x1ee   :  { %13147 = vst [vmem:[#allocation20_spill] sm:$0xff] %v7807_v38  ;;  %v614_v0 = vsub.f32 1.5, %v613_v61  ;;  %v513_v42 = vpop.xlane.xlu2 %512  ;;  %v1740_v62 = vpack.c.bf16 %v7807_v38, %v7802_v6  ;;  %v575_v11 = vmul.f32 %v7739_v14, %v574_v23 }
 0x1ef   :  { %v7822_v43 = vpop.eup %6499  ;;  %v533_v56 = vadd.f32 1e-12, %v513_v42  ;;  %v589_v5 = vsel %vm7848_vm13, %v7744_v16, %v585_v18  ;;  %v565_v3 = vmul.f32 %v7752_v7, %v564_v35 }
 0x1f0   :  { %v615_v46 = vmul.f32 %v6498_v19, %v614_v0  ;;  %v7834_v53 = vsel %vm116_vm0, %v1740_v62, 0  ;;  %v541_v51 = vmul.f32 %v7822_v43, %v7786_v59  ;;  %v7884_v16 = vmul.f32 %v589_v5, %v7586_v45 }
 0x1f1   :  { %6501 = vrsqrt.f32 %v533_v56  ;;  %1769 = vmatpush.bf16.xpose.msra.mxu3 %v7834_v53  ;;  %v579_v20 = vsel %vm7879_vm3, %v7739_v14, %v575_v11  ;;  %v569_v45 = vsel %vm7887_vm4, %v7752_v7, %v565_v3  ;;  %vm547_vm6 = vweird.f32 %v7822_v43 }
 0x1f2   :  { %v619_v31 = vsel %vm618_vm11, %v6498_v19, %v615_v46  ;;  %v599_v19 = vsel %vm7838_vm12, %v7748_v52, %v595_v13  ;;  %v542_v41 = vmul.f32 %v7822_v43, %v541_v51  ;;  %13159 = vst [vmem:[#allocation24_spill] sm:$0xff] %v7884_v16  ;;  %v7907_v0 = vmul.f32 %v579_v20, %v7578_v36  ;;  %vm548_vm9 = vmor %vm546_vm5, %vm547_vm6 }
 0x1f3   :  { %v7856_v10 = vmul.f32 %v619_v31, %v7642_v39  ;;  %v7873_v52 = vmul.f32 %v599_v19, %v7601_v55  ;;  %vm556_vm7 = vweird.f32 %v533_v56  ;;  %v7911_v7 = vmul.f32 %v569_v45, %v7571_v28 }
 0x1f4   :  { %v543_v55 = vmul.f32 0.5, %v542_v41  ;;  %13162 = vst [vmem:[#allocation25_spill] sm:$0xff] %v7907_v0 }
 0x1f5   :  { %13155 = vst [vmem:[#allocation22_spill] sm:$0xff] %v7856_v10  ;;  %v2371_v63 = vpack.c.bf16 %v7856_v10, %v7853_v58  ;;  %v2370_v26 = vpack.c.bf16 %v7873_v52, %v7884_v16  ;;  %v2369_v62 = vpack.c.bf16 %v7907_v0, %v7911_v7 }
 0x1f6   :  { %13156 = vst [vmem:[#allocation23_spill] sm:$0xff] %v7873_v52  ;;  %v544_v61 = vsub.f32 1.5, %v543_v55 }
 0x1f7   :  { %v6502_v39 = vpop.eup %6501  ;;  %v7870_v34 = vsel %vm116_vm0, %v2371_v63, 0  ;;  %v7904_v32 = vsel %vm116_vm0, %v2370_v26, 0  ;;  %13163 = vst [vmem:[#allocation26_spill] sm:$0xff] %v7911_v7 }
 0x1f8   :  { %v551_v8 = vmul.f32 %v6502_v39, %v533_v56  ;;  %2400 = vmatpush.bf16.xpose.msrb.mxu1 %v7870_v34  ;;  %vm557_vm8 = vweird.f32 %v6502_v39  ;;  %v545_v59 = vmul.f32 %v7822_v43, %v544_v61  ;;  %v7922_v56 = vsel %vm116_vm0, %v2369_v62, 0 }
 0x1f9   :  { %vm558_vm10 = vmor %vm556_vm7, %vm557_vm8 }
 0x1fa   :  { %v552_v30 = vmul.f32 %v6502_v39, %v551_v8  ;;  %v549_v36 = vsel %vm548_vm9, %v7822_v43, %v545_v59  ;;  %v7990_v59 = vadd.f32 %v7591_v40, %v7580_v37 }
 0x1fb   :  { %v7929_v49 = vmul.f32 %v549_v36, %v7648_v29 }
 0x1fc   :  { %v553_v48 = vmul.f32 0.5, %v552_v30 }
 0x1fd   :  { %13165 = vst [vmem:[#allocation28_spill] sm:$0xff] %v7929_v49 }
 0x1fe   :  { %v554_v12 = vsub.f32 1.5, %v553_v48 }
 0x1ff   :  { %v7901_v50 = vpop.f32.mrf.mxu2 }
 0x200   :  { %v555_v14 = vmul.f32 %v6502_v39, %v554_v12  ;;  %2401 = vmatpush.bf16.xpose.msrb.mxu1 %v7904_v32 }
 0x202   :  { %v559_v9 = vsel %vm558_vm10, %v6502_v39, %v555_v14 }
 0x203   :  { %v7914_v42 = vpop.f32.mrf.mxu0  ;;  %v7925_v28 = vmul.f32 %v559_v9, %v7666_v1 }
 0x205   :  { %13164 = vst [vmem:[#allocation27_spill] sm:$0xff] %v7925_v28  ;;  %v2368_v33 = vpack.c.bf16 %v7925_v28, %v7929_v49 }
 0x207   :  { %v7919_v13 = vpop.f32.mrf.mxu2  ;;  %v7941_v1 = vsel %vm116_vm0, %v2368_v33, 0 }
 0x208   :  { %2402 = vmatpush.bf16.xpose.msrb.mxu1 %v7922_v56 }
 0x20b   :  { %v1282_v46 = vpop.f32.mrf.mxu0 }
 0x20c   :  { %v7934_v57 = vadd.f32 %v7591_v40, %v1282_v46  ;;  %v253_v46 = vmul.f32 %v7990_v59, %v7990_v59 }
 0x20e   :  { %v1301_v43 = vmul.f32 %v7934_v57, %v7934_v57 }
 0x20f   :  { %v7938_v18 = vpop.f32.mrf.mxu2 }
 0x210   :  { %2403 = vmatpush.bf16.xpose.msrb.mxu1 %v7941_v1  ;;  %v1311_v29 = vsel %vm116_vm0, %v1301_v43, 0.0  ;;  %v8002_v43 = vadd.f32 %v7591_v40, %v7549_v17 }
 0x211   :  { %1312 = vadd.xlane.f32.xlu1 %v1311_v29  ;;  %v271_v29 = vsel %vm116_vm0, %v253_v46, 0.0 }
 0x213   :  { %v1285_v31 = vpop.f32.mrf.mxu0 }
 0x214   :  { %v7947_v51 = vadd.f32 %v7591_v40, %v1285_v31 }
 0x216   :  { %v1302_v21 = vmul.f32 %v7947_v51, %v7947_v51 }
 0x217   :  { %v7952_v23 = vpop.f32.mrf.mxu2 }
 0x218   :  { %3106 = vmatpush.bf16.msra.mxu1 %v7560_v24  ;;  %v1314_v19 = vsel %vm116_vm0, %v1302_v21, 0.0 }
 0x219   :  { %1315 = vadd.xlane.f32.xlu1 %v1314_v19  ;;  %v250_v19 = vmul.f32 %v8002_v43, %v8002_v43 }
 0x21b   :  { %v1287_v63 = vpop.f32.mrf.mxu0 }
 0x21c   :  { %3107 = vmatpush.bf16.msra.mxu1 %v7611_v60 }
 0x21f   :  { %v7955_v35 = vpop.f32.mrf.mxu2 }
 0x223   :  { %v7957_v41 = vpop.f32.mrf.mxu0 }
 0x227   :  { %v7959_v24 = vpop.f32.mrf.mxu2 }
 0x22b   :  { %v1292_v5 = vpop.f32.mrf.mxu0 }
 0x22c   :  { %v7962_v39 = vadd.f32 %v7591_v40, %v1292_v5  ;;  %v8017_v5 = vadd.f32 %v7591_v40, %v7545_v15 }
 0x22e   :  { %v1305_v60 = vmul.f32 %v7962_v39, %v7962_v39 }
 0x22f   :  { %v7966_v11 = vpop.f32.mrf.mxu2 }
 0x230   :  { %v1323_v8 = vsel %vm116_vm0, %v1305_v60, 0.0  ;;  %v262_v60 = vsel %vm116_vm0, %v250_v19, 0.0 }
 0x231   :  { %1324 = vadd.xlane.f32.xlu1 %v1323_v8 }
 0x237   :  { %v7969_v4 = vpop.f32.mrf.mxu2 }
 0x238   :  { %13166 = vst [vmem:[#allocation29_spill] sm:$0xff] %v7969_v4 }
 0x23f   :  { %v1522_v3 = vpop.f32.mrf.mxu2 }
 0x240   :  { %v7972_v55 = vadd.f32 %v7568_v25, %v1522_v3 }
 0x242   :  { %v1542_v30 = vmul.f32 %v7972_v55, %v7972_v55 }
 0x244   :  { %v1550_v2 = vsel %vm116_vm0, %v1542_v30, 0.0 }
 0x245   :  { %1551 = vadd.xlane.f32.xlu2 %v1550_v2  ;;  %v249_v2 = vmul.f32 %v8017_v5, %v8017_v5 }
 0x247   :  { %v1524_v26 = vpop.f32.mrf.mxu2 }
 0x248   :  { %v7978_v20 = vadd.f32 %v7568_v25, %v1524_v26 }
 0x24a   :  { %v1543_v48 = vmul.f32 %v7978_v20, %v7978_v20 }
 0x24c   :  { %v1553_v45 = vsel %vm116_vm0, %v1543_v48, 0.0  ;;  %v8029_v48 = vadd.f32 %v7591_v40, %v7914_v42  ;;  %v7164_v40 = vld [vmem:[%s12980_s10] ss:$0 sm:$0xff] }
 0x24d   :  { %1554 = vadd.xlane.f32.xlu2 %v1553_v45  ;;  %v259_v45 = vsel %vm116_vm0, %v249_v2, 0.0  ;;  %v8042_v42 = vadd.f32 %v7164_v40, %v1287_v63  ;;  %v8055_v63 = vadd.f32 %v7164_v40, %v7957_v41 }
 0x24f   :  { %v1527_v61 = vpop.f32.mrf.mxu2  ;;  %v1303_v19 = vmul.f32 %v8042_v42, %v8042_v42  ;;  %v1304_v2 = vmul.f32 %v8055_v63, %v8055_v63 }
 0x250   :  { %v7984_v12 = vadd.f32 %v7568_v25, %v1527_v61 }
 0x252   :  { %v1544_v14 = vmul.f32 %v7984_v12, %v7984_v12 }
 0x254   :  { %v1556_v62 = vsel %vm116_vm0, %v1544_v14, 0.0 }
 0x255   :  { %1557 = vadd.xlane.f32.xlu2 %v1556_v62  ;;  %v1300_v62 = vmul.f32 %v8029_v48, %v8029_v48 }
 0x257   :  { %v1529_v9 = vpop.f32.mrf.mxu2  ;;  %v1308_v46 = vsel %vm116_vm0, %v1300_v62, 0.0 }
 0x258   :  { %v7994_v36 = vadd.f32 %v7568_v25, %v1529_v9  ;;  %v7163_v25 = vld [vmem:[%s12984_s14] ss:$0 sm:$0xff] }
 0x25a   :  { %v1545_v33 = vmul.f32 %v7994_v36, %v7994_v36 }
 0x25c   :  { %v1559_v37 = vsel %vm116_vm0, %v1545_v33, 0.0 }
 0x25d   :  { %1560 = vadd.xlane.f32.xlu0 %v1559_v37  ;;  %272 = vadd.xlane.f32.xlu2 %v271_v29 }
 0x25f   :  { %v1532_v31 = vpop.f32.mrf.mxu2 }
 0x260   :  { %v8009_v21 = vadd.f32 %v7163_v25, %v1532_v31  ;;  %v1295_v29 = vpop.f32.mrf.mxu0 }
 0x262   :  { %v1546_v17 = vmul.f32 %v8009_v21, %v8009_v21 }
 0x264   :  { %v1562_v8 = vsel %vm116_vm0, %v1546_v17, 0.0 }
 0x265   :  { %263 = vadd.xlane.f32.xlu0 %v262_v60  ;;  %1563 = vadd.xlane.f32.xlu2 %v1562_v8  ;;  %v8052_v60 = vadd.f32 %v7164_v40, %v1295_v29 }
 0x267   :  { %v1534_v3 = vpop.f32.mrf.mxu2 }
 0x268   :  { %v8021_v30 = vadd.f32 %v7163_v25, %v1534_v3  ;;  %v1317_v3 = vsel %vm116_vm0, %v1303_v19, 0.0 }
 0x26a   :  { %v1547_v26 = vmul.f32 %v8021_v30, %v8021_v30 }
 0x26c   :  { %v1565_v15 = vsel %vm116_vm0, %v1547_v26, 0.0  ;;  %v1297_v26 = vpop.f32.mrf.mxu0 }
 0x26d   :  { %1566 = vadd.xlane.f32.xlu0 %v1565_v15  ;;  %260 = vadd.xlane.f32.xlu2 %v259_v45  ;;  %v1320_v45 = vsel %vm116_vm0, %v1304_v2, 0.0 }
 0x26f   :  { %v1537_v61 = vpop.f32.mrf.mxu2 }
 0x270   :  { %v8033_v14 = vadd.f32 %v7163_v25, %v1537_v61  ;;  %v8065_v61 = vadd.f32 %v7164_v40, %v1297_v26 }
 0x272   :  { %v1548_v9 = vmul.f32 %v8033_v14, %v8033_v14  ;;  %v1307_v41 = vmul.f32 %v8065_v61, %v8065_v61 }
 0x274   :  { %v1568_v33 = vsel %vm116_vm0, %v1548_v9, 0.0  ;;  %v1329_v62 = vsel %vm116_vm0, %v1307_v41, 0.0  ;;  %v270_v9 = vpop.xlane.xlu1 %269 }
 0x275   :  { %1309 = vadd.xlane.f32.xlu0 %v1308_v46  ;;  %1569 = vadd.xlane.f32.xlu2 %v1568_v33 }
 0x277   :  { %v1539_v37 = vpop.f32.mrf.mxu2 }
 0x278   :  { %v8046_v31 = vadd.f32 %v7163_v25, %v1539_v37  ;;  %v1306_v25 = vmul.f32 %v8052_v60, %v8052_v60  ;;  %v8070_v37 = vadd.f32 1e-12, %v270_v9 }
 0x27a   :  { %v1549_v17 = vmul.f32 %v8046_v31, %v8046_v31  ;;  %v1326_v15 = vsel %vm116_vm0, %v1306_v25, 0.0  ;;  %vm334_vm3 = vweird.f32 %v8070_v37 }
 0x27c   :  { %v1571_v8 = vsel %vm116_vm0, %v1549_v17, 0.0  ;;  %v267_v29 = vpop.xlane.xlu1 %266 }
 0x27d   :  { %1572 = vadd.xlane.f32.xlu0 %v1571_v8  ;;  %1318 = vadd.xlane.f32.xlu2 %v1317_v3  ;;  %v8073_v8 = vadd.f32 1e-12, %v267_v29 }
 0x27f   :  { %vm324_vm5 = vweird.f32 %v8073_v8 }
 0x285   :  { %1321 = vadd.xlane.f32.xlu0 %v1320_v45  ;;  %1327 = vadd.xlane.f32.xlu2 %v1326_v15  ;;  %v258_v15 = vpop.xlane.xlu1 %257 }
 0x28d   :  { %1330 = vadd.xlane.f32.xlu0 %v1329_v62  ;;  %v1313_v16 = vpop.xlane.xlu1 %1312 }
 0x2b8   :  { %v1552_v46 = vpop.xlane.xlu2 %1551 }
 0x2b9   :  { %v1574_v33 = vadd.f32 1e-12, %v1552_v46  ;;  %v8082_v46 = vadd.f32 1e-12, %v258_v15 }
 0x2bb   :  { %6503 = vrsqrt.f32 %v1574_v33  ;;  %vm1588_vm12 = vweird.f32 %v1574_v33 }
 0x2bc   :  { %6505 = vrsqrt.f32 %v8070_v37 }
 0x2c0   :  { %v1555_v19 = vpop.xlane.xlu2 %1554 }
 0x2c1   :  { %v6504_v40 = vpop.eup %6503  ;;  %v1575_v17 = vadd.f32 1e-12, %v1555_v19 }
 0x2c2   :  { %v1583_v3 = vmul.f32 %v6504_v40, %v1574_v33  ;;  %v8075_v2 = vpop.eup %6505  ;;  %vm1589_vm11 = vweird.f32 %v6504_v40 }
 0x2c3   :  { %6507 = vrsqrt.f32 %v1575_v17  ;;  %v329_v62 = vmul.f32 %v8075_v2, %v8070_v37  ;;  %vm1590_vm14 = vmor %vm1588_vm12, %vm1589_vm11  ;;  %vm1598_vm15 = vweird.f32 %v1575_v17  ;;  %vm335_vm2 = vweird.f32 %v8075_v2 }
 0x2c4   :  { %v1584_v25 = vmul.f32 %v6504_v40, %v1583_v3  ;;  %6509 = vrsqrt.f32 %v8073_v8  ;;  %vm8134_vm4 = vmor %vm334_vm3, %vm335_vm2 }
 0x2c5   :  { %v330_v58 = vmul.f32 %v8075_v2, %v329_v62 }
 0x2c6   :  { %v1585_v26 = vmul.f32 0.5, %v1584_v25 }
 0x2c7   :  { %v331_v49 = vmul.f32 0.5, %v330_v58 }
 0x2c8   :  { %v1558_v45 = vpop.xlane.xlu2 %1557  ;;  %v1586_v29 = vsub.f32 1.5, %v1585_v26 }
 0x2c9   :  { %v6508_v41 = vpop.eup %6507  ;;  %v8080_v9 = vadd.f32 1e-12, %v1558_v45 }
 0x2ca   :  { %v1593_v19 = vmul.f32 %v6508_v41, %v1575_v17  ;;  %v8085_v3 = vpop.eup %6509  ;;  %v1587_v25 = vmul.f32 %v6504_v40, %v1586_v29  ;;  %vm1599_vm13 = vweird.f32 %v6508_v41  ;;  %v332_v17 = vsub.f32 1.5, %v331_v49 }
 0x2cb   :  { %6511 = vrsqrt.f32 %v8080_v9  ;;  %v319_v45 = vmul.f32 %v8085_v3, %v8073_v8  ;;  %vm1600_vm1 = vmor %vm1598_vm15, %vm1599_vm13  ;;  %vm325_vm6 = vweird.f32 %v8085_v3  ;;  %vm1608_vm8 = vweird.f32 %v8080_v9 }
 0x2cc   :  { %v1594_v10 = vmul.f32 %v6508_v41, %v1593_v19  ;;  %6513 = vrsqrt.f32 %v8082_v46  ;;  %v1591_v29 = vsel %vm1590_vm14, %v6504_v40, %v1587_v25  ;;  %vm8195_vm2 = vmor %vm324_vm5, %vm325_vm6 }
 0x2cd   :  { %v320_v33 = vmul.f32 %v8085_v3, %v319_v45 }
 0x2ce   :  { %v1595_v52 = vmul.f32 0.5, %v1594_v10 }
 0x2d0   :  { %v1596_v15 = vsub.f32 1.5, %v1595_v52  ;;  %v1561_v26 = vpop.xlane.xlu0 %1560  ;;  %v273_v7 = vpop.xlane.xlu2 %272  ;;  %v8100_v52 = vadd.f32 1e-12, %v1313_v16  ;;  %v321_v16 = vmul.f32 0.5, %v320_v33 }
 0x2d1   :  { %v8091_v28 = vpop.eup %6511  ;;  %v8093_v19 = vadd.f32 1e-12, %v1561_v26  ;;  %v8095_v62 = vadd.f32 1e-12, %v273_v7  ;;  %v8108_v7 = vmul.f32 %v1591_v29, %v7972_v55 }
 0x2d2   :  { %v1597_v0 = vmul.f32 %v6508_v41, %v1596_v15  ;;  %v1603_v10 = vmul.f32 %v8091_v28, %v8080_v9  ;;  %v8103_v6 = vpop.eup %6513  ;;  %vm1609_vm7 = vweird.f32 %v8091_v28 }
 0x2d3   :  { %6515 = vrsqrt.f32 %v8093_v19  ;;  %13167 = vst [vmem:[#allocation30_spill] sm:$0xff] %v8108_v7  ;;  %v289_v45 = vmul.f32 %v8103_v6, %v8082_v46  ;;  %vm8154_vm10 = vmor %vm1608_vm8, %vm1609_vm7  ;;  %vm1618_vm12 = vweird.f32 %v8093_v19  ;;  %vm344_vm14 = vweird.f32 %v8095_v62 }
 0x2d4   :  { %v1601_v58 = vsel %vm1600_vm1, %v6508_v41, %v1597_v0  ;;  %v1604_v26 = vmul.f32 %v8091_v28, %v1603_v10  ;;  %6517 = vrsqrt.f32 %v8095_v62  ;;  %vm294_vm1 = vweird.f32 %v8082_v46 }
 0x2d5   :  { %v8111_v40 = vmul.f32 %v1601_v58, %v7978_v20  ;;  %6519 = vrsqrt.f32 %v8100_v52  ;;  %v333_v20 = vmul.f32 %v8075_v2, %v332_v17  ;;  %v322_v58 = vsub.f32 1.5, %v321_v16 }
 0x2d6   :  { %v1605_v25 = vmul.f32 0.5, %v1604_v26  ;;  %v290_v26 = vmul.f32 %v8103_v6, %v289_v45  ;;  %vm295_vm3 = vweird.f32 %v8103_v6  ;;  %vm1356_vm8 = vweird.f32 %v8100_v52 }
 0x2d7   :  { %13168 = vst [vmem:[#allocation31_spill] sm:$0xff] %v8111_v40  ;;  %v2364_v0 = vpack.c.bf16 %v8111_v40, %v8108_v7  ;;  %v8144_v45 = vmul.f32 %v8085_v3, %v322_v58  ;;  %vm8234_vm5 = vmor %vm294_vm1, %vm295_vm3 }
 0x2d8   :  { %v264_v41 = vpop.xlane.xlu0 %263  ;;  %v1564_v15 = vpop.xlane.xlu2 %1563  ;;  %v1606_v29 = vsub.f32 1.5, %v1605_v25  ;;  %v291_v37 = vmul.f32 0.5, %v290_v26 }
 0x2d9   :  { %v6516_v10 = vpop.eup %6515  ;;  %v8118_v38 = vadd.f32 1e-12, %v264_v41  ;;  %v8120_v55 = vadd.f32 1e-12, %v1564_v15  ;;  %6243 = vmatmul.msk.bf16.vlgmr.msrb.gmra.mxu1 %vm116_vm0, %v2364_v0 }
 0x2da   :  { %v6518_v49 = vpop.eup %6517  ;;  %v1613_v33 = vmul.f32 %v6516_v10, %v8093_v19  ;;  %3817 = vmatpush.bf16.msrb.mxu1 %v7430_v44  ;;  %v1607_v44 = vmul.f32 %v8091_v28, %v1606_v29  ;;  %vm1619_vm9 = vweird.f32 %v6516_v10 }
 0x2db   :  { %v339_v41 = vmul.f32 %v6518_v49, %v8095_v62  ;;  %6521 = vrsqrt.f32 %v8118_v38  ;;  %v8131_v0 = vpop.eup %6519  ;;  %vm345_vm11 = vweird.f32 %v6518_v49  ;;  %vm1620_vm13 = vmor %vm1618_vm12, %vm1619_vm9  ;;  %vm314_vm6 = vweird.f32 %v8118_v38 }
 0x2dc   :  { %v1614_v15 = vmul.f32 %v6516_v10, %v1613_v33  ;;  %6523 = vrsqrt.f32 %v8120_v55  ;;  %v1351_v40 = vmul.f32 %v8131_v0, %v8100_v52  ;;  %v1611_v9 = vsel %vm8154_vm10, %v8091_v28, %v1607_v44  ;;  %vm346_vm15 = vmor %vm344_vm14, %vm345_vm11 }
 0x2dd   :  { %v340_v17 = vmul.f32 %v6518_v49, %v339_v41  ;;  %v337_v41 = vsel %vm8134_vm4, %v8075_v2, %v333_v20  ;;  %v8179_v44 = vmul.f32 %v1611_v9, %v7984_v12  ;;  %vm1357_vm10 = vweird.f32 %v8131_v0 }
 0x2de   :  { %v1615_v16 = vmul.f32 0.5, %v1614_v15  ;;  %3818 = vmatpush.bf16.msrb.mxu1 %v7439_v47  ;;  %v1316_v47 = vpop.xlane.xlu1 %1315  ;;  %vm1628_vm11 = vweird.f32 %v8120_v55 }
 0x2df   :  { %v341_v33 = vmul.f32 0.5, %v340_v17  ;;  %13173 = vst [vmem:[#allocation32_spill] sm:$0xff] %v8179_v44 }
 0x2e0   :  { %v1616_v29 = vsub.f32 1.5, %v1615_v16  ;;  %v1567_v7 = vpop.xlane.xlu0 %1566  ;;  %v261_v15 = vpop.xlane.xlu2 %260 }
 0x2e1   :  { %v8152_v4 = vpop.eup %6521  ;;  %v342_v58 = vsub.f32 1.5, %v341_v33  ;;  %v8158_v26 = vadd.f32 1e-12, %v1567_v7  ;;  %v8160_v2 = vadd.f32 1e-12, %v261_v15  ;;  %v292_v33 = vsub.f32 1.5, %v291_v37 }
 0x2e2   :  { %v8162_v20 = vpop.eup %6523  ;;  %v1617_v17 = vmul.f32 %v6516_v10, %v1616_v29  ;;  %v309_v25 = vmul.f32 %v8152_v4, %v8118_v38  ;;  %vm315_vm4 = vweird.f32 %v8152_v4 }
 0x2e3   :  { %v343_v16 = vmul.f32 %v6518_v49, %v342_v58  ;;  %v1623_v7 = vmul.f32 %v8162_v20, %v8120_v55  ;;  %6525 = vrsqrt.f32 %v8158_v26  ;;  %vm316_vm7 = vmor %vm314_vm6, %vm315_vm4  ;;  %vm1629_vm9 = vweird.f32 %v8162_v20 }
 0x2e4   :  { %v1621_v15 = vsel %vm1620_vm13, %v6516_v10, %v1617_v17  ;;  %v310_v28 = vmul.f32 %v8152_v4, %v309_v25  ;;  %6527 = vrsqrt.f32 %v8160_v2  ;;  %v8186_v10 = vmul.f32 %v337_v41, %v7636_v22  ;;  %vm8269_vm14 = vmor %vm1628_vm11, %vm1629_vm9 }
 0x2e5   :  { %v1624_v19 = vmul.f32 %v8162_v20, %v1623_v7  ;;  %v8182_v62 = vmul.f32 %v1621_v15, %v7994_v36  ;;  %v347_v29 = vsel %vm346_vm15, %v6518_v49, %v343_v16  ;;  %v1352_v36 = vmul.f32 %v8131_v0, %v1351_v40  ;;  %vm8317_vm4 = vmor %vm1356_vm8, %vm1357_vm10 }
 0x2e6   :  { %v311_v37 = vmul.f32 0.5, %v310_v28  ;;  %13175 = vst [vmem:[#allocation34_spill] sm:$0xff] %v8186_v10  ;;  %v8189_v58 = vmul.f32 %v347_v29, %v7990_v59  ;;  %v8204_v41 = vmul.f32 %v8103_v6, %v292_v33  ;;  %v327_v25 = vsel %vm8195_vm2, %v8085_v3, %v8144_v45 }
 0x2e7   :  { %13174 = vst [vmem:[#allocation33_spill] sm:$0xff] %v8182_v62  ;;  %v1625_v49 = vmul.f32 0.5, %v1624_v19  ;;  %v2365_v22 = vpack.c.bf16 %v8182_v62, %v8179_v44  ;;  %v8214_v40 = vadd.f32 1e-12, %v1316_v47  ;;  %v1353_v47 = vmul.f32 0.5, %v1352_v36 }
 0x2e8   :  { %13176 = vst [vmem:[#allocation35_spill] sm:$0xff] %v8189_v58  ;;  %v312_v59 = vsub.f32 1.5, %v311_v37  ;;  %v1310_v9 = vpop.xlane.xlu0 %1309  ;;  %v1570_v17 = vpop.xlane.xlu2 %1569  ;;  %v1739_v8 = vpack.c.bf16 %v8189_v58, %v8186_v10  ;;  %v8248_v46 = vmul.f32 %v327_v25, %v7654_v54  ;;  %v297_v38 = vsel %vm8234_vm5, %v8103_v6, %v8204_v41 }
 0x2e9   :  { %v8212_v16 = vpop.eup %6525  ;;  %v8217_v7 = vadd.f32 1e-12, %v1310_v9  ;;  %v8219_v33 = vadd.f32 1e-12, %v1570_v17  ;;  %6244 = vmatmul.msk.bf16.gmra.mxu1 %vm116_vm0, %v2365_v22  ;;  %v1626_v19 = vsub.f32 1.5, %v1625_v49  ;;  %v1354_v9 = vsub.f32 1.5, %v1353_v47 }
 0x2ea   :  { %v8222_v15 = vpop.eup %6527  ;;  %v313_v28 = vmul.f32 %v8152_v4, %v312_v59  ;;  %v1633_v3 = vmul.f32 %v8212_v16, %v8158_v26  ;;  %v8228_v45 = vsel %vm116_vm0, %v1739_v8, 0  ;;  %13181 = vst [vmem:[#allocation36_spill] sm:$0xff] %v8248_v46  ;;  %vm1638_vm12 = vweird.f32 %v8158_v26 }
 0x2eb   :  { %v299_v37 = vmul.f32 %v8222_v15, %v8160_v2  ;;  %6529 = vrsqrt.f32 %v8217_v7  ;;  %1770 = vmatpush.bf16.xpose.msra.mxu3 %v8228_v45  ;;  %v1627_v22 = vmul.f32 %v8162_v20, %v1626_v19  ;;  %vm1639_vm13 = vweird.f32 %v8212_v16 }
 0x2ec   :  { %v1634_v12 = vmul.f32 %v8212_v16, %v1633_v3  ;;  %6531 = vrsqrt.f32 %v8219_v33  ;;  %v317_v49 = vsel %vm316_vm7, %v8152_v4, %v313_v28  ;;  %vm305_vm15 = vweird.f32 %v8222_v15  ;;  %vm1640_vm1 = vmor %vm1638_vm12, %vm1639_vm13 }
 0x2ed   :  { %6533 = vrsqrt.f32 %v8214_v40  ;;  %v300_v36 = vmul.f32 %v8222_v15, %v299_v37  ;;  %v8261_v54 = vmul.f32 %v317_v49, %v8002_v43  ;;  %v1631_v29 = vsel %vm8269_vm14, %v8162_v20, %v1627_v22 }
 0x2ee   :  { %v1635_v59 = vmul.f32 0.5, %v1634_v12  ;;  %vm304_vm2 = vweird.f32 %v8160_v2  ;;  %v1355_v22 = vmul.f32 %v8131_v0, %v1354_v9  ;;  %v8307_v2 = vmul.f32 %v1631_v29, %v8009_v21  ;;  %v1325_v9 = vpop.xlane.xlu1 %1324 }
 0x2ef   :  { %13182 = vst [vmem:[#allocation37_spill] sm:$0xff] %v8261_v54  ;;  %v301_v6 = vmul.f32 0.5, %v300_v36  ;;  %v1738_v8 = vpack.c.bf16 %v8248_v46, %v8261_v54  ;;  %vm306_vm3 = vmor %vm304_vm2, %vm305_vm15  ;;  %vm1346_vm6 = vweird.f32 %v8217_v7  ;;  %vm1648_vm9 = vweird.f32 %v8219_v33 }
 0x2f0   :  { %v1636_v41 = vsub.f32 1.5, %v1635_v59  ;;  %v1573_v4 = vpop.xlane.xlu0 %1572  ;;  %v1319_v17 = vpop.xlane.xlu2 %1318  ;;  %13185 = vst [vmem:[#allocation38_spill] sm:$0xff] %v8307_v2  ;;  %vm1366_vm14 = vweird.f32 %v8214_v40 }
 0x2f1   :  { %v6530_v25 = vpop.eup %6529  ;;  %v302_v28 = vsub.f32 1.5, %v301_v6  ;;  %v8274_v55 = vadd.f32 1e-12, %v1573_v4  ;;  %v8276_v19 = vadd.f32 1e-12, %v1319_v17  ;;  %v8286_v12 = vsel %vm116_vm0, %v1738_v8, 0 }
 0x2f2   :  { %v8278_v3 = vpop.eup %6531  ;;  %v1637_v47 = vmul.f32 %v8212_v16, %v1636_v41  ;;  %v1341_v37 = vmul.f32 %v6530_v25, %v8217_v7  ;;  %v8322_v8 = vmul.f32 %v297_v38, %v7671_v27  ;;  %vm1347_vm5 = vweird.f32 %v6530_v25 }
 0x2f3   :  { %v8288_v36 = vpop.eup %6533  ;;  %v303_v49 = vmul.f32 %v8222_v15, %v302_v28  ;;  %v1643_v20 = vmul.f32 %v8278_v3, %v8219_v33  ;;  %6535 = vrsqrt.f32 %v8274_v55  ;;  %1771 = vmatpush.bf16.xpose.msra.mxu3 %v8286_v12  ;;  %v1359_v27 = vsel %vm8317_vm4, %v8131_v0, %v1355_v22  ;;  %vm1348_vm7 = vmor %vm1346_vm6, %vm1347_vm5 }
 0x2f4   :  { %v1641_v59 = vsel %vm1640_vm1, %v8212_v16, %v1637_v47  ;;  %v1342_v26 = vmul.f32 %v6530_v25, %v1341_v37  ;;  %6537 = vrsqrt.f32 %v8276_v19  ;;  %13189 = vst [vmem:[#allocation40_spill] sm:$0xff] %v8322_v8  ;;  %v8356_v16 = vmul.f32 %v1359_v27, %v7934_v57 }
 0x2f5   :  { %v1644_v6 = vmul.f32 %v8278_v3, %v1643_v20  ;;  %v8310_v41 = vmul.f32 %v1641_v59, %v8021_v30  ;;  %v307_v4 = vsel %vm306_vm3, %v8222_v15, %v303_v49  ;;  %v1361_v30 = vmul.f32 %v8288_v36, %v8214_v40 }
 0x2f6   :  { %v1343_v17 = vmul.f32 0.5, %v1342_v26  ;;  %v8325_v21 = vmul.f32 %v307_v4, %v8017_v5  ;;  %v8336_v5 = vadd.f32 1e-12, %v1325_v9  ;;  %v13191_v4 = vld [vmem:[#allocation15_spill] sm:$0xff]  ;;  %vm1649_vm8 = vweird.f32 %v8278_v3 }
 0x2f7   :  { %13186 = vst [vmem:[#allocation39_spill] sm:$0xff] %v8310_v41  ;;  %v1645_v15 = vmul.f32 0.5, %v1644_v6  ;;  %v2366_v43 = vpack.c.bf16 %v8310_v41, %v8307_v2  ;;  %v1362_v6 = vmul.f32 %v8288_v36, %v1361_v30  ;;  %vm8369_vm11 = vmor %vm1648_vm9, %vm1649_vm8  ;;  %vm1658_vm12 = vweird.f32 %v8274_v55 }
 0x2f8   :  { %13190 = vst [vmem:[#allocation41_spill] sm:$0xff] %v8325_v21  ;;  %v1344_v52 = vsub.f32 1.5, %v1343_v17  ;;  %v1322_v28 = vpop.xlane.xlu0 %1321  ;;  %v1737_v29 = vpack.c.bf16 %v8325_v21, %v8322_v8  ;;  %vm1367_vm15 = vweird.f32 %v8288_v36  ;;  %vm1376_vm3 = vweird.f32 %v8276_v19 }
 0x2f9   :  { %v6536_v47 = vpop.eup %6535  ;;  %v8339_v38 = vadd.f32 1e-12, %v1322_v28  ;;  %6245 = vmatmul.msk.bf16.gmra.mxu1 %vm116_vm0, %v2366_v43  ;;  %v1646_v20 = vsub.f32 1.5, %v1645_v15  ;;  %13192 = vst [vmem:[#allocation15_spill] sm:$0xff] %v8356_v16  ;;  %v1363_v15 = vmul.f32 0.5, %v1362_v6  ;;  %vm8391_vm2 = vmor %vm1366_vm14, %vm1367_vm15  ;;  %vm1396_vm5 = vweird.f32 %v8336_v5 }
 0x2fa   :  { %v8342_v37 = vpop.eup %6537  ;;  %v1345_v49 = vmul.f32 %v6530_v25, %v1344_v52  ;;  %v1653_v59 = vmul.f32 %v6536_v47, %v8274_v55  ;;  %v8346_v26 = vsel %vm116_vm0, %v1737_v29, 0  ;;  %vm1659_vm10 = vweird.f32 %v6536_v47 }
 0x2fb   :  { %v1371_v0 = vmul.f32 %v8342_v37, %v8276_v19  ;;  %1772 = vmatpush.bf16.xpose.msra.mxu3 %v8346_v26  ;;  %6539 = vrsqrt.f32 %v8339_v38  ;;  %v1647_v30 = vmul.f32 %v8278_v3, %v1646_v20  ;;  %v1364_v33 = vsub.f32 1.5, %v1363_v15  ;;  %vm1660_vm13 = vmor %vm1658_vm12, %vm1659_vm10  ;;  %v13201_v15 = vld [vmem:[#allocation14_spill] sm:$0xff] }
 0x2fc   :  { %v1349_v7 = vsel %vm1348_vm7, %v6530_v25, %v1345_v49  ;;  %v1654_v22 = vmul.f32 %v6536_v47, %v1653_v59  ;;  %6541 = vrsqrt.f32 %v8336_v5  ;;  %v13196_v59 = vld [vmem:[#allocation13_spill] sm:$0xff]  ;;  %vm1377_vm1 = vweird.f32 %v8342_v37 }
 0x2fd   :  { %v8359_v9 = vmul.f32 %v1349_v7, %v8029_v48  ;;  %v1372_v17 = vmul.f32 %v8342_v37, %v1371_v0  ;;  %v13193_v48 = vld [vmem:[#allocation17_spill] sm:$0xff]  ;;  %v1651_v49 = vsel %vm8369_vm11, %v8278_v3, %v1647_v30  ;;  %v1328_v30 = vpop.xlane.xlu2 %1327  ;;  %vm1378_vm4 = vmor %vm1376_vm3, %vm1377_vm1  ;;  %vm1386_vm9 = vweird.f32 %v8339_v38 }
 0x2fe   :  { %v1655_v25 = vmul.f32 0.5, %v1654_v22  ;;  %v8385_v55 = vmul.f32 %v1651_v49, %v8033_v14  ;;  %vm1818_vm3 = vcmask 523264  }
 0x2ff   :  { %v1373_v43 = vmul.f32 0.5, %v1372_v17  ;;  %v1733_v52 = vpack.c.bf16 %v8356_v16, %v8359_v9  ;;  %v1365_v17 = vmul.f32 %v8288_v36, %v1364_v33 }
 0x300   :  { %v1656_v57 = vsub.f32 1.5, %v1655_v25  ;;  %v1331_v22 = vpop.xlane.xlu0 %1330  ;;  %13197 = vst [vmem:[#allocation17_spill] sm:$0xff] %v8385_v55 }
 0x301   :  { %v1374_v29 = vsub.f32 1.5, %v1373_v43  ;;  %v6540_v27 = vpop.eup %6539  ;;  %v1339_v14 = vadd.f32 1e-12, %v1331_v22 }
 0x302   :  { %v1657_v20 = vmul.f32 %v6536_v47, %v1656_v57  ;;  %6231 = vmatmul.msk.bf16.vlgmr.msra.gmra.mxu3 %vm116_vm0, %v1733_v52  ;;  %v6542_v6 = vpop.eup %6541  ;;  %v1381_v3 = vmul.f32 %v6540_v27, %v8339_v38  ;;  %v1338_v52 = vadd.f32 1e-12, %v1328_v30  ;;  %vm1387_vm7 = vweird.f32 %v6540_v27 }
 0x303   :  { %2964 = vmatpush.bf16.msrb.mxu3 %v13191_v4  ;;  %v1375_v7 = vmul.f32 %v8342_v37, %v1374_v29  ;;  %6543 = vrsqrt.f32 %v1339_v14  ;;  %vm1397_vm6 = vweird.f32 %v6542_v6  ;;  %vm1388_vm10 = vmor %vm1386_vm9, %vm1387_vm7 }
 0x304   :  { %v1661_v0 = vsel %vm1660_vm13, %v6536_v47, %v1657_v20  ;;  %v1391_v47 = vmul.f32 %v6542_v6, %v8336_v5  ;;  %6545 = vrsqrt.f32 %v1338_v52  ;;  %vm1398_vm8 = vmor %vm1396_vm5, %vm1397_vm6  ;;  %vm1416_vm13 = vweird.f32 %v1339_v14 }
 0x305   :  { %v8388_v4 = vmul.f32 %v1661_v0, %v8046_v31  ;;  %v1382_v31 = vmul.f32 %v6540_v27, %v1381_v3  ;;  %v1379_v43 = vsel %vm1378_vm4, %v8342_v37, %v1375_v7  ;;  %vm1406_vm15 = vweird.f32 %v1338_v52 }
 0x306   :  { %v1392_v57 = vmul.f32 %v6542_v6, %v1391_v47  ;;  %v8406_v19 = vmul.f32 %v1379_v43, %v8042_v42 }
 0x307   :  { %2965 = vmatpush.bf16.msrb.mxu3 %v13193_v48  ;;  %13198 = vst [vmem:[#allocation13_spill] sm:$0xff] %v8388_v4  ;;  %v2367_v25 = vpack.c.bf16 %v8388_v4, %v8385_v55  ;;  %v1369_v48 = vsel %vm8391_vm2, %v8288_v36, %v1365_v17  ;;  %v1383_v28 = vmul.f32 0.5, %v1382_v31 }
 0x308   :  { %v8409_v29 = vmul.f32 %v1369_v48, %v7947_v51  ;;  %v1393_v49 = vmul.f32 0.5, %v1392_v57 }
 0x309   :  { %6246 = vmatmul.msk.bf16.gmra.mxu1 %vm116_vm0, %v2367_v25  ;;  %v1384_v37 = vsub.f32 1.5, %v1383_v28  ;;  %v6544_v33 = vpop.eup %6543  ;;  %v7205_v28 = vmov 0.5  }
 0x30a   :  { %13202 = vst [vmem:[#allocation14_spill] sm:$0xff] %v8409_v29  ;;  %v1734_v20 = vpack.c.bf16 %v8406_v19, %v8409_v29  ;;  %v6546_v0 = vpop.eup %6545  ;;  %v1411_v36 = vmul.f32 %v6544_v33, %v1339_v14  ;;  %vm1417_vm11 = vweird.f32 %v6544_v33  ;;  %6547 = vrcp.f32 %v7205_v28 }
 0x30b   :  { %3575 = vmatpush.bf16.msra.mxu3 %v13196_v59  ;;  %v1394_v59 = vsub.f32 1.5, %v1393_v49  ;;  %v1385_v42 = vmul.f32 %v6540_v27, %v1384_v37  ;;  %v1401_v51 = vmul.f32 %v6546_v0, %v1338_v52  ;;  %vm1407_vm12 = vweird.f32 %v6546_v0  ;;  %vm1418_vm14 = vmor %vm1416_vm13, %vm1417_vm11  ;;  %v13205_v52 = vld [vmem:[#allocation9_spill] sm:$0xff] }
 0x30c   :  { %v1412_v3 = vmul.f32 %v6544_v33, %v1411_v36  ;;  %vm1408_vm1 = vmor %vm1406_vm15, %vm1407_vm12  ;;  %2987 = vrot.lane.b32.xlu2 %v13205_v52, %s7206_s7  ;;  %v13208_v36 = vld [vmem:[#allocation10_spill] sm:$0xff] }
 0x30d   :  { %v1395_v7 = vmul.f32 %v6542_v6, %v1394_v59  ;;  %v1389_v22 = vsel %vm1388_vm10, %v6540_v27, %v1385_v42  ;;  %v1402_v17 = vmul.f32 %v6546_v0, %v1401_v51 }
 0x30e   :  { %v8417_v47 = vmul.f32 %v1389_v22, %v8055_v63  ;;  %v1413_v30 = vmul.f32 0.5, %v1412_v3 }
 0x30f   :  { %3576 = vmatpush.bf16.msra.mxu3 %v13201_v15  ;;  %v1399_v40 = vsel %vm1398_vm8, %v6542_v6, %v1395_v7  ;;  %v1403_v25 = vmul.f32 0.5, %v1402_v17 }
 0x310   :  { %13203 = vst [vmem:[#allocation42_spill] sm:$0xff] %v8417_v47  ;;  %v8420_v5 = vmul.f32 %v1399_v40, %v7962_v39  ;;  %v1414_v31 = vsub.f32 1.5, %v1413_v30  ;;  %v6548_v49 = vpop.eup %6547 }
 0x311   :  { %v1404_v38 = vsub.f32 1.5, %v1403_v25  ;;  %v1703_v14 = vmul.f32 0.5, %v6548_v49  ;;  %vm1707_vm2 = vweird.f32 %v6548_v49 }
 0x312   :  { %6232 = vmatmul.msk.bf16.gmra.mxu3 %vm116_vm0, %v1734_v20  ;;  %v1735_v15 = vpack.c.bf16 %v8420_v5, %v8417_v47  ;;  %v1415_v43 = vmul.f32 %v6544_v33, %v1414_v31 }
 0x313   :  { %v1405_v27 = vmul.f32 %v6546_v0, %v1404_v38  ;;  %v1704_v20 = vsub.f32 1.0, %v1703_v14 }
 0x314   :  { %v1419_v63 = vsel %vm1418_vm14, %v6544_v33, %v1415_v43 }
 0x315   :  { %v1409_v6 = vsel %vm1408_vm1, %v6546_v0, %v1405_v27  ;;  %v8426_v39 = vmul.f32 %v1419_v63, %v8065_v61  ;;  %v1705_v37 = vmul.f32 %v6548_v49, %v1704_v20 }
 0x316   :  { %v8429_v57 = vmul.f32 %v1409_v6, %v8052_v60  ;;  %v13206_v60 = vld [vmem:[#allocation11_spill] sm:$0xff] }
 0x317   :  { %v1706_v61 = vadd.f32 %v6548_v49, %v1705_v37  ;;  %2989 = vrot.lane.b32.xlu2 %v13206_v60, %s7206_s7 }
 0x318   :  { %13204 = vst [vmem:[#allocation43_spill] sm:$0xff] %v8429_v57  ;;  %v1736_v48 = vpack.c.bf16 %v8426_v39, %v8429_v57 }
 0x319   :  { %v8438_v33 = vsel %vm1707_vm2, %v6548_v49, %v1706_v61 }
 0x31a   :  { %13207 = vst [vmem:[#allocation9_spill] sm:$0xff] %v8438_v33 }
 0x31f   :  { %2991 = vrot.lane.b32.xlu2 %v13208_v36, %s7206_s7 }
 0x322   :  { %6233 = vmatmul.msk.bf16.gmra.mxu3 %vm116_vm0, %v1735_v15 }
 0x327   :  { %2938 = vrot.lane.b32.xlu2 %v13205_v52, %s7207_s11 }
 0x332   :  { %6234 = vmatmul.msk.bf16.gmra.mxu3 %vm116_vm0, %v1736_v48 }
 0x356   :  { %v2405_v59 = vpop.f32.mrf.mxu1 }
 0x357   :  { %v2425_v0 = vmul.f32 %v2405_v59, %v8438_v33 }
 0x359   :  { %v2433_v42 = vmul.f32 1.442695, %v2425_v0 }
 0x35b   :  { %6549 = vpow2.f32 %v2433_v42 }
 0x35e   :  { %v2407_v7 = vpop.f32.mrf.mxu1 }
 0x35f   :  { %v2426_v51 = vmul.f32 %v2407_v7, %v8438_v33 }
 0x361   :  { %v8444_v3 = vpop.eup %6549  ;;  %v2435_v22 = vmul.f32 1.442695, %v2426_v51 }
 0x362   :  { %13209 = vst [vmem:[#allocation11_spill] sm:$0xff] %v8444_v3  ;;  %2659 = vxpose.xlu1.b32.start [1/8] (short) (narrow) %v8444_v3, 64 }
 0x363   :  { %6551 = vpow2.f32 %v2435_v22 }
 0x366   :  { %v2410_v17 = vpop.f32.mrf.mxu1 }
 0x367   :  { %v2427_v40 = vmul.f32 %v2410_v17, %v8438_v33 }
 0x369   :  { %v8448_v30 = vpop.eup %6551  ;;  %v2437_v25 = vmul.f32 1.442695, %v2427_v40 }
 0x36a   :  { %13210 = vst [vmem:[#allocation10_spill] sm:$0xff] %v8448_v30  ;;  %2660 = vxpose.xlu1.b32.cont [2/8] (short) (narrow) %v8448_v30, 64 }
 0x36b   :  { %6553 = vpow2.f32 %v2437_v25 }
 0x36e   :  { %v2412_v15 = vpop.f32.mrf.mxu1 }
 0x36f   :  { %v2428_v31 = vmul.f32 %v2412_v15, %v8438_v33 }
 0x371   :  { %v8452_v38 = vpop.eup %6553  ;;  %v2439_v43 = vmul.f32 1.442695, %v2428_v31 }
 0x372   :  { %13211 = vst [vmem:[#allocation44_spill] sm:$0xff] %v8452_v38  ;;  %2661 = vxpose.xlu1.b32.cont [3/8] (short) (narrow) %v8452_v38, 64 }
 0x373   :  { %6555 = vpow2.f32 %v2439_v43 }
 0x376   :  { %v2415_v27 = vpop.f32.mrf.mxu1 }
 0x377   :  { %v2429_v63 = vmul.f32 %v2415_v27, %v8438_v33 }
 0x379   :  { %v8456_v6 = vpop.eup %6555  ;;  %v2441_v48 = vmul.f32 1.442695, %v2429_v63 }
 0x37a   :  { %13212 = vst [vmem:[#allocation45_spill] sm:$0xff] %v8456_v6  ;;  %2662 = vxpose.xlu1.b32.cont [4/8] (short) (narrow) %v8456_v6, 64 }
 0x37b   :  { %6557 = vpow2.f32 %v2441_v48 }
 0x37e   :  { %v2417_v28 = vpop.f32.mrf.mxu1 }
 0x37f   :  { %v2430_v49 = vmul.f32 %v2417_v28, %v8438_v33 }
 0x381   :  { %v8460_v14 = vpop.eup %6557  ;;  %v2443_v20 = vmul.f32 1.442695, %v2430_v49 }
 0x382   :  { %13213 = vst [vmem:[#allocation46_spill] sm:$0xff] %v8460_v14  ;;  %2663 = vxpose.xlu1.b32.cont [5/8] (short) (narrow) %v8460_v14, 64 }
 0x383   :  { %6559 = vpow2.f32 %v2443_v20  ;;  %v13217_v20 = vld [vmem:[#allocation12_spill] sm:$0xff] }
 0x384   :  { %2993 = vrot.lane.b32.xlu2 %v13217_v20, %s7206_s7 }
 0x385   :  { %v1774_v37 = vpop.f32.mrf.mxu3 }
 0x386   :  { %v1794_v61 = vmul.f32 %v1774_v37, %v8438_v33  ;;  %v2420_v59 = vpop.f32.mrf.mxu1 }
 0x387   :  { %v2431_v0 = vmul.f32 %v2420_v59, %v8438_v33 }
 0x388   :  { %v1802_v42 = vmul.f32 1.442695, %v1794_v61 }
 0x389   :  { %v8465_v7 = vpop.eup %6559  ;;  %v2445_v51 = vmul.f32 1.442695, %v2431_v0 }
 0x38a   :  { %13214 = vst [vmem:[#allocation47_spill] sm:$0xff] %v8465_v7  ;;  %6561 = vpow2.f32 %v1802_v42  ;;  %2664 = vxpose.xlu1.b32.cont [6/8] (short) (narrow) %v8465_v7, 64 }
 0x38b   :  { %6563 = vpow2.f32 %v2445_v51 }
 0x38c   :  { %2940 = vrot.lane.b32.xlu2 %v13206_v60, %s7207_s11 }
 0x38d   :  { %v1776_v22 = vpop.f32.mrf.mxu3 }
 0x38e   :  { %v1795_v17 = vmul.f32 %v1776_v22, %v8438_v33  ;;  %v2422_v40 = vpop.f32.mrf.mxu1 }
 0x38f   :  { %v2432_v25 = vmul.f32 %v2422_v40, %v8438_v33  ;;  %v13032_v40 = vmov 1.0  }
 0x390   :  { %v8470_v15 = vpop.eup %6561  ;;  %v1804_v31 = vmul.f32 1.442695, %v1795_v17  ;;  %2723 = vmatpush.msrb.mxu2 %v13032_v40  ;;  %2093 = vmatpush.msrb.mxu0 %v13032_v40 }
 0x391   :  { %13215 = vst [vmem:[#allocation48_spill] sm:$0xff] %v8470_v15  ;;  %v8474_v43 = vpop.eup %6563  ;;  %v2447_v27 = vmul.f32 1.442695, %v2432_v25  ;;  %2029 = vxpose.xlu0.b32.start [1/8] (short) (narrow) %v8470_v15, 64 }
 0x392   :  { %13216 = vst [vmem:[#allocation49_spill] sm:$0xff] %v8474_v43  ;;  %6565 = vpow2.f32 %v1804_v31  ;;  %2665 = vxpose.xlu1.b32.cont [7/8] (short) (narrow) %v8474_v43, 64  ;;  %2724 = vmatpush.msrb.mxu2 %v13032_v40 }
 0x393   :  { %6567 = vpow2.f32 %v2447_v27  ;;  %2094 = vmatpush.msrb.mxu0 %v13032_v40 }
 0x394   :  { %2942 = vrot.lane.b32.xlu2 %v13208_v36, %s7207_s11  ;;  %2725 = vmatpush.msrb.mxu2 %v13032_v40 }
 0x395   :  { %v1779_v63 = vpop.f32.mrf.mxu3  ;;  %2095 = vmatpush.msrb.mxu0 %v13032_v40 }
 0x396   :  { %v1796_v48 = vmul.f32 %v1779_v63, %v8438_v33  ;;  %2726 = vmatpush.msrb.mxu2 %v13032_v40 }
 0x397   :  { %2096 = vmatpush.msrb.mxu0 %v13032_v40 }
 0x398   :  { %v8479_v28 = vpop.eup %6565  ;;  %v1806_v49 = vmul.f32 1.442695, %v1796_v48  ;;  %2727 = vmatpush.msrb.mxu2 %v13032_v40 }
 0x399   :  { %v8483_v37 = vpop.eup %6567  ;;  %2030 = vxpose.xlu0.b32.cont [2/8] (short) (narrow) %v8479_v28, 64  ;;  %2097 = vmatpush.msrb.mxu0 %v13032_v40 }
 0x39a   :  { %13218 = vst [vmem:[#allocation12_spill] sm:$0xff] %v8483_v37  ;;  %6569 = vpow2.f32 %v1806_v49  ;;  %2666 = vxpose.xlu1.b32.end [8/8] (short) (narrow) %v8483_v37, 64  ;;  %2728 = vmatpush.msrb.mxu2 %v13032_v40 }
 0x39b   :  { %2098 = vmatpush.msrb.mxu0 %v13032_v40 }
 0x39c   :  { %2944 = vrot.lane.b32.xlu2 %v13217_v20, %s7207_s11  ;;  %2729 = vmatpush.msrb.mxu2 %v13032_v40  ;;  %v13221_v20 = vld [vmem:[#allocation5_spill] sm:$0xff] }
 0x39d   :  { %v1781_v52 = vpop.f32.mrf.mxu3  ;;  %2099 = vmatpush.msrb.mxu0 %v13032_v40 }
 0x39e   :  { %v1797_v61 = vmul.f32 %v1781_v52, %v8438_v33  ;;  %2730 = vmatpush.msrb.mxu2 %v13032_v40  ;;  %v13222_v52 = vld [vmem:[#allocation16_spill] sm:$0xff] }
 0x39f   :  { %2100 = vmatpush.msrb.mxu0 %v13032_v40 }
 0x3a0   :  { %v8488_v59 = vpop.eup %6569  ;;  %v1808_v0 = vmul.f32 1.442695, %v1797_v61  ;;  %3490 = vmatpush.bf16.msra.mxu2 %v13221_v20 }
 0x3a1   :  { %13219 = vst [vmem:[#allocation50_spill] sm:$0xff] %v8488_v59  ;;  %2031 = vxpose.xlu0.b32.cont [3/8] (short) (narrow) %v8488_v59, 64  ;;  %3013 = vmatpush.bf16.msra.mxu0 %v13222_v52 }
 0x3a2   :  { %6571 = vpow2.f32 %v1808_v0  ;;  %v13223_v0 = vld [vmem:[#allocation7_spill] sm:$0xff] }
 0x3a4   :  { %3491 = vmatpush.bf16.msra.mxu2 %v13223_v0 }
 0x3a5   :  { %v1784_v42 = vpop.f32.mrf.mxu3 }
 0x3a6   :  { %v1798_v51 = vmul.f32 %v1784_v42, %v8438_v33 }
 0x3a8   :  { %v8494_v22 = vpop.eup %6571  ;;  %v1810_v17 = vmul.f32 1.442695, %v1798_v51  ;;  %v13224_v51 = vld [vmem:[#allocation18_spill] sm:$0xff] }
 0x3a9   :  { %2032 = vxpose.xlu0.b32.cont [4/8] (short) (narrow) %v8494_v22, 64  ;;  %3014 = vmatpush.bf16.msra.mxu0 %v13224_v51 }
 0x3aa   :  { %6573 = vpow2.f32 %v1810_v17 }
 0x3ad   :  { %v1786_v60 = vpop.f32.mrf.mxu3 }
 0x3ae   :  { %v1799_v25 = vmul.f32 %v1786_v60, %v8438_v33 }
 0x3b0   :  { %v8506_v36 = vpop.eup %6573  ;;  %v1812_v31 = vmul.f32 1.442695, %v1799_v25 }
 0x3b1   :  { %13220 = vst [vmem:[#allocation51_spill] sm:$0xff] %v8506_v36  ;;  %2033 = vxpose.xlu0.b32.cont [5/8] (short) (narrow) %v8506_v36, 64 }
 0x3b2   :  { %6575 = vpow2.f32 %v1812_v31 }
 0x3b5   :  { %v1789_v27 = vpop.f32.mrf.mxu3 }
 0x3b6   :  { %v1800_v63 = vmul.f32 %v1789_v27, %v8438_v33  ;;  %v13226_v27 = vld [vmem:[#allocation6_spill] sm:$0xff] }
 0x3b8   :  { %v8520_v48 = vpop.eup %6575  ;;  %v1814_v49 = vmul.f32 1.442695, %v1800_v63  ;;  %v13227_v63 = vld [vmem:[#allocation8_spill] sm:$0xff] }
 0x3b9   :  { %2034 = vxpose.xlu0.b32.cont [6/8] (short) (narrow) %v8520_v48, 64 }
 0x3ba   :  { %6577 = vpow2.f32 %v1814_v49 }
 0x3bd   :  { %v1791_v61 = vpop.f32.mrf.mxu3 }
 0x3be   :  { %v1801_v42 = vmul.f32 %v1791_v61, %v8438_v33 }
 0x3c0   :  { %v8530_v17 = vpop.eup %6577  ;;  %v1816_v60 = vmul.f32 1.442695, %v1801_v42  ;;  %v2988_v42 = vpop.permute.xlu2 %2987 }
 0x3c1   :  { %2035 = vxpose.xlu0.b32.cont [7/8] (short) (narrow) %v8530_v17, 64 }
 0x3c2   :  { %6579 = vpow2.f32 %v1816_v60 }
 0x3c8   :  { %v8533_v25 = vpop.eup %6579 }
 0x3c9   :  { %13225 = vst [vmem:[#allocation5_spill] sm:$0xff] %v8533_v25  ;;  %2036 = vxpose.xlu0.b32.end [8/8] (short) (narrow) %v8533_v25, 64 }
 0x406   :  { %v2675_v31 = vpop.trf.xlu1 }
 0x407   :  { %6247 = vmatmul.msk.f32.vlgmr.msrb.gmra.mxu2 %vm1818_vm3, %v2675_v31  ;;  %v2990_v31 = vpop.permute.xlu2 %2989 }
 0x408   :  { %6351 = vmatpush.bf16.msrb.mxu2 %v13226_v27 }
 0x40c   :  { %6352 = vmatpush.bf16.msrb.mxu2 %v13227_v63 }
 0x40e   :  { %v2676_v49 = vpop.trf.xlu1 }
 0x40f   :  { %6248 = vmatmul.msk.f32.gmra.mxu2 %vm1818_vm3, %v2676_v49 }
 0x416   :  { %v2677_v20 = vpop.trf.xlu1 }
 0x417   :  { %6249 = vmatmul.msk.f32.gmra.mxu2 %vm1818_vm3, %v2677_v20 }
 0x41e   :  { %v2678_v52 = vpop.trf.xlu1 }
 0x41f   :  { %6250 = vmatmul.msk.f32.gmra.mxu2 %vm1818_vm3, %v2678_v52  ;;  %v2992_v52 = vpop.permute.xlu2 %2991 }
 0x426   :  { %v2679_v61 = vpop.trf.xlu1 }
 0x427   :  { %6251 = vmatmul.msk.f32.gmra.mxu2 %vm1818_vm3, %v2679_v61 }
 0x42e   :  { %v2680_v0 = vpop.trf.xlu1 }
 0x42f   :  { %6252 = vmatmul.msk.f32.gmra.mxu2 %vm1818_vm3, %v2680_v0  ;;  %v8553_v0 = vpop.permute.xlu2 %2938 }
 0x430   :  { %6255 = vmatmul.msk.bf16.vlgmr.msrb.gmra.mxu3 %vm116_vm0, %v8553_v0 }
 0x431   :  { %4367 = vmatpush.msrb.mxu3 %v13032_v40 }
 0x433   :  { %4368 = vmatpush.msrb.mxu3 %v13032_v40 }
 0x435   :  { %v2045_v51 = vpop.trf.xlu0  ;;  %4369 = vmatpush.msrb.mxu3 %v13032_v40 }
 0x436   :  { %6235 = vmatmul.msk.f32.vlgmr.msrb.gmra.mxu0 %vm1818_vm3, %v2045_v51  ;;  %v2681_v60 = vpop.trf.xlu1 }
 0x437   :  { %6253 = vmatmul.msk.f32.gmra.mxu2 %vm1818_vm3, %v2681_v60  ;;  %3732 = vmatpush.bf16.msrb.mxu0 %v13226_v27 }
 0x438   :  { %4370 = vmatpush.msrb.mxu3 %v13032_v40 }
 0x43a   :  { %4371 = vmatpush.msrb.mxu3 %v13032_v40 }
 0x43b   :  { %3733 = vmatpush.bf16.msrb.mxu0 %v13227_v63  ;;  %v2994_v63 = vpop.permute.xlu2 %2993 }
 0x43c   :  { %4372 = vmatpush.msrb.mxu3 %v13032_v40 }
 0x43d   :  { %v2046_v49 = vpop.trf.xlu0 }
 0x43e   :  { %6236 = vmatmul.msk.f32.gmra.mxu0 %vm1818_vm3, %v2046_v49  ;;  %v2682_v20 = vpop.trf.xlu1  ;;  %4373 = vmatpush.msrb.mxu3 %v13032_v40 }
 0x43f   :  { %6254 = vmatmul.msk.f32.gmra.mxu2 %vm1818_vm3, %v2682_v20 }
 0x440   :  { %4374 = vmatpush.msrb.mxu3 %v13032_v40 }
 0x443   :  { %v2941_v51 = vpop.permute.xlu2 %2940 }
 0x444   :  { %6256 = vmatmul.msk.bf16.gmra.mxu3 %vm116_vm0, %v2941_v51 }
 0x445   :  { %v2047_v61 = vpop.trf.xlu0 }
 0x446   :  { %6237 = vmatmul.msk.f32.gmra.mxu0 %vm1818_vm3, %v2047_v61 }
 0x447   :  { %6283 = vmatmul.msk.bf16.vlgmr.msra.gmra.mxu2 %vm116_vm0, %v2988_v42 }
 0x448   :  { %4044 = vmatpush.bf16.xpose.msra.mxu2 %v7834_v53 }
 0x44b   :  { %v2943_v49 = vpop.permute.xlu2 %2942 }
 0x44d   :  { %v2048_v27 = vpop.trf.xlu0 }
 0x44e   :  { %6238 = vmatmul.msk.f32.gmra.mxu0 %vm1818_vm3, %v2048_v27  ;;  %v7170_v27 = vld [vmem:[%s13131_s27 + $0x10] sm:$0xff] }
 0x450   :  { %4045 = vmatpush.bf16.xpose.msra.mxu2 %v8228_v45 }
 0x453   :  { %v2945_v20 = vpop.permute.xlu2 %2944 }
 0x454   :  { %6257 = vmatmul.msk.bf16.gmra.mxu3 %vm116_vm0, %v2943_v49 }
 0x455   :  { %v2049_v53 = vpop.trf.xlu0 }
 0x456   :  { %6239 = vmatmul.msk.f32.gmra.mxu0 %vm1818_vm3, %v2049_v53  ;;  %v7171_v53 = vld [vmem:[%s13131_s27 + $0x8] sm:$0xff] }
 0x457   :  { %6284 = vmatmul.msk.bf16.gmra.mxu2 %vm116_vm0, %v2990_v31 }
 0x458   :  { %4046 = vmatpush.bf16.xpose.msra.mxu2 %v8286_v12 }
 0x45d   :  { %v2050_v45 = vpop.trf.xlu0 }
 0x45e   :  { %6240 = vmatmul.msk.f32.gmra.mxu0 %vm1818_vm3, %v2050_v45 }
 0x460   :  { %4047 = vmatpush.bf16.xpose.msra.mxu2 %v8346_v26  ;;  %v7165_v26 = vld [vmem:[%s13131_s27 + $0x38] sm:$0xff] }
 0x464   :  { %6258 = vmatmul.msk.bf16.gmra.mxu3 %vm116_vm0, %v2945_v20 }
 0x465   :  { %v2051_v60 = vpop.trf.xlu0 }
 0x466   :  { %6241 = vmatmul.msk.f32.gmra.mxu0 %vm1818_vm3, %v2051_v60 }
 0x467   :  { %6285 = vmatmul.msk.bf16.gmra.mxu2 %vm116_vm0, %v2992_v52 }
 0x46d   :  { %v2052_v12 = vpop.trf.xlu0 }
 0x46e   :  { %6242 = vmatmul.msk.f32.gmra.mxu0 %vm1818_vm3, %v2052_v12 }
 0x476   :  { %6259 = vmatmul.msk.bf16.vlgmr.msra.gmra.mxu0 %vm116_vm0, %v2988_v42 }
 0x477   :  { %4658 = vmatpush.bf16.xpose.msra.mxu0 %v7870_v34  ;;  %6286 = vmatmul.msk.bf16.gmra.mxu2 %vm116_vm0, %v2994_v63  ;;  %v7166_v34 = vld [vmem:[%s13131_s27 + $0x30] sm:$0xff] }
 0x47f   :  { %4659 = vmatpush.bf16.xpose.msra.mxu0 %v7904_v32  ;;  %v7167_v32 = vld [vmem:[%s13131_s27 + $0x28] sm:$0xff] }
 0x486   :  { %6260 = vmatmul.msk.bf16.gmra.mxu0 %vm116_vm0, %v2990_v31  ;;  %v7169_v31 = vld [vmem:[%s13131_s27 + $0x18] sm:$0xff] }
 0x487   :  { %4660 = vmatpush.bf16.xpose.msra.mxu0 %v7922_v56  ;;  %6301 = vmatmul.msk.bf16.vlgmr.msrb.gmra.mxu2 %vm116_vm0, %v2943_v49  ;;  %v7168_v56 = vld [vmem:[%s13131_s27 + $0x20] sm:$0xff] }
 0x488   :  { %5217 = vmatpush.msrb.mxu2 %v7165_v26 }
 0x48a   :  { %v8588_v42 = vpop.f32.mrf.mxu2  ;;  %5218 = vmatpush.msrb.mxu2 %v7166_v34 }
 0x48b   :  { %13228 = vst [vmem:[#allocation16_spill] sm:$0xff] %v8588_v42 }
 0x48c   :  { %5219 = vmatpush.msrb.mxu2 %v7167_v32 }
 0x48e   :  { %5220 = vmatpush.msrb.mxu2 %v7168_v56  ;;  %v8651_v56 = vld [vmem:[%s12978_s8] ss:$0 sm:$0xff] }
 0x48f   :  { %4661 = vmatpush.bf16.xpose.msra.mxu0 %v7941_v1  ;;  %v7172_v1 = vld [vmem:[%s13131_s27] sm:$0xff] }
 0x490   :  { %5221 = vmatpush.msrb.mxu2 %v7169_v31 }
 0x492   :  { %v8603_v61 = vpop.f32.mrf.mxu2  ;;  %5222 = vmatpush.msrb.mxu2 %v7170_v27 }
 0x493   :  { %13229 = vst [vmem:[#allocation7_spill] sm:$0xff] %v8603_v61 }
 0x494   :  { %5223 = vmatpush.msrb.mxu2 %v7171_v53 }
 0x496   :  { %6261 = vmatmul.msk.bf16.gmra.mxu0 %vm116_vm0, %v2992_v52  ;;  %5224 = vmatpush.msrb.mxu2 %v7172_v1 }
 0x497   :  { %6302 = vmatmul.msk.bf16.gmra.mxu2 %vm116_vm0, %v2945_v20 }
 0x49a   :  { %v8616_v45 = vpop.f32.mrf.mxu2 }
 0x49b   :  { %13230 = vst [vmem:[#allocation18_spill] sm:$0xff] %v8616_v45 }
 0x4a2   :  { %v8618_v60 = vpop.f32.mrf.mxu2 }
 0x4a3   :  { %13231 = vst [vmem:[#allocation6_spill] sm:$0xff] %v8618_v60 }
 0x4a6   :  { %6262 = vmatmul.msk.bf16.gmra.mxu0 %vm116_vm0, %v2994_v63 }
 0x4aa   :  { %v8621_v49 = vpop.f32.mrf.mxu2 }
 0x4ab   :  { %13232 = vst [vmem:[#allocation8_spill] sm:$0xff] %v8621_v49 }
 0x4b2   :  { %v8623_v12 = vpop.f32.mrf.mxu2 }
 0x4b3   :  { %13233 = vst [vmem:[#allocation52_spill] sm:$0xff] %v8623_v12  ;;  %v8625_v26 = vpop.f32.mrf.mxu0  ;;  %v2967_v42 = vpop.f32.mrf.mxu3 }
 0x4b4   :  { %13234 = vst [vmem:[#allocation53_spill] sm:$0xff] %v8625_v26 }
 0x4b6   :  { %6299 = vmatmul.msk.bf16.vlgmr.msrb.gmra.mxu0 %vm116_vm0, %v8553_v0 }
 0x4b7   :  { %4981 = vmatpush.msrb.mxu0 %v13032_v40 }
 0x4b9   :  { %4982 = vmatpush.msrb.mxu0 %v13032_v40 }
 0x4ba   :  { %v8631_v52 = vpop.f32.mrf.mxu2 }
 0x4bb   :  { %13235 = vst [vmem:[#allocation54_spill] sm:$0xff] %v8631_v52  ;;  %v8633_v20 = vpop.f32.mrf.mxu0  ;;  %4983 = vmatpush.msrb.mxu0 %v13032_v40 }
 0x4bc   :  { %13236 = vst [vmem:[#allocation55_spill] sm:$0xff] %v8633_v20 }
 0x4bd   :  { %4984 = vmatpush.msrb.mxu0 %v13032_v40 }
 0x4bf   :  { %4985 = vmatpush.msrb.mxu0 %v13032_v40 }
 0x4c1   :  { %4986 = vmatpush.msrb.mxu0 %v13032_v40 }
 0x4c2   :  { %v8639_v63 = vpop.f32.mrf.mxu2 }
 0x4c3   :  { %13237 = vst [vmem:[#allocation56_spill] sm:$0xff] %v8639_v63  ;;  %v8641_v34 = vpop.f32.mrf.mxu0  ;;  %4987 = vmatpush.msrb.mxu0 %v13032_v40 }
 0x4c4   :  { %13238 = vst [vmem:[#allocation57_spill] sm:$0xff] %v8641_v34 }
 0x4c5   :  { %4988 = vmatpush.msrb.mxu0 %v13032_v40 }
 0x4c6   :  { %6300 = vmatmul.msk.bf16.gmra.mxu0 %vm116_vm0, %v2941_v51 }
 0x4ca   :  { %v3493_v0 = vpop.f32.mrf.mxu2 }
 0x4cb   :  { %v8646_v32 = vpop.f32.mrf.mxu0  ;;  %v3494_v31 = vadd.f32 %v8651_v56, %v3493_v0 }
 0x4cc   :  { %13239 = vst [vmem:[#allocation58_spill] sm:$0xff] %v8646_v32 }
 0x4cd   :  { %v3521_v27 = vmul.f32 1.442695, %v3494_v31  ;;  %vm3513_vm4 = vcmp.gt.f32.partialorder %v3494_v31, 0.0 }
 0x4cf   :  { %6581 = vpow2.f32 %v3521_v27 }
 0x4d2   :  { %v3495_v53 = vpop.f32.mrf.mxu2 }
 0x4d3   :  { %v8654_v1 = vpop.f32.mrf.mxu0  ;;  %v3496_v63 = vadd.f32 %v8651_v56, %v3495_v53 }
 0x4d4   :  { %13240 = vst [vmem:[#allocation59_spill] sm:$0xff] %v8654_v1 }
 0x4d5   :  { %v3523_v40 = vmul.f32 1.442695, %v3496_v63  ;;  %v6582_v51 = vpop.eup %6581  ;;  %vm3514_vm5 = vcmp.gt.f32.partialorder %v3496_v63, 0.0 }
 0x4d6   :  { %v6287_v38 = vadd.f32 -1.0, %v6582_v51 }
 0x4d7   :  { %6583 = vpow2.f32 %v3523_v40 }
 0x4d8   :  { %v3545_v30 = vsel %vm3513_vm4, %v3494_v31, %v6287_v38  ;;  %v2969_v31 = vpop.f32.mrf.mxu3 }
 0x4da   :  { %v3498_v43 = vpop.f32.mrf.mxu2 }
 0x4db   :  { %v8657_v14 = vpop.f32.mrf.mxu0  ;;  %v3499_v52 = vadd.f32 %v8651_v56, %v3498_v43 }
 0x4dc   :  { %13241 = vst [vmem:[#allocation60_spill] sm:$0xff] %v8657_v14 }
 0x4dd   :  { %v6584_v12 = vpop.eup %6583  ;;  %v3525_v0 = vmul.f32 1.442695, %v3499_v52  ;;  %vm3515_vm6 = vcmp.gt.f32.partialorder %v3499_v52, 0.0 }
 0x4de   :  { %v6288_v49 = vadd.f32 -1.0, %v6584_v12 }
 0x4df   :  { %6585 = vpow2.f32 %v3525_v0 }
 0x4e0   :  { %v3546_v27 = vsel %vm3514_vm5, %v3496_v63, %v6288_v49 }
 0x4e1   :  { %v3553_v60 = vpack.c.bf16 %v3546_v27, %v3545_v30 }
 0x4e2   :  { %v3500_v45 = vpop.f32.mrf.mxu2 }
 0x4e3   :  { %v8660_v53 = vpop.f32.mrf.mxu0  ;;  %v3501_v40 = vadd.f32 %v8651_v56, %v3500_v45  ;;  %6295 = vmatmul.msk.bf16.vlgmr.msra.gmra.mxu3 %vm116_vm0, %v3553_v60 }
 0x4e4   :  { %13242 = vst [vmem:[#allocation61_spill] sm:$0xff] %v8660_v53 }
 0x4e5   :  { %v3527_v61 = vmul.f32 1.442695, %v3501_v40  ;;  %v6586_v43 = vpop.eup %6585  ;;  %vm3516_vm7 = vcmp.gt.f32.partialorder %v3501_v40, 0.0 }
 0x4e6   :  { %v6289_v38 = vadd.f32 -1.0, %v6586_v43  ;;  %v8672_v43 = vld [vmem:[%s12974_s4] ss:$0 sm:$0xff] }
 0x4e7   :  { %6587 = vpow2.f32 %v3527_v61 }
 0x4e8   :  { %v3547_v0 = vsel %vm3515_vm6, %v3499_v52, %v6289_v38 }
 0x4ea   :  { %v3503_v51 = vpop.f32.mrf.mxu2 }
 0x4eb   :  { %v8664_v3 = vpop.f32.mrf.mxu0  ;;  %v3504_v12 = vadd.f32 %v8651_v56, %v3503_v51 }
 0x4ec   :  { %13243 = vst [vmem:[#allocation62_spill] sm:$0xff] %v8664_v3 }
 0x4ed   :  { %v6588_v49 = vpop.eup %6587  ;;  %v3529_v63 = vmul.f32 1.442695, %v3504_v12  ;;  %vm3517_vm8 = vcmp.gt.f32.partialorder %v3504_v12, 0.0 }
 0x4ee   :  { %v6290_v30 = vadd.f32 -1.0, %v6588_v49 }
 0x4ef   :  { %6589 = vpow2.f32 %v3529_v63 }
 0x4f0   :  { %v3548_v45 = vsel %vm3516_vm7, %v3501_v40, %v6290_v30  ;;  %v2972_v40 = vpop.f32.mrf.mxu3 }
 0x4f1   :  { %v3554_v27 = vpack.c.bf16 %v3548_v45, %v3547_v0 }
 0x4f2   :  { %v3505_v60 = vpop.f32.mrf.mxu2 }
 0x4f3   :  { %v3016_v4 = vpop.f32.mrf.mxu0  ;;  %v3506_v61 = vadd.f32 %v8651_v56, %v3505_v60  ;;  %6296 = vmatmul.msk.bf16.gmra.mxu3 %vm116_vm0, %v3554_v27 }
 0x4f4   :  { %v3017_v55 = vadd.f32 %v3016_v4, %v2967_v42 }
 0x4f5   :  { %v3531_v41 = vmul.f32 1.442695, %v3506_v61  ;;  %v6590_v52 = vpop.eup %6589  ;;  %vm3518_vm9 = vcmp.gt.f32.partialorder %v3506_v61, 0.0 }
 0x4f6   :  { %v3036_v51 = vadd.f32 %v8672_v43, %v3017_v55  ;;  %v6291_v0 = vadd.f32 -1.0, %v6590_v52 }
 0x4f7   :  { %6591 = vpow2.f32 %v3531_v41 }
 0x4f8   :  { %v3052_v38 = vmul.f32 1.442695, %v3036_v51  ;;  %v3549_v2 = vsel %vm3517_vm8, %v3504_v12, %v6291_v0  ;;  %vm3044_vm10 = vcmp.gt.f32.partialorder %v3036_v51, 0.0 }
 0x4fa   :  { %v3508_v49 = vpop.f32.mrf.mxu2  ;;  %6593 = vpow2.f32 %v3052_v38 }
 0x4fb   :  { %v3018_v30 = vpop.f32.mrf.mxu0  ;;  %v3509_v63 = vadd.f32 %v8651_v56, %v3508_v49 }
 0x4fc   :  { %v3019_v45 = vadd.f32 %v3018_v30, %v2969_v31  ;;  %v2974_v31 = vpop.f32.mrf.mxu3 }
 0x4fd   :  { %v6592_v27 = vpop.eup %6591  ;;  %v3533_v60 = vmul.f32 1.442695, %v3509_v63  ;;  %vm3519_vm12 = vcmp.gt.f32.partialorder %v3509_v63, 0.0 }
 0x4fe   :  { %v6292_v4 = vadd.f32 -1.0, %v6592_v27  ;;  %v3037_v42 = vadd.f32 %v8672_v43, %v3019_v45 }
 0x500   :  { %v3550_v55 = vsel %vm3518_vm9, %v3506_v61, %v6292_v4  ;;  %v3054_v41 = vmul.f32 1.442695, %v3037_v42  ;;  %v6594_v52 = vpop.eup %6593  ;;  %vm3045_vm11 = vcmp.gt.f32.partialorder %v3037_v42, 0.0 }
 0x501   :  { %v3555_v44 = vpack.c.bf16 %v3550_v55, %v3549_v2  ;;  %v6263_v27 = vadd.f32 -1.0, %v6594_v52  ;;  %v13244_v52 = vmov 1.0  }
 0x502   :  { %6595 = vpow2.f32 %v3054_v41  ;;  %v3510_v3 = vpop.f32.mrf.mxu2 }
 0x503   :  { %6597 = vpow2.f32 %v3533_v60  ;;  %v3021_v53 = vpop.f32.mrf.mxu0  ;;  %v3511_v49 = vadd.f32 %v8651_v56, %v3510_v3  ;;  %6297 = vmatmul.msk.bf16.gmra.mxu3 %vm116_vm0, %v3555_v44  ;;  %v3076_v4 = vsel %vm3044_vm10, %v3036_v51, %v6263_v27 }
 0x504   :  { %v3022_v38 = vadd.f32 %v3021_v53, %v2972_v40  ;;  %v2977_v14 = vpop.f32.mrf.mxu3 }
 0x505   :  { %v3535_v30 = vmul.f32 1.442695, %v3511_v49  ;;  %vm3520_vm13 = vcmp.gt.f32.partialorder %v3511_v49, 0.0 }
 0x506   :  { %v3038_v45 = vadd.f32 %v8672_v43, %v3022_v38 }
 0x507   :  { %6599 = vpow2.f32 %v3535_v30 }
 0x508   :  { %v6596_v12 = vpop.eup %6595  ;;  %v3056_v2 = vmul.f32 1.442695, %v3038_v45  ;;  %vm3046_vm14 = vcmp.gt.f32.partialorder %v3038_v45, 0.0 }
 0x509   :  { %v6598_v61 = vpop.eup %6597  ;;  %v6264_v0 = vadd.f32 -1.0, %v6596_v12 }
 0x50a   :  { %v6293_v56 = vadd.f32 -1.0, %v6598_v61  ;;  %6601 = vpow2.f32 %v3056_v2 }
 0x50b   :  { %v3077_v60 = vsel %vm3045_vm11, %v3037_v42, %v6264_v0  ;;  %v3023_v55 = vpop.f32.mrf.mxu0 }
 0x50c   :  { %v3084_v3 = vpack.c.bf16 %v3077_v60, %v3076_v4  ;;  %v3024_v44 = vadd.f32 %v3023_v55, %v2974_v31  ;;  %v3551_v38 = vsel %vm3519_vm12, %v3509_v63, %v6293_v56  ;;  %v2979_v2 = vpop.f32.mrf.mxu3 }
 0x50d   :  { %v6600_v41 = vpop.eup %6599 }
 0x50e   :  { %v6294_v53 = vadd.f32 -1.0, %v6600_v41  ;;  %v3039_v40 = vadd.f32 %v8672_v43, %v3024_v44  ;;  %6271 = vmatmul.msk.bf16.vlgmr.msra.gmra.mxu1 %vm116_vm0, %v3084_v3 }
 0x50f   :  { %6353 = vmatpush.msra.mxu1 %v13244_v52 }
 0x510   :  { %v3552_v30 = vsel %vm3520_vm13, %v3511_v49, %v6294_v53  ;;  %v3058_v51 = vmul.f32 1.442695, %v3039_v40  ;;  %v6602_v27 = vpop.eup %6601  ;;  %vm3047_vm15 = vcmp.gt.f32.partialorder %v3039_v40, 0.0 }
 0x511   :  { %v3556_v42 = vpack.c.bf16 %v3552_v30, %v3551_v38  ;;  %6354 = vmatpush.msra.mxu1 %v13244_v52  ;;  %v6265_v0 = vadd.f32 -1.0, %v6602_v27 }
 0x512   :  { %6603 = vpow2.f32 %v3058_v51 }
 0x513   :  { %v3026_v31 = vpop.f32.mrf.mxu0  ;;  %6298 = vmatmul.msk.bf16.gmra.mxu3 %vm116_vm0, %v3556_v42  ;;  %6355 = vmatpush.msra.mxu1 %v13244_v52  ;;  %v3078_v60 = vsel %vm3046_vm14, %v3038_v45, %v6265_v0 }
 0x514   :  { %v3027_v12 = vadd.f32 %v3026_v31, %v2977_v14  ;;  %v2982_v53 = vpop.f32.mrf.mxu3 }
 0x515   :  { %6356 = vmatpush.msra.mxu1 %v13244_v52 }
 0x516   :  { %v3040_v61 = vadd.f32 %v8672_v43, %v3027_v12 }
 0x517   :  { %6357 = vmatpush.msra.mxu1 %v13244_v52 }
 0x518   :  { %v6604_v63 = vpop.eup %6603  ;;  %v3060_v4 = vmul.f32 1.442695, %v3040_v61  ;;  %vm3048_vm1 = vcmp.gt.f32.partialorder %v3040_v61, 0.0 }
 0x519   :  { %v6266_v49 = vadd.f32 -1.0, %v6604_v63  ;;  %6358 = vmatpush.msra.mxu1 %v13244_v52 }
 0x51a   :  { %6605 = vpow2.f32 %v3060_v4 }
 0x51b   :  { %v3079_v55 = vsel %vm3047_vm15, %v3039_v40, %v6266_v49  ;;  %v3028_v3 = vpop.f32.mrf.mxu0  ;;  %6359 = vmatpush.msra.mxu1 %v13244_v52 }
 0x51c   :  { %v3029_v14 = vadd.f32 %v3028_v3, %v2979_v2  ;;  %v3085_v56 = vpack.c.bf16 %v3079_v55, %v3078_v60  ;;  %v2984_v2 = vpop.f32.mrf.mxu3 }
 0x51d   :  { %6360 = vmatpush.msra.mxu1 %v13244_v52 }
 0x51e   :  { %v3041_v44 = vadd.f32 %v8672_v43, %v3029_v14  ;;  %6272 = vmatmul.msk.bf16.gmra.mxu1 %vm116_vm0, %v3085_v56  ;;  %v7175_v56 = vld [vmem:[%s12982_s12] ss:$0 sm:$0xff] }
 0x520   :  { %v3062_v41 = vmul.f32 1.442695, %v3041_v44  ;;  %v6606_v30 = vpop.eup %6605  ;;  %vm3049_vm2 = vcmp.gt.f32.partialorder %v3041_v44, 0.0 }
 0x521   :  { %v6267_v40 = vadd.f32 -1.0, %v6606_v30 }
 0x522   :  { %6607 = vpow2.f32 %v3062_v41 }
 0x523   :  { %v3031_v38 = vpop.f32.mrf.mxu0  ;;  %v3080_v12 = vsel %vm3048_vm1, %v3040_v61, %v6267_v40 }
 0x524   :  { %v3032_v51 = vadd.f32 %v3031_v38, %v2982_v53 }
 0x526   :  { %v3042_v45 = vadd.f32 %v8672_v43, %v3032_v51 }
 0x528   :  { %v6608_v42 = vpop.eup %6607  ;;  %v3064_v27 = vmul.f32 1.442695, %v3042_v45  ;;  %vm3050_vm4 = vcmp.gt.f32.partialorder %v3042_v45, 0.0 }
 0x529   :  { %v6268_v31 = vadd.f32 -1.0, %v6608_v42 }
 0x52a   :  { %6609 = vpow2.f32 %v3064_v27  ;;  %v3745_v27 = vpop.f32.mrf.mxu2 }
 0x52b   :  { %v3081_v0 = vsel %vm3049_vm2, %v3041_v44, %v6268_v31  ;;  %v3033_v63 = vpop.f32.mrf.mxu0 }
 0x52c   :  { %v3034_v49 = vadd.f32 %v3033_v63, %v2984_v2  ;;  %v3086_v4 = vpack.c.bf16 %v3081_v0, %v3080_v12 }
 0x52e   :  { %v3043_v60 = vadd.f32 %v8672_v43, %v3034_v49  ;;  %6273 = vmatmul.msk.bf16.gmra.mxu1 %vm116_vm0, %v3086_v4 }
 0x530   :  { %v3066_v55 = vmul.f32 1.442695, %v3043_v60  ;;  %v6610_v14 = vpop.eup %6609  ;;  %vm3051_vm5 = vcmp.gt.f32.partialorder %v3043_v60, 0.0 }
 0x531   :  { %v6269_v61 = vadd.f32 -1.0, %v6610_v14 }
 0x532   :  { %6611 = vpow2.f32 %v3066_v55 }
 0x533   :  { %v3735_v3 = vpop.f32.mrf.mxu0  ;;  %v3082_v30 = vsel %vm3050_vm4, %v3042_v45, %v6269_v61 }
 0x534   :  { %v3736_v41 = vadd.f32 %v7175_v56, %v3735_v3 }
 0x536   :  { %v3763_v38 = vmul.f32 1.442695, %v3736_v41  ;;  %vm3755_vm7 = vcmp.gt.f32.partialorder %v3736_v41, 0.0 }
 0x538   :  { %v6612_v44 = vpop.eup %6611  ;;  %6613 = vpow2.f32 %v3763_v38 }
 0x539   :  { %v6270_v53 = vadd.f32 -1.0, %v6612_v44  ;;  %v3747_v44 = vpop.f32.mrf.mxu2 }
 0x53b   :  { %v3083_v51 = vsel %vm3051_vm5, %v3043_v60, %v6270_v53  ;;  %v3737_v43 = vpop.f32.mrf.mxu0 }
 0x53c   :  { %v3738_v40 = vadd.f32 %v7175_v56, %v3737_v43  ;;  %v3087_v42 = vpack.c.bf16 %v3083_v51, %v3082_v30  ;;  %v3748_v30 = vadd.f32 %v7175_v56, %v3747_v44  ;;  %v3746_v43 = vadd.f32 %v7175_v56, %v3745_v27 }
 0x53e   :  { %v3765_v31 = vmul.f32 1.442695, %v3738_v40  ;;  %6274 = vmatmul.msk.bf16.gmra.mxu1 %vm116_vm0, %v3087_v42  ;;  %v6614_v0 = vpop.eup %6613  ;;  %vm3756_vm6 = vcmp.gt.f32.partialorder %v3738_v40, 0.0  ;;  %vm3760_vm10 = vcmp.gt.f32.partialorder %v3748_v30, 0.0  ;;  %vm3759_vm11 = vcmp.gt.f32.partialorder %v3746_v43, 0.0 }
 0x53f   :  { %v6303_v49 = vadd.f32 -1.0, %v6614_v0 }
 0x540   :  { %6615 = vpow2.f32 %v3765_v31 }
 0x541   :  { %v3787_v60 = vsel %vm3755_vm7, %v3736_v41, %v6303_v49  ;;  %v3750_v42 = vpop.f32.mrf.mxu2  ;;  %v3771_v41 = vmul.f32 1.442695, %v3746_v43 }
 0x542   :  { %v3751_v27 = vadd.f32 %v7175_v56, %v3750_v42 }
 0x543   :  { %v3740_v12 = vpop.f32.mrf.mxu0 }
 0x544   :  { %v3741_v63 = vadd.f32 %v7175_v56, %v3740_v12  ;;  %vm3761_vm13 = vcmp.gt.f32.partialorder %v3751_v27, 0.0 }
 0x546   :  { %v6616_v2 = vpop.eup %6615  ;;  %v3767_v45 = vmul.f32 1.442695, %v3741_v63  ;;  %vm3757_vm9 = vcmp.gt.f32.partialorder %v3741_v63, 0.0 }
 0x547   :  { %v6304_v4 = vadd.f32 -1.0, %v6616_v2 }
 0x548   :  { %6617 = vpow2.f32 %v3767_v45 }
 0x549   :  { %v3788_v55 = vsel %vm3756_vm6, %v3738_v40, %v6304_v4  ;;  %v3773_v40 = vmul.f32 1.442695, %v3748_v30  ;;  %v3752_v4 = vpop.f32.mrf.mxu2 }
 0x54a   :  { %v3795_v14 = vpack.c.bf16 %v3788_v55, %v3787_v60  ;;  %v3753_v60 = vadd.f32 %v7175_v56, %v3752_v4 }
 0x54b   :  { %v3742_v3 = vpop.f32.mrf.mxu0 }
 0x54c   :  { %v3743_v61 = vadd.f32 %v7175_v56, %v3742_v3  ;;  %vm3762_vm12 = vcmp.gt.f32.partialorder %v3753_v60, 0.0 }
 0x54e   :  { %v3769_v53 = vmul.f32 1.442695, %v3743_v61  ;;  %6311 = vmatmul.msk.bf16.vlgmr.msrb.gmra.mxu1 %vm116_vm0, %v3795_v14  ;;  %v6618_v38 = vpop.eup %6617  ;;  %vm3758_vm8 = vcmp.gt.f32.partialorder %v3743_v61, 0.0 }
 0x54f   :  { %v6305_v31 = vadd.f32 -1.0, %v6618_v38 }
 0x550   :  { %6619 = vpow2.f32 %v3769_v53  ;;  %v3777_v53 = vmul.f32 1.442695, %v3753_v60 }
 0x551   :  { %v3789_v2 = vsel %vm3757_vm9, %v3741_v63, %v6305_v31  ;;  %6621 = vpow2.f32 %v3773_v40  ;;  %v3775_v31 = vmul.f32 1.442695, %v3751_v27 }
 0x552   :  { %6623 = vpow2.f32 %v3771_v41 }
 0x553   :  { %6625 = vpow2.f32 %v3777_v53 }
 0x554   :  { %6627 = vpow2.f32 %v3775_v31 }
 0x556   :  { %v6620_v51 = vpop.eup %6619 }
 0x557   :  { %v6306_v12 = vadd.f32 -1.0, %v6620_v51  ;;  %v6622_v55 = vpop.eup %6621 }
 0x558   :  { %v6624_v45 = vpop.eup %6623  ;;  %v6308_v3 = vadd.f32 -1.0, %v6622_v55 }
 0x559   :  { %v3790_v0 = vsel %vm3758_vm8, %v3743_v61, %v6306_v12  ;;  %v6307_v44 = vadd.f32 -1.0, %v6624_v45  ;;  %v8706_v61 = vld [vmem:[%s12980_s10] ss:$0 sm:$0xff]  ;;  %v6626_v41 = vpop.eup %6625 }
 0x55a   :  { %v3796_v49 = vpack.c.bf16 %v3790_v0, %v3789_v2  ;;  %v3792_v38 = vsel %vm3760_vm10, %v3748_v30, %v6308_v3  ;;  %v8718_v0 = vld [vmem:[%s12976_s6] ss:$0 sm:$0xff]  ;;  %v6628_v4 = vpop.eup %6627  ;;  %v6310_v55 = vadd.f32 -1.0, %v6626_v41 }
 0x55b   :  { %v3791_v12 = vsel %vm3759_vm11, %v3746_v43, %v6307_v44  ;;  %v8727_v2 = vadd.f32 %v8718_v0, %v7901_v50  ;;  %v6309_v3 = vadd.f32 -1.0, %v6628_v4  ;;  %v8739_v50 = vadd.f32 %v8718_v0, %v7952_v23 }
 0x55c   :  { %v3797_v42 = vpack.c.bf16 %v3792_v38, %v3791_v12  ;;  %v3794_v53 = vsel %vm3762_vm12, %v3753_v60, %v6310_v55  ;;  %v8871_v21 = vadd.f32 %v8718_v0, %v7938_v18 }
 0x55d   :  { %v839_v44 = vmul.f32 %v8727_v2, %v8727_v2 }
 0x55e   :  { %6312 = vmatmul.msk.bf16.gmra.mxu1 %vm116_vm0, %v3796_v49 }
 0x55f   :  { %v847_v12 = vsel %vm116_vm0, %v839_v44, 0.0 }
 0x566   :  { %v3578_v14 = vpop.f32.mrf.mxu3 }
 0x567   :  { %v8709_v63 = vadd.f32 %v8706_v61, %v3578_v14 }
 0x569   :  { %v3598_v51 = vmul.f32 %v8709_v63, %v8709_v63 }
 0x56b   :  { %v3606_v56 = vsel %vm116_vm0, %v3598_v51, 0.0  ;;  %v3793_v51 = vsel %vm3761_vm13, %v3751_v27, %v6309_v3  ;;  %v8753_v27 = vadd.f32 %v8718_v0, %v7966_v11 }
 0x56c   :  { %3607 = vadd.xlane.f32.xlu2 %v3606_v56  ;;  %v3798_v56 = vpack.c.bf16 %v3794_v53, %v3793_v51 }
 0x56d   :  { %v845_v55 = vmul.f32 %v8753_v27, %v8753_v27 }
 0x56e   :  { %6313 = vmatmul.msk.bf16.gmra.mxu1 %vm116_vm0, %v3797_v42  ;;  %v3580_v40 = vpop.f32.mrf.mxu3 }
 0x56f   :  { %v8721_v30 = vadd.f32 %v8706_v61, %v3580_v40  ;;  %v842_v40 = vmul.f32 %v8739_v50, %v8739_v50  ;;  %v865_v44 = vsel %vm116_vm0, %v845_v55, 0.0 }
 0x571   :  { %v3599_v43 = vmul.f32 %v8721_v30, %v8721_v30  ;;  %v856_v41 = vsel %vm116_vm0, %v842_v40, 0.0 }
 0x573   :  { %v3609_v49 = vsel %vm116_vm0, %v3599_v43, 0.0 }
 0x574   :  { %3610 = vadd.xlane.f32.xlu0 %v3609_v49 }
 0x576   :  { %v3583_v45 = vpop.f32.mrf.mxu3 }
 0x577   :  { %v8731_v14 = vadd.f32 %v8706_v61, %v3583_v45 }
 0x579   :  { %v3600_v38 = vmul.f32 %v8731_v14, %v8731_v14 }
 0x57b   :  { %v3612_v31 = vsel %vm116_vm0, %v3600_v38, 0.0 }
 0x57c   :  { %3613 = vadd.xlane.f32.xlu1 %v3612_v31  ;;  %848 = vadd.xlane.f32.xlu0 %v847_v12 }
 0x57e   :  { %6314 = vmatmul.msk.bf16.gmra.mxu1 %vm116_vm0, %v3798_v56  ;;  %v3585_v42 = vpop.f32.mrf.mxu3 }
 0x57f   :  { %v8745_v60 = vadd.f32 %v8706_v61, %v3585_v42 }
 0x581   :  { %v3601_v23 = vmul.f32 %v8745_v60, %v8745_v60 }
 0x583   :  { %v3615_v43 = vsel %vm116_vm0, %v3601_v23, 0.0 }
 0x584   :  { %3616 = vadd.xlane.f32.xlu2 %v3615_v43  ;;  %857 = vadd.xlane.f32.xlu0 %v856_v41 }
 0x586   :  { %v3588_v49 = vpop.f32.mrf.mxu3 }
 0x587   :  { %v8758_v4 = vadd.f32 %v8706_v61, %v3588_v49 }
 0x589   :  { %v3602_v45 = vmul.f32 %v8758_v4, %v8758_v4 }
 0x58b   :  { %v8764_v3 = vpop.f32.mrf.mxu1  ;;  %v3618_v11 = vsel %vm116_vm0, %v3602_v45, 0.0 }
 0x58c   :  { %13245 = vst [vmem:[#allocation63_spill] sm:$0xff] %v8764_v3  ;;  %3619 = vadd.xlane.f32.xlu2 %v3618_v11  ;;  %866 = vadd.xlane.f32.xlu0 %v865_v44 }
 0x58e   :  { %v3590_v53 = vpop.f32.mrf.mxu3 }
 0x58f   :  { %v8769_v38 = vadd.f32 %v8706_v61, %v3590_v53 }
 0x591   :  { %v3603_v51 = vmul.f32 %v8769_v38, %v8769_v38 }
 0x593   :  { %v8773_v31 = vpop.f32.mrf.mxu1  ;;  %v3621_v12 = vsel %vm116_vm0, %v3603_v51, 0.0 }
 0x594   :  { %13246 = vst [vmem:[#allocation64_spill] sm:$0xff] %v8773_v31  ;;  %3622 = vadd.xlane.f32.xlu2 %v3621_v12 }
 0x596   :  { %v3593_v56 = vpop.f32.mrf.mxu3 }
 0x597   :  { %v8777_v42 = vadd.f32 %v8706_v61, %v3593_v56 }
 0x599   :  { %v3604_v40 = vmul.f32 %v8777_v42, %v8777_v42 }
 0x59b   :  { %v8781_v23 = vpop.f32.mrf.mxu1  ;;  %v3624_v43 = vsel %vm116_vm0, %v3604_v40, 0.0 }
 0x59c   :  { %13247 = vst [vmem:[#allocation65_spill] sm:$0xff] %v8781_v23  ;;  %3625 = vadd.xlane.f32.xlu2 %v3624_v43 }
 0x59e   :  { %v3595_v41 = vpop.f32.mrf.mxu3 }
 0x59f   :  { %v8785_v49 = vadd.f32 %v8706_v61, %v3595_v41  ;;  %v8803_v61 = vld [vmem:[%s12984_s14] ss:$0 sm:$0xff] }
 0x5a1   :  { %v3605_v55 = vmul.f32 %v8785_v49, %v8785_v49 }
 0x5a3   :  { %v8789_v45 = vpop.f32.mrf.mxu1  ;;  %v3627_v11 = vsel %vm116_vm0, %v3605_v55, 0.0 }
 0x5a4   :  { %13248 = vst [vmem:[#allocation66_spill] sm:$0xff] %v8789_v45  ;;  %3628 = vadd.xlane.f32.xlu2 %v3627_v11 }
 0x5ab   :  { %v8792_v44 = vpop.f32.mrf.mxu1 }
 0x5ac   :  { %13249 = vst [vmem:[#allocation67_spill] sm:$0xff] %v8792_v44 }
 0x5b3   :  { %v8794_v53 = vpop.f32.mrf.mxu1 }
 0x5b4   :  { %13250 = vst [vmem:[#allocation68_spill] sm:$0xff] %v8794_v53 }
 0x5bb   :  { %v8796_v51 = vpop.f32.mrf.mxu1 }
 0x5bc   :  { %13251 = vst [vmem:[#allocation69_spill] sm:$0xff] %v8796_v51 }
 0x5c3   :  { %v8798_v12 = vpop.f32.mrf.mxu1 }
 0x5c4   :  { %13252 = vst [vmem:[#allocation70_spill] sm:$0xff] %v8798_v12 }
 0x5cb   :  { %v3820_v56 = vpop.f32.mrf.mxu1 }
 0x5cc   :  { %v8806_v40 = vadd.f32 %v8803_v61, %v3820_v56  ;;  %v8820_v56 = vld [vmem:[%s12972_s2 + $0x8] sm:$0xff] }
 0x5ce   :  { %v3840_v43 = vmul.f32 %v8806_v40, %v8806_v40 }
 0x5d0   :  { %v3848_v41 = vsel %vm116_vm0, %v3840_v43, 0.0  ;;  %v968_v43 = vmul.f32 %v8820_v56, %v8820_v56 }
 0x5d1   :  { %3849 = vadd.xlane.f32.xlu2 %v3848_v41 }
 0x5d3   :  { %v3822_v55 = vpop.f32.mrf.mxu1 }
 0x5d4   :  { %v8812_v11 = vadd.f32 %v8803_v61, %v3822_v55  ;;  %v978_v55 = vsel %vm116_vm0, %v968_v43, 0.0 }
 0x5d5   :  { %979 = vadd.xlane.f32.xlu0 %v978_v55 }
 0x5d6   :  { %v3841_v53 = vmul.f32 %v8812_v11, %v8812_v11 }
 0x5d8   :  { %v3851_v44 = vsel %vm116_vm0, %v3841_v53, 0.0 }
 0x5d9   :  { %3852 = vadd.xlane.f32.xlu2 %v3851_v44 }
 0x5db   :  { %v3825_v23 = vpop.f32.mrf.mxu1 }
 0x5dc   :  { %v8825_v41 = vadd.f32 %v8803_v61, %v3825_v23 }
 0x5de   :  { %v3842_v3 = vmul.f32 %v8825_v41, %v8825_v41 }
 0x5df   :  { %v3608_v53 = vpop.xlane.xlu2 %3607 }
 0x5e0   :  { %v3630_v44 = vadd.f32 1e-12, %v3608_v53  ;;  %v3854_v12 = vsel %vm116_vm0, %v3842_v3, 0.0  ;;  %v8840_v3 = vld [vmem:[%s12972_s2 + $0x20] sm:$0xff] }
 0x5e1   :  { %3855 = vadd.xlane.f32.xlu2 %v3854_v12 }
 0x5e2   :  { %6629 = vrsqrt.f32 %v3630_v44  ;;  %vm3644_vm15 = vweird.f32 %v3630_v44 }
 0x5e3   :  { %v3827_v45 = vpop.f32.mrf.mxu1 }
 0x5e4   :  { %v8832_v31 = vadd.f32 %v8803_v61, %v3827_v45  ;;  %v971_v45 = vmul.f32 %v8840_v3, %v8840_v3 }
 0x5e6   :  { %v3843_v23 = vmul.f32 %v8832_v31, %v8832_v31 }
 0x5e7   :  { %v3611_v52 = vpop.xlane.xlu0 %3610 }
 0x5e8   :  { %v6630_v51 = vpop.eup %6629  ;;  %v3631_v43 = vadd.f32 1e-12, %v3611_v52  ;;  %v3857_v1 = vsel %vm116_vm0, %v3843_v23, 0.0  ;;  %v987_v52 = vsel %vm116_vm0, %v971_v45, 0.0 }
 0x5e9   :  { %v3639_v32 = vmul.f32 %v6630_v51, %v3630_v44  ;;  %3858 = vadd.xlane.f32.xlu2 %v3857_v1  ;;  %988 = vadd.xlane.f32.xlu0 %v987_v52  ;;  %vm3645_vm14 = vweird.f32 %v6630_v51 }
 0x5ea   :  { %6631 = vrsqrt.f32 %v3631_v43  ;;  %vm3646_vm2 = vmor %vm3644_vm15, %vm3645_vm14  ;;  %vm3654_vm4 = vweird.f32 %v3631_v43 }
 0x5eb   :  { %v3640_v12 = vmul.f32 %v6630_v51, %v3639_v32  ;;  %v3830_v55 = vpop.f32.mrf.mxu1 }
 0x5ec   :  { %v8845_v53 = vadd.f32 %v8803_v61, %v3830_v55 }
 0x5ed   :  { %v3641_v34 = vmul.f32 0.5, %v3640_v12  ;;  %v8857_v12 = vld [vmem:[%s12972_s2 + $0x38] sm:$0xff] }
 0x5ee   :  { %v3844_v1 = vmul.f32 %v8845_v53, %v8845_v53  ;;  %v974_v52 = vmul.f32 %v8857_v12, %v8857_v12 }
 0x5ef   :  { %v3614_v23 = vpop.xlane.xlu1 %3613  ;;  %v3642_v37 = vsub.f32 1.5, %v3641_v34 }
 0x5f0   :  { %v6632_v20 = vpop.eup %6631  ;;  %v8850_v26 = vadd.f32 1e-12, %v3614_v23  ;;  %v3860_v32 = vsel %vm116_vm0, %v3844_v1, 0.0  ;;  %v996_v1 = vsel %vm116_vm0, %v974_v52, 0.0 }
 0x5f1   :  { %v3649_v7 = vmul.f32 %v6632_v20, %v3631_v43  ;;  %3861 = vadd.xlane.f32.xlu2 %v3860_v32  ;;  %v3643_v6 = vmul.f32 %v6630_v51, %v3642_v37  ;;  %997 = vadd.xlane.f32.xlu0 %v996_v1  ;;  %vm3655_vm1 = vweird.f32 %v6632_v20 }
 0x5f2   :  { %6633 = vrsqrt.f32 %v8850_v26  ;;  %vm3656_vm5 = vmor %vm3654_vm4, %vm3655_vm1  ;;  %vm3664_vm7 = vweird.f32 %v8850_v26 }
 0x5f3   :  { %v3650_v55 = vmul.f32 %v6632_v20, %v3649_v7  ;;  %v3832_v45 = vpop.f32.mrf.mxu1 }
 0x5f4   :  { %v8862_v23 = vadd.f32 %v8803_v61, %v3832_v45  ;;  %v3647_v45 = vsel %vm3646_vm2, %v6630_v51, %v3643_v6 }
 0x5f5   :  { %v3651_v34 = vmul.f32 0.5, %v3650_v55  ;;  %v8878_v18 = vmul.f32 %v3647_v45, %v8709_v63  ;;  %v8894_v63 = vadd.f32 %v8718_v0, %v7919_v13 }
 0x5f6   :  { %v3845_v32 = vmul.f32 %v8862_v23, %v8862_v23 }
 0x5f7   :  { %v3652_v62 = vsub.f32 1.5, %v3651_v34  ;;  %v3617_v7 = vpop.xlane.xlu2 %3616  ;;  %13253 = vst [vmem:[#allocation71_spill] sm:$0xff] %v8878_v18 }
 0x5f8   :  { %v8867_v16 = vpop.eup %6633  ;;  %v3633_v37 = vadd.f32 1e-12, %v3617_v7  ;;  %v3863_v55 = vsel %vm116_vm0, %v3845_v32, 0.0 }
 0x5f9   :  { %v3653_v52 = vmul.f32 %v6632_v20, %v3652_v62  ;;  %v3659_v1 = vmul.f32 %v8867_v16, %v8850_v26  ;;  %3864 = vadd.xlane.f32.xlu2 %v3863_v55  ;;  %v841_v62 = vmul.f32 %v8871_v21, %v8871_v21  ;;  %vm3665_vm6 = vweird.f32 %v8867_v16 }
 0x5fa   :  { %6635 = vrsqrt.f32 %v3633_v37  ;;  %vm3666_vm9 = vmor %vm3664_vm7, %vm3665_vm6  ;;  %vm3674_vm10 = vweird.f32 %v3633_v37 }
 0x5fb   :  { %v3657_v44 = vsel %vm3656_vm5, %v6632_v20, %v3653_v52  ;;  %v3660_v34 = vmul.f32 %v8867_v16, %v3659_v1  ;;  %v3835_v36 = vpop.f32.mrf.mxu1  ;;  %v853_v52 = vsel %vm116_vm0, %v841_v62, 0.0 }
 0x5fc   :  { %v8881_v7 = vmul.f32 %v3657_v44, %v8721_v30  ;;  %v8884_v6 = vadd.f32 %v8803_v61, %v3835_v36  ;;  %v8898_v36 = vadd.f32 %v8718_v0, %v7959_v24  ;;  %v840_v24 = vmul.f32 %v8894_v63, %v8894_v63 }
 0x5fd   :  { %v3661_v51 = vmul.f32 0.5, %v3660_v34 }
 0x5fe   :  { %13254 = vst [vmem:[#allocation72_spill] sm:$0xff] %v8881_v7  ;;  %v4024_v43 = vpack.c.bf16 %v8881_v7, %v8878_v18  ;;  %v3846_v20 = vmul.f32 %v8884_v6, %v8884_v6  ;;  %v844_v34 = vmul.f32 %v8898_v36, %v8898_v36  ;;  %v850_v26 = vsel %vm116_vm0, %v840_v24, 0.0 }
 0x5ff   :  { %13255 = vst [vmem:[#allocation73_spill] sm:$0xff] %v8884_v6  ;;  %v3620_v32 = vpop.xlane.xlu2 %3619  ;;  %v3662_v1 = vsub.f32 1.5, %v3661_v51 }
 0x600   :  { %v6636_v30 = vpop.eup %6635  ;;  %v8900_v55 = vadd.f32 1e-12, %v3620_v32  ;;  %6315 = vmatmul.msk.bf16.vlgmr.msra.gmra.mxu2 %vm116_vm0, %v4024_v43  ;;  %v3866_v45 = vsel %vm116_vm0, %v3846_v20, 0.0  ;;  %v8916_v20 = vld [vmem:[%s12972_s2] sm:$0xff] }
 0x601   :  { %v3669_v44 = vmul.f32 %v6636_v30, %v3633_v37  ;;  %3867 = vadd.xlane.f32.xlu1 %v3866_v45  ;;  %854 = vadd.xlane.f32.xlu2 %v853_v52  ;;  %v3663_v32 = vmul.f32 %v8867_v16, %v3662_v1  ;;  %vm3675_vm8 = vweird.f32 %v6636_v30  ;;  %v8922_v52 = vadd.f32 %v8718_v0, %v7955_v35 }
 0x602   :  { %6637 = vrsqrt.f32 %v8900_v55  ;;  %vm3676_vm11 = vmor %vm3674_vm10, %vm3675_vm8  ;;  %v967_v35 = vmul.f32 %v8916_v20, %v8916_v20  ;;  %vm3684_vm13 = vweird.f32 %v8900_v55 }
 0x603   :  { %v3670_v13 = vmul.f32 %v6636_v30, %v3669_v44  ;;  %v862_v44 = vsel %vm116_vm0, %v844_v34, 0.0  ;;  %v843_v37 = vmul.f32 %v8922_v52, %v8922_v52 }
 0x605   :  { %v3671_v43 = vmul.f32 0.5, %v3670_v13  ;;  %v3667_v13 = vsel %vm3666_vm9, %v8867_v16, %v3663_v32 }
 0x606   :  { %v8934_v24 = vmul.f32 %v3667_v13, %v8731_v14 }
 0x607   :  { %v3672_v62 = vsub.f32 1.5, %v3671_v43  ;;  %v3623_v51 = vpop.xlane.xlu2 %3622 }
 0x608   :  { %v8918_v45 = vpop.eup %6637  ;;  %v3635_v1 = vadd.f32 1e-12, %v3623_v51  ;;  %13256 = vst [vmem:[#allocation74_spill] sm:$0xff] %v8934_v24 }
 0x609   :  { %v3673_v43 = vmul.f32 %v6636_v30, %v3672_v62  ;;  %v3679_v18 = vmul.f32 %v8918_v45, %v8900_v55  ;;  %863 = vadd.xlane.f32.xlu2 %v862_v44  ;;  %851 = vadd.xlane.f32.xlu1 %v850_v26  ;;  %v975_v44 = vsel %vm116_vm0, %v967_v35, 0.0  ;;  %vm3685_vm12 = vweird.f32 %v8918_v45 }
 0x60a   :  { %6639 = vrsqrt.f32 %v3635_v1  ;;  %vm3686_vm15 = vmor %vm3684_vm13, %vm3685_vm12  ;;  %vm3694_vm1 = vweird.f32 %v3635_v1 }
 0x60b   :  { %v3677_v51 = vsel %vm3676_vm11, %v6636_v30, %v3673_v43  ;;  %v3680_v34 = vmul.f32 %v8918_v45, %v3679_v18  ;;  %v8947_v18 = vld [vmem:[%s12972_s2 + $0x18] sm:$0xff]  ;;  %v13258_v30 = vld [vmem:[#allocation29_spill] sm:$0xff]  ;;  %v859_v43 = vsel %vm116_vm0, %v843_v37, 0.0 }
 0x60c   :  { %v8937_v16 = vmul.f32 %v3677_v51, %v8745_v60  ;;  %v8951_v60 = vadd.f32 %v8718_v0, %v13258_v30  ;;  %v970_v35 = vmul.f32 %v8947_v18, %v8947_v18  ;;  %v8971_v30 = vld [vmem:[%s12972_s2 + $0x10] sm:$0xff] }
 0x60d   :  { %v3681_v32 = vmul.f32 0.5, %v3680_v34  ;;  %v969_v7 = vmul.f32 %v8971_v30, %v8971_v30 }
 0x60e   :  { %13257 = vst [vmem:[#allocation75_spill] sm:$0xff] %v8937_v16  ;;  %v4025_v62 = vpack.c.bf16 %v8937_v16, %v8934_v24  ;;  %v846_v16 = vmul.f32 %v8951_v60, %v8951_v60 }
 0x60f   :  { %v3626_v26 = vpop.xlane.xlu2 %3625  ;;  %v3682_v51 = vsub.f32 1.5, %v3681_v32 }
 0x610   :  { %v6640_v14 = vpop.eup %6639  ;;  %v3636_v13 = vadd.f32 1e-12, %v3626_v26  ;;  %6316 = vmatmul.msk.bf16.gmra.mxu2 %vm116_vm0, %v4025_v62  ;;  %v984_v62 = vsel %vm116_vm0, %v970_v35, 0.0 }
 0x611   :  { %v3689_v34 = vmul.f32 %v6640_v14, %v3635_v1  ;;  %976 = vadd.xlane.f32.xlu2 %v975_v44  ;;  %860 = vadd.xlane.f32.xlu1 %v859_v43  ;;  %v3683_v0 = vmul.f32 %v8918_v45, %v3682_v51  ;;  %vm3695_vm14 = vweird.f32 %v6640_v14  ;;  %v8966_v44 = vld [vmem:[%s12972_s2 + $0x30] sm:$0xff]  ;;  %v868_v51 = vsel %vm116_vm0, %v846_v16, 0.0 }
 0x612   :  { %6641 = vrsqrt.f32 %v3636_v13  ;;  %vm3696_vm2 = vmor %vm3694_vm1, %vm3695_vm14  ;;  %vm3704_vm5 = vweird.f32 %v3636_v13 }
 0x613   :  { %v3690_v24 = vmul.f32 %v6640_v14, %v3689_v34  ;;  %v3687_v55 = vsel %vm3686_vm15, %v8918_v45, %v3683_v0 }
 0x615   :  { %v3691_v26 = vmul.f32 0.5, %v3690_v24 }
 0x617   :  { %v3692_v37 = vsub.f32 1.5, %v3691_v26  ;;  %v3629_v32 = vpop.xlane.xlu2 %3628  ;;  %v973_v26 = vmul.f32 %v8966_v44, %v8966_v44 }
 0x618   :  { %v6642_v43 = vpop.eup %6641  ;;  %v3637_v24 = vadd.f32 1e-12, %v3629_v32  ;;  %v8980_v32 = vmul.f32 %v3687_v55, %v8758_v4 }
 0x619   :  { %v3693_v34 = vmul.f32 %v6640_v14, %v3692_v37  ;;  %v3699_v35 = vmul.f32 %v6642_v43, %v3636_v13  ;;  %985 = vadd.xlane.f32.xlu2 %v984_v62  ;;  %869 = vadd.xlane.f32.xlu1 %v868_v51  ;;  %v993_v0 = vsel %vm116_vm0, %v973_v26, 0.0  ;;  %v981_v62 = vsel %vm116_vm0, %v969_v7, 0.0  ;;  %v8992_v37 = vld [vmem:[%s12972_s2 + $0x28] sm:$0xff] }
 0x61a   :  { %6643 = vrsqrt.f32 %v3637_v24  ;;  %13259 = vst [vmem:[#allocation29_spill] sm:$0xff] %v8980_v32  ;;  %vm3705_vm4 = vweird.f32 %v6642_v43  ;;  %vm3714_vm8 = vweird.f32 %v3637_v24 }
 0x61b   :  { %v3697_v59 = vsel %vm3696_vm2, %v6640_v14, %v3693_v34  ;;  %v3700_v15 = vmul.f32 %v6642_v43, %v3699_v35  ;;  %vm3706_vm7 = vmor %vm3704_vm5, %vm3705_vm4 }
 0x61c   :  { %v8983_v45 = vmul.f32 %v3697_v59, %v8769_v38 }
 0x61d   :  { %v3701_v1 = vmul.f32 0.5, %v3700_v15  ;;  %v972_v15 = vmul.f32 %v8992_v37, %v8992_v37 }
 0x61e   :  { %13260 = vst [vmem:[#allocation76_spill] sm:$0xff] %v8983_v45  ;;  %v4026_v16 = vpack.c.bf16 %v8983_v45, %v8980_v32 }
 0x61f   :  { %v3702_v4 = vsub.f32 1.5, %v3701_v1  ;;  %v990_v7 = vsel %vm116_vm0, %v972_v15, 0.0 }
 0x620   :  { %v6644_v14 = vpop.eup %6643  ;;  %6317 = vmatmul.msk.bf16.gmra.mxu2 %vm116_vm0, %v4026_v16 }
 0x621   :  { %v3709_v51 = vmul.f32 %v6644_v14, %v3637_v24  ;;  %994 = vadd.xlane.f32.xlu2 %v993_v0  ;;  %982 = vadd.xlane.f32.xlu1 %v981_v62  ;;  %v3703_v38 = vmul.f32 %v6642_v43, %v3702_v4  ;;  %vm3715_vm6 = vweird.f32 %v6644_v14 }
 0x622   :  { %vm3716_vm9 = vmor %vm3714_vm8, %vm3715_vm6 }
 0x623   :  { %v3710_v59 = vmul.f32 %v6644_v14, %v3709_v51  ;;  %v3707_v35 = vsel %vm3706_vm7, %v6642_v43, %v3703_v38  ;;  %v849_v43 = vpop.xlane.xlu0 %848 }
 0x624   :  { %v8999_v16 = vmul.f32 %v3707_v35, %v8777_v42 }
 0x625   :  { %v3711_v55 = vmul.f32 0.5, %v3710_v59 }
 0x626   :  { %13261 = vst [vmem:[#allocation77_spill] sm:$0xff] %v8999_v16 }
 0x627   :  { %v3712_v34 = vsub.f32 1.5, %v3711_v55 }
 0x629   :  { %v3713_v26 = vmul.f32 %v6644_v14, %v3712_v34  ;;  %991 = vadd.xlane.f32.xlu1 %v990_v7 }
 0x62b   :  { %v3717_v1 = vsel %vm3716_vm9, %v6644_v14, %v3713_v26 }
 0x62c   :  { %v9002_v0 = vmul.f32 %v3717_v1, %v8785_v49  ;;  %v858_v49 = vpop.xlane.xlu0 %857 }
 0x62e   :  { %13262 = vst [vmem:[#allocation78_spill] sm:$0xff] %v9002_v0  ;;  %v4027_v62 = vpack.c.bf16 %v9002_v0, %v8999_v16 }
 0x630   :  { %6318 = vmatmul.msk.bf16.gmra.mxu2 %vm116_vm0, %v4027_v62 }
 0x634   :  { %v867_v32 = vpop.xlane.xlu0 %866 }
 0x644   :  { %v3850_v13 = vpop.xlane.xlu2 %3849 }
 0x645   :  { %v3872_v4 = vadd.f32 1e-12, %v3850_v13 }
 0x647   :  { %6645 = vrsqrt.f32 %v3872_v4  ;;  %vm3886_vm11 = vweird.f32 %v3872_v4 }
 0x64c   :  { %v3853_v51 = vpop.xlane.xlu2 %3852 }
 0x64d   :  { %v6646_v24 = vpop.eup %6645  ;;  %v3873_v15 = vadd.f32 1e-12, %v3853_v51 }
 0x64e   :  { %v3881_v59 = vmul.f32 %v6646_v24, %v3872_v4  ;;  %vm3887_vm10 = vweird.f32 %v6646_v24 }
 0x64f   :  { %6647 = vrsqrt.f32 %v3873_v15  ;;  %vm3888_vm13 = vmor %vm3886_vm11, %vm3887_vm10  ;;  %vm3896_vm14 = vweird.f32 %v3873_v15 }
 0x650   :  { %v3882_v14 = vmul.f32 %v6646_v24, %v3881_v59 }
 0x652   :  { %v3883_v42 = vmul.f32 0.5, %v3882_v14 }
 0x654   :  { %v3856_v38 = vpop.xlane.xlu2 %3855  ;;  %v3884_v34 = vsub.f32 1.5, %v3883_v42 }
 0x655   :  { %v6648_v55 = vpop.eup %6647  ;;  %v3874_v7 = vadd.f32 1e-12, %v3856_v38 }
 0x656   :  { %v3891_v35 = vmul.f32 %v6648_v55, %v3873_v15  ;;  %v3885_v1 = vmul.f32 %v6646_v24, %v3884_v34  ;;  %vm3897_vm12 = vweird.f32 %v6648_v55 }
 0x657   :  { %6649 = vrsqrt.f32 %v3874_v7  ;;  %vm3898_vm15 = vmor %vm3896_vm14, %vm3897_vm12  ;;  %vm3906_vm2 = vweird.f32 %v3874_v7 }
 0x658   :  { %v3892_v26 = vmul.f32 %v6648_v55, %v3891_v35  ;;  %v3889_v59 = vsel %vm3888_vm13, %v6646_v24, %v3885_v1 }
 0x659   :  { %v9008_v34 = vmul.f32 %v3889_v59, %v8806_v40  ;;  %v9019_v40 = vadd.f32 1e-12, %v849_v43 }
 0x65a   :  { %v3893_v62 = vmul.f32 0.5, %v3892_v26 }
 0x65b   :  { %13263 = vst [vmem:[#allocation79_spill] sm:$0xff] %v9008_v34 }
 0x65c   :  { %v3894_v13 = vsub.f32 1.5, %v3893_v62  ;;  %v3859_v0 = vpop.xlane.xlu2 %3858 }
 0x65d   :  { %v6650_v51 = vpop.eup %6649  ;;  %v3875_v16 = vadd.f32 1e-12, %v3859_v0 }
 0x65e   :  { %v3895_v14 = vmul.f32 %v6648_v55, %v3894_v13  ;;  %v3901_v45 = vmul.f32 %v6650_v51, %v3874_v7  ;;  %vm3907_vm1 = vweird.f32 %v6650_v51 }
 0x65f   :  { %6651 = vrsqrt.f32 %v3875_v16  ;;  %vm3908_vm5 = vmor %vm3906_vm2, %vm3907_vm1  ;;  %vm3916_vm6 = vweird.f32 %v3875_v16  ;;  %vm885_vm2 = vweird.f32 %v9019_v40 }
 0x660   :  { %v3899_v42 = vsel %vm3898_vm15, %v6648_v55, %v3895_v14  ;;  %v3902_v38 = vmul.f32 %v6650_v51, %v3901_v45  ;;  %v980_v45 = vpop.xlane.xlu0 %979 }
 0x661   :  { %v9011_v4 = vmul.f32 %v3899_v42, %v8812_v11 }
 0x662   :  { %v3903_v35 = vmul.f32 0.5, %v3902_v38  ;;  %v9024_v38 = vadd.f32 1e-12, %v858_v49 }
 0x663   :  { %13264 = vst [vmem:[#allocation80_spill] sm:$0xff] %v9011_v4  ;;  %v4638_v26 = vpack.c.bf16 %v9011_v4, %v9008_v34 }
 0x664   :  { %v3862_v0 = vpop.xlane.xlu2 %3861  ;;  %v3904_v15 = vsub.f32 1.5, %v3903_v35 }
 0x665   :  { %v6652_v24 = vpop.eup %6651  ;;  %v9015_v1 = vadd.f32 1e-12, %v3862_v0  ;;  %6327 = vmatmul.msk.bf16.vlgmr.msra.gmra.mxu0 %vm116_vm0, %v4638_v26  ;;  %v9026_v26 = vadd.f32 1e-12, %v980_v45 }
 0x666   :  { %v3911_v62 = vmul.f32 %v6652_v24, %v3875_v16  ;;  %v3905_v11 = vmul.f32 %v6650_v51, %v3904_v15  ;;  %vm3917_vm4 = vweird.f32 %v6652_v24 }
 0x667   :  { %6653 = vrsqrt.f32 %v9015_v1  ;;  %vm3918_vm7 = vmor %vm3916_vm6, %vm3917_vm4  ;;  %vm3926_vm9 = vweird.f32 %v9015_v1  ;;  %vm1023_vm15 = vweird.f32 %v9026_v26  ;;  %vm915_vm4 = vweird.f32 %v9024_v38 }
 0x668   :  { %v3912_v55 = vmul.f32 %v6652_v24, %v3911_v62  ;;  %6655 = vrsqrt.f32 %v9019_v40  ;;  %v3909_v43 = vsel %vm3908_vm5, %v6650_v51, %v3905_v11  ;;  %v989_v7 = vpop.xlane.xlu0 %988  ;;  %v9043_v11 = vadd.f32 1e-12, %v867_v32 }
 0x669   :  { %v9041_v45 = vadd.f32 1e-12, %v989_v7 }
 0x66a   :  { %v3913_v13 = vmul.f32 0.5, %v3912_v55 }
 0x66c   :  { %v3914_v59 = vsub.f32 1.5, %v3913_v13  ;;  %v3865_v14 = vpop.xlane.xlu2 %3864  ;;  %v9032_v13 = vmul.f32 %v3909_v43, %v8825_v41 }
 0x66d   :  { %v9022_v42 = vpop.eup %6653  ;;  %v3877_v35 = vadd.f32 1e-12, %v3865_v14 }
 0x66e   :  { %v3915_v0 = vmul.f32 %v6652_v24, %v3914_v59  ;;  %v3921_v15 = vmul.f32 %v9022_v42, %v9015_v1  ;;  %13265 = vst [vmem:[#allocation81_spill] sm:$0xff] %v9032_v13  ;;  %v9038_v51 = vpop.eup %6655  ;;  %vm3927_vm8 = vweird.f32 %v9022_v42 }
 0x66f   :  { %6657 = vrsqrt.f32 %v3877_v35  ;;  %vm3928_vm11 = vmor %vm3926_vm9, %vm3927_vm8  ;;  %vm3936_vm12 = vweird.f32 %v3877_v35  ;;  %vm886_vm14 = vweird.f32 %v9038_v51  ;;  %vm1053_vm8 = vweird.f32 %v9041_v45 }
 0x670   :  { %v3919_v62 = vsel %vm3918_vm7, %v6652_v24, %v3915_v0  ;;  %v3922_v55 = vmul.f32 %v9022_v42, %v3921_v15  ;;  %6659 = vrsqrt.f32 %v9026_v26  ;;  %vm9121_vm5 = vmor %vm885_vm2, %vm886_vm14 }
 0x671   :  { %v9035_v49 = vmul.f32 %v3919_v62, %v8832_v31  ;;  %6661 = vrsqrt.f32 %v9024_v38  ;;  %v880_v31 = vmul.f32 %v9038_v51, %v9019_v40 }
 0x672   :  { %v3923_v16 = vmul.f32 0.5, %v3922_v55  ;;  %6663 = vrsqrt.f32 %v9041_v45 }
 0x673   :  { %13266 = vst [vmem:[#allocation82_spill] sm:$0xff] %v9035_v49  ;;  %v4639_v24 = vpack.c.bf16 %v9035_v49, %v9032_v13  ;;  %6665 = vrsqrt.f32 %v9043_v11  ;;  %v881_v62 = vmul.f32 %v9038_v51, %v880_v31  ;;  %v998_v49 = vpop.xlane.xlu0 %997 }
 0x674   :  { %v9047_v59 = vpop.xlane.xlu1 %3867  ;;  %v855_v41 = vpop.xlane.xlu2 %854  ;;  %v3924_v43 = vsub.f32 1.5, %v3923_v16  ;;  %v9077_v1 = vadd.f32 1e-12, %v998_v49 }
 0x675   :  { %13267 = vst [vmem:[#allocation83_spill] sm:$0xff] %v9047_v59  ;;  %v6658_v14 = vpop.eup %6657  ;;  %6328 = vmatmul.msk.bf16.gmra.mxu0 %vm116_vm0, %v4639_v24 }
 0x676   :  { %v3931_v0 = vmul.f32 %v6658_v14, %v3877_v35  ;;  %v9053_v15 = vpop.eup %6659  ;;  %v3925_v55 = vmul.f32 %v9022_v42, %v3924_v43  ;;  %vm3937_vm10 = vweird.f32 %v6658_v14  ;;  %v882_v43 = vmul.f32 0.5, %v881_v62 }
 0x677   :  { %v9056_v32 = vpop.eup %6661  ;;  %v1018_v16 = vmul.f32 %v9053_v15, %v9026_v26  ;;  %vm3938_vm13 = vmor %vm3936_vm12, %vm3937_vm10  ;;  %vm1024_vm1 = vweird.f32 %v9053_v15  ;;  %vm945_vm10 = vweird.f32 %v9043_v11 }
 0x678   :  { %v3932_v7 = vmul.f32 %v6658_v14, %v3931_v0  ;;  %v910_v24 = vmul.f32 %v9056_v32, %v9024_v38  ;;  %v9065_v4 = vpop.eup %6663  ;;  %v3929_v47 = vsel %vm3928_vm11, %v9022_v42, %v3925_v55  ;;  %vm916_vm6 = vweird.f32 %v9056_v32  ;;  %vm9133_vm7 = vmor %vm1023_vm15, %vm1024_vm1 }
 0x679   :  { %v9068_v57 = vpop.eup %6665  ;;  %v1019_v29 = vmul.f32 %v9053_v15, %v1018_v16  ;;  %v9085_v42 = vmul.f32 %v3929_v47, %v8845_v53  ;;  %vm1054_vm9 = vweird.f32 %v9065_v4  ;;  %vm9192_vm15 = vmor %vm915_vm4, %vm916_vm6 }
 0x67a   :  { %v3933_v34 = vmul.f32 0.5, %v3932_v7  ;;  %v911_v54 = vmul.f32 %v9056_v32, %v910_v24  ;;  %v940_v62 = vmul.f32 %v9068_v57, %v9043_v11  ;;  %v3837_v24 = vpop.f32.mrf.mxu1  ;;  %vm946_vm1 = vweird.f32 %v9068_v57 }
 0x67b   :  { %13268 = vst [vmem:[#allocation84_spill] sm:$0xff] %v9085_v42  ;;  %v1020_v55 = vmul.f32 0.5, %v1019_v29  ;;  %v9105_v29 = vadd.f32 %v8803_v61, %v3837_v24 }
 0x67c   :  { %v3934_v13 = vsub.f32 1.5, %v3933_v34  ;;  %v864_v0 = vpop.xlane.xlu2 %863  ;;  %v852_v31 = vpop.xlane.xlu1 %851  ;;  %v1048_v34 = vmul.f32 %v9065_v4, %v9041_v45  ;;  %v912_v16 = vmul.f32 0.5, %v911_v54 }
 0x67d   :  { %v9070_v7 = vadd.f32 1e-12, %v852_v31  ;;  %v9082_v31 = vadd.f32 1e-12, %v855_v41  ;;  %13270 = vst [vmem:[#allocation86_spill] sm:$0xff] %v9105_v29  ;;  %v3847_v40 = vmul.f32 %v9105_v29, %v9105_v29 }
 0x67e   :  { %v3935_v10 = vmul.f32 %v6658_v14, %v3934_v13  ;;  %v883_v13 = vsub.f32 1.5, %v882_v43  ;;  %v1049_v49 = vmul.f32 %v9065_v4, %v1048_v34  ;;  %v913_v43 = vsub.f32 1.5, %v912_v16 }
 0x67f   :  { %6667 = vrsqrt.f32 %v9070_v7  ;;  %v9126_v26 = vadd.f32 1e-12, %v864_v0  ;;  %vm895_vm12 = vweird.f32 %v9070_v7 }
 0x680   :  { %v3939_v6 = vsel %vm3938_vm13, %v6658_v14, %v3935_v10  ;;  %6669 = vrsqrt.f32 %v9077_v1  ;;  %v941_v10 = vmul.f32 %v9068_v57, %v940_v62  ;;  %v1050_v62 = vmul.f32 0.5, %v1049_v49  ;;  %vm9168_vm13 = vmor %vm1053_vm8, %vm1054_vm9 }
 0x681   :  { %v9088_v35 = vmul.f32 %v3939_v6, %v8862_v23  ;;  %6671 = vrsqrt.f32 %v9082_v31  ;;  %v1021_v23 = vsub.f32 1.5, %v1020_v55  ;;  %v884_v6 = vmul.f32 %v9038_v51, %v883_v13 }
 0x682   :  { %v914_v0 = vmul.f32 %v9056_v32, %v913_v43 }
 0x683   :  { %13269 = vst [vmem:[#allocation85_spill] sm:$0xff] %v9088_v35  ;;  %v4640_v59 = vpack.c.bf16 %v9088_v35, %v9085_v42  ;;  %v1022_v55 = vmul.f32 %v9053_v15, %v1021_v23 }
 0x684   :  { %v977_v41 = vpop.xlane.xlu2 %976  ;;  %v861_v14 = vpop.xlane.xlu1 %860 }
 0x685   :  { %v9096_v47 = vadd.f32 1e-12, %v977_v41  ;;  %v9098_v53 = vadd.f32 1e-12, %v861_v14  ;;  %6329 = vmatmul.msk.bf16.gmra.mxu0 %vm116_vm0, %v4640_v59  ;;  %v9101_v54 = vpop.eup %6667  ;;  %v942_v41 = vmul.f32 0.5, %v941_v10  ;;  %v1051_v10 = vsub.f32 1.5, %v1050_v62 }
 0x686   :  { %v890_v34 = vmul.f32 %v9101_v54, %v9070_v7  ;;  %v9113_v59 = vpop.eup %6669  ;;  %v888_v14 = vsel %vm9121_vm5, %v9038_v51, %v884_v6  ;;  %vm896_vm11 = vweird.f32 %v9101_v54  ;;  %v1026_v13 = vsel %vm9133_vm7, %v9053_v15, %v1022_v55  ;;  %vm9223_vm5 = vmor %vm945_vm10, %vm946_vm1 }
 0x687   :  { %6673 = vrsqrt.f32 %v9096_v47  ;;  %v9131_v16 = vpop.eup %6671  ;;  %vm897_vm14 = vmor %vm895_vm12, %vm896_vm11  ;;  %v9180_v45 = vmul.f32 %v888_v14, %v8727_v2  ;;  %v1088_v25 = vmul.f32 %v1026_v13, %v8820_v56  ;;  %v918_v56 = vsel %vm9192_vm15, %v9056_v32, %v914_v0 }
 0x688   :  { %v891_v61 = vmul.f32 %v9101_v54, %v890_v34  ;;  %6675 = vrsqrt.f32 %v9098_v53  ;;  %v943_v34 = vsub.f32 1.5, %v942_v41  ;;  %v900_v43 = vmul.f32 %v9131_v16, %v9082_v31 }
 0x689   :  { %6677 = vrsqrt.f32 %v9126_v26  ;;  %vm1013_vm2 = vweird.f32 %v9096_v47  ;;  %vm925_vm8 = vweird.f32 %v9098_v53  ;;  %vm905_vm12 = vweird.f32 %v9082_v31 }
 0x68a   :  { %v892_v24 = vmul.f32 0.5, %v891_v61  ;;  %v1078_v61 = vmul.f32 %v9113_v59, %v9077_v1  ;;  %v901_v2 = vmul.f32 %v9131_v16, %v900_v43  ;;  %vm906_vm15 = vweird.f32 %v9131_v16 }
 0x68c   :  { %v986_v23 = vpop.xlane.xlu2 %985  ;;  %v870_v35 = vpop.xlane.xlu1 %869  ;;  %v893_v62 = vsub.f32 1.5, %v892_v24  ;;  %v1079_v55 = vmul.f32 %v9113_v59, %v1078_v61 }
 0x68d   :  { %v9145_v42 = vpop.eup %6673  ;;  %v9149_v51 = vadd.f32 1e-12, %v986_v23  ;;  %v9151_v6 = vadd.f32 1e-12, %v870_v35  ;;  %v1052_v23 = vmul.f32 %v9065_v4, %v1051_v10 }
 0x68e   :  { %v1008_v41 = vmul.f32 %v9145_v42, %v9096_v47  ;;  %v9161_v29 = vpop.eup %6675  ;;  %v894_v24 = vmul.f32 %v9101_v54, %v893_v62  ;;  %v9186_v62 = vsel %vm116_vm0, %v3847_v40, 0.0  ;;  %v9207_v40 = vmul.f32 %v9068_v57, %v943_v34 }
 0x68f   :  { %6679 = vrsqrt.f32 %v9149_v51  ;;  %v920_v7 = vmul.f32 %v9161_v29, %v9098_v53  ;;  %v1056_v38 = vsel %vm9168_vm13, %v9065_v4, %v1052_v23  ;;  %v1080_v13 = vmul.f32 0.5, %v1079_v55 }
 0x690   :  { %v1009_v15 = vmul.f32 %v9145_v42, %v1008_v41  ;;  %6681 = vrsqrt.f32 %v9151_v6  ;;  %v898_v49 = vsel %vm897_vm14, %v9101_v54, %v894_v24  ;;  %v9209_v41 = vpop.eup %6677  ;;  %vm1014_vm4 = vweird.f32 %v9145_v42 }
 0x691   :  { %v921_v61 = vmul.f32 %v9161_v29, %v920_v7  ;;  %v960_v54 = vmul.f32 %v898_v49, %v8894_v63  ;;  %v902_v34 = vmul.f32 0.5, %v901_v2  ;;  %v9230_v23 = vmul.f32 %v918_v56, %v8739_v50  ;;  %vm9244_vm6 = vmor %vm1013_vm2, %vm1014_vm4 }
 0x692   :  { %v1010_v14 = vmul.f32 0.5, %v1009_v15  ;;  %v930_v10 = vmul.f32 %v9209_v41, %v9126_v26  ;;  %vm926_vm7 = vweird.f32 %v9161_v29  ;;  %v1081_v56 = vsub.f32 1.5, %v1080_v13 }
 0x693   :  { %v922_v43 = vmul.f32 0.5, %v921_v61  ;;  %v1096_v15 = vmul.f32 %v1088_v25, %v960_v54  ;;  %v1091_v54 = vmul.f32 %v1056_v38, %v8840_v3  ;;  %vm9259_vm9 = vmor %vm925_vm8, %vm926_vm7  ;;  %vm1043_vm10 = vweird.f32 %v9149_v51 }
 0x694   :  { %v995_v63 = vpop.xlane.xlu2 %994  ;;  %v983_v24 = vpop.xlane.xlu1 %982  ;;  %v1011_v49 = vsub.f32 1.5, %v1010_v14  ;;  %vm1083_vm13 = vweird.f32 %v9077_v1  ;;  %vm1084_vm14 = vweird.f32 %v9113_v59  ;;  %vm955_vm4 = vweird.f32 %v9151_v6 }
 0x695   :  { %v9212_v7 = vpop.eup %6679  ;;  %v9215_v32 = vadd.f32 1e-12, %v995_v63  ;;  %v9217_v4 = vadd.f32 1e-12, %v983_v24  ;;  %v923_v35 = vsub.f32 1.5, %v922_v43  ;;  %v1106_v11 = vsel %vm116_vm0, %v1096_v15, 0.0 }
 0x696   :  { %v1038_v25 = vmul.f32 %v9212_v7, %v9149_v51  ;;  %v9232_v55 = vpop.eup %6681  ;;  %1107 = vadd.xlane.f32.xlu2 %v1106_v11  ;;  %v1012_v43 = vmul.f32 %v9145_v42, %v1011_v49  ;;  %v903_v63 = vsub.f32 1.5, %v902_v34  ;;  %vm1044_vm11 = vweird.f32 %v9212_v7 }
 0x697   :  { %6683 = vrsqrt.f32 %v9215_v32  ;;  %v950_v61 = vmul.f32 %v9232_v55, %v9151_v6  ;;  %v924_v47 = vmul.f32 %v9161_v29, %v923_v35  ;;  %vm9283_vm1 = vmor %vm1043_vm10, %vm1044_vm11  ;;  %vm956_vm2 = vweird.f32 %v9232_v55 }
 0x698   :  { %v1039_v50 = vmul.f32 %v9212_v7, %v1038_v25  ;;  %6685 = vrsqrt.f32 %v9217_v4  ;;  %v931_v25 = vmul.f32 %v9209_v41, %v930_v10  ;;  %v1016_v3 = vsel %vm9244_vm6, %v9145_v42, %v1012_v43  ;;  %vm9308_vm6 = vmor %vm1083_vm13, %vm1084_vm14 }
 0x699   :  { %v951_v15 = vmul.f32 %v9232_v55, %v950_v61  ;;  %v1087_v49 = vmul.f32 %v1016_v3, %v8916_v20  ;;  %v928_v34 = vsel %vm9259_vm9, %v9161_v29, %v924_v47  ;;  %v1082_v42 = vmul.f32 %v9113_v59, %v1081_v56  ;;  %vm9314_vm8 = vmor %vm955_vm4, %vm956_vm2 }
 0x69a   :  { %v1040_v24 = vmul.f32 0.5, %v1039_v50  ;;  %v904_v2 = vmul.f32 %v9131_v16, %v903_v63  ;;  %v963_v56 = vmul.f32 %v928_v34, %v8922_v52  ;;  %v932_v51 = vmul.f32 0.5, %v931_v25  ;;  %vm9328_vm13 = vmor %vm905_vm12, %vm906_vm15  ;;  %v4049_v52 = vpop.f32.mrf.mxu2 }
 0x69b   :  { %v952_v38 = vmul.f32 0.5, %v951_v15  ;;  %v1095_v50 = vmul.f32 %v1087_v49, %v9180_v45  ;;  %vm1073_vm7 = vweird.f32 %v9215_v32  ;;  %vm1033_vm10 = vweird.f32 %v9217_v4 }
 0x69c   :  { %v1041_v53 = vsub.f32 1.5, %v1040_v24  ;;  %v992_v13 = vpop.xlane.xlu1 %991  ;;  %v1099_v1 = vmul.f32 %v1091_v54, %v963_v56  ;;  %v933_v49 = vsub.f32 1.5, %v932_v51  ;;  %v1086_v54 = vsel %vm9308_vm6, %v9113_v59, %v1082_v42 }
 0x69d   :  { %v9273_v35 = vpop.eup %6683  ;;  %v9277_v10 = vadd.f32 1e-12, %v992_v13  ;;  %v953_v11 = vsub.f32 1.5, %v952_v38  ;;  %v1103_v63 = vsel %vm116_vm0, %v1095_v50, 0.0  ;;  %v13295_v31 = vsel %vm9223_vm5, %v9068_v57, %v9207_v40 }
 0x69e   :  { %v1068_v29 = vmul.f32 %v9273_v35, %v9215_v32  ;;  %v6686_v14 = vpop.eup %6685  ;;  %v1042_v61 = vmul.f32 %v9212_v7, %v1041_v53  ;;  %3870 = vadd.xlane.f32.xlu2 %v9186_v62  ;;  %1104 = vadd.xlane.f32.xlu1 %v1103_v63  ;;  %vm1074_vm9 = vweird.f32 %v9273_v35  ;;  %v965_v20 = vmul.f32 %v13295_v31, %v8753_v27 }
 0x69f   :  { %6687 = vrsqrt.f32 %v9277_v10  ;;  %v1028_v47 = vmul.f32 %v6686_v14, %v9217_v4  ;;  %v954_v24 = vmul.f32 %v9232_v55, %v953_v11  ;;  %vm1034_vm11 = vweird.f32 %v6686_v14  ;;  %vm9337_vm14 = vmor %vm1073_vm7, %vm1074_vm9 }
 0x6a0   :  { %v1069_v43 = vmul.f32 %v9273_v35, %v1068_v29  ;;  %v1046_v45 = vsel %vm9283_vm1, %v9212_v7, %v1042_v61  ;;  %vm9350_vm12 = vmor %vm1033_vm10, %vm1034_vm11  ;;  %v1115_v42 = vsel %vm116_vm0, %v1099_v1, 0.0  ;;  %v908_v57 = vsel %vm9328_vm13, %v9131_v16, %v904_v2 }
 0x6a1   :  { %v1029_v6 = vmul.f32 %v6686_v14, %v1028_v47  ;;  %v1090_v62 = vmul.f32 %v1046_v45, %v8947_v18  ;;  %v958_v38 = vsel %vm9314_vm8, %v9232_v55, %v954_v24  ;;  %v1094_v40 = vmul.f32 %v1086_v54, %v8857_v12 }
 0x6a2   :  { %v1070_v15 = vmul.f32 0.5, %v1069_v43  ;;  %v966_v29 = vmul.f32 %v958_v38, %v8951_v60  ;;  %vm936_vm5 = vweird.f32 %v9209_v41  ;;  %vm1063_vm15 = vweird.f32 %v9277_v10 }
 0x6a3   :  { %v1030_v3 = vmul.f32 0.5, %v1029_v6  ;;  %v1098_v53 = vmul.f32 %v1090_v62, %v9230_v23  ;;  %v934_v0 = vmul.f32 %v9209_v41, %v933_v49  ;;  %vm935_vm2 = vweird.f32 %v9126_v26 }
 0x6a4   :  { %v1071_v7 = vsub.f32 1.5, %v1070_v15  ;;  %v961_v12 = vmul.f32 %v908_v57, %v8871_v21  ;;  %v1102_v56 = vmul.f32 %v1094_v40, %v966_v29  ;;  %vm937_vm4 = vmor %vm935_vm2, %vm936_vm5  ;;  %v1673_v6 = vmul.f32 %v8406_v19, %v8248_v46  ;;  %v13302_v40 = vld [vmem:[#allocation5_spill] sm:$0xff] }
 0x6a5   :  { %v6688_v13 = vpop.eup %6687  ;;  %v1031_v55 = vsub.f32 1.5, %v1030_v3  ;;  %v1112_v32 = vsel %vm116_vm0, %v1098_v53, 0.0  ;;  %v938_v47 = vsel %vm937_vm4, %v9209_v41, %v934_v0  ;;  %v1670_v41 = vmul.f32 %v8359_v9, %v8322_v8 }
 0x6a6   :  { %v1058_v34 = vmul.f32 %v6688_v13, %v9277_v10  ;;  %v1072_v11 = vmul.f32 %v9273_v35, %v1071_v7  ;;  %1116 = vadd.xlane.f32.xlu2 %v1115_v42  ;;  %vm1064_vm1 = vweird.f32 %v6688_v13  ;;  %1113 = vadd.xlane.f32.xlu1 %v1112_v32  ;;  %v1124_v26 = vsel %vm116_vm0, %v1102_v56, 0.0  ;;  %v13298_v7 = vld [vmem:[#allocation20_spill] sm:$0xff] }
 0x6a7   :  { %v1032_v27 = vmul.f32 %v6686_v14, %v1031_v55  ;;  %vm1065_vm6 = vmor %vm1063_vm15, %vm1064_vm1  ;;  %v1678_v15 = vsel %vm116_vm0, %v1670_v41, 0.0  ;;  %v1687_v62 = vsel %vm116_vm0, %v1673_v6, 0.0  ;;  %v4069_v1 = vmul.f32 %v4049_v52, %v8438_v33 }
 0x6a8   :  { %v1059_v50 = vmul.f32 %v6688_v13, %v1058_v34  ;;  %v1076_v4 = vsel %vm9337_vm14, %v9273_v35, %v1072_v11  ;;  %v1677_v3 = vmul.f32 %v8426_v39, %v13298_v7  ;;  %v1828_v34 = vsel %vm1818_vm3, %v8494_v22, 0.0 }
 0x6a9   :  { %v1036_v61 = vsel %vm9350_vm12, %v6686_v14, %v1032_v27  ;;  %v1093_v16 = vmul.f32 %v1076_v4, %v8966_v44  ;;  %v4077_v53 = vmul.f32 1.442695, %v4069_v1  ;;  %v1834_v59 = vsel %vm1818_vm3, %v8520_v48, 0.0 }
 0x6aa   :  { %v1060_v60 = vmul.f32 0.5, %v1059_v50  ;;  %v1089_v2 = vmul.f32 %v1036_v61, %v8971_v30  ;;  %v964_v30 = vmul.f32 %v938_v47, %v8898_v36  ;;  %v4051_v36 = vpop.f32.mrf.mxu2  ;;  %v1699_v38 = vsel %vm116_vm0, %v1677_v3, 0.0 }
 0x6ab   :  { %v1101_v35 = vmul.f32 %v1093_v16, %v965_v20  ;;  %6689 = vpow2.f32 %v4077_v53  ;;  %v4070_v19 = vmul.f32 %v4051_v36, %v8438_v33  ;;  %v1837_v29 = vsel %vm1818_vm3, %v8530_v17, 0.0  ;;  %v13315_v53 = vld [vmem:[#allocation34_spill] sm:$0xff] }
 0x6ac   :  { %v1061_v51 = vsub.f32 1.5, %v1060_v60  ;;  %v1097_v43 = vmul.f32 %v1089_v2, %v961_v12  ;;  %v1840_v4 = vsel %vm1818_vm3, %v13302_v40, 0.0  ;;  %v13304_v12 = vld [vmem:[#allocation83_spill] sm:$0xff]  ;;  %vm1151_vm11 = vcmask 7168  }
 0x6ad   :  { %v1121_v44 = vsel %vm116_vm0, %v1101_v35, 0.0  ;;  %v3878_v2 = vadd.f32 1e-12, %v13304_v12 }
 0x6ae   :  { %v1062_v63 = vmul.f32 %v6688_v13, %v1061_v51  ;;  %v1109_v14 = vsel %vm116_vm0, %v1097_v43, 0.0  ;;  %1125 = vadd.xlane.f32.xlu2 %v1124_v26  ;;  %1122 = vadd.xlane.f32.xlu1 %v1121_v44 }
 0x6af   :  { %1110 = vadd.xlane.f32.xlu0 %v1109_v14  ;;  %vm3946_vm8 = vweird.f32 %v3878_v2 }
 0x6b0   :  { %v1066_v21 = vsel %vm1065_vm6, %v6688_v13, %v1062_v63  ;;  %v4079_v13 = vmul.f32 1.442695, %v4070_v19 }
 0x6b1   :  { %v1092_v45 = vmul.f32 %v1066_v21, %v8992_v37  ;;  %v1675_v37 = vmul.f32 %v8420_v5, %v8189_v58  ;;  %v9397_v49 = vpop.eup %6689  ;;  %v1822_v5 = vsel %vm1818_vm3, %v8479_v28, 0.0 }
 0x6b2   :  { %v4054_v9 = vpop.f32.mrf.mxu2  ;;  %13299 = vst [vmem:[#allocation87_spill] sm:$0xff] %v9397_v49  ;;  %6691 = vpow2.f32 %v4079_v13 }
 0x6b3   :  { %v1100_v10 = vmul.f32 %v1092_v45, %v964_v30  ;;  %v1693_v25 = vsel %vm116_vm0, %v1675_v37, 0.0  ;;  %v4071_v54 = vmul.f32 %v4054_v9, %v8438_v33 }
 0x6b5   :  { %v1118_v24 = vsel %vm116_vm0, %v1100_v10, 0.0  ;;  %v4081_v39 = vmul.f32 1.442695, %v4071_v54 }
 0x6b6   :  { %1679 = vadd.xlane.f32.xlu1 %v1678_v15 }
 0x6b7   :  { %1119 = vadd.xlane.f32.xlu0 %v1118_v24  ;;  %6693 = vpow2.f32 %v4081_v39 }
 0x6b8   :  { %v9403_v23 = vpop.eup %6691 }
 0x6b9   :  { %13300 = vst [vmem:[#allocation88_spill] sm:$0xff] %v9403_v23 }
 0x6ba   :  { %v4056_v18 = vpop.f32.mrf.mxu2 }
 0x6bb   :  { %v4072_v31 = vmul.f32 %v4056_v18, %v8438_v33 }
 0x6bd   :  { %v4083_v28 = vmul.f32 1.442695, %v4072_v31  ;;  %v9409_v20 = vpop.eup %6693 }
 0x6be   :  { %1688 = vadd.xlane.f32.xlu1 %v1687_v62 }
 0x6bf   :  { %6695 = vpow2.f32 %v4083_v28 }
 0x6c2   :  { %v4059_v55 = vpop.f32.mrf.mxu2 }
 0x6c3   :  { %v4073_v32 = vmul.f32 %v4059_v55, %v8438_v33 }
 0x6c5   :  { %v4085_v22 = vmul.f32 1.442695, %v4073_v32  ;;  %v9415_v11 = vpop.eup %6695 }
 0x6c6   :  { %1694 = vadd.xlane.f32.xlu1 %v1693_v25 }
 0x6c7   :  { %6697 = vpow2.f32 %v4085_v22 }
 0x6ca   :  { %v4061_v42 = vpop.f32.mrf.mxu2 }
 0x6cb   :  { %v4074_v50 = vmul.f32 %v4061_v42, %v8438_v33 }
 0x6cd   :  { %v4087_v57 = vmul.f32 1.442695, %v4074_v50  ;;  %v9421_v27 = vpop.eup %6697 }
 0x6ce   :  { %1700 = vadd.xlane.f32.xlu1 %v1699_v38  ;;  %13301 = vst [vmem:[#allocation89_spill] sm:$0xff] %v9421_v27 }
 0x6cf   :  { %6699 = vpow2.f32 %v4087_v57 }
 0x6d2   :  { %v4064_v48 = vpop.f32.mrf.mxu2 }
 0x6d3   :  { %v4075_v0 = vmul.f32 %v4064_v48, %v8438_v33 }
 0x6d5   :  { %v4089_v17 = vmul.f32 1.442695, %v4075_v0  ;;  %v9427_v61 = vpop.eup %6699 }
 0x6d6   :  { %1823 = vadd.xlane.f32.xlu1 %v1822_v5  ;;  %13303 = vst [vmem:[#allocation5_spill] sm:$0xff] %v9427_v61 }
 0x6d7   :  { %4303 = vxpose.xlu2.b32.start [1/8] (short) (narrow) %v9397_v49, 64  ;;  %6701 = vpow2.f32 %v4089_v17 }
 0x6d8   :  { %6703 = vrsqrt.f32 %v3878_v2 }
 0x6da   :  { %v4066_v60 = vpop.f32.mrf.mxu2 }
 0x6db   :  { %v4076_v16 = vmul.f32 %v4066_v60, %v8438_v33 }
 0x6dd   :  { %v4091_v56 = vmul.f32 1.442695, %v4076_v16  ;;  %v9432_v51 = vpop.eup %6701 }
 0x6de   :  { %1829 = vadd.xlane.f32.xlu1 %v1828_v34  ;;  %13305 = vst [vmem:[#allocation83_spill] sm:$0xff] %v9432_v51  ;;  %v6704_v43 = vpop.eup %6703 }
 0x6df   :  { %4304 = vxpose.xlu2.b32.cont [2/8] (short) (narrow) %v9403_v23, 64  ;;  %6705 = vpow2.f32 %v4091_v56  ;;  %v3941_v63 = vmul.f32 %v6704_v43, %v3878_v2  ;;  %vm3947_vm7 = vweird.f32 %v6704_v43 }
 0x6e0   :  { %vm9438_vm9 = vmor %vm3946_vm8, %vm3947_vm7 }
 0x6e1   :  { %v3942_v44 = vmul.f32 %v6704_v43, %v3941_v63 }
 0x6e3   :  { %v3943_v30 = vmul.f32 0.5, %v3942_v44 }
 0x6e5   :  { %v9435_v47 = vpop.eup %6705  ;;  %v3944_v41 = vsub.f32 1.5, %v3943_v30 }
 0x6e6   :  { %1835 = vadd.xlane.f32.xlu1 %v1834_v59  ;;  %13306 = vst [vmem:[#allocation90_spill] sm:$0xff] %v9435_v47 }
 0x6e7   :  { %4305 = vxpose.xlu2.b32.cont [3/8] (short) (narrow) %v9409_v20, 64  ;;  %v3945_v25 = vmul.f32 %v6704_v43, %v3944_v41 }
 0x6e9   :  { %v3949_v5 = vsel %vm9438_vm9, %v6704_v43, %v3945_v25  ;;  %v13313_v25 = vld [vmem:[#allocation37_spill] sm:$0xff] }
 0x6ee   :  { %1838 = vadd.xlane.f32.xlu1 %v1837_v29  ;;  %v13309_v29 = vld [vmem:[#allocation73_spill] sm:$0xff] }
 0x6ef   :  { %4306 = vxpose.xlu2.b32.cont [4/8] (short) (narrow) %v9415_v11, 64  ;;  %v9447_v50 = vmul.f32 %v3949_v5, %v13309_v29  ;;  %v13318_v5 = vld [vmem:[#allocation43_spill] sm:$0xff] }
 0x6f0   :  { %v13323_v29 = vld [vmem:[#allocation15_spill] sm:$0xff] }
 0x6f1   :  { %13310 = vst [vmem:[#allocation73_spill] sm:$0xff] %v9447_v50 }
 0x6f6   :  { %1841 = vadd.xlane.f32.xlu1 %v1840_v4  ;;  %v13311_v4 = vld [vmem:[#allocation86_spill] sm:$0xff] }
 0x6f7   :  { %4307 = vxpose.xlu2.b32.cont [5/8] (short) (narrow) %v9421_v27, 64 }
 0x6ff   :  { %4308 = vxpose.xlu2.b32.cont [6/8] (short) (narrow) %v9427_v61, 64 }
 0x707   :  { %4309 = vxpose.xlu2.b32.cont [7/8] (short) (narrow) %v9432_v51, 64 }
 0x709   :  { %v1108_v35 = vpop.xlane.xlu2 %1107 }
 0x70a   :  { %v1128_v10 = vsub.f32 1.0, %v1108_v35 }
 0x70c   :  { %v1136_v36 = vmax.f32 %v1128_v10, 0.0 }
 0x70e   :  { %v1144_v38 = vmul.f32 %v1136_v36, %v1136_v36 }
 0x70f   :  { %4310 = vxpose.xlu2.b32.end [8/8] (short) (narrow) %v9435_v47, 64 }
 0x710   :  { %v1153_v59 = vsel %vm1151_vm11, %v1144_v38, 0.0  ;;  %v13316_v38 = vld [vmem:[#allocation42_spill] sm:$0xff] }
 0x711   :  { %v3871_v14 = vpop.xlane.xlu2 %3870  ;;  %v1105_v21 = vpop.xlane.xlu1 %1104 }
 0x712   :  { %v3879_v26 = vadd.f32 1e-12, %v3871_v14  ;;  %v1127_v45 = vsub.f32 1.0, %v1105_v21 }
 0x714   :  { %6707 = vrsqrt.f32 %v3879_v26  ;;  %v1135_v62 = vmax.f32 %v1127_v45, 0.0  ;;  %vm3956_vm13 = vweird.f32 %v3879_v26 }
 0x716   :  { %v1143_v3 = vmul.f32 %v1135_v62, %v1135_v62 }
 0x718   :  { %v1152_v31 = vsel %vm1151_vm11, %v1143_v3, 0.0 }
 0x719   :  { %v1114_v15 = vpop.xlane.xlu1 %1113  ;;  %v1117_v6 = vpop.xlane.xlu2 %1116  ;;  %v1154_v17 = vadd.f32 %v1153_v59, %v1152_v31  ;;  %v13320_v31 = vld [vmem:[#allocation50_spill] sm:$0xff]  ;;  %v13321_v59 = vld [vmem:[#allocation51_spill] sm:$0xff] }
 0x71a   :  { %v6708_v24 = vpop.eup %6707  ;;  %v1130_v1 = vsub.f32 1.0, %v1114_v15  ;;  %v1131_v13 = vsub.f32 1.0, %v1117_v6 }
 0x71b   :  { %v3951_v52 = vmul.f32 %v6708_v24, %v3879_v26  ;;  %vm3957_vm10 = vweird.f32 %v6708_v24 }
 0x71c   :  { %v1138_v54 = vmax.f32 %v1130_v1, 0.0  ;;  %vm3958_vm14 = vmor %vm3956_vm13, %vm3957_vm10  ;;  %v1139_v42 = vmax.f32 %v1131_v13, 0.0  ;;  %v13314_v1 = vld [vmem:[#allocation14_spill] sm:$0xff] }
 0x71d   :  { %v3952_v37 = vmul.f32 %v6708_v24, %v3951_v52 }
 0x71e   :  { %v1146_v48 = vmul.f32 %v1138_v54, %v1138_v54  ;;  %v1147_v43 = vmul.f32 %v1139_v42, %v1139_v42  ;;  %v4663_v42 = vpop.f32.mrf.mxu0 }
 0x71f   :  { %v3953_v9 = vmul.f32 0.5, %v3952_v37 }
 0x720   :  { %v1157_v35 = vsel %vm1151_vm11, %v1146_v48, 0.0  ;;  %v1159_v30 = vsel %vm1151_vm11, %v1147_v43, 0.0 }
 0x721   :  { %v3954_v19 = vsub.f32 1.5, %v3953_v9  ;;  %v1123_v34 = vpop.xlane.xlu1 %1122  ;;  %v1126_v22 = vpop.xlane.xlu2 %1125  ;;  %v1672_v9 = vmul.f32 %v13314_v1, %v13313_v25  ;;  %v7209_v1 = vmov 64.0  }
 0x722   :  { %v1111_v18 = vpop.xlane.xlu0 %1110  ;;  %v1133_v57 = vsub.f32 1.0, %v1123_v34  ;;  %v1134_v60 = vsub.f32 1.0, %v1126_v22  ;;  %v13322_v22 = vld [vmem:[#allocation41_spill] sm:$0xff] }
 0x723   :  { %v1129_v39 = vsub.f32 1.0, %v1111_v18  ;;  %v3955_v55 = vmul.f32 %v6708_v24, %v3954_v19  ;;  %v1684_v3 = vsel %vm116_vm0, %v1672_v9, 0.0  ;;  %v1674_v19 = vmul.f32 %v13316_v38, %v13315_v53  ;;  %v13317_v18 = vld [vmem:[#allocation19_spill] sm:$0xff] }
 0x724   :  { %v1141_v63 = vmax.f32 %v1133_v57, 0.0  ;;  %v1142_v26 = vmax.f32 %v1134_v60, 0.0  ;;  %v1676_v54 = vmul.f32 %v13318_v5, %v13317_v18  ;;  %v1671_v48 = vmul.f32 %v13323_v29, %v13322_v22  ;;  %v13325_v60 = vld [vmem:[#allocation33_spill] sm:$0xff] }
 0x725   :  { %v1137_v28 = vmax.f32 %v1129_v39, 0.0  ;;  %v3959_v32 = vsel %vm3958_vm14, %v6708_v24, %v3955_v55  ;;  %v1690_v13 = vsel %vm116_vm0, %v1674_v19, 0.0  ;;  %v13319_v55 = vld [vmem:[#allocation48_spill] sm:$0xff] }
 0x726   :  { %v9450_v0 = vmul.f32 %v3959_v32, %v13311_v4  ;;  %v1149_v45 = vmul.f32 %v1141_v63, %v1141_v63  ;;  %v1150_v41 = vmul.f32 %v1142_v26, %v1142_v26  ;;  %v1696_v39 = vsel %vm116_vm0, %v1676_v54, 0.0  ;;  %v4665_v57 = vpop.f32.mrf.mxu0  ;;  %v13327_v26 = vld [vmem:[#allocation45_spill] sm:$0xff]  ;;  %v13331_v19 = vld [vmem:[#allocation12_spill] sm:$0xff] }
 0x727   :  { %v1145_v40 = vmul.f32 %v1137_v28, %v1137_v28  ;;  %v1819_v34 = vsel %vm1818_vm3, %v13319_v55, 0.0  ;;  %v1825_v28 = vsel %vm1818_vm3, %v13320_v31, 0.0  ;;  %v1831_v32 = vsel %vm1818_vm3, %v13321_v59, 0.0 }
 0x728   :  { %13312 = vst [vmem:[#allocation86_spill] sm:$0xff] %v9450_v0  ;;  %v4641_v12 = vpack.c.bf16 %v9450_v0, %v9447_v50  ;;  %v1163_v6 = vsel %vm1151_vm11, %v1149_v45, 0.0  ;;  %v1165_v36 = vsel %vm1151_vm11, %v1150_v41, 0.0  ;;  %v4683_v4 = vmul.f32 %v4663_v42, %v8438_v33 }
 0x729   :  { %v1155_v16 = vsel %vm1151_vm11, %v1145_v40, 0.0  ;;  %v1681_v40 = vsel %vm116_vm0, %v1671_v48, 0.0  ;;  %v9484_v63 = vpop.xlane.xlu1 %1679 }
 0x72a   :  { %v1156_v2 = vadd.f32 %v1155_v16, %v1154_v17  ;;  %v1120_v56 = vpop.xlane.xlu0 %1119  ;;  %6330 = vmatmul.msk.bf16.gmra.mxu0 %vm116_vm0, %v4641_v12  ;;  %v13324_v17 = vld [vmem:[#allocation25_spill] sm:$0xff]  ;;  %v4691_v12 = vmul.f32 1.442695, %v4683_v4 }
 0x72b   :  { %v1132_v14 = vsub.f32 1.0, %v1120_v56  ;;  %v2311_v16 = vmul.f32 %v13325_v60, %v13324_v17 }
 0x72c   :  { %v1158_v44 = vadd.f32 %v1157_v35, %v1156_v2  ;;  %6709 = vpow2.f32 %v4691_v12  ;;  %v4684_v35 = vmul.f32 %v4665_v57, %v8438_v33 }
 0x72d   :  { %v1140_v21 = vmax.f32 %v1132_v14, 0.0  ;;  %v2325_v56 = vsel %vm116_vm0, %v2311_v16, 0.0 }
 0x72e   :  { %v1160_v24 = vadd.f32 %v1159_v30, %v1158_v44  ;;  %v4668_v2 = vpop.f32.mrf.mxu0  ;;  %v4693_v14 = vmul.f32 1.442695, %v4684_v35 }
 0x72f   :  { %v1148_v10 = vmul.f32 %v1140_v21, %v1140_v21  ;;  %v2458_v21 = vsel %vm1818_vm3, %v13327_v26, 0.0  ;;  %v4685_v45 = vmul.f32 %v4668_v2, %v8438_v33 }
 0x730   :  { %6711 = vpow2.f32 %v4693_v14 }
 0x731   :  { %v1161_v52 = vsel %vm1151_vm11, %v1148_v10, 0.0  ;;  %v9494_v41 = vpop.xlane.xlu1 %1688 }
 0x732   :  { %v1162_v15 = vadd.f32 %v1161_v52, %v1160_v24  ;;  %v9487_v44 = vpop.eup %6709  ;;  %v4695_v24 = vmul.f32 1.442695, %v4685_v45 }
 0x733   :  { %13326 = vst [vmem:[#allocation14_spill] sm:$0xff] %v9487_v44 }
 0x734   :  { %v1164_v62 = vadd.f32 %v1163_v6, %v1162_v15  ;;  %v13329_v15 = vld [vmem:[#allocation47_spill] sm:$0xff]  ;;  %6713 = vpow2.f32 %v4695_v24 }
 0x735   :  { %v2464_v6 = vsel %vm1818_vm3, %v13329_v15, 0.0  ;;  %6715 = vrcp.f32 %v7209_v1  ;;  %v5205_v15 = vld [vmem:[%s12985_s15] sm:$0xf] }
 0x736   :  { %v1166_v37 = vadd.f32 %v1165_v36, %v1164_v62  ;;  %v4670_v30 = vpop.f32.mrf.mxu0  ;;  %v9496_v52 = vpop.eup %6711  ;;  %6339 = vmatmul.msk.f32.vlgmr.msrb.gmra.mxu2 %vm1818_vm3, %v5205_v15 }
 0x737   :  { %13328 = vst [vmem:[#allocation34_spill] sm:$0xff] %v9496_v52  ;;  %v4686_v62 = vmul.f32 %v4670_v30, %v8438_v33 }
 0x738   :  { %1167 = vadd.xlane.f32.xlu0 %v1166_v37 }
 0x739   :  { %v4697_v9 = vmul.f32 1.442695, %v4686_v62  ;;  %v9505_v38 = vpop.xlane.xlu1 %1694 }
 0x73b   :  { %6717 = vpow2.f32 %v4697_v9 }
 0x73e   :  { %v4673_v36 = vpop.f32.mrf.mxu0 }
 0x73f   :  { %v4687_v5 = vmul.f32 %v4673_v36, %v8438_v33 }
 0x740   :  { %1685 = vadd.xlane.f32.xlu0 %v1684_v3  ;;  %v9503_v3 = vpop.eup %6713 }
 0x741   :  { %13330 = vst [vmem:[#allocation42_spill] sm:$0xff] %v9503_v3  ;;  %v6716_v54 = vpop.eup %6715 }
 0x742   :  { %v1177_v31 = vmul.f32 64.0, %v6716_v54  ;;  %vm1181_vm12 = vweird.f32 %v6716_v54 }
 0x744   :  { %v1178_v42 = vsub.f32 1.0, %v1177_v31 }
 0x746   :  { %v4675_v55 = vpop.f32.mrf.mxu0  ;;  %v1179_v2 = vmul.f32 %v6716_v54, %v1178_v42 }
 0x747   :  { %v4688_v59 = vmul.f32 %v4675_v55, %v8438_v33 }
 0x748   :  { %1691 = vadd.xlane.f32.xlu0 %v1690_v13  ;;  %v2470_v13 = vsel %vm1818_vm3, %v13331_v19, 0.0  ;;  %v1180_v26 = vadd.f32 %v6716_v54, %v1179_v2 }
 0x749   :  { %v4701_v16 = vmul.f32 1.442695, %v4688_v59 }
 0x74a   :  { %v1182_v9 = vsel %vm1181_vm12, %v6716_v54, %v1180_v26  ;;  %v13341_v26 = vld [vmem:[#allocation60_spill] sm:$0xff] }
 0x750   :  { %1697 = vadd.xlane.f32.xlu0 %v1696_v39 }
 0x758   :  { %1820 = vadd.xlane.f32.xlu0 %v1819_v34  ;;  %v4699_v34 = vmul.f32 1.442695, %v4687_v5 }
 0x75a   :  { %6719 = vpow2.f32 %v4699_v34 }
 0x760   :  { %1826 = vadd.xlane.f32.xlu0 %v1825_v28  ;;  %v9512_v28 = vpop.eup %6717 }
 0x761   :  { %13332 = vst [vmem:[#allocation43_spill] sm:$0xff] %v9512_v28 }
 0x768   :  { %1832 = vadd.xlane.f32.xlu0 %v1831_v32  ;;  %v9516_v32 = vpop.xlane.xlu1 %1700 }
 0x769   :  { %v1716_v47 = vmul.f32 %v8438_v33, %v9516_v32 }
 0x770   :  { %v4319_v43 = vpop.trf.xlu2  ;;  %v9539_v36 = vpop.xlane.xlu1 %1823 }
 0x771   :  { %6319 = vmatmul.msk.f32.vlgmr.msrb.gmra.mxu3 %vm1818_vm3, %v4319_v43 }
 0x778   :  { %v4320_v10 = vpop.trf.xlu2 }
 0x779   :  { %6320 = vmatmul.msk.f32.gmra.mxu3 %vm1818_vm3, %v4320_v10 }
 0x780   :  { %1682 = vadd.xlane.f32.xlu2 %v1681_v40  ;;  %v4321_v37 = vpop.trf.xlu2  ;;  %v13333_v40 = vld [vmem:[#allocation53_spill] sm:$0xff] }
 0x781   :  { %6321 = vmatmul.msk.f32.gmra.mxu3 %vm1818_vm3, %v4321_v37  ;;  %v9520_v4 = vadd.f32 1e-08, %v13333_v40  ;;  %v1830_v40 = vpop.xlane.xlu1 %1829 }
 0x783   :  { %6721 = vrcp.f32 %v9520_v4  ;;  %vm2131_vm15 = vweird.f32 %v9520_v4 }
 0x784   :  { %6723 = vpow2.f32 %v4701_v16 }
 0x788   :  { %2326 = vadd.xlane.f32.xlu2 %v2325_v56  ;;  %v4322_v39 = vpop.trf.xlu2  ;;  %v9522_v56 = vpop.eup %6719 }
 0x789   :  { %6322 = vmatmul.msk.f32.gmra.mxu3 %vm1818_vm3, %v4322_v39  ;;  %13334 = vst [vmem:[#allocation48_spill] sm:$0xff] %v9522_v56  ;;  %v9542_v19 = vpop.eup %6721  ;;  %v13338_v39 = vld [vmem:[#allocation58_spill] sm:$0xff] }
 0x78a   :  { %v9545_v5 = vpop.eup %6723  ;;  %v9548_v55 = vadd.f32 1e-08, %v13338_v39  ;;  %v2127_v54 = vmul.f32 %v9542_v19, %v9520_v4  ;;  %vm2132_vm5 = vweird.f32 %v9542_v19 }
 0x78b   :  { %13337 = vst [vmem:[#allocation50_spill] sm:$0xff] %v9545_v5  ;;  %vm9612_vm2 = vmor %vm2131_vm15, %vm2132_vm5 }
 0x78c   :  { %vm2176_vm12 = vweird.f32 %v9548_v55 }
 0x790   :  { %2459 = vadd.xlane.f32.xlu2 %v2458_v21  ;;  %v4323_v48 = vpop.trf.xlu2  ;;  %v13335_v21 = vld [vmem:[#allocation55_spill] sm:$0xff] }
 0x791   :  { %4917 = vxpose.xlu0.b32.start [1/8] (short) (narrow) %v9487_v44, 64  ;;  %6323 = vmatmul.msk.f32.gmra.mxu3 %vm1818_vm3, %v4323_v48  ;;  %v9528_v30 = vadd.f32 1e-08, %v13335_v21  ;;  %v9577_v21 = vadd.f32 1e-08, %v13341_v26 }
 0x793   :  { %6725 = vrcp.f32 %v9528_v30  ;;  %vm2146_vm4 = vweird.f32 %v9528_v30  ;;  %v2210_v0 = vand.u32 2147483647, %v9577_v21 }
 0x798   :  { %2465 = vadd.xlane.f32.xlu2 %v2464_v6  ;;  %v4324_v10 = vpop.trf.xlu2  ;;  %v13336_v6 = vld [vmem:[#allocation57_spill] sm:$0xff] }
 0x799   :  { %4918 = vxpose.xlu0.b32.cont [2/8] (short) (narrow) %v9496_v52, 64  ;;  %6324 = vmatmul.msk.f32.gmra.mxu3 %vm1818_vm3, %v4324_v10  ;;  %v9537_v62 = vadd.f32 1e-08, %v13336_v6  ;;  %v9559_v42 = vpop.eup %6725  ;;  %v2135_v6 = vand.u32 2147483647, %v9520_v4 }
 0x79a   :  { %v2142_v16 = vmul.f32 %v9559_v42, %v9528_v30  ;;  %vm2147_vm6 = vweird.f32 %v9559_v42 }
 0x79b   :  { %6727 = vrcp.f32 %v9537_v62  ;;  %vm9599_vm1 = vcmp.eq.f32.partialorder %v2135_v6, 8.507059e+37  ;;  %vm2161_vm8 = vweird.f32 %v9537_v62  ;;  %vm9659_vm13 = vmor %vm2146_vm4, %vm2147_vm6  ;;  %vm2206_vm4 = vweird.f32 %v9577_v21 }
 0x79c   :  { %v2143_v15 = vsub.f32 1.0, %v2142_v16 }
 0x7a0   :  { %2471 = vadd.xlane.f32.xlu2 %v2470_v13  ;;  %v4325_v59 = vpop.trf.xlu2 }
 0x7a1   :  { %4919 = vxpose.xlu0.b32.cont [3/8] (short) (narrow) %v9503_v3, 64  ;;  %6325 = vmatmul.msk.f32.gmra.mxu3 %vm1818_vm3, %v4325_v59  ;;  %v9561_v48 = vpop.eup %6727  ;;  %v2144_v59 = vmul.f32 %v9559_v42, %v2143_v15  ;;  %v2167_v15 = vand.u32 2147483648, %v9537_v62 }
 0x7a2   :  { %vm2162_vm9 = vweird.f32 %v9561_v48 }
 0x7a3   :  { %v2168_v50 = vor.u32 1.1754944e-38, %v2167_v15  ;;  %vm9680_vm5 = vmor %vm2161_vm8, %vm2162_vm9  ;;  %vm9743_vm9 = vcmp.eq.f32.partialorder %v2210_v0, 8.507059e+37 }
 0x7a7   :  { %v4678_v60 = vpop.f32.mrf.mxu0 }
 0x7a8   :  { %v4689_v43 = vmul.f32 %v4678_v60, %v8438_v33 }
 0x7a9   :  { %4920 = vxpose.xlu0.b32.cont [4/8] (short) (narrow) %v9512_v28, 64 }
 0x7aa   :  { %v4703_v37 = vmul.f32 1.442695, %v4689_v43 }
 0x7ab   :  { %v1168_v29 = vpop.xlane.xlu0 %1167 }
 0x7ac   :  { %v1169_v57 = vrot.slane %v1168_v29, 4  ;;  %6729 = vpow2.f32 %v4703_v37 }
 0x7ad   :  { %6731 = vrcp.f32 %v9548_v55 }
 0x7ae   :  { %v1170_v12 = vadd.f32 %v1169_v57, %v1168_v29  ;;  %v2128_v57 = vsub.f32 1.0, %v2127_v54 }
 0x7af   :  { %v4680_v13 = vpop.f32.mrf.mxu0 }
 0x7b0   :  { %v1171_v35 = vrot.slane %v1170_v12, 2  ;;  %v4690_v34 = vmul.f32 %v4680_v13, %v8438_v33  ;;  %v2129_v43 = vmul.f32 %v9542_v19, %v2128_v57 }
 0x7b1   :  { %4921 = vxpose.xlu0.b32.cont [5/8] (short) (narrow) %v9522_v56, 64  ;;  %v2182_v56 = vand.u32 2147483648, %v9548_v55 }
 0x7b2   :  { %v1172_v14 = vadd.f32 %v1171_v35, %v1170_v12  ;;  %v4705_v29 = vmul.f32 1.442695, %v4690_v34  ;;  %v9563_v60 = vpop.eup %6729  ;;  %v13340_v12 = vld [vmem:[#allocation59_spill] sm:$0xff]  ;;  %v2130_v39 = vadd.f32 %v9542_v19, %v2129_v43  ;;  %v2150_v34 = vand.u32 2147483647, %v9528_v30  ;;  %v9605_v43 = vpop.xlane.xlu1 %1835 }
 0x7b3   :  { %v9530_v45 = vpop.xlane.xlu0 %1685  ;;  %13339 = vst [vmem:[#allocation51_spill] sm:$0xff] %v9563_v60  ;;  %v9568_v2 = vadd.f32 1e-08, %v13340_v12  ;;  %v9571_v35 = vpop.eup %6731 }
 0x7b4   :  { %v1173_v24 = vrot.slane %v1172_v14, 1  ;;  %6733 = vpow2.f32 %v4705_v29  ;;  %v2172_v37 = vmul.f32 %v9571_v35, %v9548_v55  ;;  %v13343_v29 = vld [vmem:[#allocation61_spill] sm:$0xff]  ;;  %vm9624_vm7 = vcmp.eq.f32.partialorder %v2150_v34, 8.507059e+37 }
 0x7b5   :  { %6735 = vrcp.f32 %v9568_v2  ;;  %v9596_v57 = vadd.f32 1e-08, %v13343_v29  ;;  %v2165_v29 = vand.u32 2147483647, %v9537_v62  ;;  %vm2177_vm14 = vweird.f32 %v9571_v35 }
 0x7b6   :  { %v1174_v1 = vadd.f32 %v1173_v24, %v1172_v14  ;;  %v2157_v14 = vmul.f32 %v9561_v48, %v9537_v62  ;;  %v4326_v24 = vpop.trf.xlu2  ;;  %6737 = vrcp.f32 %v9577_v21  ;;  %v2173_v16 = vsub.f32 1.0, %v2172_v37  ;;  %vm9693_vm15 = vmor %vm2176_vm12, %vm2177_vm14 }
 0x7b7   :  { %6326 = vmatmul.msk.f32.gmra.mxu3 %vm1818_vm3, %v4326_v24  ;;  %v2134_v37 = vsel %vm9612_vm2, %v9542_v19, %v2130_v39  ;;  %6739 = vrcp.f32 %v9596_v57  ;;  %vm9651_vm10 = vcmp.eq.f32.partialorder %v2165_v29, 8.507059e+37  ;;  %v2197_v29 = vand.u32 2147483648, %v9568_v2 }
 0x7b8   :  { %6362 = vpush %v1174_v1  ;;  %v2137_v1 = vand.u32 2147483648, %v9520_v4  ;;  %v2158_v13 = vsub.f32 1.0, %v2157_v14  ;;  %v1709_v14 = vmul.f32 %v8438_v33, %v9484_v63  ;;  %v2174_v39 = vmul.f32 %v9571_v35, %v2173_v16 }
 0x7b9   :  { %6364 = vpush %v1182_v9  ;;  %4922 = vxpose.xlu0.b32.cont [6/8] (short) (narrow) %v9545_v5, 64  ;;  %v2152_v9 = vand.u32 2147483648, %v9528_v30 }
 0x7ba   :  { %v9592_v54 = vpop.eup %6733  ;;  %v2138_v4 = vor.u32 1.1754944e-38, %v2137_v1  ;;  %v2159_v63 = vmul.f32 %v9561_v48, %v2158_v13  ;;  %v13350_v1 = vld [vmem:[#allocation62_spill] sm:$0xff]  ;;  %v2145_v13 = vadd.f32 %v9559_v42, %v2144_v59  ;;  %v1717_v24 = vmul.f32 1.442695, %v1709_v14 }
 0x7bb   :  { %v9555_v31 = vpop.xlane.xlu0 %1691  ;;  %13342 = vst [vmem:[#allocation41_spill] sm:$0xff] %v9592_v54  ;;  %v9608_v26 = vpop.eup %6735  ;;  %v2153_v6 = vor.u32 1.1754944e-38, %v2152_v9  ;;  %v1712_v9 = vmul.f32 %v8438_v33, %v9494_v41  ;;  %v9645_v41 = vadd.f32 1e-08, %v9539_v36  ;;  %v9647_v59 = vadd.f32 1e-08, %v1830_v40 }
 0x7bc   :  { %v9635_v19 = vpop.eup %6737  ;;  %v2187_v34 = vmul.f32 %v9608_v26, %v9568_v2  ;;  %v2160_v3 = vadd.f32 %v9561_v48, %v2159_v63  ;;  %v2149_v14 = vsel %vm9659_vm13, %v9559_v42, %v2145_v13  ;;  %v2175_v15 = vadd.f32 %v9571_v35, %v2174_v39 }
 0x7bd   :  { %v2202_v36 = vmul.f32 %v9635_v19, %v9577_v21  ;;  %v1723_v40 = vmul.f32 1.442695, %v1712_v9  ;;  %v9671_v30 = vpop.eup %6739  ;;  %v2183_v63 = vor.u32 1.1754944e-38, %v2182_v56  ;;  %v1839_v9 = vpop.xlane.xlu1 %1838  ;;  %vm2207_vm8 = vweird.f32 %v9635_v19 }
 0x7be   :  { %v2164_v56 = vsel %vm9680_vm5, %v9561_v48, %v2160_v3  ;;  %v2217_v3 = vmul.f32 %v9671_v30, %v9596_v57  ;;  %v2179_v48 = vsel %vm9693_vm15, %v9571_v35, %v2175_v15  ;;  %v2198_v35 = vor.u32 1.1754944e-38, %v2197_v29  ;;  %vm9783_vm14 = vmor %vm2206_vm4, %vm2207_vm8 }
 0x7bf   :  { %v2203_v39 = vsub.f32 1.0, %v2202_v36  ;;  %vm2222_vm12 = vweird.f32 %v9671_v30  ;;  %vm1901_vm4 = vweird.f32 %v9647_v59 }
 0x7c1   :  { %4923 = vxpose.xlu0.b32.cont [7/8] (short) (narrow) %v9563_v60, 64  ;;  %v9630_v60 = vadd.f32 1e-08, %v13350_v1  ;;  %v2139_v1 = vsel %vm9599_vm1, %v2138_v4, %v2134_v37  ;;  %v2188_v4 = vsub.f32 1.0, %v2187_v34  ;;  %v2180_v37 = vand.u32 2147483647, %v9548_v55 }
 0x7c2   :  { %v2195_v55 = vand.u32 2147483647, %v9568_v2  ;;  %v2212_v34 = vand.u32 2147483648, %v9577_v21  ;;  %vm2191_vm1 = vweird.f32 %v9568_v2  ;;  %v2204_v15 = vmul.f32 %v9635_v19, %v2203_v39 }
 0x7c3   :  { %v9579_v10 = vpop.xlane.xlu0 %1697  ;;  %6741 = vrcp.f32 %v9630_v60  ;;  %v2189_v12 = vmul.f32 %v9608_v26, %v2188_v4  ;;  %vm2181_vm2 = vcmp.eq.f32.partialorder %v2180_v37, 8.507059e+37 }
 0x7c4   :  { %6743 = vpow2.f32 %v1717_v24  ;;  %v9699_v24 = vsel %vm9624_vm7, %v2153_v6, %v2149_v14  ;;  %v9715_v6 = vsel %vm9651_vm10, %v2168_v50, %v2164_v56  ;;  %vm9720_vm6 = vcmp.eq.f32.partialorder %v2195_v55, 8.507059e+37 }
 0x7c5   :  { %6745 = vrcp.f32 %v9645_v41  ;;  %v2213_v37 = vor.u32 1.1754944e-38, %v2212_v34  ;;  %v2184_v62 = vsel %vm2181_vm2, %v2183_v63, %v2179_v48  ;;  %v9730_v50 = vadd.f32 1e-08, %v9605_v43  ;;  %v1842_v49 = vpop.xlane.xlu1 %1841 }
 0x7c6   :  { %6747 = vrcp.f32 %v9647_v59  ;;  %v2218_v56 = vsub.f32 1.0, %v2217_v3  ;;  %v2190_v55 = vadd.f32 %v9608_v26, %v2189_v12  ;;  %vm2192_vm7 = vweird.f32 %v9608_v26 }
 0x7c7   :  { %6749 = vpow2.f32 %v1723_v40  ;;  %vm2221_vm10 = vweird.f32 %v9596_v57  ;;  %v1714_v63 = vmul.f32 %v8438_v33, %v9505_v38  ;;  %v2205_v3 = vadd.f32 %v9635_v19, %v2204_v15  ;;  %vm9761_vm13 = vmor %vm2191_vm1, %vm2192_vm7 }
 0x7c8   :  { %v2219_v0 = vmul.f32 %v9671_v30, %v2218_v56  ;;  %v9769_v15 = vadd.f32 1e-08, %v1839_v9  ;;  %v2194_v25 = vsel %vm9761_vm13, %v9608_v26, %v2190_v55  ;;  %vm9820_vm5 = vmor %vm2221_vm10, %vm2222_vm12  ;;  %vm1871_vm2 = vweird.f32 %v9645_v41 }
 0x7c9   :  { %4924 = vxpose.xlu0.b32.end [8/8] (short) (narrow) %v9592_v54, 64  ;;  %v9709_v42 = vpop.eup %6741  ;;  %v2209_v32 = vsel %vm9783_vm14, %v9635_v19, %v2205_v3  ;;  %v9796_v21 = vsel %vm9720_vm6, %v2198_v35, %v2194_v25  ;;  %vm1931_vm13 = vweird.f32 %v9730_v50 }
 0x7ca   :  { %v9717_v40 = vpop.eup %6743  ;;  %v1950_v46 = vand.u32 2147483647, %v9769_v15 }
 0x7cb   :  { %v1821_v54 = vpop.xlane.xlu0 %1820  ;;  %v9726_v4 = vpop.eup %6745  ;;  %v2140_v39 = vmul.f32 %v9717_v40, %v2139_v1 }
 0x7cc   :  { %v9707_v36 = vadd.f32 1e-08, %v1821_v54  ;;  %v9732_v16 = vpop.eup %6747  ;;  %v1867_v34 = vmul.f32 %v9726_v4, %v9645_v41  ;;  %vm1872_vm15 = vweird.f32 %v9726_v4 }
 0x7cd   :  { %v9737_v29 = vpop.eup %6749  ;;  %v1897_v1 = vmul.f32 %v9732_v16, %v9647_v59  ;;  %v2246_v18 = vadd.f32 1e-12, %v2140_v39  ;;  %vm1902_vm1 = vweird.f32 %v9732_v16  ;;  %vm9870_vm6 = vmor %vm1871_vm2, %vm1872_vm15  ;;  %vm1946_vm2 = vweird.f32 %v9769_v15 }
 0x7ce   :  { %6751 = vrcp.f32 %v9707_v36  ;;  %v2185_v44 = vmul.f32 %v9737_v29, %v2184_v62  ;;  %v1727_v62 = vmul.f32 1.442695, %v1714_v63  ;;  %v1868_v56 = vsub.f32 1.0, %v1867_v34  ;;  %vm9878_vm7 = vmor %vm1901_vm4, %vm1902_vm1 }
 0x7cf   :  { %v1898_v55 = vsub.f32 1.0, %v1897_v1  ;;  %v9802_v63 = vadd.f32 %v9671_v30, %v2219_v0  ;;  %v1877_v1 = vand.u32 2147483648, %v9645_v41  ;;  %vm1856_vm14 = vweird.f32 %v9707_v36 }
 0x7d0   :  { %v2249_v48 = vadd.f32 1e-12, %v2185_v44  ;;  %v9813_v44 = vsel %vm9743_vm9, %v2213_v37, %v2209_v32  ;;  %v1869_v35 = vmul.f32 %v9726_v4, %v1868_v56  ;;  %v1905_v32 = vand.u32 2147483647, %v9647_v59 }
 0x7d1   :  { %v1899_v3 = vmul.f32 %v9732_v16, %v1898_v55  ;;  %v1907_v55 = vand.u32 2147483648, %v9647_v59  ;;  %v9858_v58 = vor.u32 1.1754944e-38, %v1877_v1 }
 0x7d2   :  { %vm9882_vm8 = vcmp.eq.f32.partialorder %v1905_v32, 8.507059e+37 }
 0x7d3   :  { %v1827_v13 = vpop.xlane.xlu0 %1826 }
 0x7d4   :  { %v9724_v54 = vadd.f32 1e-08, %v1827_v13  ;;  %v2232_v13 = vmul.f32 %v9709_v42, %v9630_v60 }
 0x7d6   :  { %6753 = vrcp.f32 %v9724_v54  ;;  %v2233_v2 = vsub.f32 1.0, %v2232_v13  ;;  %v9792_v13 = vadd.f32 1e-08, %v1842_v49  ;;  %v1731_v49 = vmul.f32 1.442695, %v1716_v47 }
 0x7d7   :  { %6755 = vrcp.f32 %v9730_v50  ;;  %vm1886_vm1 = vweird.f32 %v9724_v54 }
 0x7d8   :  { %v2234_v19 = vmul.f32 %v9709_v42, %v2233_v2 }
 0x7db   :  { %v1833_v12 = vpop.xlane.xlu0 %1832 }
 0x7dc   :  { %v9765_v38 = vadd.f32 1e-08, %v1833_v12  ;;  %v9777_v12 = vpop.eup %6751 }
 0x7dd   :  { %v9798_v39 = vpop.eup %6753  ;;  %v1852_v25 = vmul.f32 %v9777_v12, %v9707_v36  ;;  %vm1857_vm10 = vweird.f32 %v9777_v12 }
 0x7de   :  { %6757 = vrcp.f32 %v9765_v38  ;;  %v9805_v34 = vpop.eup %6755  ;;  %vm1887_vm12 = vweird.f32 %v9798_v39  ;;  %vm9919_vm15 = vmor %vm1856_vm14, %vm1857_vm10 }
 0x7df   :  { %6759 = vrcp.f32 %v9769_v15  ;;  %v1927_v0 = vmul.f32 %v9805_v34, %v9730_v50  ;;  %v1853_v9 = vsub.f32 1.0, %v1852_v25  ;;  %v1937_v25 = vand.u32 2147483648, %v9730_v50  ;;  %vm9935_vm4 = vmor %vm1886_vm1, %vm1887_vm12 }
 0x7e0   :  { %6761 = vlog2.f32 %v2246_v18  ;;  %v1882_v18 = vmul.f32 %v9798_v39, %v9724_v54  ;;  %vm1932_vm9 = vweird.f32 %v9805_v34  ;;  %vm1916_vm12 = vweird.f32 %v9765_v38 }
 0x7e1   :  { %6763 = vpow2.f32 %v1727_v62  ;;  %v9838_v62 = vadd.f32 %v9709_v42, %v2234_v19  ;;  %v1928_v26 = vsub.f32 1.0, %v1927_v0  ;;  %v1854_v17 = vmul.f32 %v9777_v12, %v1853_v9  ;;  %vm9962_vm1 = vmor %vm1931_vm13, %vm1932_vm9 }
 0x7e2   :  { %6765 = vrcp.f32 %v9792_v13  ;;  %v1883_v14 = vsub.f32 1.0, %v1882_v18  ;;  %v1711_v18 = vmul.f32 %v8438_v33, %v9530_v45  ;;  %v1908_v45 = vor.u32 1.1754944e-38, %v1907_v55 }
 0x7e3   :  { %6767 = vlog2.f32 %v2249_v48  ;;  %v9846_v48 = vadd.f32 %v9726_v4, %v1869_v35  ;;  %v1935_v9 = vand.u32 2147483647, %v9730_v50  ;;  %v9896_v51 = vor.u32 1.1754944e-38, %v1937_v25 }
 0x7e4   :  { %v9827_v37 = vpop.eup %6757  ;;  %6769 = vpow2.f32 %v1731_v49  ;;  %v1900_v49 = vadd.f32 %v9732_v16, %v1899_v3  ;;  %v1884_v32 = vmul.f32 %v9798_v39, %v1883_v14  ;;  %v1929_v55 = vmul.f32 %v9805_v34, %v1928_v26 }
 0x7e5   :  { %v9840_v56 = vpop.eup %6759  ;;  %v1912_v19 = vmul.f32 %v9827_v37, %v9765_v38  ;;  %v1721_v8 = vmul.f32 1.442695, %v1711_v18  ;;  %v1713_v26 = vmul.f32 %v8438_v33, %v9555_v31  ;;  %v1715_v14 = vmul.f32 %v8438_v33, %v9579_v10 }
 0x7e6   :  { %v9848_v43 = vpop.eup %6761  ;;  %v1942_v3 = vmul.f32 %v9840_v56, %v9769_v15  ;;  %v1904_v52 = vsel %vm9878_vm7, %v9732_v16, %v1900_v49  ;;  %v1855_v16 = vadd.f32 %v9777_v12, %v1854_v17  ;;  %v1862_v49 = vand.u32 2147483648, %v9707_v36 }
 0x7e7   :  { %v9854_v2 = vpop.eup %6763  ;;  %v1913_v23 = vsub.f32 1.0, %v1912_v19  ;;  %v1860_v25 = vand.u32 2147483647, %v9707_v36  ;;  %v1885_v19 = vadd.f32 %v9798_v39, %v1884_v32  ;;  %v1892_v10 = vand.u32 2147483648, %v9724_v54 }
 0x7e8   :  { %v9860_v35 = vpop.eup %6765  ;;  %v1943_v28 = vsub.f32 1.0, %v1942_v3  ;;  %v1930_v3 = vadd.f32 %v9805_v34, %v1929_v55  ;;  %v1909_v59 = vsel %vm9882_vm8, %v1908_v45, %v1904_v52  ;;  %6771 = vpow2.f32 %v1721_v8 }
 0x7e9   :  { %v9874_v1 = vpop.eup %6767  ;;  %v1957_v27 = vmul.f32 %v9860_v35, %v9792_v13  ;;  %v1914_v17 = vmul.f32 %v9827_v37, %v1913_v23  ;;  %v1859_v36 = vsel %vm9919_vm15, %v9777_v12, %v1855_v16  ;;  %v1890_v23 = vand.u32 2147483647, %v9724_v54 }
 0x7ea   :  { %v9891_v5 = vpop.eup %6769  ;;  %v1725_v32 = vmul.f32 1.442695, %v1713_v26  ;;  %v1729_v55 = vmul.f32 1.442695, %v1715_v14  ;;  %v1863_v61 = vor.u32 1.1754944e-38, %v1862_v49  ;;  %vm9939_vm7 = vcmp.eq.f32.partialorder %v1935_v9, 8.507059e+37 }
 0x7eb   :  { %v1958_v18 = vsub.f32 1.0, %v1957_v27  ;;  %v1944_v27 = vmul.f32 %v9840_v56, %v1943_v28  ;;  %vm1861_vm8 = vcmp.eq.f32.partialorder %v1860_v25, 8.507059e+37  ;;  %v1889_v52 = vsel %vm9935_vm4, %v9798_v39, %v1885_v19 }
 0x7ec   :  { %v1915_v28 = vadd.f32 %v9827_v37, %v1914_v17  ;;  %vm1917_vm10 = vweird.f32 %v9827_v37  ;;  %v1864_v12 = vsel %vm1861_vm8, %v1863_v61, %v1859_v36  ;;  %v1893_v45 = vor.u32 1.1754944e-38, %v1892_v10 }
 0x7ed   :  { %v1922_v16 = vand.u32 2147483648, %v9765_v38  ;;  %v1959_v9 = vmul.f32 %v9860_v35, %v1958_v18  ;;  %vm1891_vm14 = vcmp.eq.f32.partialorder %v1890_v23, 8.507059e+37  ;;  %v1920_v14 = vand.u32 2147483647, %v9765_v38  ;;  %vm9953_vm15 = vmor %vm1916_vm12, %vm1917_vm10 }
 0x7ee   :  { %6773 = vpow2.f32 %v1725_v32  ;;  %v1894_v39 = vsel %vm1891_vm14, %v1893_v45, %v1889_v52  ;;  %v1910_v61 = vmul.f32 %v9737_v29, %v1909_v59  ;;  %v6772_v19 = vpop.eup %6771  ;;  %vm1947_vm4 = vweird.f32 %v9840_v56 }
 0x7ef   :  { %6775 = vpow2.f32 %v1729_v55  ;;  %v1865_v38 = vmul.f32 %v9717_v40, %v1864_v12  ;;  %v1919_v18 = vsel %vm9953_vm15, %v9827_v37, %v1915_v28  ;;  %vm2237_vm8 = vweird.f32 %v9709_v42  ;;  %vm9986_vm14 = vmor %vm1946_vm2, %vm1947_vm4 }
 0x7f0   :  { %v1945_v29 = vadd.f32 %v9840_v56, %v1944_v27  ;;  %v1923_v31 = vor.u32 1.1754944e-38, %v1922_v16  ;;  %v1934_v50 = vsel %vm9962_vm1, %v9805_v34, %v1930_v3  ;;  %vm2236_vm9 = vweird.f32 %v9630_v60 }
 0x7f1   :  { %v1895_v10 = vmul.f32 %v6772_v19, %v1894_v39  ;;  %vm1921_vm13 = vcmp.eq.f32.partialorder %v1920_v14, 8.507059e+37  ;;  %v1960_v40 = vadd.f32 %v9860_v35, %v1959_v9  ;;  %vm1962_vm10 = vweird.f32 %v9860_v35  ;;  %vm10029_vm4 = vmor %vm2236_vm9, %vm2237_vm8 }
 0x7f2   :  { %v2170_v37 = vmul.f32 %v6772_v19, %v9715_v6  ;;  %v1924_v59 = vsel %vm1921_vm13, %v1923_v31, %v1919_v18  ;;  %v1965_v36 = vand.u32 2147483647, %v9792_v13  ;;  %v1967_v23 = vand.u32 2147483648, %v9792_v13 }
 0x7f3   :  { %v1683_v54 = vpop.xlane.xlu2 %1682  ;;  %v1971_v3 = vadd.f32 1e-12, %v1865_v38  ;;  %v13387_v27 = vand.u32 2147483647, %v9645_v41  ;;  %v1939_v6 = vsel %vm9939_vm7, %v9896_v51, %v1934_v50  ;;  %vm1961_vm15 = vweird.f32 %v9792_v13 }
 0x7f4   :  { %v1710_v26 = vmul.f32 %v8438_v33, %v1683_v54  ;;  %v6774_v32 = vpop.eup %6773  ;;  %v1949_v55 = vsel %vm9986_vm14, %v9840_v56, %v1945_v29  ;;  %vm1951_vm2 = vcmp.eq.f32.partialorder %v1950_v46, 8.507059e+37  ;;  %v13388_v41 = vsel %vm9870_vm6, %v9726_v4, %v9846_v48  ;;  %vm10007_vm1 = vmor %vm1961_vm15, %vm1962_vm10 }
 0x7f5   :  { %vm1876_vm12 = vcmp.eq.f32.partialorder %v13387_v27, 8.507059e+37  ;;  %v1974_v51 = vadd.f32 1e-12, %v1910_v61  ;;  %v6776_v13 = vpop.eup %6775  ;;  %v13391_v52 = vand.u32 2147483648, %v9769_v15  ;;  %v1925_v56 = vmul.f32 %v6774_v32, %v1924_v59 }
 0x7f6   :  { %v1719_v25 = vmul.f32 1.442695, %v1710_v26  ;;  %v1879_v7 = vsel %vm1876_vm12, %v9858_v58, %v13388_v41  ;;  %v1964_v46 = vsel %vm10007_vm1, %v9860_v35, %v1960_v40  ;;  %v1973_v0 = vadd.f32 1e-12, %v1895_v10 }
 0x7f7   :  { %v1953_v28 = vor.u32 1.1754944e-38, %v13391_v52  ;;  %v2248_v12 = vadd.f32 1e-12, %v2170_v37  ;;  %v1940_v4 = vmul.f32 %v9854_v2, %v1939_v6  ;;  %vm1966_vm6 = vcmp.eq.f32.partialorder %v1965_v36, 8.507059e+37 }
 0x7f8   :  { %6777 = vpow2.f32 %v1719_v25  ;;  %v1968_v58 = vor.u32 1.1754944e-38, %v1967_v23  ;;  %v2200_v15 = vmul.f32 %v6774_v32, %v9796_v21  ;;  %v1975_v35 = vadd.f32 1e-12, %v1925_v56 }
 0x7f9   :  { %v1954_v48 = vsel %vm1951_vm2, %v1953_v28, %v1949_v55  ;;  %6779 = vlog2.f32 %v1971_v3  ;;  %v13392_v49 = vand.u32 2147483648, %v9596_v57  ;;  %v2215_v61 = vmul.f32 %v9854_v2, %v9813_v44 }
 0x7fa   :  { %v1955_v26 = vmul.f32 %v6776_v13, %v1954_v48  ;;  %v1969_v9 = vsel %vm1966_vm6, %v1968_v58, %v1964_v46  ;;  %6781 = vlog2.f32 %v1974_v51  ;;  %v13393_v19 = vand.u32 2147483647, %v9596_v57 }
 0x7fb   :  { %6783 = vlog2.f32 %v1973_v0  ;;  %v2228_v25 = vor.u32 1.1754944e-38, %v13392_v49  ;;  %v1970_v21 = vmul.f32 %v9891_v5, %v1969_v9  ;;  %v1976_v17 = vadd.f32 1e-12, %v1940_v4 }
 0x7fc   :  { %6785 = vlog2.f32 %v2248_v12  ;;  %vm2226_vm7 = vcmp.eq.f32.partialorder %v13393_v19, 8.507059e+37  ;;  %v2239_v44 = vsel %vm10029_vm4, %v9709_v42, %v9838_v62  ;;  %v2250_v2 = vadd.f32 1e-12, %v2200_v15 }
 0x7fd   :  { %v13396_v57 = vsel %vm9820_vm5, %v9671_v30, %v9802_v63  ;;  %v13397_v18 = vand.u32 2147483648, %v9630_v60  ;;  %v1977_v10 = vadd.f32 1e-12, %v1955_v26  ;;  %v13398_v40 = vand.u32 2147483647, %v9630_v60 }
 0x7fe   :  { %v6778_v54 = vpop.eup %6777  ;;  %v2229_v38 = vsel %vm2226_vm7, %v2228_v25, %v13396_v57  ;;  %v2251_v42 = vadd.f32 1e-12, %v2215_v61  ;;  %v1978_v47 = vadd.f32 1e-12, %v1970_v21  ;;  %v2255_v27 = vmul.f32 0.6931472, %v9848_v43 }
 0x7ff   :  { %v1880_v45 = vmul.f32 %v6778_v54, %v1879_v7  ;;  %v2155_v16 = vmul.f32 %v6778_v54, %v9699_v24  ;;  %v2243_v29 = vor.u32 1.1754944e-38, %v13397_v18  ;;  %v6780_v31 = vpop.eup %6779  ;;  %v2230_v50 = vmul.f32 %v6776_v13, %v2229_v38 }
 0x800   :  { %vm2241_vm8 = vcmp.eq.f32.partialorder %v13398_v40, 8.507059e+37  ;;  %v6782_v37 = vpop.eup %6781  ;;  %v1980_v36 = vmul.f32 0.6931472, %v6780_v31  ;;  %v2261_v0 = vmul.f32 0.6931472, %v9874_v1  ;;  %v2270_v54 = vsel %vm1151_vm11, %v2255_v27, 0.0 }
 0x801   :  { %v1972_v14 = vadd.f32 1e-12, %v1880_v45  ;;  %v2247_v39 = vadd.f32 1e-12, %v2155_v16  ;;  %v2244_v62 = vsel %vm2241_vm8, %v2243_v29, %v2239_v44  ;;  %v6784_v59 = vpop.eup %6783  ;;  %v2252_v34 = vadd.f32 1e-12, %v2230_v50 }
 0x802   :  { %v2245_v30 = vmul.f32 %v9891_v5, %v2244_v62  ;;  %v6786_v63 = vpop.eup %6785  ;;  %v1984_v60 = vmul.f32 0.6931472, %v6784_v59  ;;  %v1986_v5 = vmul.f32 0.6931472, %v6782_v37  ;;  %v1995_v51 = vsel %vm1151_vm11, %v1980_v36, 0.0  ;;  %v13400_v36 = vld [vmem:[#allocation30_spill] sm:$0xff] }
 0x803   :  { %6787 = vlog2.f32 %v1972_v14  ;;  %v2259_v7 = vmul.f32 0.6931472, %v6786_v63  ;;  %v2275_v1 = vsel %vm1151_vm11, %v2261_v0, 0.0  ;;  %v13399_v63 = vld [vmem:[#allocation28_spill] sm:$0xff]  ;;  %v13402_v27 = vld [vmem:[#allocation31_spill] sm:$0xff] }
 0x804   :  { %6789 = vlog2.f32 %v2247_v39  ;;  %v2253_v41 = vadd.f32 1e-12, %v2245_v30  ;;  %v1998_v46 = vsel %vm1151_vm11, %v1984_v60, 0.0  ;;  %v2000_v16 = vsel %vm1151_vm11, %v1986_v5, 0.0 }
 0x805   :  { %6791 = vlog2.f32 %v1975_v35  ;;  %v2273_v15 = vsel %vm1151_vm11, %v2259_v7, 0.0  ;;  %v13403_v7 = vld [vmem:[#allocation26_spill] sm:$0xff] }
 0x806   :  { %6793 = vlog2.f32 %v1976_v17 }
 0x807   :  { %6795 = vlog2.f32 %v2250_v2 }
 0x808   :  { %6797 = vlog2.f32 %v1977_v10 }
 0x809   :  { %v6788_v23 = vpop.eup %6787  ;;  %6799 = vlog2.f32 %v2251_v42 }
 0x80a   :  { %v6790_v3 = vpop.eup %6789  ;;  %v1982_v6 = vmul.f32 0.6931472, %v6788_v23  ;;  %6801 = vlog2.f32 %v1978_v47  ;;  %v2308_v23 = vmul.f32 %v13400_v36, %v13399_v63 }
 0x80b   :  { %v6792_v32 = vpop.eup %6791  ;;  %v2257_v55 = vmul.f32 0.6931472, %v6790_v3  ;;  %6803 = vlog2.f32 %v2252_v34  ;;  %v13401_v3 = vld [vmem:[#allocation27_spill] sm:$0xff] }
 0x80c   :  { %v1996_v8 = vsel %vm1151_vm11, %v1982_v6, 0.0  ;;  %v6794_v13 = vpop.eup %6793  ;;  %v1988_v43 = vmul.f32 0.6931472, %v6792_v32  ;;  %6805 = vlog2.f32 %v2253_v41  ;;  %v2316_v34 = vsel %vm116_vm0, %v2308_v23, 0.0  ;;  %v7178_v32 = vld [vmem:[%s13131_s27 + $0x8] sm:$0xff] }
 0x80d   :  { %v2271_v52 = vsel %vm1151_vm11, %v2257_v55, 0.0  ;;  %v1997_v28 = vadd.f32 %v1996_v8, %v1995_v51  ;;  %v6796_v56 = vpop.eup %6795  ;;  %v1990_v45 = vmul.f32 0.6931472, %v6794_v13  ;;  %v2309_v6 = vmul.f32 %v13402_v27, %v13401_v3  ;;  %v13404_v8 = vld [vmem:[#allocation32_spill] sm:$0xff]  ;;  %v5226_v51 = vpop.f32.mrf.mxu2  ;;  %v10081_v13 = vld [vmem:[%s12976_s6] ss:$0 sm:$0xff] }
 0x80e   :  { %v6798_v12 = vpop.eup %6797  ;;  %v2272_v58 = vadd.f32 %v2271_v52, %v2270_v54  ;;  %v2002_v35 = vsel %vm1151_vm11, %v1988_v43, 0.0  ;;  %v2263_v49 = vmul.f32 0.6931472, %v6796_v56  ;;  %v5325_v55 = vmul.f32 %v7178_v32, %v7178_v32  ;;  %v13405_v52 = vld [vmem:[#allocation69_spill] sm:$0xff]  ;;  %6361 = vmatpush.xpose.msk.msra.mxu3 %vm116_vm0, %v5226_v51  ;;  %6340 = vmatpush.xpose.msk.msra.mxu0 %vm116_vm0, %v5226_v51 }
 0x80f   :  { %v1999_v4 = vadd.f32 %v1998_v46, %v1997_v28  ;;  %v6800_v48 = vpop.eup %6799  ;;  %v1992_v39 = vmul.f32 0.6931472, %v6798_v12  ;;  %v2004_v21 = vsel %vm1151_vm11, %v1990_v45, 0.0  ;;  %v2319_v60 = vsel %vm116_vm0, %v2309_v6, 0.0  ;;  %v13407_v12 = vld [vmem:[#allocation24_spill] sm:$0xff] }
 0x810   :  { %v6802_v26 = vpop.eup %6801  ;;  %v2274_v14 = vadd.f32 %v2273_v15, %v2272_v58  ;;  %v2265_v17 = vmul.f32 0.6931472, %v6800_v48  ;;  %v2277_v18 = vsel %vm1151_vm11, %v2263_v49, 0.0  ;;  %v5335_v41 = vsel %vm116_vm0, %v5325_v55, 0.0  ;;  %v7181_v15 = vld [vmem:[%s13131_s27] sm:$0xff] }
 0x811   :  { %v2001_v9 = vadd.f32 %v2000_v16, %v1999_v4  ;;  %v6804_v25 = vpop.eup %6803  ;;  %v1994_v24 = vmul.f32 0.6931472, %v6802_v26  ;;  %v2006_v57 = vsel %vm1151_vm11, %v1992_v39, 0.0  ;;  %v2310_v5 = vmul.f32 %v13404_v8, %v13403_v7  ;;  %6342 = vmatmul.msk.f32.vlgmr.msra.gmra.mxu3 %vm116_vm0, %v7178_v32  ;;  %v13408_v4 = vld [vmem:[#allocation38_spill] sm:$0xff]  ;;  %v7180_v16 = vld [vmem:[%s13131_s27 + $0x10] sm:$0xff]  ;;  %v13411_v49 = vld [vmem:[#allocation21_spill] sm:$0xff] }
 0x812   :  { %v2276_v19 = vadd.f32 %v2275_v1, %v2274_v14  ;;  %v6806_v44 = vpop.eup %6805  ;;  %v2267_v38 = vmul.f32 0.6931472, %v6804_v25  ;;  %v2279_v40 = vsel %vm1151_vm11, %v2265_v17, 0.0  ;;  %v10085_v28 = vadd.f32 %v10081_v13, %v13405_v52  ;;  %v13409_v26 = vld [vmem:[#allocation23_spill] sm:$0xff]  ;;  %v13412_v1 = vld [vmem:[#allocation17_spill] sm:$0xff]  ;;  %v13416_v8 = vld [vmem:[#allocation16_spill] sm:$0xff] }
 0x813   :  { %v2003_v61 = vadd.f32 %v2002_v35, %v2001_v9  ;;  %v2008_v50 = vsel %vm1151_vm11, %v1994_v24, 0.0  ;;  %v2269_v10 = vmul.f32 0.6931472, %v6806_v44  ;;  %v5297_v56 = vmul.f32 %v5226_v51, %v5226_v51  ;;  %v13410_v9 = vld [vmem:[#allocation39_spill] sm:$0xff]  ;;  %v7182_v35 = vld [vmem:[%s13131_s27 + $0x18] sm:$0xff]  ;;  %v7183_v24 = vld [vmem:[%s13131_s27 + $0x20] sm:$0xff] }
 0x814   :  { %v2278_v31 = vadd.f32 %v2277_v18, %v2276_v19  ;;  %v2281_v62 = vsel %vm1151_vm11, %v2267_v38, 0.0  ;;  %v2322_v43 = vsel %vm116_vm0, %v2310_v5, 0.0  ;;  %v3144_v46 = vmul.f32 %v10085_v28, %v10085_v28  ;;  %v13414_v17 = vld [vmem:[#allocation13_spill] sm:$0xff]  ;;  %v7184_v38 = vld [vmem:[%s13131_s27 + $0x28] sm:$0xff]  ;;  %v13415_v18 = vld [vmem:[#allocation11_spill] sm:$0xff] }
 0x815   :  { %v2005_v2 = vadd.f32 %v2004_v21, %v2003_v61  ;;  %v2283_v47 = vsel %vm1151_vm11, %v2269_v10, 0.0  ;;  %6349 = vmatpush.xpose.msk.msra.mxu2 %vm116_vm0, %v5297_v56  ;;  %v13406_v54 = vmov 1.0   ;;  %v2312_v58 = vmul.f32 %v13408_v4, %v13407_v12  ;;  %v13413_v21 = vld [vmem:[#allocation22_spill] sm:$0xff]  ;;  %v13417_v56 = vld [vmem:[#allocation7_spill] sm:$0xff] }
 0x816   :  { %v2280_v42 = vadd.f32 %v2279_v40, %v2278_v31  ;;  %v3164_v48 = vsel %vm116_vm0, %v3144_v46, 0.0  ;;  %v2313_v14 = vmul.f32 %v13410_v9, %v13409_v26  ;;  %v2314_v25 = vmul.f32 %v13412_v1, %v13411_v49  ;;  %v13418_v9 = vld [vmem:[#allocation18_spill] sm:$0xff] }
 0x817   :  { %v2007_v29 = vadd.f32 %v2006_v57, %v2005_v2  ;;  %v2328_v45 = vsel %vm116_vm0, %v2312_v58, 0.0  ;;  %v2315_v44 = vmul.f32 %v13414_v17, %v13413_v21  ;;  %v5324_v10 = vmul.f32 %v7181_v15, %v7181_v15 }
 0x818   :  { %v2282_v59 = vadd.f32 %v2281_v62, %v2280_v42  ;;  %6350 = vmatmul.msk.f32.vlgmr.msra.gmra.mxu2 %vm116_vm0, %v13406_v54  ;;  %v2331_v39 = vsel %vm116_vm0, %v2313_v14, 0.0  ;;  %v2334_v61 = vsel %vm116_vm0, %v2314_v25, 0.0  ;;  %v7186_v42 = vld [vmem:[%s13131_s27 + $0x38] sm:$0xff]  ;;  %v5326_v62 = vmul.f32 %v7180_v16, %v7180_v16 }
 0x819   :  { %v2009_v37 = vadd.f32 %v2008_v50, %v2007_v29  ;;  %6343 = vmatmul.msk.f32.gmra.mxu3 %vm116_vm0, %v7180_v16  ;;  %v2337_v2 = vsel %vm116_vm0, %v2315_v44, 0.0  ;;  %v2449_v29 = vsel %vm1818_vm3, %v13415_v18, 0.0  ;;  %v7185_v50 = vld [vmem:[%s13131_s27 + $0x30] sm:$0xff]  ;;  %v5332_v40 = vsel %vm116_vm0, %v5324_v10, 0.0 }
 0x81a   :  { %v2284_v30 = vadd.f32 %v2283_v47, %v2282_v59  ;;  %v5338_v59 = vsel %vm116_vm0, %v5326_v62, 0.0  ;;  %v5329_v6 = vmul.f32 %v7184_v38, %v7184_v38  ;;  %v5330_v55 = vmul.f32 %v7185_v50, %v7185_v50  ;;  %v13421_v62 = vld [vmem:[#allocation8_spill] sm:$0xff] }
 0x81b   :  { %2010 = vadd.xlane.f32.xlu1 %v2009_v37  ;;  %v10153_v5 = vadd.f32 1e-08, %v13416_v8  ;;  %v5331_v54 = vmul.f32 %v7186_v42, %v7186_v42  ;;  %v10165_v14 = vadd.f32 1e-08, %v13418_v9  ;;  %v13428_v9 = vld [vmem:[#allocation54_spill] sm:$0xff] }
 0x81c   :  { %v5350_v52 = vsel %vm116_vm0, %v5330_v55, 0.0  ;;  %v13424_v55 = vld [vmem:[#allocation52_spill] sm:$0xff] }
 0x81d   :  { %6807 = vrcp.f32 %v10153_v5  ;;  %v5353_v16 = vsel %vm116_vm0, %v5331_v54, 0.0  ;;  %vm2761_vm5 = vweird.f32 %v10153_v5  ;;  %vm2791_vm1 = vweird.f32 %v10165_v14 }
 0x821   :  { %6344 = vmatmul.msk.f32.gmra.mxu3 %vm116_vm0, %v7182_v35 }
 0x823   :  { %2285 = vadd.xlane.f32.xlu1 %v2284_v30  ;;  %v5327_v30 = vmul.f32 %v7182_v35, %v7182_v35 }
 0x825   :  { %v5341_v36 = vsel %vm116_vm0, %v5327_v30, 0.0 }
 0x829   :  { %6345 = vmatmul.msk.f32.gmra.mxu3 %vm116_vm0, %v7183_v24 }
 0x82b   :  { %2317 = vadd.xlane.f32.xlu1 %v2316_v34  ;;  %v5328_v34 = vmul.f32 %v7183_v24, %v7183_v24 }
 0x82d   :  { %v5344_v27 = vsel %vm116_vm0, %v5328_v34, 0.0  ;;  %v2767_v34 = vand.u32 2147483648, %v10153_v5 }
 0x831   :  { %6346 = vmatmul.msk.f32.gmra.mxu3 %vm116_vm0, %v7184_v38 }
 0x833   :  { %2320 = vadd.xlane.f32.xlu1 %v2319_v60  ;;  %v5347_v60 = vsel %vm116_vm0, %v5329_v6, 0.0 }
 0x835   :  { %v4933_v0 = vpop.trf.xlu0 }
 0x836   :  { %6331 = vmatmul.msk.f32.vlgmr.msrb.gmra.mxu0 %vm1818_vm3, %v4933_v0 }
 0x839   :  { %6347 = vmatmul.msk.f32.gmra.mxu3 %vm116_vm0, %v7185_v50  ;;  %v13420_v50 = vld [vmem:[#allocation10_spill] sm:$0xff] }
 0x83a   :  { %5336 = vadd.xlane.f32.xlu0 %v5335_v41  ;;  %v2452_v10 = vsel %vm1818_vm3, %v13420_v50, 0.0  ;;  %v2795_v50 = vand.u32 2147483647, %v10165_v14 }
 0x83b   :  { %2323 = vadd.xlane.f32.xlu1 %v2322_v43  ;;  %v10157_v43 = vadd.f32 1e-08, %v13417_v56  ;;  %v13425_v56 = vld [vmem:[#allocation44_spill] sm:$0xff] }
 0x83c   :  { %vm2796_vm4 = vcmp.eq.f32.partialorder %v2795_v50, 8.507059e+37 }
 0x83d   :  { %v4934_v19 = vpop.trf.xlu0  ;;  %6809 = vrcp.f32 %v10157_v43  ;;  %vm2776_vm13 = vweird.f32 %v10157_v43 }
 0x83e   :  { %6341 = vmatmul.msk.f32.vlgmr.msra.gmra.mxu0 %vm116_vm0, %v7181_v15  ;;  %6332 = vmatmul.msk.f32.vlgmr.msra.gmra.mxu1 %vm1818_vm3, %v4934_v19  ;;  %v10162_v15 = vpop.eup %6807  ;;  %6811 = vrcp.f32 %v10165_v14 }
 0x83f   :  { %vm2762_vm9 = vweird.f32 %v10162_v15 }
 0x840   :  { %vm10199_vm14 = vmor %vm2761_vm5, %vm2762_vm9 }
 0x841   :  { %6348 = vmatmul.msk.f32.gmra.mxu3 %vm116_vm0, %v7186_v42 }
 0x842   :  { %3165 = vadd.xlane.f32.xlu0 %v3164_v48 }
 0x843   :  { %2329 = vadd.xlane.f32.xlu1 %v2328_v45  ;;  %v10167_v1 = vpop.eup %6809 }
 0x844   :  { %v2772_v24 = vmul.f32 %v10167_v1, %v10157_v43  ;;  %vm2777_vm10 = vweird.f32 %v10167_v1 }
 0x845   :  { %v4935_v57 = vpop.trf.xlu0  ;;  %vm10211_vm12 = vmor %vm2776_vm13, %vm2777_vm10 }
 0x846   :  { %6333 = vmatmul.msk.f32.gmra.mxu1 %vm1818_vm3, %v4935_v57  ;;  %v2773_v18 = vsub.f32 1.0, %v2772_v24 }
 0x84b   :  { %2332 = vadd.xlane.f32.xlu1 %v2331_v39 }
 0x84d   :  { %v4936_v31 = vpop.trf.xlu0 }
 0x84e   :  { %6334 = vmatmul.msk.f32.gmra.mxu1 %vm1818_vm3, %v4936_v31 }
 0x853   :  { %2335 = vadd.xlane.f32.xlu1 %v2334_v61  ;;  %v2757_v61 = vmul.f32 %v10162_v15, %v10153_v5 }
 0x855   :  { %v4937_v37 = vpop.trf.xlu0  ;;  %v2758_v57 = vsub.f32 1.0, %v2757_v61 }
 0x856   :  { %6335 = vmatmul.msk.f32.gmra.mxu1 %vm1818_vm3, %v4937_v37 }
 0x857   :  { %v2759_v42 = vmul.f32 %v10162_v15, %v2758_v57 }
 0x859   :  { %v2760_v6 = vadd.f32 %v10162_v15, %v2759_v42 }
 0x85b   :  { %2338 = vadd.xlane.f32.xlu1 %v2337_v2 }
 0x85d   :  { %v4938_v47 = vpop.trf.xlu0 }
 0x85e   :  { %6336 = vmatmul.msk.f32.gmra.mxu1 %vm1818_vm3, %v4938_v47  ;;  %v2774_v47 = vmul.f32 %v10167_v1, %v2773_v18 }
 0x863   :  { %2450 = vadd.xlane.f32.xlu1 %v2449_v29  ;;  %v13419_v29 = vld [vmem:[#allocation6_spill] sm:$0xff] }
 0x864   :  { %v10176_v31 = vadd.f32 1e-08, %v13419_v29 }
 0x865   :  { %v4939_v23 = vpop.trf.xlu0 }
 0x866   :  { %6337 = vmatmul.msk.f32.gmra.mxu1 %vm1818_vm3, %v4939_v23  ;;  %6813 = vrcp.f32 %v10176_v31  ;;  %v2765_v23 = vand.u32 2147483647, %v10153_v5  ;;  %vm2806_vm8 = vweird.f32 %v10176_v31 }
 0x868   :  { %vm2766_vm15 = vcmp.eq.f32.partialorder %v2765_v23, 8.507059e+37 }
 0x86b   :  { %5333 = vadd.xlane.f32.xlu1 %v5332_v40  ;;  %v10180_v40 = vpop.eup %6811 }
 0x86c   :  { %v2787_v30 = vmul.f32 %v10180_v40, %v10165_v14  ;;  %vm2792_vm6 = vweird.f32 %v10180_v40 }
 0x86d   :  { %v4940_v32 = vpop.trf.xlu0  ;;  %vm10253_vm7 = vmor %vm2791_vm1, %vm2792_vm6 }
 0x86e   :  { %6338 = vmatmul.msk.f32.gmra.mxu1 %vm1818_vm3, %v4940_v32  ;;  %v2782_v32 = vand.u32 2147483648, %v10157_v43  ;;  %v2788_v5 = vsub.f32 1.0, %v2787_v30 }
 0x873   :  { %5339 = vadd.xlane.f32.xlu1 %v5338_v59  ;;  %v10184_v59 = vadd.f32 1e-08, %v13421_v62 }
 0x875   :  { %vm2821_vm9 = vweird.f32 %v10184_v59 }
 0x87b   :  { %5342 = vadd.xlane.f32.xlu1 %v5341_v36 }
 0x883   :  { %5345 = vadd.xlane.f32.xlu1 %v5344_v27 }
 0x88b   :  { %5348 = vadd.xlane.f32.xlu1 %v5347_v60 }
 0x88e   :  { %v2011_v41 = vpop.xlane.xlu1 %2010 }
 0x88f   :  { %v2012_v51 = vrot.slane %v2011_v41, 4 }
 0x891   :  { %v2013_v46 = vadd.f32 %v2012_v51, %v2011_v41  ;;  %v10205_v41 = vadd.f32 1e-08, %v13424_v55  ;;  %v2775_v51 = vadd.f32 %v10167_v1, %v2774_v47 }
 0x893   :  { %5351 = vadd.xlane.f32.xlu1 %v5350_v52  ;;  %v2014_v0 = vrot.slane %v2013_v46, 2  ;;  %v2780_v52 = vand.u32 2147483647, %v10157_v43  ;;  %v2783_v43 = vor.u32 1.1754944e-38, %v2782_v32  ;;  %v2842_v50 = vand.u32 2147483648, %v10205_v41 }
 0x895   :  { %v2015_v4 = vadd.f32 %v2014_v0, %v2013_v46  ;;  %v2455_v46 = vsel %vm1818_vm3, %v13425_v56, 0.0  ;;  %v2768_v0 = vor.u32 1.1754944e-38, %v2767_v34  ;;  %vm2781_vm2 = vcmp.eq.f32.partialorder %v2780_v52, 8.507059e+37 }
 0x896   :  { %v2286_v58 = vpop.xlane.xlu1 %2285  ;;  %v2812_v56 = vand.u32 2147483648, %v10176_v31 }
 0x897   :  { %v2287_v48 = vrot.slane %v2286_v58, 4  ;;  %v2016_v45 = vrot.slane %v2015_v4, 1 }
 0x899   :  { %v2288_v39 = vadd.f32 %v2287_v48, %v2286_v58  ;;  %v2017_v35 = vadd.f32 %v2016_v45, %v2015_v4  ;;  %v10215_v4 = vpop.eup %6813  ;;  %v2764_v58 = vsel %vm10199_vm14, %v10162_v15, %v2760_v6  ;;  %vm2836_vm14 = vweird.f32 %v10205_v41 }
 0x89a   :  { %v2769_v15 = vsel %vm2766_vm15, %v2768_v0, %v2764_v58  ;;  %v13433_v0 = vld [vmem:[#allocation56_spill] sm:$0xff]  ;;  %vm2807_vm5 = vweird.f32 %v10215_v4 }
 0x89b   :  { %5354 = vadd.xlane.f32.xlu1 %v5353_v16  ;;  %6366 = vpush %v2017_v35  ;;  %v2289_v25 = vrot.slane %v2288_v39, 2  ;;  %v2789_v16 = vmul.f32 %v10180_v40, %v2788_v5  ;;  %v2779_v35 = vsel %vm10211_vm12, %v10167_v1, %v2775_v51  ;;  %v2797_v1 = vand.u32 2147483648, %v10165_v14  ;;  %vm10289_vm10 = vmor %vm2806_vm8, %vm2807_vm5 }
 0x89c   :  { %v2784_v18 = vsel %vm2781_vm2, %v2783_v43, %v2779_v35  ;;  %v10275_v54 = vadd.f32 1e-08, %v13433_v0 }
 0x89d   :  { %v2290_v19 = vadd.f32 %v2289_v25, %v2288_v39  ;;  %v10227_v39 = vadd.f32 1e-08, %v13428_v9  ;;  %v2798_v34 = vor.u32 1.1754944e-38, %v2797_v1 }
 0x89e   :  { %v2318_v17 = vpop.xlane.xlu1 %2317 }
 0x89f   :  { %v2340_v44 = vmul.f32 %v2318_v17, %v8438_v33  ;;  %v2291_v2 = vrot.slane %v2290_v19, 1  ;;  %v2802_v17 = vmul.f32 %v10215_v4, %v10176_v31 }
 0x8a1   :  { %v2292_v38 = vadd.f32 %v2291_v2, %v2290_v19  ;;  %v2348_v37 = vmul.f32 1.442695, %v2340_v44  ;;  %v13429_v19 = vld [vmem:[#allocation46_spill] sm:$0xff]  ;;  %v2327_v44 = vpop.xlane.xlu2 %2326  ;;  %v2803_v30 = vsub.f32 1.0, %v2802_v17 }
 0x8a2   :  { %v2461_v24 = vsel %vm1818_vm3, %v13429_v19, 0.0  ;;  %v2343_v47 = vmul.f32 %v2327_v44, %v8438_v33  ;;  %v2810_v19 = vand.u32 2147483647, %v10176_v31 }
 0x8a3   :  { %2453 = vadd.xlane.f32.xlu1 %v2452_v10  ;;  %6368 = vpush %v2292_v38  ;;  %6815 = vpow2.f32 %v2348_v37  ;;  %v2790_v37 = vadd.f32 %v10180_v40, %v2789_v16  ;;  %v2804_v52 = vmul.f32 %v10215_v4, %v2803_v30  ;;  %v2827_v16 = vand.u32 2147483648, %v10184_v59 }
 0x8a4   :  { %6817 = vrcp.f32 %v10184_v59  ;;  %v2354_v32 = vmul.f32 1.442695, %v2343_v47  ;;  %vm2811_vm15 = vcmp.eq.f32.partialorder %v2810_v19, 8.507059e+37 }
 0x8a5   :  { %v2794_v14 = vsel %vm10253_vm7, %v10180_v40, %v2790_v37 }
 0x8a6   :  { %v2321_v36 = vpop.xlane.xlu1 %2320  ;;  %v2799_v58 = vsel %vm2796_vm4, %v2798_v34, %v2794_v14  ;;  %v2840_v14 = vand.u32 2147483647, %v10205_v41  ;;  %vm2851_vm4 = vweird.f32 %v10227_v39 }
 0x8a7   :  { %v2341_v27 = vmul.f32 %v2321_v36, %v8438_v33 }
 0x8a8   :  { %vm2841_vm7 = vcmp.eq.f32.partialorder %v2840_v14, 8.507059e+37 }
 0x8a9   :  { %v2350_v8 = vmul.f32 1.442695, %v2341_v27  ;;  %v10220_v48 = vpop.eup %6815 }
 0x8aa   :  { %v10223_v45 = vpop.eup %6817  ;;  %v2770_v2 = vmul.f32 %v10220_v48, %v2769_v15 }
 0x8ab   :  { %6819 = vpow2.f32 %v2350_v8  ;;  %2456 = vadd.xlane.f32.xlu1 %v2455_v46  ;;  %v2817_v38 = vmul.f32 %v10223_v45, %v10184_v59  ;;  %v13432_v8 = vld [vmem:[#allocation49_spill] sm:$0xff]  ;;  %vm2822_vm13 = vweird.f32 %v10223_v45 }
 0x8ac   :  { %6821 = vrcp.f32 %v10205_v41  ;;  %v2876_v36 = vadd.f32 1e-12, %v2770_v2  ;;  %v2467_v5 = vsel %vm1818_vm3, %v13432_v8, 0.0  ;;  %v2825_v2 = vand.u32 2147483647, %v10184_v59  ;;  %vm10301_vm12 = vmor %vm2821_vm9, %vm2822_vm13 }
 0x8ad   :  { %6823 = vrcp.f32 %v10227_v39  ;;  %v2818_v27 = vsub.f32 1.0, %v2817_v38  ;;  %v2828_v38 = vor.u32 1.1754944e-38, %v2827_v16  ;;  %v2843_v8 = vor.u32 1.1754944e-38, %v2842_v50 }
 0x8ae   :  { %v2324_v25 = vpop.xlane.xlu1 %2323  ;;  %vm2826_vm1 = vcmp.eq.f32.partialorder %v2825_v2, 8.507059e+37  ;;  %vm2866_vm13 = vweird.f32 %v10275_v54 }
 0x8af   :  { %v2342_v61 = vmul.f32 %v2324_v25, %v8438_v33  ;;  %v2819_v40 = vmul.f32 %v10223_v45, %v2818_v27 }
 0x8b1   :  { %v10240_v57 = vpop.eup %6819  ;;  %v2352_v29 = vmul.f32 1.442695, %v2342_v61  ;;  %v2805_v61 = vadd.f32 %v10215_v4, %v2804_v52  ;;  %v2820_v44 = vadd.f32 %v10223_v45, %v2819_v40 }
 0x8b2   :  { %v2785_v10 = vmul.f32 %v10240_v57, %v2784_v18  ;;  %v10249_v42 = vpop.eup %6821 }
 0x8b3   :  { %6825 = vpow2.f32 %v2352_v29  ;;  %2462 = vadd.xlane.f32.xlu1 %v2461_v24  ;;  %v2832_v6 = vmul.f32 %v10249_v42, %v10205_v41  ;;  %v10266_v51 = vpop.eup %6823  ;;  %v2809_v30 = vsel %vm10289_vm10, %v10215_v4, %v2805_v61  ;;  %vm2837_vm2 = vweird.f32 %v10249_v42 }
 0x8b4   :  { %v2877_v23 = vadd.f32 1e-12, %v2785_v10  ;;  %v2847_v25 = vmul.f32 %v10266_v51, %v10227_v39  ;;  %v2813_v10 = vor.u32 1.1754944e-38, %v2812_v56  ;;  %vm10325_vm6 = vmor %vm2836_vm14, %vm2837_vm2  ;;  %vm2852_vm8 = vweird.f32 %v10266_v51 }
 0x8b5   :  { %v2833_v9 = vsub.f32 1.0, %v2832_v6  ;;  %vm10348_vm5 = vmor %vm2851_vm4, %vm2852_vm8 }
 0x8b6   :  { %6827 = vlog2.f32 %v2877_v23  ;;  %v2330_v60 = vpop.xlane.xlu1 %2329  ;;  %v2848_v47 = vsub.f32 1.0, %v2847_v25  ;;  %v2824_v23 = vsel %vm10301_vm12, %v10223_v45, %v2820_v44  ;;  %v2814_v4 = vsel %vm2811_vm15, %v2813_v10, %v2809_v30 }
 0x8b7   :  { %v2344_v55 = vmul.f32 %v2330_v60, %v8438_v33  ;;  %6829 = vlog2.f32 %v2876_v36  ;;  %v2834_v18 = vmul.f32 %v10249_v42, %v2833_v9  ;;  %v2829_v52 = vsel %vm2826_vm1, %v2828_v38, %v2824_v23 }
 0x8b8   :  { %6831 = vpow2.f32 %v2354_v32  ;;  %v2849_v56 = vmul.f32 %v10266_v51, %v2848_v47  ;;  %v10360_v47 = vld [vmem:[%s12972_s2 + $0x48] sm:$0xff] }
 0x8b9   :  { %v10271_v46 = vpop.eup %6825  ;;  %v2356_v43 = vmul.f32 1.442695, %v2344_v55  ;;  %v2835_v6 = vadd.f32 %v10249_v42, %v2834_v18 }
 0x8ba   :  { %v2800_v35 = vmul.f32 %v10271_v46, %v2799_v58  ;;  %v2850_v18 = vadd.f32 %v10266_v51, %v2849_v56 }
 0x8bb   :  { %2468 = vadd.xlane.f32.xlu1 %v2467_v5  ;;  %6833 = vpow2.f32 %v2356_v43  ;;  %v2839_v16 = vsel %vm10325_vm6, %v10249_v42, %v2835_v6  ;;  %v2855_v42 = vand.u32 2147483647, %v10227_v39 }
 0x8bc   :  { %v6828_v15 = vpop.eup %6827  ;;  %v2878_v24 = vadd.f32 1e-12, %v2800_v35  ;;  %6835 = vrcp.f32 %v10275_v54  ;;  %v2844_v44 = vsel %vm2841_vm7, %v2843_v8, %v2839_v16 }
 0x8bd   :  { %v6830_v1 = vpop.eup %6829  ;;  %v2887_v37 = vmul.f32 0.6931472, %v6828_v15  ;;  %vm2856_vm9 = vcmp.eq.f32.partialorder %v2855_v42, 8.507059e+37 }
 0x8be   :  { %6837 = vlog2.f32 %v2878_v24  ;;  %v2333_v29 = vpop.xlane.xlu1 %2332  ;;  %v10311_v59 = vpop.eup %6831  ;;  %v2885_v36 = vmul.f32 0.6931472, %v6830_v1  ;;  %v2857_v24 = vand.u32 2147483648, %v10227_v39  ;;  %v2854_v39 = vsel %vm10348_vm5, %v10266_v51, %v2850_v18 }
 0x8bf   :  { %v2345_v62 = vmul.f32 %v2333_v29, %v8438_v33  ;;  %v2901_v32 = vsel %vm1151_vm11, %v2887_v37, 0.0  ;;  %v2815_v5 = vmul.f32 %v10311_v59, %v2814_v4 }
 0x8c0   :  { %v2900_v40 = vsel %vm1151_vm11, %v2885_v36, 0.0  ;;  %v2858_v50 = vor.u32 1.1754944e-38, %v2857_v24  ;;  %v2872_v36 = vand.u32 2147483648, %v10275_v54 }
 0x8c1   :  { %v2358_v34 = vmul.f32 1.442695, %v2345_v62  ;;  %v10316_v27 = vpop.eup %6833  ;;  %v2902_v43 = vadd.f32 %v2901_v32, %v2900_v40  ;;  %v2879_v15 = vadd.f32 1e-12, %v2815_v5  ;;  %v2870_v32 = vand.u32 2147483647, %v10275_v54 }
 0x8c2   :  { %v10320_v60 = vpop.eup %6835  ;;  %v2830_v58 = vmul.f32 %v10316_v27, %v2829_v52  ;;  %v2859_v23 = vsel %vm2856_vm9, %v2858_v50, %v2854_v39  ;;  %v2873_v56 = vor.u32 1.1754944e-38, %v2872_v36 }
 0x8c3   :  { %6839 = vpow2.f32 %v2358_v34  ;;  %v2862_v41 = vmul.f32 %v10320_v60, %v10275_v54  ;;  %vm2867_vm10 = vweird.f32 %v10320_v60  ;;  %v3267_v34 = vmul.f32 %v10360_v47, %v10360_v47 }
 0x8c4   :  { %v6838_v45 = vpop.eup %6837  ;;  %v2880_v17 = vadd.f32 1e-12, %v2830_v58  ;;  %vm10372_vm14 = vmor %vm2866_vm13, %vm2867_vm10  ;;  %vm2871_vm12 = vcmp.eq.f32.partialorder %v2870_v32, 8.507059e+37 }
 0x8c5   :  { %v2889_v0 = vmul.f32 0.6931472, %v6838_v45  ;;  %v2863_v1 = vsub.f32 1.0, %v2862_v41  ;;  %v3277_v8 = vsel %vm116_vm0, %v3267_v34, 0.0 }
 0x8c6   :  { %v2336_v9 = vpop.xlane.xlu1 %2335  ;;  %3278 = vadd.xlane.f32.xlu0 %v3277_v8 }
 0x8c7   :  { %v2903_v35 = vsel %vm1151_vm11, %v2889_v0, 0.0  ;;  %v2346_v25 = vmul.f32 %v2336_v9, %v8438_v33  ;;  %v2864_v10 = vmul.f32 %v10320_v60, %v2863_v1 }
 0x8c8   :  { %v2904_v61 = vadd.f32 %v2903_v35, %v2902_v43  ;;  %v6279_v43 = vld [vmem:[%s12972_s2 + $0x60] sm:$0xff] }
 0x8c9   :  { %v10342_v19 = vpop.eup %6839  ;;  %v2360_v2 = vmul.f32 1.442695, %v2346_v25  ;;  %v2865_v4 = vadd.f32 %v10320_v60, %v2864_v10  ;;  %v3270_v9 = vmul.f32 %v6279_v43, %v6279_v43  ;;  %v6282_v10 = vld [vmem:[%s12972_s2 + $0x78] sm:$0xff]  ;;  %v13445_v43 = vld [vmem:[#allocation66_spill] sm:$0xff] }
 0x8ca   :  { %v2845_v38 = vmul.f32 %v10342_v19, %v2844_v44 }
 0x8cb   :  { %6841 = vpow2.f32 %v2360_v2  ;;  %v2869_v58 = vsel %vm10372_vm14, %v10320_v60, %v2865_v4  ;;  %v3286_v44 = vsel %vm116_vm0, %v3270_v9, 0.0 }
 0x8cc   :  { %6843 = vlog2.f32 %v2879_v15  ;;  %v2881_v29 = vadd.f32 1e-12, %v2845_v38  ;;  %v2874_v25 = vsel %vm2871_vm12, %v2873_v56, %v2869_v58  ;;  %v13444_v56 = vld [vmem:[#allocation64_spill] sm:$0xff] }
 0x8cd   :  { %6845 = vlog2.f32 %v2880_v17 }
 0x8ce   :  { %v2339_v37 = vpop.xlane.xlu1 %2338  ;;  %6847 = vlog2.f32 %v2881_v29  ;;  %3287 = vadd.xlane.f32.xlu0 %v3286_v44 }
 0x8cf   :  { %v2347_v62 = vmul.f32 %v2339_v37, %v8438_v33  ;;  %v3273_v37 = vmul.f32 %v6282_v10, %v6282_v10 }
 0x8d1   :  { %v10364_v30 = vpop.eup %6841  ;;  %v2362_v51 = vmul.f32 1.442695, %v2347_v62 }
 0x8d2   :  { %v6844_v6 = vpop.eup %6843  ;;  %v2860_v14 = vmul.f32 %v10364_v30, %v2859_v23  ;;  %v3295_v23 = vsel %vm116_vm0, %v3273_v37, 0.0 }
 0x8d3   :  { %v6846_v55 = vpop.eup %6845  ;;  %6849 = vpow2.f32 %v2362_v51  ;;  %v2891_v40 = vmul.f32 0.6931472, %v6844_v6 }
 0x8d4   :  { %v2882_v5 = vadd.f32 1e-12, %v2860_v14  ;;  %v6848_v52 = vpop.eup %6847  ;;  %v2893_v0 = vmul.f32 0.6931472, %v6846_v55 }
 0x8d5   :  { %v2895_v16 = vmul.f32 0.6931472, %v6848_v52  ;;  %v2905_v24 = vsel %vm1151_vm11, %v2891_v40, 0.0  ;;  %v10402_v40 = vadd.f32 %v10081_v13, %v13444_v56 }
 0x8d6   :  { %v2451_v54 = vpop.xlane.xlu1 %2450  ;;  %6851 = vlog2.f32 %v2882_v5  ;;  %v2907_v60 = vsel %vm1151_vm11, %v2893_v0, 0.0  ;;  %v2906_v17 = vadd.f32 %v2905_v24, %v2904_v61  ;;  %3296 = vadd.xlane.f32.xlu0 %v3295_v23 }
 0x8d7   :  { %v2473_v41 = vadd.f32 1e-08, %v2451_v54  ;;  %v2909_v42 = vsel %vm1151_vm11, %v2895_v16, 0.0  ;;  %v3139_v54 = vmul.f32 %v10402_v40, %v10402_v40  ;;  %v10413_v16 = vadd.f32 %v10081_v13, %v13445_v43 }
 0x8d8   :  { %v2908_v38 = vadd.f32 %v2907_v60, %v2906_v17 }
 0x8d9   :  { %v10383_v35 = vpop.eup %6849  ;;  %6853 = vrcp.f32 %v2473_v41  ;;  %v2492_v51 = vand.u32 2147483648, %v2473_v41  ;;  %v2490_v14 = vand.u32 2147483647, %v2473_v41  ;;  %vm2486_vm2 = vweird.f32 %v2473_v41 }
 0x8da   :  { %v2875_v15 = vmul.f32 %v10383_v35, %v2874_v25  ;;  %v2910_v50 = vadd.f32 %v2909_v42, %v2908_v38  ;;  %v3149_v9 = vsel %vm116_vm0, %v3139_v54, 0.0  ;;  %v3141_v25 = vmul.f32 %v10413_v16, %v10413_v16  ;;  %v2460_v42 = vpop.xlane.xlu2 %2459 }
 0x8db   :  { %v2493_v45 = vor.u32 1.1754944e-38, %v2492_v51  ;;  %vm2491_vm6 = vcmp.eq.f32.partialorder %v2490_v14, 8.507059e+37 }
 0x8dc   :  { %v2883_v2 = vadd.f32 1e-12, %v2875_v15  ;;  %v6852_v1 = vpop.eup %6851  ;;  %v3155_v60 = vsel %vm116_vm0, %v3141_v25, 0.0 }
 0x8dd   :  { %v2897_v31 = vmul.f32 0.6931472, %v6852_v1  ;;  %v2476_v1 = vadd.f32 1e-08, %v2460_v42 }
 0x8de   :  { %v10390_v18 = vpop.xlane.xlu1 %5333  ;;  %6855 = vlog2.f32 %v2883_v2 }
 0x8df   :  { %v6854_v29 = vpop.eup %6853  ;;  %v2911_v61 = vsel %vm1151_vm11, %v2897_v31, 0.0  ;;  %6857 = vrcp.f32 %v2476_v1  ;;  %vm2531_vm4 = vweird.f32 %v2476_v1 }
 0x8e0   :  { %v2482_v39 = vmul.f32 %v6854_v29, %v2473_v41  ;;  %v2912_v62 = vadd.f32 %v2911_v61, %v2910_v50  ;;  %vm2487_vm15 = vweird.f32 %v6854_v29 }
 0x8e1   :  { %vm2488_vm1 = vmor %vm2486_vm2, %vm2487_vm15 }
 0x8e2   :  { %v2483_v36 = vsub.f32 1.0, %v2482_v39  ;;  %v2466_v31 = vpop.xlane.xlu2 %2465 }
 0x8e3   :  { %v10434_v50 = vadd.f32 1e-08, %v2466_v31 }
 0x8e4   :  { %v6856_v34 = vpop.eup %6855  ;;  %v2484_v6 = vmul.f32 %v6854_v29, %v2483_v36 }
 0x8e5   :  { %v2899_v4 = vmul.f32 0.6931472, %v6856_v34  ;;  %6859 = vrcp.f32 %v10434_v50  ;;  %vm2561_vm2 = vweird.f32 %v10434_v50 }
 0x8e6   :  { %v2485_v32 = vadd.f32 %v6854_v29, %v2484_v6  ;;  %v10397_v55 = vpop.xlane.xlu1 %5339 }
 0x8e7   :  { %v2913_v8 = vsel %vm1151_vm11, %v2899_v4, 0.0 }
 0x8e8   :  { %v2489_v5 = vsel %vm2488_vm1, %v6854_v29, %v2485_v32  ;;  %v2914_v52 = vadd.f32 %v2913_v8, %v2912_v62 }
 0x8e9   :  { %v2494_v0 = vsel %vm2491_vm6, %v2493_v45, %v2489_v5  ;;  %v2537_v45 = vand.u32 2147483648, %v2476_v1  ;;  %v2535_v5 = vand.u32 2147483647, %v2476_v1 }
 0x8ea   :  { %v10405_v58 = vmul.f32 %v10220_v48, %v2494_v0  ;;  %2915 = vadd.xlane.f32.xlu2 %v2914_v52  ;;  %v13446_v48 = vld [vmem:[#allocation70_spill] sm:$0xff]  ;;  %v2472_v37 = vpop.xlane.xlu2 %2471 }
 0x8eb   :  { %v10422_v24 = vadd.f32 %v10081_v13, %v13446_v48  ;;  %v6858_v13 = vpop.eup %6857  ;;  %v10437_v36 = vadd.f32 1e-08, %v2472_v37  ;;  %vm2536_vm9 = vcmp.eq.f32.partialorder %v2535_v5, 8.507059e+37  ;;  %v2567_v37 = vand.u32 2147483648, %v10434_v50 }
 0x8ec   :  { %v2527_v10 = vmul.f32 %v6858_v13, %v2476_v1  ;;  %v10439_v51 = vpop.eup %6859  ;;  %vm2532_vm7 = vweird.f32 %v6858_v13 }
 0x8ed   :  { %v3145_v17 = vmul.f32 %v10422_v24, %v10422_v24  ;;  %v2557_v4 = vmul.f32 %v10439_v51, %v10434_v50  ;;  %vm2533_vm8 = vmor %vm2531_vm4, %vm2532_vm7  ;;  %vm2562_vm12 = vweird.f32 %v10439_v51 }
 0x8ee   :  { %v10409_v41 = vpop.xlane.xlu1 %5342  ;;  %v2528_v61 = vsub.f32 1.0, %v2527_v10  ;;  %vm10466_vm1 = vmor %vm2561_vm2, %vm2562_vm12 }
 0x8ef   :  { %v3167_v2 = vsel %vm116_vm0, %v3145_v17, 0.0  ;;  %v2558_v0 = vsub.f32 1.0, %v2557_v4 }
 0x8f0   :  { %v2529_v23 = vmul.f32 %v6858_v13, %v2528_v61 }
 0x8f1   :  { %v2559_v1 = vmul.f32 %v10439_v51, %v2558_v0  ;;  %v2568_v0 = vor.u32 1.1754944e-38, %v2567_v37 }
 0x8f2   :  { %3150 = vadd.xlane.f32.xlu2 %v3149_v9  ;;  %v2530_v14 = vadd.f32 %v6858_v13, %v2529_v23  ;;  %v2538_v9 = vor.u32 1.1754944e-38, %v2537_v45 }
 0x8f3   :  { %v2560_v45 = vadd.f32 %v10439_v51, %v2559_v1 }
 0x8f4   :  { %v2534_v56 = vsel %vm2533_vm8, %v6858_v13, %v2530_v14 }
 0x8f6   :  { %v10418_v15 = vpop.xlane.xlu1 %5345 }
 0x8fa   :  { %3156 = vadd.xlane.f32.xlu2 %v3155_v60  ;;  %v2539_v60 = vsel %vm2536_vm9, %v2538_v9, %v2534_v56 }
 0x8fe   :  { %v10427_v44 = vpop.xlane.xlu1 %5348 }
 0x902   :  { %3168 = vadd.xlane.f32.xlu2 %v3167_v2 }
 0x906   :  { %v10430_v38 = vpop.xlane.xlu1 %5351 }
 0x90e   :  { %v10432_v29 = vpop.xlane.xlu1 %5354 }
 0x916   :  { %v2454_v39 = vpop.xlane.xlu1 %2453 }
 0x917   :  { %v2474_v62 = vadd.f32 1e-08, %v2454_v39 }
 0x919   :  { %6861 = vrcp.f32 %v2474_v62  ;;  %v2507_v54 = vand.u32 2147483648, %v2474_v62  ;;  %v2505_v48 = vand.u32 2147483647, %v2474_v62  ;;  %vm2501_vm13 = vweird.f32 %v2474_v62 }
 0x91a   :  { %6863 = vrcp.f32 %v10437_v36 }
 0x91b   :  { %v2508_v13 = vor.u32 1.1754944e-38, %v2507_v54  ;;  %vm2506_vm14 = vcmp.eq.f32.partialorder %v2505_v48, 8.507059e+37 }
 0x91e   :  { %v2457_v34 = vpop.xlane.xlu1 %2456 }
 0x91f   :  { %v6862_v6 = vpop.eup %6861  ;;  %v10444_v32 = vadd.f32 1e-08, %v2457_v34 }
 0x920   :  { %v2497_v8 = vmul.f32 %v6862_v6, %v2474_v62  ;;  %v10447_v43 = vpop.eup %6863  ;;  %vm2502_vm5 = vweird.f32 %v6862_v6  ;;  %v2540_v62 = vmul.f32 %v10311_v59, %v2539_v60  ;;  %v2565_v59 = vand.u32 2147483647, %v10434_v50 }
 0x921   :  { %6865 = vrcp.f32 %v10444_v32  ;;  %v2587_v31 = vmul.f32 %v10447_v43, %v10437_v36  ;;  %vm2503_vm10 = vmor %vm2501_vm13, %vm2502_vm5  ;;  %v2520_v56 = vand.u32 2147483647, %v10444_v32  ;;  %vm2516_vm6 = vweird.f32 %v10444_v32 }
 0x922   :  { %v2498_v52 = vsub.f32 1.0, %v2497_v8  ;;  %v2522_v8 = vand.u32 2147483648, %v10444_v32  ;;  %v2604_v9 = vadd.f32 1e-12, %v2540_v62  ;;  %v2564_v60 = vsel %vm10466_vm1, %v10439_v51, %v2560_v45 }
 0x923   :  { %v2588_v4 = vsub.f32 1.0, %v2587_v31  ;;  %vm2521_vm4 = vcmp.eq.f32.partialorder %v2520_v56, 8.507059e+37  ;;  %vm2566_vm8 = vcmp.eq.f32.partialorder %v2565_v59, 8.507059e+37  ;;  %vm2592_vm5 = vweird.f32 %v10447_v43 }
 0x924   :  { %v2499_v25 = vmul.f32 %v6862_v6, %v2498_v52  ;;  %v2523_v50 = vor.u32 1.1754944e-38, %v2522_v8  ;;  %vm2591_vm13 = vweird.f32 %v10437_v36 }
 0x925   :  { %v2589_v48 = vmul.f32 %v10447_v43, %v2588_v4 }
 0x926   :  { %v2500_v17 = vadd.f32 %v6862_v6, %v2499_v25  ;;  %v2463_v2 = vpop.xlane.xlu1 %2462 }
 0x927   :  { %v6866_v42 = vpop.eup %6865  ;;  %v10452_v10 = vadd.f32 1e-08, %v2463_v2  ;;  %v2590_v37 = vadd.f32 %v10447_v43, %v2589_v48 }
 0x928   :  { %v2504_v39 = vsel %vm2503_vm10, %v6862_v6, %v2500_v17  ;;  %v2512_v61 = vmul.f32 %v6866_v42, %v10444_v32  ;;  %v2601_v6 = vadd.f32 1e-12, %v10405_v58  ;;  %vm2517_vm15 = vweird.f32 %v6866_v42  ;;  %vm10488_vm10 = vmor %vm2591_vm13, %vm2592_vm5 }
 0x929   :  { %v2509_v23 = vsel %vm2506_vm14, %v2508_v13, %v2504_v39  ;;  %6867 = vrcp.f32 %v10452_v10  ;;  %vm2518_vm7 = vmor %vm2516_vm6, %vm2517_vm15  ;;  %v2597_v32 = vand.u32 2147483648, %v10437_v36  ;;  %v2569_v13 = vsel %vm2566_vm8, %v2568_v0, %v2564_v60 }
 0x92a   :  { %v2510_v34 = vmul.f32 %v10240_v57, %v2509_v23  ;;  %v2513_v14 = vsub.f32 1.0, %v2512_v61  ;;  %v2570_v51 = vmul.f32 %v10342_v19, %v2569_v13  ;;  %vm2546_vm14 = vweird.f32 %v10452_v10 }
 0x92c   :  { %v2602_v5 = vadd.f32 1e-12, %v2510_v34  ;;  %v2514_v52 = vmul.f32 %v6866_v42, %v2513_v14  ;;  %v2550_v14 = vand.u32 2147483647, %v10452_v10  ;;  %v2606_v8 = vadd.f32 1e-12, %v2570_v51 }
 0x92e   :  { %6869 = vlog2.f32 %v2602_v5  ;;  %v2515_v54 = vadd.f32 %v6866_v42, %v2514_v52  ;;  %v2469_v58 = vpop.xlane.xlu1 %2468  ;;  %v2594_v5 = vsel %vm10488_vm10, %v10447_v43, %v2590_v37  ;;  %vm2551_vm15 = vcmp.eq.f32.partialorder %v2550_v14, 8.507059e+37 }
 0x92f   :  { %v6868_v25 = vpop.eup %6867  ;;  %v10475_v17 = vadd.f32 1e-08, %v2469_v58  ;;  %6871 = vlog2.f32 %v2601_v6 }
 0x930   :  { %v2519_v2 = vsel %vm2518_vm7, %v6866_v42, %v2515_v54  ;;  %v2542_v1 = vmul.f32 %v6868_v25, %v10452_v10  ;;  %v2552_v42 = vand.u32 2147483648, %v10452_v10  ;;  %vm2547_vm9 = vweird.f32 %v6868_v25 }
 0x931   :  { %v2524_v31 = vsel %vm2521_vm4, %v2523_v50, %v2519_v2  ;;  %6873 = vrcp.f32 %v10475_v17  ;;  %vm2548_vm12 = vmor %vm2546_vm14, %vm2547_vm9  ;;  %v2582_v43 = vand.u32 2147483648, %v10475_v17  ;;  %vm2576_vm6 = vweird.f32 %v10475_v17 }
 0x932   :  { %v2525_v39 = vmul.f32 %v10271_v46, %v2524_v31  ;;  %v2543_v61 = vsub.f32 1.0, %v2542_v1  ;;  %6875 = vlog2.f32 %v2604_v9  ;;  %v2595_v46 = vand.u32 2147483647, %v10437_v36 }
 0x933   :  { %v2553_v52 = vor.u32 1.1754944e-38, %v2552_v42  ;;  %v2598_v36 = vor.u32 1.1754944e-38, %v2597_v32 }
 0x934   :  { %v6870_v23 = vpop.eup %6869  ;;  %v2603_v62 = vadd.f32 1e-12, %v2525_v39  ;;  %v2544_v34 = vmul.f32 %v6868_v25, %v2543_v61  ;;  %vm2596_vm2 = vcmp.eq.f32.partialorder %v2595_v46, 8.507059e+37 }
 0x935   :  { %v6872_v4 = vpop.eup %6871  ;;  %v2612_v56 = vmul.f32 0.6931472, %v6870_v23  ;;  %v2599_v9 = vsel %vm2596_vm2, %v2598_v36, %v2594_v5 }
 0x936   :  { %6877 = vlog2.f32 %v2603_v62  ;;  %v2545_v19 = vadd.f32 %v6868_v25, %v2544_v34  ;;  %v2610_v58 = vmul.f32 0.6931472, %v6872_v4  ;;  %v2600_v60 = vmul.f32 %v10383_v35, %v2599_v9 }
 0x937   :  { %v6874_v6 = vpop.eup %6873  ;;  %6879 = vlog2.f32 %v2606_v8  ;;  %v2626_v50 = vsel %vm1151_vm11, %v2612_v56, 0.0  ;;  %v2583_v35 = vor.u32 1.1754944e-38, %v2582_v43 }
 0x938   :  { %v6876_v59 = vpop.eup %6875  ;;  %v2549_v0 = vsel %vm2548_vm12, %v6868_v25, %v2545_v19  ;;  %v2572_v57 = vmul.f32 %v6874_v6, %v10475_v17  ;;  %vm2577_vm1 = vweird.f32 %v6874_v6  ;;  %v2580_v25 = vand.u32 2147483647, %v10475_v17  ;;  %v10510_v17 = vld [vmem:[%s12972_s2 + $0x50] sm:$0xff] }
 0x939   :  { %v2554_v54 = vsel %vm2551_vm15, %v2553_v52, %v2549_v0  ;;  %v2616_v13 = vmul.f32 0.6931472, %v6876_v59  ;;  %v2625_v39 = vsel %vm1151_vm11, %v2610_v58, 0.0  ;;  %vm2578_vm7 = vmor %vm2576_vm6, %vm2577_vm1  ;;  %v2608_v37 = vadd.f32 1e-12, %v2600_v60 }
 0x93a   :  { %v2573_v10 = vsub.f32 1.0, %v2572_v57  ;;  %v2555_v48 = vmul.f32 %v10316_v27, %v2554_v54  ;;  %v2627_v27 = vadd.f32 %v2626_v50, %v2625_v39  ;;  %vm2581_vm4 = vcmp.eq.f32.partialorder %v2580_v25, 8.507059e+37  ;;  %v7187_v50 = vld [vmem:[%s12976_s6] ss:$0 sm:$0xff]  ;;  %v10530_v25 = vld [vmem:[%s12972_s2 + $0x68] sm:$0xff] }
 0x93b   :  { %v2630_v14 = vsel %vm1151_vm11, %v2616_v13, 0.0  ;;  %v3268_v45 = vmul.f32 %v10510_v17, %v10510_v17  ;;  %vm5517_vm1 = vcmask 31744  }
 0x93c   :  { %v6878_v2 = vpop.eup %6877  ;;  %v2574_v1 = vmul.f32 %v6874_v6, %v2573_v10  ;;  %v2605_v32 = vadd.f32 1e-12, %v2555_v48  ;;  %v10518_v48 = vpop.xlane.xlu0 %5336 }
 0x93d   :  { %v2614_v31 = vmul.f32 0.6931472, %v6878_v2  ;;  %v6880_v62 = vpop.eup %6879  ;;  %v3280_v52 = vsel %vm116_vm0, %v3268_v45, 0.0  ;;  %v13451_v2 = vld [vmem:[#allocation63_spill] sm:$0xff] }
 0x93e   :  { %v2575_v61 = vadd.f32 %v6874_v6, %v2574_v1  ;;  %6881 = vlog2.f32 %v2605_v32  ;;  %v2620_v5 = vmul.f32 0.6931472, %v6880_v62  ;;  %3281 = vadd.xlane.f32.xlu2 %v3280_v52  ;;  %v10525_v1 = vadd.f32 %v7187_v50, %v13451_v2  ;;  %v10532_v32 = vpop.f32.mrf.mxu3  ;;  %v13455_v62 = vld [vmem:[#allocation67_spill] sm:$0xff]  ;;  %v10579_v2 = vld [vmem:[%s12972_s2 + $0x58] sm:$0xff] }
 0x93f   :  { %v2628_v51 = vsel %vm1151_vm11, %v2614_v31, 0.0  ;;  %6883 = vlog2.f32 %v2608_v37  ;;  %13452 = vst [vmem:[#allocation15_spill] sm:$0xff] %v10532_v32  ;;  %v3271_v31 = vmul.f32 %v10530_v25, %v10530_v25 }
 0x940   :  { %v2579_v42 = vsel %vm2578_vm7, %v6874_v6, %v2575_v61  ;;  %v2629_v23 = vadd.f32 %v2628_v51, %v2627_v27  ;;  %v2634_v59 = vsel %vm1151_vm11, %v2620_v5, 0.0  ;;  %v3138_v13 = vmul.f32 %v10525_v1, %v10525_v1  ;;  %v13453_v61 = vld [vmem:[#allocation65_spill] sm:$0xff]  ;;  %v13457_v5 = vld [vmem:[#allocation68_spill] sm:$0xff] }
 0x941   :  { %v2584_v34 = vsel %vm2581_vm4, %v2583_v35, %v2579_v42  ;;  %v3289_v39 = vsel %vm116_vm0, %v3271_v31, 0.0  ;;  %v10540_v27 = vadd.f32 %v7187_v50, %v13453_v61  ;;  %v10560_v52 = vadd.f32 %v7187_v50, %v13457_v5 }
 0x942   :  { %v2585_v46 = vmul.f32 %v10364_v30, %v2584_v34  ;;  %v2631_v4 = vadd.f32 %v2630_v14, %v2629_v23  ;;  %v3146_v51 = vsel %vm116_vm0, %v3138_v13, 0.0  ;;  %v10552_v34 = vadd.f32 %v7187_v50, %v13455_v62 }
 0x943   :  { %v3140_v42 = vmul.f32 %v10540_v27, %v10540_v27  ;;  %v3269_v61 = vmul.f32 %v10579_v2, %v10579_v2 }
 0x944   :  { %v6882_v19 = vpop.eup %6881  ;;  %v2607_v8 = vadd.f32 1e-12, %v2585_v46  ;;  %v10542_v35 = vpop.xlane.xlu0 %3165 }
 0x945   :  { %v2618_v6 = vmul.f32 0.6931472, %v6882_v19  ;;  %v6884_v36 = vpop.eup %6883  ;;  %v3152_v14 = vsel %vm116_vm0, %v3140_v42, 0.0  ;;  %v3142_v19 = vmul.f32 %v10552_v34, %v10552_v34  ;;  %v3283_v62 = vsel %vm116_vm0, %v3269_v61, 0.0 }
 0x946   :  { %6885 = vlog2.f32 %v2607_v8  ;;  %v2624_v58 = vmul.f32 0.6931472, %v6884_v36  ;;  %3290 = vadd.xlane.f32.xlu2 %v3289_v39  ;;  %v10549_v23 = vpop.f32.mrf.mxu3 }
 0x947   :  { %v2632_v30 = vsel %vm1151_vm11, %v2618_v6, 0.0  ;;  %13454 = vst [vmem:[#allocation33_spill] sm:$0xff] %v10549_v23 }
 0x948   :  { %v2633_v56 = vadd.f32 %v2632_v30, %v2631_v4  ;;  %v2638_v60 = vsel %vm1151_vm11, %v2624_v58, 0.0  ;;  %v3158_v30 = vsel %vm116_vm0, %v3142_v19, 0.0 }
 0x94a   :  { %v2635_v0 = vadd.f32 %v2634_v59, %v2633_v56  ;;  %v3143_v56 = vmul.f32 %v10560_v52, %v10560_v52 }
 0x94c   :  { %v6886_v57 = vpop.eup %6885  ;;  %v3279_v46 = vpop.xlane.xlu0 %3278 }
 0x94d   :  { %v2622_v54 = vmul.f32 0.6931472, %v6886_v57  ;;  %v3299_v45 = vadd.f32 1e-12, %v3279_v46 }
 0x94e   :  { %v10557_v6 = vpop.f32.mrf.mxu3 }
 0x94f   :  { %v2636_v9 = vsel %vm1151_vm11, %v2622_v54, 0.0  ;;  %13456 = vst [vmem:[#allocation45_spill] sm:$0xff] %v10557_v6  ;;  %6887 = vrsqrt.f32 %v3299_v45  ;;  %v3161_v54 = vsel %vm116_vm0, %v3143_v56, 0.0  ;;  %vm3322_vm8 = vweird.f32 %v3299_v45 }
 0x950   :  { %v2637_v10 = vadd.f32 %v2636_v9, %v2635_v0  ;;  %v10568_v0 = vld [vmem:[%s12972_s2 + $0x40] sm:$0xff] }
 0x952   :  { %v2639_v43 = vadd.f32 %v2638_v60, %v2637_v10  ;;  %v3266_v10 = vmul.f32 %v10568_v0, %v10568_v0 }
 0x954   :  { %2640 = vadd.xlane.f32.xlu1 %v2639_v43  ;;  %v3274_v50 = vsel %vm116_vm0, %v3266_v10, 0.0 }
 0x955   :  { %v6888_v59 = vpop.eup %6887 }
 0x956   :  { %v10570_v57 = vpop.f32.mrf.mxu3  ;;  %v3317_v9 = vmul.f32 %v6888_v59, %v3299_v45  ;;  %vm3323_vm5 = vweird.f32 %v6888_v59 }
 0x957   :  { %13458 = vst [vmem:[#allocation47_spill] sm:$0xff] %v10570_v57  ;;  %vm3324_vm13 = vmor %vm3322_vm8, %vm3323_vm5 }
 0x958   :  { %v3318_v43 = vmul.f32 %v6888_v59, %v3317_v9 }
 0x95a   :  { %v3319_v13 = vmul.f32 0.5, %v3318_v43 }
 0x95c   :  { %3147 = vadd.xlane.f32.xlu1 %v3146_v51  ;;  %v3320_v42 = vsub.f32 1.5, %v3319_v13 }
 0x95d   :  { %v10545_v37 = vpop.xlane.xlu2 %2915 }
 0x95e   :  { %v10581_v39 = vpop.f32.mrf.mxu3 }
 0x95f   :  { %13459 = vst [vmem:[#allocation12_spill] sm:$0xff] %v10581_v39 }
 0x964   :  { %3153 = vadd.xlane.f32.xlu1 %v3152_v14  ;;  %v10589_v14 = vld [vmem:[%s12972_s2 + $0x70] sm:$0xff] }
 0x965   :  { %v3151_v4 = vpop.xlane.xlu2 %3150  ;;  %v3272_v19 = vmul.f32 %v10589_v14, %v10589_v14 }
 0x966   :  { %v3171_v8 = vadd.f32 1e-12, %v3151_v4  ;;  %v3321_v4 = vmul.f32 %v6888_v59, %v3320_v42  ;;  %v10593_v5 = vpop.f32.mrf.mxu3 }
 0x967   :  { %13460 = vst [vmem:[#allocation53_spill] sm:$0xff] %v10593_v5  ;;  %v3292_v56 = vsel %vm116_vm0, %v3272_v19, 0.0 }
 0x968   :  { %6889 = vrsqrt.f32 %v3171_v8  ;;  %vm3194_vm10 = vweird.f32 %v3171_v8  ;;  %v3325_v45 = vsel %vm3324_vm13, %v6888_v59, %v3321_v4  ;;  %v2917_v4 = vrot.slane %v10545_v37, 4 }
 0x96c   :  { %3159 = vadd.xlane.f32.xlu1 %v3158_v30 }
 0x96e   :  { %v6890_v36 = vpop.eup %6889  ;;  %v10598_v10 = vpop.f32.mrf.mxu3 }
 0x96f   :  { %v3189_v58 = vmul.f32 %v6890_v36, %v3171_v8  ;;  %vm3195_vm9 = vweird.f32 %v6890_v36  ;;  %13461 = vst [vmem:[#allocation55_spill] sm:$0xff] %v10598_v10 }
 0x970   :  { %vm3196_vm14 = vmor %vm3194_vm10, %vm3195_vm9 }
 0x971   :  { %v3190_v60 = vmul.f32 %v6890_v36, %v3189_v58  ;;  %v3387_v58 = vmul.f32 %v10360_v47, %v3325_v45 }
 0x973   :  { %v3191_v31 = vmul.f32 0.5, %v3190_v60 }
 0x974   :  { %3162 = vadd.xlane.f32.xlu1 %v3161_v54 }
 0x975   :  { %v3192_v51 = vsub.f32 1.5, %v3191_v31 }
 0x976   :  { %v10601_v43 = vpop.f32.mrf.mxu3 }
 0x977   :  { %v3193_v46 = vmul.f32 %v6890_v36, %v3192_v51  ;;  %13462 = vst [vmem:[#allocation57_spill] sm:$0xff] %v10601_v43 }
 0x979   :  { %v3197_v30 = vsel %vm3196_vm14, %v6890_v36, %v3193_v46  ;;  %v5321_v36 = vpop.f32.mrf.mxu2 }
 0x97a   :  { %v3259_v54 = vmul.f32 %v3197_v30, %v10402_v40  ;;  %v10605_v31 = vperm.slane %v5321_v36, 0  ;;  %v10607_v40 = vpop.xlane.xlu2 %3156 }
 0x97c   :  { %3275 = vadd.xlane.f32.xlu1 %v3274_v50  ;;  %v3395_v9 = vmul.f32 %v3387_v58, %v3259_v54  ;;  %v10603_v50 = vpop.f32.mrf.mxu0  ;;  %v5357_v47 = vadd.f32 %v10605_v31, %v10390_v18  ;;  %v5359_v30 = vadd.f32 %v10605_v31, %v10397_v55  ;;  %v10621_v54 = vadd.f32 1e-12, %v10542_v35 }
 0x97d   :  { %13463 = vst [vmem:[#allocation58_spill] sm:$0xff] %v10603_v50  ;;  %v2918_v18 = vadd.f32 %v2917_v4, %v10545_v37  ;;  %v5358_v37 = vadd.f32 %v10605_v31, %v10518_v48 }
 0x97e   :  { %v3405_v60 = vsel %vm116_vm0, %v3395_v9, 0.0  ;;  %v5276_v8 = vpop.f32.mrf.mxu3 }
 0x97f   :  { %v2919_v36 = vrot.slane %v2918_v18, 2 }
 0x984   :  { %3284 = vadd.xlane.f32.xlu1 %v3283_v62  ;;  %v5273_v13 = vpop.f32.mrf.mxu0  ;;  %v10611_v62 = vpop.xlane.xlu2 %3168 }
 0x985   :  { %v5365_v61 = vmul.f32 2.0, %v5273_v13 }
 0x986   :  { %v5279_v59 = vpop.f32.mrf.mxu3 }
 0x987   :  { %v5373_v42 = vsub.f32 %v5357_v47, %v5365_v61  ;;  %v5367_v45 = vmul.f32 2.0, %v5279_v59 }
 0x989   :  { %v5381_v46 = vmax.f32 %v5373_v42, 0.0  ;;  %v5375_v9 = vsub.f32 %v5359_v30, %v5367_v45  ;;  %v2920_v42 = vadd.f32 %v2919_v36, %v2918_v18  ;;  %v3288_v30 = vpop.xlane.xlu0 %3287 }
 0x98a   :  { %v10639_v21 = vadd.f32 1e-12, %v3288_v30 }
 0x98b   :  { %v10614_v19 = vadd.f32 1.0, %v5381_v46  ;;  %v5383_v47 = vmax.f32 %v5375_v9, 0.0  ;;  %v5366_v46 = vmul.f32 2.0, %v5276_v8  ;;  %v5360_v9 = vadd.f32 %v10605_v31, %v10409_v41 }
 0x98c   :  { %3293 = vadd.xlane.f32.xlu1 %v3292_v56  ;;  %v2921_v48 = vrot.slane %v2920_v42, 1  ;;  %vm3352_vm14 = vweird.f32 %v10639_v21 }
 0x98d   :  { %6891 = vrcp.f32 %v10614_v19  ;;  %v10633_v4 = vadd.f32 1.0, %v5383_v47  ;;  %vm5402_vm15 = vweird.f32 %v10614_v19 }
 0x98e   :  { %v5282_v51 = vpop.f32.mrf.mxu3  ;;  %6893 = vrsqrt.f32 %v10621_v54  ;;  %v2922_v26 = vadd.f32 %v2921_v48, %v2920_v42 }
 0x98f   :  { %v5368_v50 = vmul.f32 2.0, %v5282_v51  ;;  %vm5432_vm7 = vweird.f32 %v10633_v4 }
 0x991   :  { %v5376_v41 = vsub.f32 %v5360_v9, %v5368_v50 }
 0x993   :  { %v10628_v59 = vpop.eup %6891 }
 0x994   :  { %3406 = vadd.xlane.f32.xlu1 %v3405_v60  ;;  %vm5403_vm12 = vweird.f32 %v10628_v59 }
 0x995   :  { %vm10689_vm2 = vmor %vm5402_vm15, %vm5403_vm12 }
 0x996   :  { %v10618_v56 = vpop.f32.mrf.mxu3 }
 0x99e   :  { %v5288_v35 = vpop.f32.mrf.mxu3 }
 0x9a6   :  { %v5291_v63 = vpop.f32.mrf.mxu3 }
 0x9ae   :  { %v5294_v6 = vpop.f32.mrf.mxu3 }
 0x9b1   :  { %v3282_v58 = vpop.xlane.xlu2 %3281 }
 0x9b2   :  { %v10625_v60 = vadd.f32 1e-12, %v3282_v58  ;;  %v10635_v58 = vpop.eup %6893 }
 0x9b3   :  { %v3239_v47 = vmul.f32 %v10635_v58, %v10621_v54 }
 0x9b4   :  { %6895 = vrsqrt.f32 %v10625_v60  ;;  %vm3332_vm4 = vweird.f32 %v10625_v60 }
 0x9b5   :  { %6897 = vrcp.f32 %v10633_v4  ;;  %v3240_v10 = vmul.f32 %v10635_v58, %v3239_v47 }
 0x9b6   :  { %6899 = vrsqrt.f32 %v10639_v21 }
 0x9b9   :  { %v3291_v49 = vpop.xlane.xlu2 %3290 }
 0x9ba   :  { %v10645_v8 = vpop.eup %6895  ;;  %v10656_v50 = vadd.f32 1e-12, %v3291_v49 }
 0x9bb   :  { %v3327_v12 = vmul.f32 %v10645_v8, %v10625_v60  ;;  %v10659_v9 = vpop.eup %6897  ;;  %vm3333_vm8 = vweird.f32 %v10645_v8 }
 0x9bc   :  { %6901 = vrsqrt.f32 %v10656_v50  ;;  %vm10748_vm5 = vmor %vm3332_vm4, %vm3333_vm8  ;;  %vm5433_vm9 = vweird.f32 %v10659_v9  ;;  %vm3362_vm8 = vweird.f32 %v10656_v50 }
 0x9c7   :  { %v2641_v13 = vpop.xlane.xlu1 %2640 }
 0x9c8   :  { %v2642_v55 = vrot.slane %v2641_v13, 4 }
 0x9ca   :  { %v2643_v61 = vadd.f32 %v2642_v55, %v2641_v13  ;;  %v5398_v13 = vmul.f32 %v10628_v59, %v10614_v19  ;;  %v5374_v55 = vsub.f32 %v5358_v37, %v5366_v46  ;;  %v5384_v46 = vmax.f32 %v5376_v41, 0.0 }
 0x9cb   :  { %v5408_v41 = vand.u32 2147483648, %v10614_v19 }
 0x9cc   :  { %v2644_v45 = vrot.slane %v2643_v61, 2  ;;  %v5399_v51 = vsub.f32 1.0, %v5398_v13  ;;  %v5382_v37 = vmax.f32 %v5374_v55, 0.0  ;;  %v10661_v13 = vpop.eup %6899  ;;  %v10671_v49 = vadd.f32 1.0, %v5384_v46 }
 0x9cd   :  { %v5369_v46 = vmul.f32 2.0, %v10618_v56  ;;  %v3297_v56 = vpop.xlane.xlu0 %3296  ;;  %v10704_v5 = vpop.eup %6901  ;;  %vm3353_vm12 = vweird.f32 %v10661_v13 }
 0x9ce   :  { %v2645_v18 = vadd.f32 %v2644_v45, %v2643_v61  ;;  %v5362_v61 = vadd.f32 %v10605_v31, %v10427_v44  ;;  %v5370_v45 = vmul.f32 2.0, %v5288_v35  ;;  %v3328_v35 = vmul.f32 %v10645_v8, %v3327_v12 }
 0x9cf   :  { %v10643_v36 = vpop.xlane.xlu1 %3147  ;;  %v10666_v48 = vadd.f32 1.0, %v5382_v37  ;;  %v3347_v12 = vmul.f32 %v10661_v13, %v10639_v21  ;;  %v5361_v37 = vadd.f32 %v10605_v31, %v10418_v15 }
 0x9d0   :  { %v2646_v43 = vrot.slane %v2645_v18, 1  ;;  %v5378_v44 = vsub.f32 %v5362_v61, %v5370_v45  ;;  %v5438_v61 = vand.u32 2147483648, %v10633_v4  ;;  %v5409_v45 = vor.u32 1.1754944e-38, %v5408_v41 }
 0x9d1   :  { %v3348_v15 = vmul.f32 %v10661_v13, %v3347_v12  ;;  %v10723_v41 = vadd.f32 1e-12, %v3297_v56  ;;  %v10762_v56 = vadd.f32 1e-12, %v10611_v62 }
 0x9d2   :  { %v2647_v30 = vadd.f32 %v2646_v43, %v2645_v18  ;;  %v5400_v43 = vmul.f32 %v10628_v59, %v5399_v51  ;;  %v10664_v18 = vmul.f32 0.5, %v3240_v10  ;;  %v5428_v10 = vmul.f32 %v10659_v9, %v10633_v4 }
 0x9d3   :  { %v5386_v51 = vmax.f32 %v5378_v44, 0.0  ;;  %v10743_v44 = vadd.f32 1e-12, %v10607_v40 }
 0x9d4   :  { %6370 = vpush %v2647_v30  ;;  %v5401_v55 = vadd.f32 %v10628_v59, %v5400_v43  ;;  %v3329_v30 = vmul.f32 0.5, %v3328_v35  ;;  %v10701_v35 = vmul.f32 2.0, %v5291_v63  ;;  %v5377_v63 = vsub.f32 %v5361_v37, %v5369_v46 }
 0x9d5   :  { %6372 = vpush %v2922_v26  ;;  %v5406_v26 = vand.u32 2147483647, %v10614_v19  ;;  %v10706_v57 = vadd.f32 1.0, %v5386_v51  ;;  %v10714_v43 = vadd.f32 1e-12, %v10643_v36  ;;  %v10731_v36 = vmul.f32 2.0, %v5294_v6 }
 0x9d6   :  { %v5405_v19 = vsel %vm10689_vm2, %v10628_v59, %v5401_v55  ;;  %v3330_v33 = vsub.f32 1.5, %v3329_v30  ;;  %v5436_v59 = vand.u32 2147483647, %v10633_v4  ;;  %v3357_v46 = vmul.f32 %v10704_v5, %v10656_v50  ;;  %vm10795_vm2 = vmor %vm5432_vm7, %vm5433_vm9 }
 0x9d7   :  { %v3154_v42 = vpop.xlane.xlu1 %3153  ;;  %vm10697_vm6 = vcmp.eq.f32.partialorder %v5406_v26, 8.507059e+37  ;;  %v10709_v26 = vor.u32 1.1754944e-38, %v5438_v61  ;;  %v5385_v40 = vmax.f32 %v5377_v63, 0.0  ;;  %vm10820_vm7 = vmor %vm3352_vm14, %vm3353_vm12 }
 0x9d8   :  { %v10668_v47 = vadd.f32 1e-12, %v3154_v42  ;;  %v5429_v42 = vsub.f32 1.0, %v5428_v10  ;;  %v10721_v10 = vsel %vm10697_vm6, %v5409_v45, %v5405_v19  ;;  %v3331_v19 = vmul.f32 %v10645_v8, %v3330_v33 }
 0x9d9   :  { %13468 = vst [vmem:[#allocation59_spill] sm:$0xff] %v10721_v10  ;;  %vm10753_vm13 = vcmp.eq.f32.partialorder %v5436_v59, 8.507059e+37  ;;  %v10759_v33 = vsel %vm5517_vm1, %v10721_v10, 0.0  ;;  %v3358_v63 = vmul.f32 %v10704_v5, %v3357_v46 }
 0x9da   :  { %6903 = vrsqrt.f32 %v10668_v47  ;;  %v5430_v61 = vmul.f32 %v10659_v9, %v5429_v42  ;;  %v5363_v42 = vadd.f32 %v10605_v31, %v10430_v38  ;;  %vm3204_vm15 = vweird.f32 %v10668_v47 }
 0x9db   :  { %6905 = vrcp.f32 %v10666_v48  ;;  %v3359_v3 = vmul.f32 0.5, %v3358_v63 }
 0x9dc   :  { %6907 = vrcp.f32 %v10671_v49  ;;  %v5431_v59 = vadd.f32 %v10659_v9, %v5430_v61  ;;  %v5379_v6 = vsub.f32 %v5363_v42, %v10701_v35  ;;  %v10814_v42 = vadd.f32 1.0, %v5385_v40 }
 0x9df   :  { %v3160_v32 = vpop.xlane.xlu1 %3159 }
 0x9e0   :  { %v10711_v55 = vpop.eup %6903  ;;  %v10716_v12 = vadd.f32 1e-12, %v3160_v32  ;;  %v3349_v32 = vmul.f32 0.5, %v3348_v15  ;;  %v3360_v15 = vsub.f32 1.5, %v3359_v3 }
 0x9e1   :  { %v3199_v51 = vmul.f32 %v10711_v55, %v10668_v47  ;;  %v10729_v30 = vpop.eup %6905  ;;  %vm3205_vm10 = vweird.f32 %v10711_v55 }
 0x9e2   :  { %6909 = vrsqrt.f32 %v10716_v12  ;;  %v10735_v45 = vpop.eup %6907  ;;  %vm3206_vm6 = vmor %vm3204_vm15, %vm3205_vm10  ;;  %vm3224_vm9 = vweird.f32 %v10716_v12 }
 0x9e3   :  { %6911 = vrcp.f32 %v10706_v57  ;;  %v3200_v37 = vmul.f32 %v10711_v55, %v3199_v51  ;;  %v3350_v51 = vsub.f32 1.5, %v3349_v32  ;;  %v10770_v39 = vmul.f32 %v10735_v45, %v10671_v49 }
 0x9e4   :  { %6913 = vrsqrt.f32 %v10714_v43 }
 0x9e5   :  { %6915 = vrsqrt.f32 %v10723_v41  ;;  %v3201_v60 = vmul.f32 0.5, %v3200_v37  ;;  %v3335_v37 = vsel %vm10748_vm5, %v10645_v8, %v3331_v19  ;;  %v5444_v21 = vsub.f32 1.0, %v10770_v39 }
 0x9e6   :  { %6917 = vrsqrt.f32 %v10743_v44  ;;  %v3388_v47 = vmul.f32 %v10510_v17, %v3335_v37  ;;  %vm3363_vm5 = vweird.f32 %v10704_v5 }
 0x9e7   :  { %v3202_v23 = vsub.f32 1.5, %v3201_v60  ;;  %v3163_v62 = vpop.xlane.xlu1 %3162  ;;  %6919 = vrsqrt.f32 %v10762_v56  ;;  %v3351_v60 = vmul.f32 %v10661_v13, %v3350_v51  ;;  %vm10875_vm10 = vmor %vm3362_vm8, %vm3363_vm5  ;;  %vm3382_vm8 = vweird.f32 %v10723_v41 }
 0x9e8   :  { %v10777_v10 = vpop.eup %6909  ;;  %v10782_v38 = vadd.f32 1e-12, %v3163_v62 }
 0x9e9   :  { %v10784_v32 = vpop.eup %6911  ;;  %v3219_v61 = vmul.f32 %v10777_v10, %v10716_v12  ;;  %v3203_v8 = vmul.f32 %v10711_v55, %v3202_v23  ;;  %v5435_v23 = vsel %vm10795_vm2, %v10659_v9, %v5431_v59  ;;  %vm3225_vm4 = vweird.f32 %v10777_v10 }
 0x9ea   :  { %v10799_v19 = vpop.eup %6913  ;;  %6921 = vrsqrt.f32 %v10782_v38  ;;  %v10832_v40 = vsel %vm10753_vm13, %v10709_v26, %v5435_v23  ;;  %v5473_v46 = vmul.f32 %v10784_v32, %v10706_v57  ;;  %v3355_v39 = vsel %vm10820_vm7, %v10661_v13, %v3351_v60  ;;  %vm3226_vm13 = vmor %vm3224_vm9, %vm3225_vm4  ;;  %v7188_v60 = vld [vmem:[%s12972_s2 + $0x60] sm:$0xff] }
 0x9eb   :  { %v10809_v4 = vpop.eup %6915  ;;  %v3220_v62 = vmul.f32 %v10777_v10, %v3219_v61  ;;  %v3207_v35 = vsel %vm3206_vm6, %v10711_v55, %v3203_v8  ;;  %v3179_v63 = vmul.f32 %v10799_v19, %v10714_v43  ;;  %13477 = vst [vmem:[#allocation60_spill] sm:$0xff] %v10832_v40  ;;  %v5387_v61 = vmax.f32 %v5379_v6, 0.0 }
 0x9ec   :  { %v3260_v9 = vmul.f32 %v3207_v35, %v10540_v27  ;;  %v10835_v37 = vpop.eup %6917  ;;  %v3377_v27 = vmul.f32 %v10809_v4, %v10723_v41  ;;  %v3361_v12 = vmul.f32 %v10704_v5, %v3360_v15  ;;  %v10882_v15 = vsel %vm5517_vm1, %v10832_v40, 0.0 }
 0x9ed   :  { %v3221_v55 = vmul.f32 0.5, %v3220_v62  ;;  %v10841_v35 = vpop.eup %6919  ;;  %v10856_v17 = vadd.f32 1.0, %v5387_v61  ;;  %v5474_v61 = vsub.f32 1.0, %v5473_v46  ;;  %vm3234_vm12 = vweird.f32 %v10782_v38 }
 0x9ee   :  { %v3396_v8 = vmul.f32 %v3388_v47, %v3260_v9  ;;  %v3180_v9 = vmul.f32 %v10799_v19, %v3179_v63  ;;  %v3249_v13 = vmul.f32 %v10841_v35, %v10762_v56  ;;  %v3390_v63 = vmul.f32 %v7188_v60, %v3355_v39 }
 0x9ef   :  { %v3222_v62 = vsub.f32 1.5, %v3221_v55  ;;  %v3276_v26 = vpop.xlane.xlu1 %3275  ;;  %v5483_v60 = vand.u32 2147483648, %v10706_v57  ;;  %vm5477_vm2 = vweird.f32 %v10706_v57  ;;  %vm5478_vm6 = vweird.f32 %v10784_v32 }
 0x9f0   :  { %v6922_v23 = vpop.eup %6921  ;;  %v10849_v6 = vadd.f32 1e-12, %v3276_v26  ;;  %v3408_v47 = vsel %vm116_vm0, %v3396_v8, 0.0  ;;  %v3209_v26 = vmul.f32 %v10835_v37, %v10743_v44  ;;  %v3250_v50 = vmul.f32 %v10841_v35, %v3249_v13  ;;  %vm10928_vm9 = vmor %vm5477_vm2, %vm5478_vm6 }
 0x9f1   :  { %v3223_v55 = vmul.f32 %v10777_v10, %v3222_v62  ;;  %v3229_v3 = vmul.f32 %v6922_v23, %v10782_v38  ;;  %3409 = vadd.xlane.f32.xlu0 %v3408_v47  ;;  %v3378_v47 = vmul.f32 %v10809_v4, %v3377_v27  ;;  %v10886_v27 = vmul.f32 %v10735_v45, %v5444_v21 }
 0x9f2   :  { %6923 = vrsqrt.f32 %v10849_v6  ;;  %vm3235_vm14 = vweird.f32 %v6922_v23  ;;  %v3210_v21 = vmul.f32 %v10835_v37, %v3209_v26  ;;  %vm3185_vm4 = vweird.f32 %v10799_v19 }
 0x9f3   :  { %v3230_v8 = vmul.f32 %v6922_v23, %v3229_v3  ;;  %v3227_v62 = vsel %vm3226_vm13, %v10777_v10, %v3223_v55  ;;  %v3181_v10 = vmul.f32 0.5, %v3180_v9  ;;  %v5481_v55 = vand.u32 2147483647, %v10706_v57  ;;  %vm3236_vm15 = vmor %vm3234_vm12, %vm3235_vm14 }
 0x9f4   :  { %v3262_v39 = vmul.f32 %v3227_v62, %v10552_v34  ;;  %6925 = vrcp.f32 %v10856_v17  ;;  %v3365_v9 = vsel %vm10875_vm10, %v10704_v5, %v3361_v12  ;;  %v3379_v40 = vmul.f32 0.5, %v3378_v47 }
 0x9f5   :  { %v3231_v46 = vmul.f32 0.5, %v3230_v8  ;;  %v5475_v8 = vmul.f32 %v10784_v32, %v5474_v61  ;;  %v3251_v5 = vmul.f32 0.5, %v3250_v50  ;;  %v3391_v59 = vmul.f32 %v10530_v25, %v3365_v9 }
 0x9f6   :  { %v3398_v3 = vmul.f32 %v3390_v63, %v3262_v39  ;;  %v3182_v63 = vsub.f32 1.5, %v3181_v10  ;;  %v3211_v26 = vmul.f32 0.5, %v3210_v21  ;;  %v3380_v47 = vsub.f32 1.5, %v3379_v40 }
 0x9f7   :  { %v3232_v51 = vsub.f32 1.5, %v3231_v46  ;;  %v3285_v34 = vpop.xlane.xlu1 %3284  ;;  %vm10914_vm7 = vcmp.eq.f32.partialorder %v5481_v55, 8.507059e+37  ;;  %v5484_v25 = vor.u32 1.1754944e-38, %v5483_v60  ;;  %v3252_v9 = vsub.f32 1.5, %v3251_v5 }
 0x9f8   :  { %v10895_v62 = vpop.eup %6923  ;;  %v10898_v7 = vadd.f32 1e-12, %v3285_v34  ;;  %v3414_v13 = vsel %vm116_vm0, %v3398_v3, 0.0  ;;  %v5364_v3 = vadd.f32 %v10605_v31, %v10432_v29  ;;  %vm3383_vm5 = vweird.f32 %v10809_v4 }
 0x9f9   :  { %v3233_v39 = vmul.f32 %v6922_v23, %v3232_v51  ;;  %v3307_v46 = vmul.f32 %v10895_v62, %v10849_v6  ;;  %3415 = vadd.xlane.f32.xlu1 %v3414_v13  ;;  %v5476_v51 = vadd.f32 %v10784_v32, %v5475_v8  ;;  %vm5448_vm13 = vweird.f32 %v10735_v45  ;;  %vm10955_vm2 = vmor %vm3382_vm8, %vm3383_vm5 }
 0x9fa   :  { %6927 = vrsqrt.f32 %v10898_v7  ;;  %v10911_v38 = vpop.eup %6925  ;;  %vm3184_vm10 = vweird.f32 %v10714_v43  ;;  %vm3313_vm14 = vweird.f32 %v10895_v62  ;;  %v3212_v8 = vsub.f32 1.5, %v3211_v26 }
 0x9fb   :  { %v3308_v12 = vmul.f32 %v10895_v62, %v3307_v46  ;;  %v3237_v61 = vsel %vm3236_vm15, %v6922_v23, %v3233_v39  ;;  %v3183_v23 = vmul.f32 %v10799_v19, %v3182_v63  ;;  %v5480_v55 = vsel %vm10928_vm9, %v10784_v32, %v5476_v51  ;;  %vm10943_vm12 = vmor %vm3184_vm10, %vm3185_vm4 }
 0x9fc   :  { %v3263_v10 = vmul.f32 %v3237_v61, %v10560_v52  ;;  %v3381_v57 = vmul.f32 %v10809_v4, %v3380_v47  ;;  %vm5447_vm15 = vweird.f32 %v10671_v49  ;;  %vm3312_vm6 = vweird.f32 %v10849_v6 }
 0x9fd   :  { %v3309_v34 = vmul.f32 0.5, %v3308_v12  ;;  %v3187_v46 = vsel %vm10943_vm12, %v10799_v19, %v3183_v23  ;;  %v3253_v41 = vmul.f32 %v10841_v35, %v3252_v9  ;;  %vm3255_vm4 = vweird.f32 %v10841_v35  ;;  %vm3314_vm8 = vmor %vm3312_vm6, %vm3313_vm14 }
 0x9fe   :  { %v3399_v40 = vmul.f32 %v3391_v59, %v3263_v10  ;;  %v5488_v6 = vmul.f32 %v10911_v38, %v10856_v17  ;;  %v5380_v5 = vsub.f32 %v5364_v3, %v10731_v36  ;;  %vm3215_vm5 = vweird.f32 %v10835_v37  ;;  %v7189_v3 = vld [vmem:[%s12972_s2 + $0x78] sm:$0xff]  ;;  %vm11024_vm6 = vmor %vm5447_vm15, %vm5448_vm13  ;;  %s12911_s2 = spop %6362 }
 0x9ff   :  { %v3310_v29 = vsub.f32 1.5, %v3309_v34  ;;  %v3294_v31 = vpop.xlane.xlu1 %3293  ;;  %v3213_v59 = vmul.f32 %v10835_v37, %v3212_v8  ;;  %vm3254_vm9 = vweird.f32 %v10762_v56  ;;  %v3258_v12 = vmul.f32 %v3187_v46, %v10525_v1  ;;  %s12913_s1 = spop %6364 }
 0xa00   :  { %v10938_v60 = vpop.eup %6927  ;;  %v10947_v43 = vadd.f32 1e-12, %v3294_v31  ;;  %v3417_v13 = vsel %vm116_vm0, %v3399_v40, 0.0  ;;  %vm10982_vm10 = vmor %vm3254_vm9, %vm3255_vm4  ;;  %v10988_v36 = vsel %vm10914_vm7, %v5484_v25, %v5480_v55  ;;  %v3385_v56 = vsel %vm10955_vm2, %v10809_v4, %v3381_v57  ;;  %s6367_s20 = spop %6366 }
 0xa01   :  { %v3311_v63 = vmul.f32 %v10895_v62, %v3310_v29  ;;  %v3337_v39 = vmul.f32 %v10938_v60, %v10898_v7  ;;  %3418 = vadd.xlane.f32.xlu0 %v3417_v13  ;;  %5525 = vadd.xlane.f32.xlu1 %v10882_v15  ;;  %vm3214_vm14 = vweird.f32 %v10743_v44  ;;  %v5489_v47 = vsub.f32 1.0, %v5488_v6  ;;  %s6369_s26 = spop %6368  ;;  %s2027_s5 = smul.f32 %s6367_s20, %s12913_s1 }
 0xa02   :  { %6929 = vrsqrt.f32 %v10947_v43  ;;  %v5388_v10 = vmax.f32 %v5380_v5, 0.0  ;;  %vm11002_vm7 = vmor %vm3214_vm14, %vm3215_vm5  ;;  %vm3343_vm12 = vweird.f32 %v10938_v60  ;;  %v5533_v25 = vsel %vm5517_vm1, %v10988_v36, 0.0  ;;  %s2302_s23 = smul.f32 %s6369_s26, %s12913_s1 }
 0xa03   :  { %v3338_v15 = vmul.f32 %v10938_v60, %v3337_v39  ;;  %v3315_v19 = vsel %vm3314_vm8, %v10895_v62, %v3311_v63  ;;  %v5446_v62 = vadd.f32 %v10735_v45, %v10886_v27  ;;  %6931 = vrcp.f32 %v10814_v42  ;;  %s2028_s8 = ssub.f32 0.0, %s2027_s5  ;;  %s1184_s20 = smul.f32 %s12913_s1, %s12911_s2 }
 0xa04   :  { %v3386_v61 = vmul.f32 %v10568_v0, %v3315_v19  ;;  %v3257_v0 = vsel %vm10982_vm10, %v10841_v35, %v3253_v41  ;;  %v3217_v35 = vsel %vm11002_vm7, %v10835_v37, %v3213_v59  ;;  %v3393_v23 = vmul.f32 %v7189_v3, %v3385_v56  ;;  %s2303_s7 = ssub.f32 0.0, %s2302_s23 }
 0xa05   :  { %v3339_v26 = vmul.f32 0.5, %v3338_v15  ;;  %vm3342_vm2 = vweird.f32 %v10898_v7  ;;  %v3265_v40 = vmul.f32 %v3257_v0, %v10422_v24  ;;  %vm3245_vm4 = vweird.f32 %v10635_v58  ;;  %s6371_s21 = spop %6370  ;;  %s2304_s6 = smul.f32 0.5, %s2028_s8 }
 0xa06   :  { %v3394_v1 = vmul.f32 %v3386_v61, %v3258_v12  ;;  %vm3344_vm8 = vmor %vm3342_vm2, %vm3343_vm12  ;;  %v5450_v7 = vsel %vm11024_vm6, %v10735_v45, %v5446_v62  ;;  %v5413_v52 = vmul.f32 %v10729_v30, %v10666_v48  ;;  %v13494_v29 = vsub.f32 1.5, %v10664_v18  ;;  %s6373_s22 = spop %6372  ;;  %s2657_s25 = smul.f32 %s6371_s21, %s12913_s1 }
 0xa07   :  { %v3340_v27 = vsub.f32 1.5, %v3339_v26  ;;  %v13495_v8 = vand.u32 2147483648, %v10671_v49  ;;  %vm3244_vm13 = vweird.f32 %v10621_v54  ;;  %v3261_v21 = vmul.f32 %v3217_v35, %v10413_v16  ;;  %s2932_s9 = smul.f32 %s6373_s22, %s12913_s1 }
 0xa08   :  { %v6930_v4 = vpop.eup %6929  ;;  %v3402_v44 = vsel %vm116_vm0, %v3394_v1, 0.0  ;;  %v3243_v31 = vmul.f32 %v10635_v58, %v13494_v29  ;;  %v13496_v13 = vand.u32 2147483647, %v10671_v49  ;;  %v11051_v18 = vadd.f32 1.0, %v5388_v10  ;;  %vm11057_vm5 = vmor %vm3244_vm13, %vm3245_vm4  ;;  %s2658_s15 = ssub.f32 0.0, %s2657_s25  ;;  %s2305_s3 = smul.f32 0.5, %s2303_s7 }
 0xa09   :  { %v3341_v34 = vmul.f32 %v10938_v60, %v3340_v27  ;;  %v3367_v9 = vmul.f32 %v6930_v4, %v10947_v43  ;;  %3403 = vadd.xlane.f32.xlu2 %v3402_v44  ;;  %5519 = vadd.xlane.f32.xlu0 %v10759_v33  ;;  %v5490_v33 = vmul.f32 %v10911_v38, %v5489_v47  ;;  %v5454_v57 = vor.u32 1.1754944e-38, %v13495_v8  ;;  %v11049_v32 = vpop.eup %6931  ;;  %s2933_s12 = ssub.f32 0.0, %s2932_s9 }
 0xa0a   :  { %5534 = vadd.xlane.f32.xlu1 %v5533_v25  ;;  %vm5452_vm15 = vcmp.eq.f32.partialorder %v13496_v13, 8.507059e+37  ;;  %vm5493_vm9 = vweird.f32 %v10911_v38  ;;  %v5414_v54 = vsub.f32 1.0, %v5413_v52  ;;  %vm3373_vm10 = vweird.f32 %v6930_v4  ;;  %s2934_s29 = smul.f32 0.5, %s2658_s15  ;;  %s2306_s19 = sadd.f32 %s2305_s3, %s2304_s6 }
 0xa0b   :  { %v3368_v24 = vmul.f32 %v6930_v4, %v3367_v9  ;;  %v3345_v55 = vsel %vm3344_vm8, %v10938_v60, %v3341_v34  ;;  %v11053_v39 = vsel %vm5452_vm15, %v5454_v57, %v5450_v7  ;;  %v3401_v60 = vmul.f32 %v3393_v23, %v3265_v40  ;;  %v13500_v23 = vld [vmem:[#allocation29_spill] sm:$0xff]  ;;  %s2935_s13 = smul.f32 0.5, %s2933_s12 }
 0xa0c   :  { %v3389_v45 = vmul.f32 %v10579_v2, %v3345_v55  ;;  %v5491_v2 = vadd.f32 %v10911_v38, %v5490_v33  ;;  %v5498_v41 = vand.u32 2147483648, %v10856_v17  ;;  %v3247_v6 = vsel %vm11057_vm5, %v10635_v58, %v3243_v31 }
 0xa0d   :  { %v3369_v63 = vmul.f32 0.5, %v3368_v24  ;;  %v5527_v15 = vsel %vm5517_vm1, %v11053_v39, 0.0  ;;  %vm5492_vm14 = vweird.f32 %v10856_v17  ;;  %v5496_v19 = vand.u32 2147483647, %v10856_v17  ;;  %s2936_s26 = sadd.f32 %s2935_s13, %s2934_s29 }
 0xa0e   :  { %v3397_v16 = vmul.f32 %v3389_v45, %v3261_v21  ;;  %6933 = vrcp.f32 %v11051_v18  ;;  %vm3372_vm7 = vweird.f32 %v10947_v43  ;;  %v3423_v12 = vsel %vm116_vm0, %v3401_v60, 0.0  ;;  %vm5494_vm12 = vmor %vm5492_vm14, %vm5493_vm9  ;;  %v13502_v60 = vld [vmem:[#allocation71_spill] sm:$0xff] }
 0xa0f   :  { %v3370_v49 = vsub.f32 1.5, %v3369_v63  ;;  %vm3374_vm2 = vmor %vm3372_vm7, %vm3373_vm10  ;;  %v5495_v58 = vsel %vm5494_vm12, %v10911_v38, %v5491_v2  ;;  %v5415_v61 = vmul.f32 %v10729_v30, %v5414_v54  ;;  %v5458_v17 = vmul.f32 %v11049_v32, %v10814_v42  ;;  %v13499_v38 = vld [vmem:[#allocation72_spill] sm:$0xff]  ;;  %s2937_s15 = sadd.f32 %s2936_s26, %s2306_s19 }
 0xa10   :  { %v3411_v5 = vsel %vm116_vm0, %v3397_v16, 0.0  ;;  %v5499_v51 = vor.u32 1.1754944e-38, %v5498_v41  ;;  %v3264_v26 = vmul.f32 %v3247_v6, %v10085_v28  ;;  %vm5497_vm6 = vcmp.eq.f32.partialorder %v5496_v19, 8.507059e+37  ;;  %v13503_v16 = vld [vmem:[#allocation43_spill] sm:$0xff]  ;;  %v13504_v54 = vld [vmem:[#allocation36_spill] sm:$0xff] }
 0xa11   :  { %v3371_v59 = vmul.f32 %v6930_v4, %v3370_v49  ;;  %3412 = vadd.xlane.f32.xlu2 %v3411_v5  ;;  %5528 = vadd.xlane.f32.xlu0 %v5527_v15  ;;  %vm5417_vm4 = vweird.f32 %v10666_v48  ;;  %vm5418_vm8 = vweird.f32 %v10729_v30  ;;  %v3969_v1 = vmul.f32 %v13499_v38, %v13322_v22  ;;  %v13505_v49 = vld [vmem:[#allocation75_spill] sm:$0xff]  ;;  %v13506_v5 = vld [vmem:[#allocation5_spill] sm:$0xff]  ;;  %v13507_v15 = vld [vmem:[#allocation88_spill] sm:$0xff] }
 0xa12   :  { %3424 = vadd.xlane.f32.xlu1 %v3423_v12  ;;  %v11085_v56 = vsel %vm5497_vm6, %v5499_v51, %v5495_v58  ;;  %v5423_v0 = vand.u32 2147483648, %v10666_v48  ;;  %v5416_v10 = vadd.f32 %v10729_v30, %v5415_v61  ;;  %v5421_v28 = vand.u32 2147483647, %v10666_v48  ;;  %vm5419_vm13 = vmor %vm5417_vm4, %vm5418_vm8  ;;  %v13509_v58 = vld [vmem:[#allocation34_spill] sm:$0xff]  ;;  %v13513_v38 = vld [vmem:[#allocation89_spill] sm:$0xff] }
 0xa13   :  { %v3375_v43 = vsel %vm3374_vm2, %v6930_v4, %v3371_v59  ;;  %v5459_v50 = vsub.f32 1.0, %v5458_v17  ;;  %v3979_v44 = vsel %vm116_vm0, %v3969_v1, 0.0  ;;  %v3972_v34 = vmul.f32 %v13500_v23, %v13315_v53  ;;  %v13508_v59 = vld [vmem:[#allocation83_spill] sm:$0xff]  ;;  %v13510_v17 = vld [vmem:[#allocation50_spill] sm:$0xff] }
 0xa14   :  { %v3392_v62 = vmul.f32 %v10589_v14, %v3375_v43  ;;  %v6934_v27 = vpop.eup %6933  ;;  %v5536_v14 = vsel %vm5517_vm1, %v11085_v56, 0.0  ;;  %v5424_v22 = vor.u32 1.1754944e-38, %v5423_v0  ;;  %v5420_v25 = vsel %vm5419_vm13, %v10729_v30, %v5416_v10  ;;  %v13512_v43 = vld [vmem:[#allocation81_spill] sm:$0xff]  ;;  %v13515_v10 = vld [vmem:[#allocation80_spill] sm:$0xff]  ;;  %v13520_v23 = vld [vmem:[#allocation90_spill] sm:$0xff] }
 0xa15   :  { %vm5422_vm15 = vcmp.eq.f32.partialorder %v5421_v28, 8.507059e+37  ;;  %v5460_v35 = vmul.f32 %v11049_v32, %v5459_v50  ;;  %v5503_v48 = vmul.f32 %v6934_v27, %v11051_v18  ;;  %vm5463_vm5 = vweird.f32 %v11049_v32  ;;  %v13516_v50 = vld [vmem:[#allocation25_spill] sm:$0xff] }
 0xa16   :  { %v3400_v47 = vmul.f32 %v3392_v62, %v3264_v26  ;;  %v11099_v3 = vsel %vm5422_vm15, %v5424_v22, %v5420_v25  ;;  %v5468_v40 = vand.u32 2147483648, %v10814_v42  ;;  %vm5462_vm9 = vweird.f32 %v10814_v42  ;;  %v13511_v26 = vld [vmem:[#allocation26_spill] sm:$0xff]  ;;  %v3407_v22 = vpop.xlane.xlu1 %3406  ;;  %v13518_v25 = vld [vmem:[#allocation35_spill] sm:$0xff] }
 0xa17   :  { %v5461_v9 = vadd.f32 %v11049_v32, %v5460_v35  ;;  %v5504_v37 = vsub.f32 1.0, %v5503_v48  ;;  %v5521_v30 = vsel %vm5517_vm1, %v11099_v3, 0.0  ;;  %v5466_v7 = vand.u32 2147483647, %v10814_v42  ;;  %vm5464_vm10 = vmor %vm5462_vm9, %vm5463_vm5  ;;  %v13519_v35 = vld [vmem:[#allocation76_spill] sm:$0xff] }
 0xa18   :  { %v3420_v4 = vsel %vm116_vm0, %v3400_v47, 0.0  ;;  %v3988_v33 = vsel %vm116_vm0, %v3972_v34, 0.0  ;;  %v5469_v29 = vor.u32 1.1754944e-38, %v5468_v40  ;;  %vm5508_vm7 = vweird.f32 %v6934_v27  ;;  %v13514_v47 = vld [vmem:[#allocation27_spill] sm:$0xff] }
 0xa19   :  { %5537 = vadd.xlane.f32.xlu0 %v5536_v14  ;;  %3421 = vadd.xlane.f32.xlu2 %v3420_v4  ;;  %v5465_v53 = vsel %vm5464_vm10, %v11049_v32, %v5461_v9  ;;  %v5505_v52 = vmul.f32 %v6934_v27, %v5504_v37  ;;  %vm5467_vm14 = vcmp.eq.f32.partialorder %v5466_v7, 8.507059e+37  ;;  %v5513_v55 = vand.u32 2147483648, %v11051_v18  ;;  %v13521_v37 = vld [vmem:[#allocation33_spill] sm:$0xff] }
 0xa1a   :  { %3980 = vadd.xlane.f32.xlu1 %v3979_v44  ;;  %v11112_v31 = vsel %vm5467_vm14, %v5469_v29, %v5465_v53  ;;  %vm5507_vm12 = vweird.f32 %v11051_v18  ;;  %v5511_v42 = vand.u32 2147483647, %v11051_v18  ;;  %v4099_v57 = vsel %vm1818_vm3, %v9409_v20, 0.0  ;;  %v13501_v18 = vld [vmem:[#allocation40_spill] sm:$0xff]  ;;  %v13523_v53 = vld [vmem:[#allocation77_spill] sm:$0xff] }
 0xa1b   :  { %v5506_v24 = vadd.f32 %v6934_v27, %v5505_v52  ;;  %v5530_v8 = vsel %vm5517_vm1, %v11112_v31, 0.0  ;;  %vm5509_vm2 = vmor %vm5507_vm12, %vm5508_vm7  ;;  %v5514_v45 = vor.u32 1.1754944e-38, %v5513_v55  ;;  %v4102_v63 = vsel %vm1818_vm3, %v9415_v11, 0.0 }
 0xa1c   :  { %vm5512_vm6 = vcmp.eq.f32.partialorder %v5511_v42, 8.507059e+37  ;;  %v3968_v46 = vmul.f32 %v13502_v60, %v13501_v18  ;;  %v4716_v2 = vsel %vm1818_vm3, %v13503_v16, 0.0  ;;  %v3971_v41 = vmul.f32 %v13505_v49, %v13504_v54  ;;  %v13524_v42 = vld [vmem:[#allocation12_spill] sm:$0xff] }
 0xa1d   :  { %v5510_v21 = vsel %vm5509_vm2, %v6934_v27, %v5506_v24  ;;  %v4108_v11 = vsel %vm1818_vm3, %v13506_v5, 0.0  ;;  %v4096_v19 = vsel %vm1818_vm3, %v13507_v15, 0.0  ;;  %v4111_v12 = vsel %vm1818_vm3, %v13508_v59, 0.0  ;;  %v13517_v27 = vld [vmem:[#allocation82_spill] sm:$0xff]  ;;  %v13527_v15 = vld [vmem:[#allocation15_spill] sm:$0xff] }
 0xa1e   :  { %v11121_v13 = vsel %vm5512_vm6, %v5514_v45, %v5510_v21  ;;  %v3976_v20 = vsel %vm116_vm0, %v3968_v46, 0.0  ;;  %v3985_v6 = vsel %vm116_vm0, %v3971_v41, 0.0  ;;  %v4710_v61 = vsel %vm1818_vm3, %v13509_v58, 0.0  ;;  %v13525_v21 = vld [vmem:[#allocation20_spill] sm:$0xff]  ;;  %v13526_v45 = vld [vmem:[#allocation78_spill] sm:$0xff] }
 0xa1f   :  { %v5539_v32 = vsel %vm5517_vm1, %v11121_v13, 0.0  ;;  %v4722_v51 = vsel %vm1818_vm3, %v13510_v17, 0.0  ;;  %v4584_v62 = vmul.f32 %v13512_v43, %v13511_v26  ;;  %v4105_v1 = vsel %vm1818_vm3, %v13513_v38, 0.0 }
 0xa20   :  { %v4583_v28 = vmul.f32 %v13515_v10, %v13514_v47  ;;  %v4585_v14 = vmul.f32 %v13517_v27, %v13516_v50  ;;  %v3973_v48 = vmul.f32 %v13519_v35, %v13518_v25  ;;  %v4114_v34 = vsel %vm1818_vm3, %v13520_v23, 0.0  ;;  %v13529_v50 = vld [vmem:[#allocation74_spill] sm:$0xff] }
 0xa21   :  { %5522 = vadd.xlane.f32.xlu2 %v5521_v30  ;;  %v4596_v0 = vsel %vm116_vm0, %v4584_v62, 0.0  ;;  %v11162_v40 = vadd.f32 1e-08, %v13521_v37  ;;  %v3427_v18 = vsub.f32 1.0, %v3407_v22 }
 0xa22   :  { %3989 = vadd.xlane.f32.xlu1 %v3988_v33  ;;  %v4593_v4 = vsel %vm116_vm0, %v4583_v28, 0.0  ;;  %v4599_v44 = vsel %vm116_vm0, %v4585_v14, 0.0  ;;  %v3991_v9 = vsel %vm116_vm0, %v3973_v48, 0.0  ;;  %v13522_v33 = vld [vmem:[#allocation19_spill] sm:$0xff]  ;;  %v13528_v28 = vld [vmem:[#allocation37_spill] sm:$0xff] }
 0xa23   :  { %v3974_v52 = vmul.f32 %v13523_v53, %v13522_v33  ;;  %6935 = vrcp.f32 %v11162_v40  ;;  %v4426_v59 = vand.u32 2147483648, %v11162_v40  ;;  %vm4420_vm4 = vweird.f32 %v11162_v40 }
 0xa24   :  { %v11207_v27 = vmul.f32 %v13529_v50, %v13528_v28  ;;  %v13536_v28 = vld [vmem:[#allocation9_spill] sm:$0xff] }
 0xa25   :  { %v3994_v29 = vsel %vm116_vm0, %v3974_v52, 0.0  ;;  %v4424_v52 = vand.u32 2147483647, %v11162_v40 }
 0xa27   :  { %vm11250_vm7 = vcmp.eq.f32.partialorder %v4424_v52, 8.507059e+37 }
 0xa29   :  { %5531 = vadd.xlane.f32.xlu2 %v5530_v8  ;;  %v11170_v8 = vpop.eup %6935 }
 0xa2a   :  { %4100 = vadd.xlane.f32.xlu1 %v4099_v57  ;;  %v11173_v57 = vadd.f32 1e-08, %v13524_v42  ;;  %vm4421_vm8 = vweird.f32 %v11170_v8 }
 0xa2b   :  { %vm11217_vm13 = vmor %vm4420_vm4, %vm4421_vm8 }
 0xa2c   :  { %6937 = vrcp.f32 %v11173_v57  ;;  %vm4465_vm9 = vweird.f32 %v11173_v57  ;;  %v4469_v52 = vand.u32 2147483647, %v11173_v57 }
 0xa31   :  { %5540 = vadd.xlane.f32.xlu2 %v5539_v32  ;;  %v3975_v32 = vmul.f32 %v13526_v45, %v13525_v21 }
 0xa32   :  { %4103 = vadd.xlane.f32.xlu1 %v4102_v63  ;;  %v4416_v63 = vmul.f32 %v11170_v8, %v11162_v40  ;;  %v11186_v5 = vpop.eup %6937 }
 0xa33   :  { %v3997_v60 = vsel %vm116_vm0, %v3975_v32, 0.0  ;;  %vm4466_vm2 = vweird.f32 %v11186_v5 }
 0xa34   :  { %v4417_v46 = vsub.f32 1.0, %v4416_v63 }
 0xa39   :  { %3977 = vadd.xlane.f32.xlu2 %v3976_v20 }
 0xa3a   :  { %4717 = vadd.xlane.f32.xlu1 %v4716_v2  ;;  %v3435_v2 = vmax.f32 %v3427_v18, 0.0 }
 0xa3c   :  { %v3443_v58 = vmul.f32 %v3435_v2, %v3435_v2 }
 0xa3e   :  { %v3451_v14 = vsel %vm1151_vm11, %v3443_v58, 0.0 }
 0xa41   :  { %3986 = vadd.xlane.f32.xlu2 %v3985_v6 }
 0xa42   :  { %4109 = vadd.xlane.f32.xlu1 %v4108_v11 }
 0xa49   :  { %4097 = vadd.xlane.f32.xlu2 %v4096_v19  ;;  %v11189_v19 = vadd.f32 1e-08, %v13527_v15 }
 0xa4a   :  { %4112 = vadd.xlane.f32.xlu1 %v4111_v12  ;;  %v4418_v12 = vmul.f32 %v11170_v8, %v4417_v46 }
 0xa4c   :  { %v11211_v25 = vadd.f32 %v11170_v8, %v4418_v12 }
 0xa4e   :  { %v4423_v45 = vsel %vm11217_vm13, %v11170_v8, %v11211_v25 }
 0xa51   :  { %4711 = vadd.xlane.f32.xlu2 %v4710_v61 }
 0xa52   :  { %4723 = vadd.xlane.f32.xlu1 %v4722_v51  ;;  %v4461_v51 = vmul.f32 %v11186_v5, %v11173_v57 }
 0xa54   :  { %v4462_v35 = vsub.f32 1.0, %v4461_v51  ;;  %v13532_v51 = vld [vmem:[#allocation59_spill] sm:$0xff] }
 0xa56   :  { %v4463_v63 = vmul.f32 %v11186_v5, %v4462_v35 }
 0xa59   :  { %4106 = vadd.xlane.f32.xlu2 %v4105_v1  ;;  %v11200_v1 = vor.u32 1.1754944e-38, %v4426_v59 }
 0xa5a   :  { %4597 = vadd.xlane.f32.xlu1 %v4596_v0 }
 0xa61   :  { %4594 = vadd.xlane.f32.xlu2 %v4593_v4 }
 0xa62   :  { %4600 = vadd.xlane.f32.xlu1 %v4599_v44 }
 0xa64   :  { %v3410_v30 = vpop.xlane.xlu0 %3409 }
 0xa65   :  { %v3428_v54 = vsub.f32 1.0, %v3410_v30 }
 0xa67   :  { %v3436_v61 = vmax.f32 %v3428_v54, 0.0 }
 0xa69   :  { %4115 = vadd.xlane.f32.xlu2 %v4114_v34  ;;  %v3444_v4 = vmul.f32 %v3436_v61, %v3436_v61 }
 0xa6a   :  { %3992 = vadd.xlane.f32.xlu1 %v3991_v9 }
 0xa6c   :  { %v3416_v7 = vpop.xlane.xlu1 %3415 }
 0xa6d   :  { %v3430_v6 = vsub.f32 1.0, %v3416_v7 }
 0xa6f   :  { %v3438_v26 = vmax.f32 %v3430_v6, 0.0 }
 0xa71   :  { %v3446_v48 = vmul.f32 %v3438_v26, %v3438_v26 }
 0xa72   :  { %3995 = vadd.xlane.f32.xlu1 %v3994_v29 }
 0xa73   :  { %v3457_v40 = vsel %vm1151_vm11, %v3446_v48, 0.0 }
 0xa74   :  { %v11168_v24 = vpop.xlane.xlu1 %5525  ;;  %v3419_v55 = vpop.xlane.xlu0 %3418 }
 0xa75   :  { %v3431_v62 = vsub.f32 1.0, %v3419_v55  ;;  %v3453_v55 = vsel %vm1151_vm11, %v3444_v4, 0.0 }
 0xa77   :  { %v3439_v37 = vmax.f32 %v3431_v62, 0.0 }
 0xa79   :  { %v3447_v46 = vmul.f32 %v3439_v37, %v3439_v37 }
 0xa7a   :  { %3998 = vadd.xlane.f32.xlu1 %v3997_v60 }
 0xa7c   :  { %v3404_v20 = vpop.xlane.xlu2 %3403  ;;  %v11181_v16 = vpop.xlane.xlu0 %5519 }
 0xa7d   :  { %v3426_v49 = vsub.f32 1.0, %v3404_v20  ;;  %v11183_v41 = vpop.xlane.xlu1 %5534  ;;  %6939 = vrcp.f32 %v11181_v16  ;;  %v5553_v30 = vand.u32 2147483648, %v11181_v16  ;;  %v5551_v53 = vand.u32 2147483647, %v11181_v16 }
 0xa7e   :  { %6941 = vrcp.f32 %v11168_v24  ;;  %vm5547_vm5 = vweird.f32 %v11181_v16 }
 0xa7f   :  { %v3434_v11 = vmax.f32 %v3426_v49, 0.0  ;;  %6943 = vrcp.f32 %v11189_v19  ;;  %v5554_v20 = vor.u32 1.1754944e-38, %v5553_v30  ;;  %vm5552_vm14 = vcmp.eq.f32.partialorder %v5551_v53, 8.507059e+37 }
 0xa81   :  { %v3442_v17 = vmul.f32 %v3434_v11, %v3434_v11 }
 0xa83   :  { %v6940_v43 = vpop.eup %6939  ;;  %v3450_v38 = vsel %vm1151_vm11, %v3442_v17, 0.0  ;;  %v4471_v17 = vand.u32 2147483648, %v11173_v57 }
 0xa84   :  { %v5543_v0 = vmul.f32 %v6940_v43, %v11181_v16  ;;  %v3413_v47 = vpop.xlane.xlu2 %3412  ;;  %v11203_v10 = vpop.xlane.xlu0 %5528  ;;  %v3452_v23 = vadd.f32 %v3451_v14, %v3450_v38  ;;  %vm5548_vm15 = vweird.f32 %v6940_v43  ;;  %v11257_v14 = vadd.f32 %v11186_v5, %v4463_v63 }
 0xa85   :  { %v3429_v44 = vsub.f32 1.0, %v3413_v47  ;;  %v3425_v22 = vpop.xlane.xlu1 %3424  ;;  %6945 = vrcp.f32 %v11203_v10  ;;  %v11225_v29 = vpop.eup %6941  ;;  %vm5549_vm10 = vmor %vm5547_vm5, %vm5548_vm15  ;;  %v5598_v48 = vand.u32 2147483648, %v11203_v10  ;;  %vm5592_vm6 = vweird.f32 %v11203_v10 }
 0xa86   :  { %v5544_v34 = vsub.f32 1.0, %v5543_v0  ;;  %v3433_v21 = vsub.f32 1.0, %v3425_v22  ;;  %v11232_v32 = vpop.eup %6943  ;;  %v3454_v60 = vadd.f32 %v3453_v55, %v3452_v23  ;;  %v5573_v54 = vmul.f32 %v11225_v29, %v11168_v24  ;;  %vm11281_vm15 = vmor %vm4465_vm9, %vm4466_vm2 }
 0xa87   :  { %v3437_v7 = vmax.f32 %v3429_v44, 0.0  ;;  %v3459_v0 = vsel %vm1151_vm11, %v3447_v46, 0.0  ;;  %v5596_v22 = vand.u32 2147483647, %v11203_v10  ;;  %v4472_v57 = vor.u32 1.1754944e-38, %v4471_v17 }
 0xa88   :  { %v5545_v33 = vmul.f32 %v6940_v43, %v5544_v34  ;;  %v3441_v12 = vmax.f32 %v3433_v21, 0.0  ;;  %v5574_v4 = vsub.f32 1.0, %v5573_v54  ;;  %vm5578_vm13 = vweird.f32 %v11225_v29 }
 0xa89   :  { %v3445_v42 = vmul.f32 %v3437_v7, %v3437_v7  ;;  %vm5597_vm8 = vcmp.eq.f32.partialorder %v5596_v22, 8.507059e+37 }
 0xa8a   :  { %v5546_v18 = vadd.f32 %v6940_v43, %v5545_v33  ;;  %v3449_v35 = vmul.f32 %v3441_v12, %v3441_v12 }
 0xa8b   :  { %v3455_v2 = vsel %vm1151_vm11, %v3445_v42, 0.0  ;;  %v6946_v16 = vpop.eup %6945 }
 0xa8c   :  { %v5550_v49 = vsel %vm5549_vm10, %v6940_v43, %v5546_v18  ;;  %v3456_v6 = vadd.f32 %v3455_v2, %v3454_v60  ;;  %v3422_v11 = vpop.xlane.xlu2 %3421  ;;  %v11242_v15 = vpop.xlane.xlu0 %5537  ;;  %v5588_v43 = vmul.f32 %v6946_v16, %v11203_v10  ;;  %vm5593_vm12 = vweird.f32 %v6946_v16 }
 0xa8d   :  { %v5555_v59 = vsel %vm5552_vm14, %v5554_v20, %v5550_v49  ;;  %v3432_v58 = vsub.f32 1.0, %v3422_v11  ;;  %v3981_v61 = vpop.xlane.xlu1 %3980  ;;  %6947 = vrcp.f32 %v11242_v15  ;;  %v5575_v18 = vmul.f32 %v11225_v29, %v5574_v4  ;;  %vm5594_vm4 = vmor %vm5592_vm6, %vm5593_vm12 }
 0xa8e   :  { %v11247_v26 = vmul.f32 %v5555_v59, %v13532_v51  ;;  %v3458_v62 = vadd.f32 %v3457_v40, %v3456_v6  ;;  %v4001_v50 = vmul.f32 %v3981_v61, %v13536_v28  ;;  %6949 = vrcp.f32 %v11183_v41 }
 0xa8f   :  { %v3440_v47 = vmax.f32 %v3432_v58, 0.0  ;;  %v5589_v44 = vsub.f32 1.0, %v5588_v43  ;;  %v5599_v60 = vor.u32 1.1754944e-38, %v5598_v48  ;;  %v3463_v20 = vsel %vm1151_vm11, %v3449_v35, 0.0 }
 0xa90   :  { %13533 = vst [vmem:[#allocation61_spill] sm:$0xff] %v11247_v26  ;;  %v4010_v34 = vmul.f32 1.442695, %v4001_v50  ;;  %v3460_v30 = vadd.f32 %v3459_v0, %v3458_v62  ;;  %v5958_v7 = vsel %vm5517_vm1, %v11247_v26, -inf  ;;  %v5641_v11 = vand.u32 2147483647, %v11242_v15 }
 0xa91   :  { %v3448_v23 = vmul.f32 %v3440_v47, %v3440_v47  ;;  %v5590_v37 = vmul.f32 %v6946_v16, %v5589_v44  ;;  %5959 = vmax.xlane.f32.xlu1 %v5958_v7  ;;  %v5643_v59 = vand.u32 2147483648, %v11242_v15  ;;  %v4428_v43 = vsel %vm11250_vm7, %v11200_v1, %v4423_v45 }
 0xa92   :  { %6951 = vpow2.f32 %v4010_v34  ;;  %vm5637_vm9 = vweird.f32 %v11242_v15  ;;  %vm11312_vm14 = vcmp.eq.f32.partialorder %v4469_v52, 8.507059e+37  ;;  %v5576_v25 = vadd.f32 %v11225_v29, %v5575_v18 }
 0xa93   :  { %v6948_v33 = vpop.eup %6947  ;;  %v3461_v53 = vsel %vm1151_vm11, %v3448_v23, 0.0  ;;  %v5591_v55 = vadd.f32 %v6946_v16, %v5590_v37  ;;  %v5644_v8 = vor.u32 1.1754944e-38, %v5643_v59  ;;  %vm5642_vm7 = vcmp.eq.f32.partialorder %v5641_v11, 8.507059e+37  ;;  %v13549_v59 = vld [vmem:[#allocation60_spill] sm:$0xff] }
 0xa94   :  { %v3462_v42 = vadd.f32 %v3461_v53, %v3460_v30  ;;  %v5633_v21 = vmul.f32 %v6948_v33, %v11242_v15  ;;  %v11269_v63 = vpop.xlane.xlu2 %5522  ;;  %v11274_v46 = vpop.eup %6949  ;;  %vm5638_vm5 = vweird.f32 %v6948_v33  ;;  %v5583_v47 = vand.u32 2147483648, %v11168_v24 }
 0xa95   :  { %6953 = vrcp.f32 %v11269_v63  ;;  %v3990_v40 = vpop.xlane.xlu1 %3989  ;;  %v5595_v2 = vsel %vm5594_vm4, %v6946_v16, %v5591_v55  ;;  %v5618_v62 = vmul.f32 %v11274_v46, %v11183_v41  ;;  %vm5639_vm10 = vmor %vm5637_vm9, %vm5638_vm5  ;;  %vm5577_vm12 = vweird.f32 %v11168_v24 }
 0xa96   :  { %v5634_v10 = vsub.f32 1.0, %v5633_v21  ;;  %v4004_v49 = vmul.f32 %v3990_v40, %v13536_v28  ;;  %v5600_v6 = vsel %vm5597_vm8, %v5599_v60, %v5595_v2  ;;  %v3464_v12 = vadd.f32 %v3463_v20, %v3462_v42  ;;  %vm11335_vm2 = vmor %vm5577_vm12, %vm5578_vm13  ;;  %v13548_v60 = vld [vmem:[#allocation87_spill] sm:$0xff] }
 0xa97   :  { %v11289_v58 = vmul.f32 %v5600_v6, %v11053_v39  ;;  %v4468_v39 = vsel %vm11281_vm15, %v11186_v5, %v11257_v14  ;;  %v5619_v50 = vsub.f32 1.0, %v5618_v62  ;;  %v5581_v44 = vand.u32 2147483647, %v11168_v24 }
 0xa98   :  { %v5635_v16 = vmul.f32 %v6948_v33, %v5634_v10  ;;  %v4016_v61 = vmul.f32 1.442695, %v4004_v49  ;;  %v11291_v51 = vpop.eup %6951  ;;  %3465 = vadd.xlane.f32.xlu0 %v3464_v12  ;;  %v4401_v48 = vmul.f32 %v11232_v32, %v11189_v19  ;;  %v5568_v34 = vand.u32 2147483648, %v11269_v63 }
 0xa99   :  { %13539 = vst [vmem:[#allocation62_spill] sm:$0xff] %v11289_v58  ;;  %v11308_v17 = vmul.f32 %v11291_v51, %v4428_v43  ;;  %v5967_v5 = vsel %vm5517_vm1, %v11289_v58, -inf  ;;  %v4473_v37 = vsel %vm11312_vm14, %v4472_v57, %v4468_v39  ;;  %v3982_v24 = vsel %vm116_vm0, %v11207_v27, 0.0 }
 0xa9a   :  { %13540 = vst [vmem:[#allocation30_spill] sm:$0xff] %v11291_v51  ;;  %v5636_v0 = vadd.f32 %v6948_v33, %v5635_v16  ;;  %6955 = vpow2.f32 %v4016_v61  ;;  %5968 = vmax.xlane.f32.xlu1 %v5967_v5  ;;  %v5580_v30 = vsel %vm11335_vm2, %v11225_v29, %v5576_v25  ;;  %v5584_v53 = vor.u32 1.1754944e-38, %v5583_v47 }
 0xa9b   :  { %v6954_v9 = vpop.eup %6953  ;;  %v5620_v52 = vmul.f32 %v11274_v46, %v5619_v50  ;;  %vm5582_vm4 = vcmp.eq.f32.partialorder %v5581_v44, 8.507059e+37  ;;  %vm5562_vm8 = vweird.f32 %v11269_v63  ;;  %v5569_v18 = vor.u32 1.1754944e-38, %v5568_v34 }
 0xa9c   :  { %v5640_v45 = vsel %vm5639_vm10, %v6948_v33, %v5636_v0  ;;  %v5558_v38 = vmul.f32 %v6954_v9, %v11269_v63  ;;  %v11320_v15 = vpop.xlane.xlu2 %5531  ;;  %vm5563_vm6 = vweird.f32 %v6954_v9  ;;  %v5566_v33 = vand.u32 2147483647, %v11269_v63 }
 0xa9d   :  { %v5645_v14 = vsel %vm5642_vm7, %v5644_v8, %v5640_v45  ;;  %6957 = vrcp.f32 %v11320_v15  ;;  %v11324_v4 = vpop.xlane.xlu1 %4100  ;;  %v5585_v29 = vsel %vm5582_vm4, %v5584_v53, %v5580_v30  ;;  %vm5564_vm15 = vmor %vm5562_vm8, %vm5563_vm6  ;;  %v4093_v40 = vsel %vm1818_vm3, %v13548_v60, 0.0 }
 0xa9e   :  { %v11329_v22 = vmul.f32 %v5645_v14, %v11085_v56  ;;  %v5559_v35 = vsub.f32 1.0, %v5558_v38  ;;  %v4402_v20 = vsub.f32 1.0, %v4401_v48  ;;  %vm5567_vm5 = vcmp.eq.f32.partialorder %v5566_v33, 8.507059e+37  ;;  %v11405_v33 = vpop.f32.mrf.mxu1 }
 0xa9f   :  { %v5621_v49 = vadd.f32 %v11274_v46, %v5620_v52  ;;  %vm5623_vm9 = vweird.f32 %v11274_v46  ;;  %v5628_v63 = vand.u32 2147483648, %v11183_v41  ;;  %v11368_v12 = vmul.f32 %v5585_v29, %v13549_v59  ;;  %v13558_v59 = vld [vmem:[#allocation47_spill] sm:$0xff] }
 0xaa0   :  { %13543 = vst [vmem:[#allocation31_spill] sm:$0xff] %v11329_v22  ;;  %v11344_v56 = vpop.eup %6955  ;;  %v5560_v7 = vmul.f32 %v6954_v9, %v5559_v35  ;;  %3983 = vadd.xlane.f32.xlu0 %v3982_v24  ;;  %v5976_v27 = vsel %vm5517_vm1, %v11329_v22, -inf  ;;  %vm5622_vm13 = vweird.f32 %v11183_v41  ;;  %v5626_v57 = vand.u32 2147483647, %v11183_v41  ;;  %v13554_v35 = vld [vmem:[#allocation14_spill] sm:$0xff] }
 0xaa1   :  { %13546 = vst [vmem:[#allocation32_spill] sm:$0xff] %v11344_v56  ;;  %v11352_v55 = vmul.f32 %v11344_v56, %v4473_v37  ;;  %v5662_v62 = vsel %vm5517_vm1, %v11247_v26, 0.0  ;;  %v5613_v43 = vand.u32 2147483648, %v11320_v15  ;;  %vm11379_vm10 = vmor %vm5622_vm13, %vm5623_vm9  ;;  %v5665_v1 = vsel %vm5517_vm1, %v11368_v12, 0.0 }
 0xaa2   :  { %v5561_v42 = vadd.f32 %v6954_v9, %v5560_v7  ;;  %5977 = vmax.xlane.f32.xlu1 %v5976_v27  ;;  %13550 = vst [vmem:[#allocation38_spill] sm:$0xff] %v11368_v12  ;;  %v5625_v41 = vsel %vm11379_vm10, %v11274_v46, %v5621_v49  ;;  %v5629_v5 = vor.u32 1.1754944e-38, %v5628_v63  ;;  %vm5607_vm7 = vweird.f32 %v11320_v15 }
 0xaa3   :  { %13547 = vst [vmem:[#allocation69_spill] sm:$0xff] %v11352_v55  ;;  %v6958_v21 = vpop.eup %6957  ;;  %v4403_v45 = vmul.f32 %v11232_v32, %v4402_v20  ;;  %vm5627_vm12 = vcmp.eq.f32.partialorder %v5626_v57, 8.507059e+37  ;;  %v5614_v47 = vor.u32 1.1754944e-38, %v5613_v43  ;;  %v4707_v48 = vsel %vm1818_vm3, %v13554_v35, 0.0 }
 0xaa4   :  { %v5565_v2 = vsel %vm5564_vm15, %v6954_v9, %v5561_v42  ;;  %v5603_v10 = vmul.f32 %v6958_v21, %v11320_v15  ;;  %v11360_v54 = vpop.xlane.xlu2 %5540  ;;  %vm5608_vm14 = vweird.f32 %v6958_v21  ;;  %v5611_v9 = vand.u32 2147483647, %v11320_v15 }
 0xaa5   :  { %v5570_v6 = vsel %vm5567_vm5, %v5569_v18, %v5565_v2  ;;  %v11365_v11 = vpop.xlane.xlu1 %4103  ;;  %6959 = vrcp.f32 %v11360_v54  ;;  %vm5609_vm2 = vmor %vm5607_vm7, %vm5608_vm14  ;;  %v5630_v14 = vsel %vm5627_vm12, %v5629_v5, %v5625_v41  ;;  %vm4405_vm4 = vweird.f32 %v11189_v19 }
 0xaa6   :  { %v11371_v16 = vmul.f32 %v5570_v6, %v11099_v3  ;;  %v5604_v61 = vsub.f32 1.0, %v5603_v10  ;;  %vm5612_vm6 = vcmp.eq.f32.partialorder %v5611_v9, 8.507059e+37  ;;  %v4411_v23 = vand.u32 2147483648, %v11189_v19  ;;  %v13557_v10 = vld [vmem:[#allocation45_spill] sm:$0xff] }
 0xaa7   :  { %v5667_v24 = vsel %vm5517_vm1, %v11289_v58, 0.0  ;;  %vm4406_vm8 = vweird.f32 %v11232_v32  ;;  %v11408_v53 = vmul.f32 %v5630_v14, %v10988_v36  ;;  %v4404_v42 = vadd.f32 %v11232_v32, %v4403_v45  ;;  %v13564_v36 = vld [vmem:[#allocation28_spill] sm:$0xff] }
 0xaa8   :  { %13551 = vst [vmem:[#allocation39_spill] sm:$0xff] %v11371_v16  ;;  %v5663_v3 = vsel %vm5517_vm1, %v11371_v16, 0.0  ;;  %v5605_v0 = vmul.f32 %v6958_v21, %v5604_v61  ;;  %4094 = vadd.xlane.f32.xlu0 %v4093_v40  ;;  %v5658_v29 = vand.u32 2147483648, %v11360_v54  ;;  %v5656_v20 = vand.u32 2147483647, %v11360_v54  ;;  %vm11420_vm5 = vmor %vm4405_vm4, %vm4406_vm8 }
 0xaa9   :  { %v5664_v8 = vadd.f32 %v5663_v3, %v5662_v62  ;;  %v4412_v2 = vor.u32 1.1754944e-38, %v4411_v23  ;;  %v11425_v49 = vadd.f32 1e-08, %v13557_v10  ;;  %v5671_v63 = vsel %vm5517_vm1, %v11408_v53, 0.0 }
 0xaaa   :  { %v5606_v25 = vadd.f32 %v6958_v21, %v5605_v0  ;;  %vm5652_vm9 = vweird.f32 %v11360_v54  ;;  %v11431_v61 = vadd.f32 1e-08, %v13558_v59  ;;  %v5659_v57 = vor.u32 1.1754944e-38, %v5658_v29 }
 0xaab   :  { %v5666_v38 = vadd.f32 %v5665_v1, %v5664_v8  ;;  %v6960_v50 = vpop.eup %6959  ;;  %v4408_v62 = vsel %vm11420_vm5, %v11232_v32, %v4404_v42  ;;  %v4521_v39 = vadd.f32 1e-12, %v11308_v17  ;;  %vm5657_vm10 = vcmp.eq.f32.partialorder %v5656_v20, 8.507059e+37  ;;  %v13560_v1 = vld [vmem:[#allocation42_spill] sm:$0xff] }
 0xaac   :  { %v5610_v44 = vsel %vm5609_vm2, %v6958_v21, %v5606_v25  ;;  %v3978_v46 = vpop.xlane.xlu2 %3977  ;;  %v5648_v15 = vmul.f32 %v6960_v50, %v11360_v54  ;;  %vm5653_vm15 = vweird.f32 %v6960_v50  ;;  %v5673_v9 = vsel %vm5517_vm1, %v11329_v22, 0.0  ;;  %v11452_v25 = vpop.f32.mrf.mxu1 }
 0xaad   :  { %v5615_v34 = vsel %vm5612_vm6, %v5614_v47, %v5610_v44  ;;  %v4718_v37 = vpop.xlane.xlu1 %4717  ;;  %v4000_v7 = vmul.f32 %v3978_v46, %v13536_v28  ;;  %v5668_v52 = vadd.f32 %v5667_v24, %v5666_v38  ;;  %vm5654_vm13 = vmor %vm5652_vm9, %vm5653_vm15  ;;  %v4713_v5 = vsel %vm1818_vm3, %v13560_v1, 0.0  ;;  %v13561_v46 = vld [vmem:[#allocation53_spill] sm:$0xff] }
 0xaae   :  { %v11401_v30 = vmul.f32 %v5615_v34, %v11112_v31  ;;  %v5649_v27 = vsub.f32 1.0, %v5648_v15  ;;  %v4409_v31 = vand.u32 2147483647, %v11189_v19  ;;  %v11462_v35 = vadd.f32 1e-08, %v13561_v46 }
 0xaaf   :  { %v4008_v18 = vmul.f32 1.442695, %v4000_v7  ;;  %v11468_v15 = vadd.f32 1e-08, %v4718_v37  ;;  %vm4450_vm7 = vweird.f32 %v11431_v61  ;;  %vm4435_vm2 = vweird.f32 %v11425_v49 }
 0xab0   :  { %v5669_v21 = vsel %vm5517_vm1, %v11401_v30, 0.0  ;;  %v5650_v40 = vmul.f32 %v6960_v50, %v5649_v27  ;;  %4708 = vadd.xlane.f32.xlu0 %v4707_v48  ;;  %vm4410_vm14 = vcmp.eq.f32.partialorder %v4409_v31, 8.507059e+37 }
 0xab1   :  { %v5670_v60 = vadd.f32 %v5669_v21, %v5668_v52  ;;  %6961 = vpow2.f32 %v4008_v18  ;;  %v4413_v17 = vsel %vm4410_vm14, %v4412_v2, %v4408_v62  ;;  %v13563_v52 = vld [vmem:[#allocation48_spill] sm:$0xff]  ;;  %v13565_v2 = vld [vmem:[#allocation79_spill] sm:$0xff] }
 0xab2   :  { %v5651_v6 = vadd.f32 %v6960_v50, %v5650_v40  ;;  %6963 = vrcp.f32 %v11425_v49  ;;  %v4719_v27 = vsel %vm1818_vm3, %v13563_v52, 0.0  ;;  %v4582_v10 = vmul.f32 %v13565_v2, %v13564_v36  ;;  %v13574_v52 = vld [vmem:[#allocation73_spill] sm:$0xff] }
 0xab3   :  { %v5672_v19 = vadd.f32 %v5671_v63, %v5670_v60  ;;  %6965 = vrcp.f32 %v11431_v61 }
 0xab4   :  { %v11436_v43 = vpop.xlane.xlu2 %3986  ;;  %v5655_v3 = vsel %vm5654_vm13, %v6960_v50, %v5651_v6  ;;  %6967 = vlog2.f32 %v4521_v39  ;;  %v11478_v18 = vpop.f32.mrf.mxu1  ;;  %v4590_v1 = vsel %vm116_vm0, %v4582_v10, 0.0 }
 0xab5   :  { %v11439_v0 = vpop.xlane.xlu1 %4109  ;;  %v5660_v54 = vsel %vm5657_vm10, %v5659_v57, %v5655_v3  ;;  %v5674_v32 = vadd.f32 %v5673_v9, %v5672_v19  ;;  %v13567_v57 = vld [vmem:[#allocation55_spill] sm:$0xff] }
 0xab6   :  { %v11445_v41 = vmul.f32 %v5660_v54, %v11121_v13  ;;  %v11487_v62 = vadd.f32 1e-08, %v13567_v57 }
 0xab7   :  { %v11447_v8 = vpop.eup %6961 }
 0xab8   :  { %13559 = vst [vmem:[#allocation17_spill] sm:$0xff] %v11447_v8  ;;  %v5675_v45 = vsel %vm5517_vm1, %v11445_v41, 0.0  ;;  %v4414_v38 = vmul.f32 %v11447_v8, %v4413_v17  ;;  %4714 = vadd.xlane.f32.xlu0 %v4713_v5  ;;  %v11459_v44 = vpop.eup %6963 }
 0xab9   :  { %v5676_v13 = vadd.f32 %v5675_v45, %v5674_v32  ;;  %v11466_v23 = vpop.eup %6965  ;;  %v4431_v42 = vmul.f32 %v11459_v44, %v11425_v49  ;;  %v13569_v45 = vld [vmem:[#allocation24_spill] sm:$0xff]  ;;  %vm4436_vm6 = vweird.f32 %v11459_v44 }
 0xaba   :  { %v4520_v47 = vadd.f32 1e-12, %v4414_v38  ;;  %v6968_v24 = vpop.eup %6967  ;;  %v4446_v21 = vmul.f32 %v11466_v23, %v11431_v61  ;;  %v13570_v38 = vld [vmem:[#allocation84_spill] sm:$0xff]  ;;  %vm4451_vm12 = vweird.f32 %v11466_v23  ;;  %vm11567_vm8 = vmor %vm4435_vm2, %vm4436_vm6 }
 0xabb   :  { %v5677_v50 = vrot.slane %v5676_v13, 4  ;;  %v4531_v29 = vmul.f32 0.6931472, %v6968_v24  ;;  %v4432_v63 = vsub.f32 1.0, %v4431_v42  ;;  %vm11542_vm4 = vmor %vm4450_vm7, %vm4451_vm12  ;;  %vm4789_vm12 = vweird.f32 %v11468_v15 }
 0xabc   :  { %v11457_v14 = vpop.xlane.xlu2 %4097  ;;  %6969 = vlog2.f32 %v4520_v47  ;;  %v4447_v6 = vsub.f32 1.0, %v4446_v21  ;;  %v13571_v47 = vld [vmem:[#allocation23_spill] sm:$0xff]  ;;  %v4441_v21 = vand.u32 2147483648, %v11425_v49 }
 0xabd   :  { %v11464_v48 = vpop.xlane.xlu1 %4112  ;;  %v5678_v34 = vadd.f32 %v5677_v50, %v5676_v13  ;;  %6971 = vrcp.f32 %v11462_v35  ;;  %v4545_v39 = vsel %vm1151_vm11, %v4531_v29, 0.0  ;;  %v4586_v13 = vmul.f32 %v13570_v38, %v13569_v45  ;;  %v13572_v50 = vld [vmem:[#allocation85_spill] sm:$0xff]  ;;  %v13580_v38 = vld [vmem:[#allocation51_spill] sm:$0xff] }
 0xabe   :  { %13562 = vst [vmem:[#allocation13_spill] sm:$0xff] %v11464_v48  ;;  %6973 = vrcp.f32 %v11468_v15  ;;  %v4448_v5 = vmul.f32 %v11466_v23, %v4447_v6  ;;  %v4587_v46 = vmul.f32 %v13572_v50, %v13571_v47  ;;  %v13581_v47 = vld [vmem:[#allocation22_spill] sm:$0xff] }
 0xabf   :  { %v5679_v7 = vrot.slane %v5678_v34, 2  ;;  %v11533_v36 = vsel %vm116_vm0, %v4586_v13, 0.0  ;;  %v4725_v13 = vsel %vm1818_vm3, %v13580_v38, 0.0  ;;  %v13582_v50 = vld [vmem:[#allocation86_spill] sm:$0xff] }
 0xac0   :  { %4720 = vadd.xlane.f32.xlu0 %v4719_v27  ;;  %v11536_v2 = vsel %vm116_vm0, %v4587_v46, 0.0  ;;  %v11561_v46 = vmul.f32 %v13582_v50, %v13581_v47 }
 0xac1   :  { %v5680_v31 = vadd.f32 %v5679_v7, %v5678_v34  ;;  %v4433_v34 = vmul.f32 %v11459_v44, %v4432_v63  ;;  %v13573_v7 = vld [vmem:[#allocation21_spill] sm:$0xff] }
 0xac2   :  { %v6970_v37 = vpop.eup %6969  ;;  %v4588_v27 = vmul.f32 %v13574_v52, %v13573_v7  ;;  %v11573_v7 = vor.u32 1.1754944e-38, %v4441_v21  ;;  %v13585_v52 = vld [vmem:[#allocation58_spill] sm:$0xff] }
 0xac3   :  { %v5681_v60 = vrot.slane %v5680_v31, 1  ;;  %v4529_v40 = vmul.f32 0.6931472, %v6970_v37  ;;  %v11493_v9 = vpop.eup %6971  ;;  %v4456_v37 = vand.u32 2147483648, %v11431_v61 }
 0xac4   :  { %v4712_v20 = vpop.xlane.xlu2 %4711  ;;  %v11498_v17 = vpop.eup %6973  ;;  %v4476_v24 = vmul.f32 %v11493_v9, %v11462_v35 }
 0xac5   :  { %v11482_v59 = vadd.f32 1e-08, %v4712_v20  ;;  %v11484_v19 = vpop.xlane.xlu1 %4723  ;;  %v11490_v3 = vadd.f32 %v5681_v60, %v5680_v31  ;;  %v4544_v54 = vsel %vm1151_vm11, %v4529_v40, 0.0  ;;  %v4785_v42 = vmul.f32 %v11498_v17, %v11468_v15  ;;  %v11525_v60 = vpop.f32.mrf.mxu1 }
 0xac6   :  { %13566 = vst [vmem:[#allocation11_spill] sm:$0xff] %v11484_v19  ;;  %v11495_v32 = vadd.f32 %v4545_v39, %v4544_v54  ;;  %v11528_v40 = vadd.f32 %v11466_v23, %v4448_v5  ;;  %v4477_v63 = vsub.f32 1.0, %v4476_v24  ;;  %v11549_v39 = vsel %vm116_vm0, %v4588_v27, 0.0 }
 0xac7   :  { %6975 = vrcp.f32 %v11482_v59  ;;  %v11552_v54 = vadd.f32 %v11459_v44, %v4433_v34  ;;  %v4786_v45 = vsub.f32 1.0, %v4785_v42  ;;  %v11576_v27 = vadd.f32 1e-08, %v13585_v52 }
 0xac8   :  { %13568 = vst [vmem:[#allocation16_spill] sm:$0xff] %v11495_v32  ;;  %6977 = vrcp.f32 %v11490_v3  ;;  %4591 = vadd.xlane.f32.xlu0 %v4590_v1  ;;  %v13579_v1 = vld [vmem:[#allocation57_spill] sm:$0xff]  ;;  %v11580_v47 = vor.u32 1.1754944e-38, %v4456_v37  ;;  %v4454_v19 = vand.u32 2147483647, %v11431_v61  ;;  %v4478_v52 = vmul.f32 %v11493_v9, %v4477_v63 }
 0xac9   :  { %6979 = vrcp.f32 %v11487_v62  ;;  %v11555_v5 = vadd.f32 1e-08, %v13579_v1  ;;  %v13586_v1 = vld [vmem:[#allocation41_spill] sm:$0xff]  ;;  %v4787_v61 = vmul.f32 %v11498_v17, %v4786_v45  ;;  %v11604_v63 = vadd.f32 1e-08, %v11405_v33 }
 0xaca   :  { %v4728_v38 = vsel %vm1818_vm3, %v13586_v1, 0.0  ;;  %v4439_v1 = vand.u32 2147483647, %v11425_v49  ;;  %v5702_v37 = vand.u32 2147483648, %v11490_v3  ;;  %vm4480_vm3 = vweird.f32 %v11462_v35 }
 0xacb   :  { %6981 = vrcp.f32 %v11555_v5  ;;  %v5700_v45 = vand.u32 2147483647, %v11490_v3  ;;  %vm4790_vm5 = vweird.f32 %v11498_v17  ;;  %vm5696_vm9 = vweird.f32 %v11490_v3 }
 0xacc   :  { %v11519_v29 = vpop.xlane.xlu2 %4106  ;;  %6983 = vrcp.f32 %v11576_v27  ;;  %vm4759_vm7 = vweird.f32 %v11482_v59  ;;  %vm11637_vm2 = vcmp.eq.f32.partialorder %v4454_v19, 8.507059e+37  ;;  %v13604_v6 = vsel %vm11567_vm8, %v11459_v44, %v11552_v54 }
 0xacd   :  { %13575 = vst [vmem:[#allocation7_spill] sm:$0xff] %v11519_v29  ;;  %v11522_v31 = vpop.eup %6975  ;;  %v11530_v20 = vpop.xlane.xlu1 %4597  ;;  %v5703_v29 = vor.u32 1.1754944e-38, %v5702_v37  ;;  %vm5701_vm14 = vcmp.eq.f32.partialorder %v5700_v45, 8.507059e+37  ;;  %v11675_v45 = vadd.f32 1e-08, %v11452_v25 }
 0xace   :  { %13576 = vst [vmem:[#allocation18_spill] sm:$0xff] %v11530_v20  ;;  %v11538_v10 = vpop.eup %6977  ;;  %v4755_v57 = vmul.f32 %v11522_v31, %v11482_v59  ;;  %v11618_v51 = vpop.f32.mrf.mxu1  ;;  %vm4760_vm13 = vweird.f32 %v11522_v31  ;;  %v11773_v44 = vadd.f32 1e-08, %v11525_v60 }
 0xacf   :  { %v11571_v34 = vpop.eup %6979  ;;  %v5692_v21 = vmul.f32 %v11538_v10, %v11490_v3  ;;  %vm5697_vm15 = vweird.f32 %v11538_v10  ;;  %vm11643_vm6 = vmor %vm4759_vm7, %vm4760_vm13  ;;  %vm4481_vm13 = vweird.f32 %v11493_v9  ;;  %vm4495_vm7 = vweird.f32 %v11487_v62 }
 0xad0   :  { %v4756_v42 = vsub.f32 1.0, %v4755_v57  ;;  %4726 = vadd.xlane.f32.xlu0 %v4725_v13  ;;  %v11598_v50 = vmul.f32 %v11571_v34, %v11487_v62  ;;  %vm5698_vm10 = vmor %vm5696_vm9, %vm5697_vm15  ;;  %vm11662_vm9 = vcmp.eq.f32.partialorder %v4439_v1, 8.507059e+37  ;;  %v11780_v37 = vadd.f32 1e-08, %v11618_v51 }
 0xad1   :  { %v5693_v13 = vsub.f32 1.0, %v5692_v21  ;;  %v4795_v21 = vand.u32 2147483648, %v11468_v15  ;;  %vm11657_vm15 = vmor %vm4789_vm12, %vm4790_vm5  ;;  %v5686_v51 = vmul.f32 %v11289_v58, %v11289_v58 }
 0xad2   :  { %v4757_v57 = vmul.f32 %v11522_v31, %v4756_v42  ;;  %v5684_v42 = vmul.f32 %v11371_v16, %v11371_v16  ;;  %v4765_v16 = vand.u32 2147483648, %v11482_v59 }
 0xad3   :  { %v5694_v56 = vmul.f32 %v11538_v10, %v5693_v13 }
 0xad4   :  { %v4595_v32 = vpop.xlane.xlu2 %4594  ;;  %v4758_v55 = vadd.f32 %v11522_v31, %v4757_v57 }
 0xad5   :  { %v4615_v49 = vmul.f32 %v4595_v32, %v13536_v28  ;;  %v4601_v8 = vpop.xlane.xlu1 %4600  ;;  %v4788_v32 = vadd.f32 %v11498_v17, %v4787_v61  ;;  %v5695_v13 = vadd.f32 %v11538_v10, %v5694_v56  ;;  %v4763_v56 = vand.u32 2147483647, %v11482_v59 }
 0xad6   :  { %v4617_v33 = vmul.f32 %v4601_v8, %v13536_v28  ;;  %v11625_v8 = vpop.eup %6981  ;;  %v4492_v59 = vsub.f32 1.0, %v11598_v50  ;;  %v4762_v19 = vsel %vm11643_vm6, %v11522_v31, %v4758_v55 }
 0xad7   :  { %v4624_v20 = vmul.f32 1.442695, %v4615_v49  ;;  %v5699_v49 = vsel %vm5698_vm10, %v11538_v10, %v5695_v13  ;;  %v11629_v61 = vpop.eup %6983  ;;  %v4793_v10 = vand.u32 2147483647, %v11468_v15  ;;  %v4766_v15 = vor.u32 1.1754944e-38, %v4765_v16 }
 0xad8   :  { %v4628_v48 = vmul.f32 1.442695, %v4617_v33  ;;  %4729 = vadd.xlane.f32.xlu0 %v4728_v38  ;;  %v11633_v3 = vsel %vm5701_vm14, %v5703_v29, %v5699_v49  ;;  %v4479_v38 = vadd.f32 %v11493_v9, %v4478_v52  ;;  %v4792_v50 = vsel %vm11657_vm15, %v11498_v17, %v4788_v32  ;;  %vm11695_vm14 = vmor %vm4480_vm3, %vm4481_vm13 }
 0xad9   :  { %6985 = vpow2.f32 %v4624_v20  ;;  %v4506_v31 = vmul.f32 %v11625_v8, %v11555_v5  ;;  %v4796_v52 = vor.u32 1.1754944e-38, %v4795_v21  ;;  %vm4764_vm5 = vcmp.eq.f32.partialorder %v4763_v56, 8.507059e+37 }
 0xada   :  { %6987 = vpow2.f32 %v4628_v48  ;;  %v11649_v48 = vmul.f32 %v11633_v3, %v5684_v42  ;;  %v11680_v16 = vadd.f32 1e-08, %v11478_v18  ;;  %v4767_v17 = vsel %vm4764_vm5, %v4766_v15, %v4762_v19 }
 0xadb   :  { %6989 = vrcp.f32 %v11604_v63  ;;  %vm4794_vm10 = vcmp.eq.f32.partialorder %v4793_v10, 8.507059e+37  ;;  %v5685_v33 = vmul.f32 %v11368_v12, %v11368_v12  ;;  %v13596_v32 = vand.u32 2147483648, %v11462_v35  ;;  %v5008_v10 = vpop.f32.mrf.mxu1 }
 0xadc   :  { %13591 = vst [vmem:[#allocation6_spill] sm:$0xff] %v11649_v48  ;;  %v5716_v55 = vsel %vm5517_vm1, %v11649_v48, 0.0  ;;  %v4797_v21 = vsel %vm4794_vm10, %v4796_v52, %v4792_v50  ;;  %v4484_v49 = vand.u32 2147483647, %v11462_v35  ;;  %v4493_v20 = vmul.f32 %v11571_v34, %v4492_v59 }
 0xadd   :  { %5717 = vadd.xlane.f32.xlu2 %v5716_v55  ;;  %v4487_v13 = vor.u32 1.1754944e-38, %v13596_v32  ;;  %v11709_v29 = vmul.f32 %v11633_v3, %v5685_v33  ;;  %v4507_v15 = vsub.f32 1.0, %v4506_v31  ;;  %v5015_v50 = vmul.f32 %v11629_v61, %v11576_v27 }
 0xade   :  { %6991 = vrcp.f32 %v11675_v45  ;;  %v5683_v35 = vmul.f32 %v11247_v26, %v11247_v26  ;;  %v4501_v59 = vand.u32 2147483648, %v11487_v62  ;;  %vm4496_vm3 = vweird.f32 %v11571_v34 }
 0xadf   :  { %v11677_v1 = vpop.eup %6985  ;;  %13599 = vst [vmem:[#allocation10_spill] sm:$0xff] %v11709_v29  ;;  %6993 = vrcp.f32 %v11680_v16  ;;  %v4516_v55 = vand.u32 2147483648, %v11555_v5  ;;  %vm4485_vm12 = vcmp.eq.f32.partialorder %v4484_v49, 8.507059e+37  ;;  %v4494_v33 = vadd.f32 %v11571_v34, %v4493_v20  ;;  %vm11749_vm6 = vmor %vm4495_vm7, %vm4496_vm3 }
 0xae0   :  { %v11684_v42 = vpop.eup %6987  ;;  %v11689_v25 = vmul.f32 %v11677_v1, %v4767_v17  ;;  %4603 = vadd.xlane.f32.xlu0 %v11533_v36  ;;  %v4483_v36 = vsel %vm11695_vm14, %v11493_v9, %v4479_v38  ;;  %v11726_v52 = vmul.f32 %v11633_v3, %v5683_v35  ;;  %v5719_v17 = vsel %vm5517_vm1, %v11709_v29, 0.0 }
 0xae1   :  { %v11700_v56 = vpop.eup %6989  ;;  %v11705_v19 = vmul.f32 %v11684_v42, %v4797_v21  ;;  %v4499_v32 = vand.u32 2147483647, %v11487_v62  ;;  %v11734_v9 = vsel %vm116_vm0, %v11561_v46, 0.0  ;;  %v4508_v38 = vmul.f32 %v11625_v8, %v4507_v15 }
 0xae2   :  { %v5030_v31 = vmul.f32 %v11700_v56, %v11604_v63  ;;  %13600 = vst [vmem:[#allocation8_spill] sm:$0xff] %v11726_v52  ;;  %v5016_v21 = vsub.f32 1.0, %v5015_v50  ;;  %v13601_v18 = vsel %vm11542_vm4, %v11466_v23, %v11528_v40  ;;  %v11761_v23 = vsel %vm11662_vm9, %v11573_v7, %v13604_v6 }
 0xae3   :  { %v11745_v49 = vsel %vm11637_vm2, %v11580_v47, %v13601_v18  ;;  %v4502_v40 = vor.u32 1.1754944e-38, %v4501_v59  ;;  %vm4510_vm0 = vweird.f32 %v11555_v5  ;;  %v11764_v46 = vsel %vm4485_vm12, %v4487_v13, %v4483_v36  ;;  %v5011_v59 = vpop.f32.mrf.mxu1 }
 0xae4   :  { %v5687_v62 = vmul.f32 %v11401_v30, %v11401_v30  ;;  %v11768_v47 = vpop.eup %6991  ;;  %v11770_v57 = vor.u32 1.1754944e-38, %v4516_v55  ;;  %v5031_v24 = vsub.f32 1.0, %v5030_v31  ;;  %v5713_v54 = vsel %vm5517_vm1, %v11726_v52, 0.0  ;;  %v13647_v52 = vld [vmem:[#allocation69_spill] sm:$0xff] }
 0xae5   :  { %5720 = vadd.xlane.f32.xlu2 %v5719_v17  ;;  %v11777_v7 = vpop.eup %6993  ;;  %v4498_v13 = vsel %vm11749_vm6, %v11571_v34, %v4494_v33  ;;  %vm11785_vm4 = vcmp.eq.f32.partialorder %v4499_v32, 8.507059e+37  ;;  %v5017_v50 = vmul.f32 %v11629_v61, %v5016_v21  ;;  %v11794_v35 = vadd.f32 %v11625_v8, %v4508_v38 }
 0xae6   :  { %v11790_v60 = vmul.f32 %v11633_v3, %v5687_v62  ;;  %vm4511_vm8 = vweird.f32 %v11625_v8  ;;  %vm5019_vm2 = vweird.f32 %v11576_v27  ;;  %v5045_v34 = vmul.f32 %v11768_v47, %v11675_v45 }
 0xae7   :  { %v4514_v36 = vand.u32 2147483647, %v11555_v5  ;;  %vm5020_vm15 = vweird.f32 %v11629_v61  ;;  %v5032_v55 = vmul.f32 %v11700_v56, %v5031_v24  ;;  %v5060_v31 = vmul.f32 %v11777_v7, %v11680_v16  ;;  %vm11825_vm5 = vmor %vm4510_vm0, %vm4511_vm8 }
 0xae8   :  { %5714 = vadd.xlane.f32.xlu0 %v5713_v54  ;;  %13607 = vst [vmem:[#allocation52_spill] sm:$0xff] %v11790_v60  ;;  %6995 = vrcp.f32 %v11773_v44  ;;  %v11809_v17 = vmul.f32 %v11633_v3, %v5686_v51  ;;  %v5025_v33 = vand.u32 2147483648, %v11576_v27  ;;  %v11813_v32 = vadd.f32 1e-08, %v5008_v10  ;;  %vm11837_vm10 = vmor %vm5019_vm2, %vm5020_vm15 }
 0xae9   :  { %6997 = vrcp.f32 %v11780_v37  ;;  %v5725_v38 = vsel %vm5517_vm1, %v11790_v60, 0.0  ;;  %vm5034_vm9 = vweird.f32 %v11604_v63  ;;  %v11818_v21 = vadd.f32 1e-08, %v5011_v59 }
 0xaea   :  { %13608 = vst [vmem:[#allocation44_spill] sm:$0xff] %v11809_v17  ;;  %vm5035_vm13 = vweird.f32 %v11700_v56  ;;  %v5018_v10 = vadd.f32 %v11629_v61, %v5017_v50  ;;  %v5040_v20 = vand.u32 2147483648, %v11604_v63  ;;  %v5046_v6 = vsub.f32 1.0, %v5045_v34 }
 0xaeb   :  { %v5688_v62 = vmul.f32 %v11408_v53, %v11408_v53  ;;  %v5023_v5 = vand.u32 2147483647, %v11576_v27  ;;  %v5061_v54 = vsub.f32 1.0, %v5060_v31  ;;  %v5033_v51 = vadd.f32 %v11700_v56, %v5032_v55  ;;  %vm11852_vm14 = vmor %vm5034_vm9, %vm5035_vm13 }
 0xaec   :  { %v11845_v50 = vsel %vm11785_vm4, %v4502_v40, %v4498_v13  ;;  %v5722_v34 = vsel %vm5517_vm1, %v11809_v17, 0.0  ;;  %6999 = vrcp.f32 %v11813_v32  ;;  %v4513_v27 = vsel %vm11825_vm5, %v11625_v8, %v11794_v35 }
 0xaed   :  { %5726 = vadd.xlane.f32.xlu2 %v5725_v38  ;;  %vm11860_vm7 = vcmp.eq.f32.partialorder %v4514_v36, 8.507059e+37  ;;  %v11865_v40 = vmul.f32 %v11633_v3, %v5688_v62  ;;  %v5026_v55 = vor.u32 1.1754944e-38, %v5025_v33  ;;  %7001 = vrcp.f32 %v11818_v21 }
 0xaee   :  { %v11867_v13 = vpop.eup %6995  ;;  %v11871_v31 = vadd.f32 1e-08, %v11365_v11  ;;  %v5022_v8 = vsel %vm11837_vm10, %v11629_v61, %v5018_v10  ;;  %v5041_v36 = vor.u32 1.1754944e-38, %v5040_v20  ;;  %v5047_v38 = vmul.f32 %v11768_v47, %v5046_v6 }
 0xaef   :  { %13617 = vst [vmem:[#allocation54_spill] sm:$0xff] %v11865_v40  ;;  %v11876_v35 = vpop.eup %6997  ;;  %v5038_v18 = vand.u32 2147483647, %v11604_v63  ;;  %vm11880_vm3 = vcmp.eq.f32.partialorder %v5023_v5, 8.507059e+37  ;;  %vm5049_vm12 = vweird.f32 %v11675_v45  ;;  %v5055_v11 = vand.u32 2147483648, %v11675_v45 }
 0xaf0   :  { %5723 = vadd.xlane.f32.xlu0 %v5722_v34  ;;  %13618 = vst [vmem:[#allocation46_spill] sm:$0xff] %v11876_v35  ;;  %v5062_v33 = vmul.f32 %v11777_v7, %v5061_v54  ;;  %v5037_v61 = vsel %vm11852_vm14, %v11700_v56, %v5033_v51  ;;  %v5075_v10 = vmul.f32 %v11867_v13, %v11773_v44  ;;  %v11893_v20 = vadd.f32 1e-08, %v11324_v4 }
 0xaf1   :  { %vm5050_vm6 = vweird.f32 %v11768_v47  ;;  %v5728_v63 = vsel %vm5517_vm1, %v11865_v40, 0.0  ;;  %vm5064_vm0 = vweird.f32 %v11680_v16  ;;  %v5090_v6 = vmul.f32 %v11876_v35, %v11780_v37 }
 0xaf2   :  { %7003 = vrcp.f32 %v11871_v31  ;;  %vm5065_vm4 = vweird.f32 %v11777_v7  ;;  %v11903_v56 = vpop.eup %6999  ;;  %v5048_v4 = vadd.f32 %v11768_v47, %v5047_v38  ;;  %v5053_v24 = vand.u32 2147483647, %v11675_v45  ;;  %vm11918_vm2 = vmor %vm5049_vm12, %vm5050_vm6 }
 0xaf3   :  { %vm11907_vm8 = vcmp.eq.f32.partialorder %v5038_v18, 8.507059e+37  ;;  %v5689_v54 = vmul.f32 %v11329_v22, %v11329_v22  ;;  %v11913_v51 = vpop.eup %7001  ;;  %v5070_v34 = vand.u32 2147483648, %v11680_v16  ;;  %v5063_v38 = vadd.f32 %v11777_v7, %v5062_v33  ;;  %vm11934_vm15 = vmor %vm5064_vm0, %vm5065_vm4 }
 0xaf4   :  { %v5068_v18 = vand.u32 2147483647, %v11680_v16  ;;  %v5076_v40 = vsub.f32 1.0, %v5075_v10  ;;  %7005 = vrcp.f32 %v11893_v20  ;;  %v5091_v15 = vsub.f32 1.0, %v5090_v6  ;;  %v11975_v6 = vpop.xlane.xlu1 %3992 }
 0xaf5   :  { %5729 = vadd.xlane.f32.xlu2 %v5728_v63  ;;  %v11927_v63 = vsel %vm11860_vm7, %v11770_v57, %v4513_v27  ;;  %v11940_v33 = vmul.f32 %v11633_v3, %v5689_v54  ;;  %v11944_v57 = vsel %vm11880_vm3, %v5026_v55, %v5022_v8  ;;  %v5056_v27 = vor.u32 1.1754944e-38, %v5055_v11 }
 0xaf6   :  { %v5105_v10 = vmul.f32 %v11903_v56, %v11813_v32  ;;  %v11950_v16 = vsel %vm11907_vm8, %v5041_v36, %v5037_v61  ;;  %v5120_v60 = vmul.f32 %v11913_v51, %v11818_v21  ;;  %v5052_v55 = vsel %vm11918_vm2, %v11768_v47, %v5048_v4 }
 0xaf7   :  { %13627 = vst [vmem:[#allocation49_spill] sm:$0xff] %v11940_v33  ;;  %vm11960_vm9 = vcmp.eq.f32.partialorder %v5053_v24, 8.507059e+37  ;;  %v5071_v11 = vor.u32 1.1754944e-38, %v5070_v34  ;;  %v4003_v36 = vmul.f32 %v11436_v43, %v13536_v28  ;;  %v5067_v61 = vsel %vm11934_vm15, %v11777_v7, %v5063_v38 }
 0xaf8   :  { %4606 = vadd.xlane.f32.xlu0 %v11536_v2  ;;  %v11955_v2 = vadd.f32 1e-08, %v11457_v14  ;;  %v11964_v62 = vpop.eup %7003  ;;  %vm11971_vm13 = vcmp.eq.f32.partialorder %v5068_v18, 8.507059e+37  ;;  %v5077_v47 = vmul.f32 %v11867_v13, %v5076_v40  ;;  %vm5079_vm5 = vweird.f32 %v11773_v44 }
 0xaf9   :  { %v5085_v4 = vand.u32 2147483648, %v11773_v44  ;;  %v5731_v24 = vsel %vm5517_vm1, %v11940_v33, 0.0  ;;  %v5092_v43 = vmul.f32 %v11876_v35, %v5091_v15  ;;  %v5100_v5 = vand.u32 2147483648, %v11780_v37 }
 0xafa   :  { %v5106_v7 = vsub.f32 1.0, %v5105_v10  ;;  %vm5080_vm10 = vweird.f32 %v11867_v13  ;;  %v11985_v54 = vpop.eup %7005  ;;  %v5121_v34 = vsub.f32 1.0, %v5120_v60  ;;  %v4171_v40 = vmul.f32 %v11964_v62, %v11871_v31 }
 0xafb   :  { %7007 = vrcp.f32 %v11955_v2  ;;  %v5690_v59 = vmul.f32 %v11445_v41, %v11445_v41  ;;  %vm5094_vm14 = vweird.f32 %v11780_v37  ;;  %v5115_v38 = vand.u32 2147483648, %v11813_v32  ;;  %vm12019_vm3 = vmor %vm5079_vm5, %vm5080_vm10 }
 0xafc   :  { %v4014_v18 = vmul.f32 1.442695, %v4003_v36  ;;  %vm5095_vm7 = vweird.f32 %v11876_v35  ;;  %v5130_v45 = vand.u32 2147483648, %v11818_v21  ;;  %v11998_v60 = vsel %vm11960_vm9, %v5056_v27, %v5052_v55 }
 0xafd   :  { %5732 = vadd.xlane.f32.xlu2 %v5731_v24  ;;  %v12002_v15 = vmul.f32 %v11633_v3, %v5690_v59  ;;  %v12005_v10 = vadd.f32 %v11867_v13, %v5077_v47  ;;  %v12007_v24 = vor.u32 1.1754944e-38, %v5085_v4  ;;  %v4156_v36 = vmul.f32 %v11985_v54, %v11893_v20  ;;  %vm12034_vm12 = vmor %vm5094_vm14, %vm5095_vm7 }
 0xafe   :  { %v12013_v33 = vsel %vm11971_vm13, %v5071_v11, %v5067_v61  ;;  %v12024_v3 = vadd.f32 %v11876_v35, %v5092_v43  ;;  %v12026_v27 = vor.u32 1.1754944e-38, %v5100_v5  ;;  %v5107_v55 = vmul.f32 %v11903_v56, %v5106_v7 }
 0xaff   :  { %13632 = vst [vmem:[#allocation56_spill] sm:$0xff] %v12002_v15  ;;  %v5122_v8 = vmul.f32 %v11913_v51, %v5121_v34  ;;  %v4172_v14 = vsub.f32 1.0, %v4171_v40  ;;  %v13639_v11 = vmov 0  ;;  %v12038_v61 = vor.u32 1.1754944e-38, %v5115_v38  ;;  %v3996_v38 = vpop.xlane.xlu1 %3995  ;;  %v13644_v40 = vld [vmem:[#allocation39_spill] sm:$0xff] }
 0xb00   :  { %4609 = vadd.xlane.f32.xlu0 %v11549_v39  ;;  %13633 = vst [vmem:[#allocation64_spill] sm:$0xff] %v12005_v10  ;;  %v13640_v11 = vsel %vm12034_vm12, 4294967295, %v13639_v11  ;;  %7009 = vpow2.f32 %v4014_v18  ;;  %v5883_v4 = vadd.f32 1e-10, %v11368_v12  ;;  %v12044_v5 = vor.u32 1.1754944e-38, %v5130_v45 }
 0xb01   :  { %13634 = vst [vmem:[#allocation66_spill] sm:$0xff] %v12007_v24  ;;  %v12042_v43 = vpop.eup %7007  ;;  %v12047_v7 = vadd.f32 1e-08, %v11439_v0  ;;  %v5734_v34 = vsel %vm5517_vm1, %v12002_v15, 0.0  ;;  %v4157_v59 = vsub.f32 1.0, %v4156_v36  ;;  %v4173_v47 = vmul.f32 %v11964_v62, %v4172_v14  ;;  %v13645_v14 = vld [vmem:[#allocation7_spill] sm:$0xff] }
 0xb02   :  { %13637 = vst [vmem:[#allocation70_spill] sm:$0xff] %v12024_v3  ;;  %v5881_v18 = vadd.f32 1e-10, %v11247_v26  ;;  %v12063_v15 = vadd.f32 %v11903_v56, %v5107_v55  ;;  %v12067_v36 = vadd.f32 %v11913_v51, %v5122_v8  ;;  %v5961_v26 = vsel %vm5517_vm1, %v13644_v40, -inf }
 0xb03   :  { %13638 = vst [vmem:[#allocation63_spill] sm:$0xff] %v12026_v27  ;;  %7011 = vlog2.f32 %v5883_v4  ;;  %v12076_v0 = vadd.f32 1e-08, %v13645_v14  ;;  %v12080_v55 = vsel %vm5517_vm1, %v11368_v12, -inf  ;;  %v12084_v8 = vsel %vm5517_vm1, %v11408_v53, -inf  ;;  %v13646_v14 = vld [vmem:[#allocation13_spill] sm:$0xff] }
 0xb04   :  { %13641 = vst [vmem:[#allocation65_spill] sm:$0xff] %v13640_v11  ;;  %7013 = vrcp.f32 %v12047_v7  ;;  %v4158_v29 = vmul.f32 %v11985_v54, %v4157_v59  ;;  %v4166_v4 = vand.u32 2147483648, %v11893_v20  ;;  %v12089_v45 = vadd.f32 1e-10, %v11289_v58 }
 0xb05   :  { %13642 = vst [vmem:[#allocation67_spill] sm:$0xff] %v12038_v61  ;;  %5735 = vadd.xlane.f32.xlu2 %v5734_v34  ;;  %v4141_v34 = vmul.f32 %v12042_v43, %v11955_v2  ;;  %7015 = vlog2.f32 %v5881_v18  ;;  %vm4160_vm6 = vweird.f32 %v11893_v20  ;;  %vm4176_vm0 = vweird.f32 %v11964_v62 }
 0xb06   :  { %13643 = vst [vmem:[#allocation68_spill] sm:$0xff] %v12044_v5  ;;  %v7010_v17 = vpop.eup %7009  ;;  %v12095_v12 = vadd.f32 1e-08, %v13646_v14  ;;  %v4524_v48 = vadd.f32 1e-12, %v13647_v52  ;;  %vm4175_vm4 = vweird.f32 %v11871_v31  ;;  %v4181_v59 = vand.u32 2147483648, %v11871_v31 }
 0xb07   :  { %v4142_v22 = vsub.f32 1.0, %v4141_v34  ;;  %v4179_v58 = vand.u32 2147483647, %v11871_v31  ;;  %v4459_v5 = vmul.f32 %v7010_v17, %v11745_v49  ;;  %7017 = vrcp.f32 %v12076_v0  ;;  %vm12107_vm8 = vmor %vm4175_vm4, %vm4176_vm0  ;;  %v3999_v24 = vpop.xlane.xlu1 %3998 }
 0xb08   :  { %5962 = vmax.xlane.f32.xlu0 %v5961_v26  ;;  %v4174_v26 = vadd.f32 %v11964_v62, %v4173_v47  ;;  %v12105_v27 = vor.u32 1.1754944e-38, %v4166_v4  ;;  %v12113_v52 = vadd.f32 %v11985_v54, %v4158_v29  ;;  %vm4161_vm2 = vweird.f32 %v11985_v54  ;;  %v4116_v4 = vpop.xlane.xlu2 %4115 }
 0xb09   :  { %v12103_v61 = vpop.eup %7011  ;;  %v4164_v49 = vand.u32 2147483647, %v11893_v20  ;;  %7019 = vrcp.f32 %v12095_v12  ;;  %v4182_v29 = vor.u32 1.1754944e-38, %v4181_v59  ;;  %v4143_v35 = vmul.f32 %v12042_v43, %v4142_v22  ;;  %vm12135_vm9 = vmor %vm4160_vm6, %vm4161_vm2 }
 0xb0a   :  { %13648 = vst [vmem:[#allocation72_spill] sm:$0xff] %v12103_v61  ;;  %v12117_v31 = vpop.eup %7013  ;;  %v4178_v34 = vsel %vm12107_vm8, %v11964_v62, %v4174_v26  ;;  %v4005_v61 = vmul.f32 %v11975_v6, %v13536_v28  ;;  %v4006_v11 = vmul.f32 %v3996_v38, %v13536_v28  ;;  %v5970_v10 = vsel %vm5517_vm1, %v11401_v30, -inf }
 0xb0b   :  { %v3466_v18 = vpop.xlane.xlu0 %3465  ;;  %v12125_v3 = vpop.eup %7015  ;;  %7021 = vlog2.f32 %v4524_v48  ;;  %vm4180_vm15 = vcmp.eq.f32.partialorder %v4179_v58, 8.507059e+37  ;;  %v4523_v62 = vadd.f32 1e-12, %v4459_v5  ;;  %v4201_v38 = vmul.f32 %v12117_v31, %v12047_v7 }
 0xb0c   :  { %v3467_v47 = vrot.slane %v3466_v18, 4  ;;  %v4183_v22 = vsel %vm4180_vm15, %v4182_v29, %v4178_v34  ;;  %v12141_v59 = vadd.f32 1e-08, %v4116_v4  ;;  %v4163_v58 = vsel %vm12135_vm9, %v11985_v54, %v12113_v52 }
 0xb0d   :  { %4612 = vadd.xlane.f32.xlu2 %v11734_v9  ;;  %v12147_v48 = vpop.eup %7017  ;;  %vm4145_vm13 = vweird.f32 %v11955_v2  ;;  %v4018_v20 = vmul.f32 1.442695, %v4005_v61  ;;  %vm4146_vm5 = vweird.f32 %v12042_v43  ;;  %v4020_v14 = vmul.f32 1.442695, %v4006_v11  ;;  %v13655_v11 = vld [vmem:[#allocation18_spill] sm:$0xff] }
 0xb0e   :  { %v3468_v9 = vadd.f32 %v3467_v47, %v3466_v18  ;;  %v4144_v18 = vadd.f32 %v12042_v43, %v4143_v35  ;;  %v4149_v47 = vand.u32 2147483647, %v11955_v2  ;;  %7023 = vlog2.f32 %v4523_v62  ;;  %vm12166_vm10 = vmor %vm4145_vm13, %vm4146_vm5 }
 0xb0f   :  { %v12154_v4 = vpop.eup %7019  ;;  %v4151_v54 = vand.u32 2147483648, %v11955_v2  ;;  %v4184_v61 = vmul.f32 %v7010_v17, %v4183_v22  ;;  %v4202_v6 = vsub.f32 1.0, %v4201_v38  ;;  %7025 = vrcp.f32 %v12141_v59 }
 0xb10   :  { %v3469_v26 = vrot.slane %v3468_v9, 2  ;;  %5971 = vmax.xlane.f32.xlu0 %v5970_v10  ;;  %v4007_v10 = vmul.f32 %v3999_v24, %v13536_v28  ;;  %v4186_v24 = vmul.f32 %v12147_v48, %v12076_v0  ;;  %7027 = vpow2.f32 %v4018_v20 }
 0xb11   :  { %v7022_v35 = vpop.eup %7021  ;;  %7029 = vpow2.f32 %v4020_v14  ;;  %v5979_v22 = vsel %vm5517_vm1, %v11445_v41, -inf  ;;  %v4211_v2 = vand.u32 2147483648, %v12047_v7  ;;  %v4152_v38 = vor.u32 1.1754944e-38, %v4151_v54 }
 0xb12   :  { %v3470_v5 = vadd.f32 %v3469_v26, %v3468_v9  ;;  %v4022_v9 = vmul.f32 1.442695, %v4007_v10  ;;  %v4148_v26 = vsel %vm12166_vm10, %v12042_v43, %v4144_v18  ;;  %v4248_v20 = vadd.f32 1e-12, %v4184_v61 }
 0xb13   :  { %v3984_v34 = vpop.xlane.xlu0 %3983  ;;  %vm4150_vm14 = vcmp.eq.f32.partialorder %v4149_v47, 8.507059e+37  ;;  %v4187_v10 = vsub.f32 1.0, %v4186_v24  ;;  %vm4165_vm7 = vcmp.eq.f32.partialorder %v4164_v49, 8.507059e+37  ;;  %v4226_v14 = vand.u32 2147483648, %v12095_v12 }
 0xb14   :  { %v4002_v52 = vmul.f32 %v3984_v34, %v13536_v28  ;;  %v3471_v29 = vrot.slane %v3470_v5, 1  ;;  %v4209_v34 = vand.u32 2147483647, %v12047_v7  ;;  %v7024_v43 = vpop.eup %7023  ;;  %v4153_v18 = vsel %vm4150_vm14, %v4152_v38, %v4148_v26 }
 0xb15   :  { %5965 = vmax.xlane.f32.xlu2 %v12080_v55  ;;  %v4216_v55 = vmul.f32 %v12154_v4, %v12095_v12  ;;  %v12188_v61 = vsel %vm4165_vm7, %v12105_v27, %v4163_v58  ;;  %vm4205_vm6 = vweird.f32 %v12047_v7  ;;  %vm4220_vm4 = vweird.f32 %v12095_v12 }
 0xb16   :  { %v4012_v17 = vmul.f32 1.442695, %v4002_v52  ;;  %v3472_v62 = vadd.f32 %v3471_v29, %v3470_v5  ;;  %v4203_v5 = vmul.f32 %v12117_v31, %v4202_v6  ;;  %v12181_v52 = vpop.eup %7025  ;;  %v12183_v29 = vmul.f32 0.6931472, %v7022_v35 }
 0xb17   :  { %v4217_v54 = vsub.f32 1.0, %v4216_v55  ;;  %v12190_v49 = vpop.eup %7027  ;;  %v4212_v6 = vor.u32 1.1754944e-38, %v4211_v2  ;;  %vm12193_vm0 = vcmp.eq.f32.partialorder %v4209_v34, 8.507059e+37  ;;  %v4188_v27 = vmul.f32 %v12147_v48, %v4187_v10 }
 0xb18   :  { %7031 = vpow2.f32 %v4012_v17  ;;  %5980 = vmax.xlane.f32.xlu0 %v5979_v22  ;;  %6374 = vpush %v3472_v62  ;;  %v4616_v17 = vmul.f32 %v13655_v11, %v13536_v28  ;;  %v12199_v35 = vpop.eup %7029  ;;  %v13658_v62 = vld [vmem:[#allocation30_spill] sm:$0xff]  ;;  %vm4206_vm8 = vweird.f32 %v12117_v31  ;;  %v12206_v55 = vor.u32 1.1754944e-38, %v4226_v14 }
 0xb19   :  { %7033 = vpow2.f32 %v4022_v9  ;;  %v4154_v26 = vmul.f32 %v13658_v62, %v4153_v18  ;;  %v4231_v22 = vmul.f32 %v12181_v52, %v12141_v59  ;;  %v4204_v2 = vadd.f32 %v12117_v31, %v4203_v5  ;;  %vm12228_vm15 = vmor %vm4205_vm6, %vm4206_vm8 }
 0xb1a   :  { %7035 = vlog2.f32 %v4248_v20  ;;  %v4218_v38 = vmul.f32 %v12154_v4, %v4217_v54  ;;  %v4626_v34 = vmul.f32 1.442695, %v4616_v17  ;;  %v4489_v20 = vmul.f32 %v12190_v49, %v11764_v46 }
 0xb1b   :  { %v4095_v47 = vpop.xlane.xlu0 %4094  ;;  %v4194_v14 = vand.u32 2147483647, %v12076_v0  ;;  %v4196_v11 = vand.u32 2147483648, %v12076_v0  ;;  %v4504_v5 = vmul.f32 %v12199_v35, %v11845_v50  ;;  %v4189_v62 = vadd.f32 %v12147_v48, %v4188_v27 }
 0xb1c   :  { %v12197_v9 = vadd.f32 1e-08, %v4095_v47  ;;  %v4246_v47 = vadd.f32 1e-12, %v4154_v26  ;;  %vm4191_vm2 = vweird.f32 %v12147_v48  ;;  %vm4190_vm9 = vweird.f32 %v12076_v0 }
 0xb1d   :  { %5974 = vmax.xlane.f32.xlu2 %v12084_v8  ;;  %v4535_v8 = vmul.f32 0.6931472, %v7024_v43  ;;  %v4232_v43 = vsub.f32 1.0, %v4231_v22  ;;  %v4208_v50 = vsel %vm12228_vm15, %v12117_v31, %v4204_v2  ;;  %vm4221_vm13 = vweird.f32 %v12154_v4  ;;  %vm12242_vm5 = vmor %vm4190_vm9, %vm4191_vm2 }
 0xb1e   :  { %v7032_v58 = vpop.eup %7031  ;;  %7037 = vrcp.f32 %v12197_v9  ;;  %v4525_v17 = vadd.f32 1e-12, %v4489_v20  ;;  %v4219_v7 = vadd.f32 %v12154_v4, %v4218_v38  ;;  %vm12246_vm10 = vcmp.eq.f32.partialorder %v4194_v14, 8.507059e+37  ;;  %vm12261_vm14 = vmor %vm4220_vm4, %vm4221_vm13 }
 0xb1f   :  { %v4444_v10 = vmul.f32 %v7032_v58, %v11761_v23  ;;  %v12216_v18 = vpop.eup %7033  ;;  %7039 = vpow2.f32 %v4626_v34  ;;  %v4197_v31 = vor.u32 1.1754944e-38, %v4196_v11  ;;  %v4526_v2 = vadd.f32 1e-12, %v4504_v5 }
 0xb20   :  { %v12237_v54 = vpop.eup %7035  ;;  %v4519_v26 = vmul.f32 %v12216_v18, %v11927_v63  ;;  %v4193_v38 = vsel %vm12242_vm5, %v12147_v48, %v4189_v62  ;;  %v4213_v63 = vsel %vm12193_vm0, %v4212_v6, %v4208_v50  ;;  %v4233_v20 = vmul.f32 %v12181_v52, %v4232_v43 }
 0xb21   :  { %v4522_v46 = vadd.f32 1e-12, %v4444_v10  ;;  %v4224_v11 = vand.u32 2147483647, %v12095_v12  ;;  %v4549_v48 = vsel %vm1151_vm11, %v4535_v8, 0.0  ;;  %v4223_v6 = vsel %vm12261_vm14, %v12154_v4, %v4219_v7 }
 0xb22   :  { %v4527_v24 = vadd.f32 1e-12, %v4519_v26  ;;  %v4198_v62 = vsel %vm12246_vm10, %v4197_v31, %v4193_v38  ;;  %vm4235_vm7 = vweird.f32 %v12141_v59  ;;  %v4136_v23 = vand.u32 2147483648, %v12197_v9  ;;  %v13667_v31 = vld [vmem:[#allocation32_spill] sm:$0xff] }
 0xb23   :  { %v4709_v27 = vpop.xlane.xlu0 %4708  ;;  %7041 = vlog2.f32 %v4522_v46  ;;  %v4169_v46 = vmul.f32 %v7032_v58, %v12188_v61  ;;  %v4134_v43 = vand.u32 2147483647, %v12197_v9  ;;  %v4241_v4 = vand.u32 2147483648, %v12141_v59 }
 0xb24   :  { %v7038_v10 = vpop.eup %7037  ;;  %7043 = vlog2.f32 %v4246_v47  ;;  %v12266_v5 = vadd.f32 1e-08, %v4709_v27  ;;  %vm4236_vm0 = vweird.f32 %v12181_v52  ;;  %vm4130_vm4 = vweird.f32 %v12197_v9 }
 0xb25   :  { %v4126_v34 = vmul.f32 %v7038_v10, %v12197_v9  ;;  %7045 = vlog2.f32 %v4525_v17  ;;  %v12276_v12 = vpop.eup %7039  ;;  %vm4131_vm6 = vweird.f32 %v7038_v10  ;;  %v4234_v17 = vadd.f32 %v12181_v52, %v4233_v20  ;;  %vm12297_vm9 = vmor %vm4235_vm7, %vm4236_vm0 }
 0xb26   :  { %7047 = vlog2.f32 %v4526_v2  ;;  %v4239_v58 = vand.u32 2147483647, %v12141_v59  ;;  %vm4132_vm8 = vmor %vm4130_vm4, %vm4131_vm6  ;;  %v4137_v0 = vor.u32 1.1754944e-38, %v4136_v23  ;;  %v4199_v2 = vmul.f32 %v13667_v31, %v4198_v62  ;;  %v13670_v23 = vld [vmem:[#allocation17_spill] sm:$0xff] }
 0xb27   :  { %v4127_v47 = vsub.f32 1.0, %v4126_v34  ;;  %7049 = vrcp.f32 %v12266_v5  ;;  %v4247_v34 = vadd.f32 1e-12, %v4169_v46  ;;  %vm4135_vm2 = vcmp.eq.f32.partialorder %v4134_v43, 8.507059e+37 }
 0xb28   :  { %7051 = vlog2.f32 %v4527_v24  ;;  %vm4225_vm15 = vcmp.eq.f32.partialorder %v4224_v11, 8.507059e+37  ;;  %v4242_v59 = vor.u32 1.1754944e-38, %v4241_v4  ;;  %vm4240_vm13 = vcmp.eq.f32.partialorder %v4239_v58, 8.507059e+37 }
 0xb29   :  { %v4128_v8 = vmul.f32 %v7038_v10, %v4127_v47  ;;  %v7042_v50 = vpop.eup %7041  ;;  %v4228_v62 = vsel %vm4225_vm15, %v12206_v55, %v4223_v6  ;;  %v4249_v55 = vadd.f32 1e-12, %v4199_v2  ;;  %vm5109_vm10 = vweird.f32 %v11813_v32 }
 0xb2a   :  { %v12284_v7 = vpop.eup %7043  ;;  %v4533_v26 = vmul.f32 0.6931472, %v7042_v50  ;;  %v4229_v43 = vmul.f32 %v12199_v35, %v4228_v62  ;;  %vm5110_vm14 = vweird.f32 %v11903_v56  ;;  %vm5124_vm6 = vweird.f32 %v11818_v21 }
 0xb2b   :  { %v4129_v27 = vadd.f32 %v7038_v10, %v4128_v8  ;;  %v4715_v61 = vpop.xlane.xlu0 %4714  ;;  %v7046_v38 = vpop.eup %7045  ;;  %v4214_v8 = vmul.f32 %v12190_v49, %v4213_v63  ;;  %v13671_v63 = vld [vmem:[#allocation16_spill] sm:$0xff]  ;;  %vm5125_vm0 = vweird.f32 %v11913_v51  ;;  %vm4744_vm15 = vweird.f32 %v12266_v5 }
 0xb2c   :  { %v12288_v22 = vadd.f32 1e-08, %v4715_v61  ;;  %v4547_v20 = vsel %vm1151_vm11, %v4533_v26, 0.0  ;;  %v7048_v47 = vpop.eup %7047  ;;  %v4539_v50 = vmul.f32 0.6931472, %v7046_v38 }
 0xb2d   :  { %v4133_v14 = vsel %vm4132_vm8, %v7038_v10, %v4129_v27  ;;  %v4238_v10 = vsel %vm12297_vm9, %v12181_v52, %v4234_v17  ;;  %v4548_v11 = vadd.f32 %v4547_v20, %v13671_v63  ;;  %v12308_v46 = vpop.eup %7049  ;;  %v4250_v6 = vadd.f32 1e-12, %v4214_v8 }
 0xb2e   :  { %v4138_v24 = vsel %vm4135_vm2, %v4137_v0, %v4133_v14  ;;  %7053 = vrcp.f32 %v12288_v22  ;;  %v7052_v26 = vpop.eup %7051  ;;  %v4243_v0 = vsel %vm4240_vm13, %v4242_v59, %v4238_v10  ;;  %v4541_v31 = vmul.f32 0.6931472, %v7048_v47  ;;  %v13672_v47 = vld [vmem:[#allocation11_spill] sm:$0xff] }
 0xb2f   :  { %v4139_v49 = vmul.f32 %v13670_v23, %v4138_v24  ;;  %7055 = vlog2.f32 %v4247_v34  ;;  %v4550_v61 = vadd.f32 %v4549_v48, %v4548_v11  ;;  %v4551_v52 = vsel %vm1151_vm11, %v12183_v29, 0.0 }
 0xb30   :  { %v4244_v17 = vmul.f32 %v12216_v18, %v4243_v0  ;;  %v4740_v4 = vmul.f32 %v12308_v46, %v12266_v5  ;;  %v4251_v34 = vadd.f32 1e-12, %v4229_v43  ;;  %v4543_v20 = vmul.f32 0.6931472, %v7052_v26 }
 0xb31   :  { %v4245_v27 = vadd.f32 1e-12, %v4139_v49  ;;  %v4552_v58 = vadd.f32 %v4551_v52, %v4550_v61  ;;  %v4553_v48 = vsel %vm1151_vm11, %v4539_v50, 0.0  ;;  %v12322_v29 = vadd.f32 1e-10, %v13644_v40 }
 0xb32   :  { %v4260_v18 = vmul.f32 0.6931472, %v12237_v54  ;;  %v12326_v8 = vadd.f32 1e-08, %v13672_v47  ;;  %v4555_v9 = vsel %vm1151_vm11, %v4541_v31, 0.0  ;;  %v4741_v10 = vsub.f32 1.0, %v4740_v4 }
 0xb33   :  { %7057 = vlog2.f32 %v4245_v27  ;;  %v12316_v35 = vpop.xlane.xlu0 %4720  ;;  %v4554_v14 = vadd.f32 %v4553_v48, %v4552_v58  ;;  %v4252_v62 = vadd.f32 1e-12, %v4244_v17  ;;  %v5058_v49 = vmul.f32 %v12276_v12, %v11998_v60 }
 0xb34   :  { %v7054_v38 = vpop.eup %7053  ;;  %7059 = vlog2.f32 %v12089_v45  ;;  %v4557_v63 = vsel %vm1151_vm11, %v4543_v20, 0.0  ;;  %v4256_v11 = vmul.f32 0.6931472, %v12284_v7  ;;  %v4780_v43 = vand.u32 2147483648, %v12288_v22 }
 0xb35   :  { %v4770_v2 = vmul.f32 %v7054_v38, %v12288_v22  ;;  %7061 = vlog2.f32 %v4249_v55  ;;  %v7056_v24 = vpop.eup %7055  ;;  %v4556_v45 = vadd.f32 %v4555_v9, %v4554_v14  ;;  %vm4775_vm5 = vweird.f32 %v7054_v38 }
 0xb36   :  { %7063 = vlog2.f32 %v4250_v6  ;;  %v4258_v27 = vmul.f32 0.6931472, %v7056_v24  ;;  %v4778_v60 = vand.u32 2147483647, %v12288_v22  ;;  %v4742_v7 = vmul.f32 %v12308_v46, %v4741_v10 }
 0xb37   :  { %v4771_v23 = vsub.f32 1.0, %v4770_v2  ;;  %7065 = vlog2.f32 %v4251_v34  ;;  %v4558_v50 = vadd.f32 %v4557_v63, %v4556_v45  ;;  %vm4774_vm7 = vweird.f32 %v12288_v22 }
 0xb38   :  { %7067 = vrcp.f32 %v12326_v8  ;;  %vm4776_vm4 = vmor %vm4774_vm7, %vm4775_vm5  ;;  %v4270_v4 = vsel %vm1151_vm11, %v4256_v11, 0.0  ;;  %v4274_v58 = vsel %vm1151_vm11, %v4260_v18, 0.0  ;;  %v5136_v34 = vadd.f32 1e-12, %v5058_v49 }
 0xb39   :  { %v7058_v54 = vpop.eup %7057  ;;  %v4772_v59 = vmul.f32 %v7054_v38, %v4771_v23  ;;  %4559 = vadd.xlane.f32.xlu1 %v4558_v50  ;;  %7069 = vlog2.f32 %v4252_v62  ;;  %v4781_v20 = vor.u32 1.1754944e-38, %v4780_v43  ;;  %v4272_v14 = vsel %vm1151_vm11, %v4258_v27, 0.0  ;;  %vm12387_vm7 = vmor %vm5109_vm10, %vm5110_vm14  ;;  %v13696_v27 = vld [vmem:[#allocation68_spill] sm:$0xff] }
 0xb3a   :  { %v12334_v26 = vpop.eup %7059  ;;  %v4254_v61 = vmul.f32 0.6931472, %v7058_v54  ;;  %vm4779_vm8 = vcmp.eq.f32.partialorder %v4778_v60, 8.507059e+37  ;;  %v4743_v62 = vadd.f32 %v12308_v46, %v4742_v7  ;;  %vm4745_vm2 = vweird.f32 %v12308_v46 }
 0xb3b   :  { %v7062_v55 = vpop.eup %7061  ;;  %v4773_v6 = vadd.f32 %v7054_v38, %v4772_v59  ;;  %v4592_v0 = vpop.xlane.xlu0 %4591  ;;  %v5043_v18 = vmul.f32 %v11677_v1, %v11950_v16  ;;  %v12359_v63 = vadd.f32 1e-08, %v12316_v35  ;;  %v4748_v11 = vand.u32 2147483647, %v12266_v5  ;;  %vm12363_vm9 = vmor %vm4744_vm15, %vm4745_vm2 }
 0xb3c   :  { %v7064_v31 = vpop.eup %7063  ;;  %v4614_v52 = vmul.f32 %v4592_v0, %v13536_v28  ;;  %v4269_v17 = vsel %vm1151_vm11, %v4254_v61, 0.0  ;;  %v4262_v9 = vmul.f32 0.6931472, %v7062_v55  ;;  %v13675_v50 = vand.u32 2147483647, %v11773_v44 }
 0xb3d   :  { %v4777_v22 = vsel %vm4776_vm4, %v7054_v38, %v4773_v6  ;;  %v4271_v48 = vadd.f32 %v4270_v4, %v4269_v17  ;;  %v7066_v2 = vpop.eup %7065  ;;  %v4750_v38 = vand.u32 2147483648, %v12266_v5  ;;  %v4264_v45 = vmul.f32 0.6931472, %v7064_v31  ;;  %vm12398_vm4 = vmor %vm5124_vm6, %vm5125_vm0 }
 0xb3e   :  { %v4622_v47 = vmul.f32 1.442695, %v4614_v52  ;;  %v4782_v24 = vsel %vm4779_vm8, %v4781_v20, %v4777_v22  ;;  %v12352_v23 = vpop.eup %7067  ;;  %v4266_v1 = vmul.f32 0.6931472, %v7066_v2  ;;  %v4276_v16 = vsel %vm1151_vm11, %v4262_v9, 0.0 }
 0xb3f   :  { %v4273_v10 = vadd.f32 %v4272_v14, %v4271_v48  ;;  %v7070_v49 = vpop.eup %7069  ;;  %v4783_v59 = vmul.f32 %v12276_v12, %v4782_v24  ;;  %vm12371_vm13 = vcmp.eq.f32.partialorder %v13675_v50, 8.507059e+37  ;;  %v4860_v5 = vadd.f32 1e-12, %v11689_v25  ;;  %v13695_v50 = vld [vmem:[#allocation67_spill] sm:$0xff] }
 0xb40   :  { %7071 = vpow2.f32 %v4622_v47  ;;  %v4747_v12 = vsel %vm12363_vm9, %v12308_v46, %v4743_v62  ;;  %v5135_v61 = vadd.f32 1e-12, %v5043_v18  ;;  %v4751_v55 = vor.u32 1.1754944e-38, %v4750_v38 }
 0xb41   :  { %v4275_v54 = vadd.f32 %v4274_v58, %v4273_v10  ;;  %7073 = vlog2.f32 %v12322_v29  ;;  %v4268_v7 = vmul.f32 0.6931472, %v7070_v49  ;;  %v4278_v29 = vsel %vm1151_vm11, %v4264_v45, 0.0  ;;  %v13689_v49 = vld [vmem:[#allocation66_spill] sm:$0xff] }
 0xb42   :  { %7075 = vlog2.f32 %v5136_v34  ;;  %v4815_v44 = vmul.f32 %v12352_v23, %v12326_v8  ;;  %vm4749_vm5 = vcmp.eq.f32.partialorder %v4748_v11, 8.507059e+37  ;;  %v5073_v0 = vmul.f32 %v11684_v42, %v12013_v33 }
 0xb43   :  { %v4727_v35 = vpop.xlane.xlu0 %4726  ;;  %v4277_v60 = vadd.f32 %v4276_v16, %v4275_v54  ;;  %7077 = vrcp.f32 %v12359_v63  ;;  %v4861_v31 = vadd.f32 1e-12, %v4783_v59  ;;  %v4752_v52 = vsel %vm4749_vm5, %v4751_v55, %v4747_v12  ;;  %v13691_v59 = vld [vmem:[#allocation46_spill] sm:$0xff] }
 0xb44   :  { %v4280_v17 = vsel %vm1151_vm11, %v4266_v1, 0.0  ;;  %7079 = vlog2.f32 %v4860_v5  ;;  %v4282_v42 = vsel %vm1151_vm11, %v4268_v7, 0.0  ;;  %v13682_v33 = vand.u32 2147483647, %v11780_v37  ;;  %v13694_v1 = vld [vmem:[#allocation63_spill] sm:$0xff] }
 0xb45   :  { %v4279_v6 = vadd.f32 %v4278_v29, %v4277_v60  ;;  %7081 = vlog2.f32 %v5135_v61  ;;  %v5112_v2 = vsel %vm12387_vm7, %v11903_v56, %v12063_v15  ;;  %v4862_v47 = vadd.f32 1e-12, %v11705_v19  ;;  %v13697_v61 = vld [vmem:[#allocation72_spill] sm:$0xff] }
 0xb46   :  { %v7072_v46 = vpop.eup %7071  ;;  %vm12406_vm10 = vcmp.eq.f32.partialorder %v13682_v33, 8.507059e+37  ;;  %v5137_v62 = vadd.f32 1e-12, %v5073_v0  ;;  %7083 = vlog2.f32 %v4861_v31  ;;  %v13685_v10 = vand.u32 2147483647, %v11813_v32 }
 0xb47   :  { %v4753_v58 = vmul.f32 %v7072_v46, %v4752_v52  ;;  %v5028_v34 = vmul.f32 %v7072_v46, %v11944_v57  ;;  %v4281_v22 = vadd.f32 %v4280_v17, %v4279_v6  ;;  %v7074_v20 = vpop.eup %7073  ;;  %v5127_v37 = vsel %vm12398_vm4, %v11913_v51, %v12067_v36  ;;  %v13687_v51 = vld [vmem:[#allocation64_spill] sm:$0xff]  ;;  %v13698_v46 = vld [vmem:[#allocation31_spill] sm:$0xff] }
 0xb48   :  { %v7076_v14 = vpop.eup %7075  ;;  %vm5114_vm14 = vcmp.eq.f32.partialorder %v13685_v10, 8.507059e+37  ;;  %v4816_v38 = vsub.f32 1.0, %v4815_v44  ;;  %v12423_v56 = vadd.f32 1e-08, %v4727_v35  ;;  %v13686_v15 = vand.u32 2147483647, %v11818_v21 }
 0xb49   :  { %v4859_v57 = vadd.f32 1e-12, %v4753_v58  ;;  %v5134_v9 = vadd.f32 1e-12, %v5028_v34  ;;  %v4283_v24 = vadd.f32 %v4282_v42, %v4281_v22  ;;  %v12421_v18 = vpop.eup %7077  ;;  %v5886_v32 = vadd.f32 1e-10, %v11408_v53  ;;  %s6375_s27 = spop %6374 }
 0xb4a   :  { %vm5129_vm6 = vcmp.eq.f32.partialorder %v13686_v15, 8.507059e+37  ;;  %v7080_v45 = vpop.eup %7079  ;;  %v13688_v36 = vsel %vm12019_vm3, %v11867_v13, %v13687_v51  ;;  %v13692_v21 = vld [vmem:[#allocation70_spill] sm:$0xff]  ;;  %v12449_v39 = vsel %vm5114_vm14, %v13695_v50, %v5112_v2  ;;  %v4800_v13 = vmul.f32 %v12421_v18, %v12359_v63  ;;  %s3482_s14 = smul.f32 %s6375_s27, %s12913_s1 }
 0xb4b   :  { %7085 = vlog2.f32 %v4859_v57  ;;  %4284 = vadd.xlane.f32.xlu2 %v4283_v24  ;;  %v4730_v19 = vpop.xlane.xlu0 %4729  ;;  %v12436_v11 = vsel %vm12371_vm13, %v13689_v49, %v13688_v36  ;;  %v13693_v43 = vsel %vm12034_vm12, %v13691_v59, %v13692_v21  ;;  %v7082_v5 = vpop.eup %7081  ;;  %v12454_v12 = vsel %vm5129_vm6, %v13696_v27, %v5127_v37 }
 0xb4c   :  { %7087 = vlog2.f32 %v5134_v9  ;;  %v12446_v16 = vsel %vm12406_vm10, %v13694_v1, %v13693_v43  ;;  %v5885_v35 = vadd.f32 1e-10, %v11401_v30  ;;  %v4817_v60 = vmul.f32 %v12352_v23, %v4816_v38  ;;  %v7084_v29 = vpop.eup %7083  ;;  %s3483_s21 = sadd.f32 %s3482_s14, %s1184_s20 }
 0xb4d   :  { %7089 = vlog2.f32 %v4862_v47  ;;  %v12460_v55 = vmul.f32 0.6931472, %v13697_v61  ;;  %v12463_v7 = vmul.f32 0.6931472, %v12125_v3  ;;  %v4870_v44 = vmul.f32 0.6931472, %v7080_v45 }
 0xb4e   :  { %7091 = vlog2.f32 %v5137_v62  ;;  %v12468_v25 = vmul.f32 0.6931472, %v12334_v26  ;;  %v12471_v0 = vadd.f32 1e-10, %v13698_v46  ;;  %v5145_v52 = vmul.f32 0.6931472, %v7082_v5 }
 0xb4f   :  { %7093 = vrcp.f32 %v12423_v56  ;;  %v12473_v17 = vmul.f32 0.6931472, %v7074_v20  ;;  %v12477_v3 = vadd.f32 1e-10, %v11445_v41  ;;  %v4825_v58 = vand.u32 2147483648, %v12326_v8 }
 0xb50   :  { %v12465_v6 = vpop.xlane.xlu2 %5717  ;;  %7095 = vlog2.f32 %v5886_v32  ;;  %v4801_v34 = vsub.f32 1.0, %v4800_v13  ;;  %v5147_v42 = vmul.f32 0.6931472, %v7076_v14  ;;  %v4818_v2 = vadd.f32 %v12352_v23, %v4817_v60 }
 0xb51   :  { %v7086_v31 = vpop.eup %7085  ;;  %7097 = vrcp.f32 %v12465_v6  ;;  %vm4820_vm3 = vweird.f32 %v12352_v23  ;;  %vm4819_vm12 = vweird.f32 %v12326_v8  ;;  %v4884_v47 = vsel %vm1151_vm11, %v4870_v44, 0.0 }
 0xb52   :  { %v7088_v4 = vpop.eup %7087  ;;  %v4868_v22 = vmul.f32 0.6931472, %v7086_v31  ;;  %7099 = vlog2.f32 %v5885_v35  ;;  %v12485_v9 = vadd.f32 1e-08, %v4730_v19  ;;  %v5159_v62 = vsel %vm1151_vm11, %v5145_v52, 0.0  ;;  %vm12497_vm0 = vmor %vm4819_vm12, %vm4820_vm3 }
 0xb53   :  { %v7090_v26 = vpop.eup %7089  ;;  %v5143_v33 = vmul.f32 0.6931472, %v7088_v4  ;;  %v4604_v48 = vpop.xlane.xlu0 %4603  ;;  %v4872_v37 = vmul.f32 0.6931472, %v7084_v29  ;;  %v4826_v15 = vor.u32 1.1754944e-38, %v4825_v58  ;;  %v4802_v32 = vmul.f32 %v12421_v18, %v4801_v34 }
 0xb54   :  { %v7092_v20 = vpop.eup %7091  ;;  %v4883_v57 = vsel %vm1151_vm11, %v4868_v22, 0.0  ;;  %v4618_v10 = vmul.f32 %v4604_v48, %v13536_v28  ;;  %v5161_v49 = vsel %vm1151_vm11, %v5147_v42, 0.0  ;;  %v4822_v59 = vsel %vm12497_vm0, %v12352_v23, %v4818_v2 }
 0xb55   :  { %v12487_v24 = vpop.eup %7093  ;;  %v5158_v14 = vsel %vm1151_vm11, %v5143_v33, 0.0  ;;  %v4885_v45 = vadd.f32 %v4884_v47, %v4883_v57  ;;  %v5149_v54 = vmul.f32 0.6931472, %v7092_v20  ;;  %v4823_v21 = vand.u32 2147483647, %v12326_v8 }
 0xb56   :  { %v12492_v38 = vpop.eup %7095  ;;  %v5160_v51 = vadd.f32 %v5159_v62, %v5158_v14  ;;  %v4874_v1 = vmul.f32 0.6931472, %v7090_v26  ;;  %v4830_v50 = vmul.f32 %v12487_v24, %v12423_v56  ;;  %7101 = vrcp.f32 %v12485_v9 }
 0xb57   :  { %v12501_v36 = vpop.eup %7097  ;;  %vm4805_vm8 = vweird.f32 %v12421_v18  ;;  %v4630_v27 = vmul.f32 1.442695, %v4618_v10  ;;  %v4886_v23 = vsel %vm1151_vm11, %v4872_v37, 0.0  ;;  %v4803_v35 = vadd.f32 %v12421_v18, %v4802_v32 }
 0xb58   :  { %v7100_v43 = vpop.eup %7099  ;;  %v5753_v5 = vmul.f32 %v12501_v36, %v12465_v6  ;;  %v12513_v13 = vpop.xlane.xlu2 %5720  ;;  %v5162_v60 = vadd.f32 %v5161_v49, %v5160_v51  ;;  %v4887_v61 = vadd.f32 %v4886_v23, %v4885_v45  ;;  %vm4804_vm2 = vweird.f32 %v12359_v63 }
 0xb59   :  { %7103 = vrcp.f32 %v12513_v13  ;;  %vm4824_vm15 = vcmp.eq.f32.partialorder %v4823_v21, 8.507059e+37  ;;  %v5163_v44 = vsel %vm1151_vm11, %v5149_v54, 0.0  ;;  %v12523_v31 = vmul.f32 0.6931472, %v7100_v43  ;;  %vm12530_vm9 = vmor %vm4804_vm2, %vm4805_vm8 }
 0xb5a   :  { %v5754_v8 = vsub.f32 1.0, %v5753_v5  ;;  %v4810_v52 = vand.u32 2147483648, %v12359_v63  ;;  %v4831_v4 = vsub.f32 1.0, %v4830_v50  ;;  %v4808_v22 = vand.u32 2147483647, %v12359_v63 }
 0xb5b   :  { %v12520_v29 = vpop.xlane.xlu0 %5714  ;;  %v12535_v26 = vadd.f32 %v5163_v44, %v5162_v60  ;;  %v4888_v42 = vsel %vm1151_vm11, %v4874_v1, 0.0  ;;  %v4840_v48 = vand.u32 2147483648, %v12423_v56  ;;  %v4807_v2 = vsel %vm12530_vm9, %v12421_v18, %v4803_v35 }
 0xb5c   :  { %v5755_v58 = vmul.f32 %v12501_v36, %v5754_v8  ;;  %7105 = vrcp.f32 %v12520_v29  ;;  %v12538_v33 = vpop.eup %7101  ;;  %v12544_v20 = vsel %vm4824_vm15, %v4826_v15, %v4822_v59  ;;  %v12546_v47 = vadd.f32 %v4888_v42, %v4887_v61 }
 0xb5d   :  { %7107 = vpow2.f32 %v4630_v27  ;;  %vm5758_vm13 = vweird.f32 %v12501_v36  ;;  %v5761_v62 = vand.u32 2147483647, %v12465_v6  ;;  %v5763_v14 = vand.u32 2147483648, %v12465_v6 }
 0xb5e   :  { %v5756_v63 = vadd.f32 %v12501_v36, %v5755_v58  ;;  %v4811_v10 = vor.u32 1.1754944e-38, %v4810_v52  ;;  %v4832_v37 = vmul.f32 %v12487_v24, %v4831_v4  ;;  %7109 = vlog2.f32 %v12471_v0 }
 0xb5f   :  { %v12548_v57 = vpop.eup %7103  ;;  %v12562_v32 = vmul.f32 %v12538_v33, %v12485_v9  ;;  %vm5757_vm5 = vweird.f32 %v12465_v6  ;;  %vm4809_vm7 = vcmp.eq.f32.partialorder %v4808_v22, 8.507059e+37  ;;  %v12566_v51 = vor.u32 1.1754944e-38, %v4840_v48 }
 0xb60   :  { %v5768_v18 = vmul.f32 %v12548_v57, %v12513_v13  ;;  %v12557_v15 = vpop.xlane.xlu2 %5726  ;;  %vm12568_vm4 = vmor %vm5757_vm5, %vm5758_vm13  ;;  %v4812_v49 = vsel %vm4809_vm7, %v4811_v10, %v4807_v2  ;;  %v4838_v0 = vand.u32 2147483647, %v12423_v56  ;;  %vm5762_vm10 = vcmp.eq.f32.partialorder %v5761_v62, 8.507059e+37 }
 0xb61   :  { %7111 = vrcp.f32 %v12557_v15  ;;  %v5760_v21 = vsel %vm12568_vm4, %v12501_v36, %v5756_v63  ;;  %v5764_v6 = vor.u32 1.1754944e-38, %v5763_v14  ;;  %v5776_v5 = vand.u32 2147483647, %v12513_v13 }
 0xb62   :  { %v7106_v45 = vpop.eup %7105  ;;  %v5769_v54 = vsub.f32 1.0, %v5768_v18  ;;  %v5778_v27 = vand.u32 2147483648, %v12513_v13  ;;  %v12583_v23 = vadd.f32 %v12487_v24, %v4832_v37  ;;  %v4846_v8 = vsub.f32 1.0, %v12562_v32 }
 0xb63   :  { %v7108_v59 = vpop.eup %7107  ;;  %v5738_v43 = vmul.f32 %v7106_v45, %v12520_v29  ;;  %v12577_v1 = vpop.xlane.xlu0 %5723  ;;  %vm5773_vm14 = vweird.f32 %v12548_v57  ;;  %v5765_v60 = vsel %vm5762_vm10, %v5764_v6, %v5760_v21  ;;  %v5748_v52 = vand.u32 2147483648, %v12520_v29 }
 0xb64   :  { %v5770_v50 = vmul.f32 %v12548_v57, %v5769_v54  ;;  %7113 = vrcp.f32 %v12577_v1  ;;  %v12588_v35 = vpop.eup %7109  ;;  %v4813_v61 = vmul.f32 %v7108_v59, %v4812_v49  ;;  %vm5772_vm6 = vweird.f32 %v12513_v13  ;;  %v13709_v13 = vld [vmem:[#allocation6_spill] sm:$0xff] }
 0xb65   :  { %v5739_v36 = vsub.f32 1.0, %v5738_v43  ;;  %vm5743_vm3 = vweird.f32 %v7106_v45  ;;  %v5746_v34 = vand.u32 2147483647, %v12520_v29  ;;  %vm12596_vm12 = vmor %vm5772_vm6, %vm5773_vm14  ;;  %vm12600_vm0 = vcmp.eq.f32.partialorder %v5776_v5, 8.507059e+37 }
 0xb66   :  { %v5771_v44 = vadd.f32 %v12548_v57, %v5770_v50  ;;  %v5779_v48 = vor.u32 1.1754944e-38, %v5778_v27  ;;  %vm5742_vm8 = vweird.f32 %v12520_v29  ;;  %v12610_v62 = vmul.f32 %v5765_v60, %v13709_v13 }
 0xb67   :  { %v12592_v4 = vpop.eup %7111  ;;  %v5740_v58 = vmul.f32 %v7106_v45, %v5739_v36  ;;  %v4863_v37 = vadd.f32 1e-12, %v4813_v61  ;;  %vm5744_vm2 = vmor %vm5742_vm8, %vm5743_vm3  ;;  %v5749_v18 = vor.u32 1.1754944e-38, %v5748_v52  ;;  %v5808_v29 = vand.u32 2147483648, %v12557_v15  ;;  %v13710_v36 = vld [vmem:[#allocation8_spill] sm:$0xff] }
 0xb68   :  { %v5798_v2 = vmul.f32 %v12592_v4, %v12557_v15  ;;  %v12607_v63 = vpop.xlane.xlu2 %5729  ;;  %v5775_v14 = vsel %vm12596_vm12, %v12548_v57, %v5771_v44  ;;  %v12618_v54 = vmul.f32 %v7108_v59, %v12436_v11  ;;  %vm5747_vm15 = vcmp.eq.f32.partialorder %v5746_v34, 8.507059e+37 }
 0xb69   :  { %v5741_v10 = vadd.f32 %v7106_v45, %v5740_v58  ;;  %7115 = vrcp.f32 %v12607_v63  ;;  %vm5802_vm9 = vweird.f32 %v12557_v15  ;;  %v5780_v57 = vsel %vm12600_vm0, %v5779_v48, %v5775_v14  ;;  %v13711_v58 = vld [vmem:[#allocation10_spill] sm:$0xff] }
 0xb6a   :  { %v5799_v19 = vsub.f32 1.0, %v5798_v2  ;;  %v7114_v49 = vpop.eup %7113  ;;  %v5858_v27 = vadd.f32 1e-10, %v12610_v62  ;;  %v5806_v11 = vand.u32 2147483647, %v12557_v15  ;;  %vm4835_vm13 = vweird.f32 %v12487_v24 }
 0xb6b   :  { %v5745_v21 = vsel %vm5744_vm2, %v7106_v45, %v5741_v10  ;;  %v4607_v6 = vpop.xlane.xlu0 %4606  ;;  %v5783_v5 = vmul.f32 %v7114_v49, %v12577_v1  ;;  %v5791_v45 = vand.u32 2147483647, %v12577_v1  ;;  %7117 = vlog2.f32 %v4863_v37 }
 0xb6c   :  { %v5750_v43 = vsel %vm5747_vm15, %v5749_v18, %v5745_v21  ;;  %v5800_v50 = vmul.f32 %v12592_v4, %v5799_v19  ;;  %v5809_v59 = vor.u32 1.1754944e-38, %v5808_v29  ;;  %v5793_v44 = vand.u32 2147483648, %v12577_v1  ;;  %v13721_v18 = vld [vmem:[#allocation52_spill] sm:$0xff] }
 0xb6d   :  { %v12627_v60 = vmul.f32 %v5750_v43, %v13710_v36  ;;  %v5784_v61 = vsub.f32 1.0, %v5783_v5  ;;  %vm4834_vm5 = vweird.f32 %v12423_v56  ;;  %v12635_v34 = vmul.f32 %v5780_v57, %v13711_v58 }
 0xb6e   :  { %v5801_v22 = vadd.f32 %v12592_v4, %v5800_v50  ;;  %vm5803_vm7 = vweird.f32 %v12592_v4  ;;  %v4619_v42 = vmul.f32 %v4607_v6, %v13536_v28  ;;  %vm5787_vm4 = vweird.f32 %v12577_v1 }
 0xb6f   :  { %v7116_v52 = vpop.eup %7115  ;;  %v5785_v48 = vmul.f32 %v7114_v49, %v5784_v61  ;;  %vm5788_vm10 = vweird.f32 %v7114_v49  ;;  %7119 = vlog2.f32 %v5858_v27  ;;  %v5857_v14 = vadd.f32 1e-10, %v12627_v60  ;;  %vm12651_vm6 = vmor %vm5802_vm9, %vm5803_vm7 }
 0xb70   :  { %v5813_v2 = vmul.f32 %v7116_v52, %v12607_v63  ;;  %v12642_v13 = vpop.xlane.xlu2 %5732  ;;  %vm12645_vm14 = vcmp.eq.f32.partialorder %v5791_v45, 8.507059e+37  ;;  %v4632_v37 = vmul.f32 1.442695, %v4619_v42  ;;  %v5794_v29 = vor.u32 1.1754944e-38, %v5793_v44  ;;  %vm5789_vm3 = vmor %vm5787_vm4, %vm5788_vm10  ;;  %v13718_v44 = vld [vmem:[#allocation44_spill] sm:$0xff] }
 0xb71   :  { %v5786_v19 = vadd.f32 %v7114_v49, %v5785_v48  ;;  %7121 = vrcp.f32 %v12642_v13  ;;  %v5859_v6 = vadd.f32 1e-10, %v12635_v34  ;;  %v5805_v57 = vsel %vm12651_vm6, %v12592_v4, %v5801_v22  ;;  %v7118_v50 = vpop.eup %7117  ;;  %vm12683_vm7 = vmor %vm4834_vm5, %vm4835_vm13 }
 0xb72   :  { %v5814_v21 = vsub.f32 1.0, %v5813_v2  ;;  %v5823_v15 = vand.u32 2147483648, %v12607_v63  ;;  %7123 = vpow2.f32 %v4632_v37  ;;  %vm5818_vm12 = vweird.f32 %v7116_v52 }
 0xb73   :  { %v4610_v43 = vpop.xlane.xlu0 %4609  ;;  %v5790_v5 = vsel %vm5789_vm3, %v7114_v49, %v5786_v19  ;;  %v5821_v36 = vand.u32 2147483647, %v12607_v63  ;;  %7125 = vlog2.f32 %v5857_v14  ;;  %vm5807_vm0 = vcmp.eq.f32.partialorder %v5806_v11, 8.507059e+37 }
 0xb74   :  { %v5815_v27 = vmul.f32 %v7116_v52, %v5814_v21  ;;  %v5795_v45 = vsel %vm12645_vm14, %v5794_v29, %v5790_v5  ;;  %vm12668_vm8 = vcmp.eq.f32.partialorder %v4838_v0, 8.507059e+37  ;;  %v4620_v4 = vmul.f32 %v4610_v43, %v13536_v28  ;;  %v13722_v5 = vld [vmem:[#allocation54_spill] sm:$0xff] }
 0xb75   :  { %v5810_v61 = vsel %vm5807_vm0, %v5809_v59, %v5805_v57  ;;  %v12674_v49 = vmul.f32 %v5795_v45, %v13718_v44  ;;  %vm5817_vm2 = vweird.f32 %v12607_v63  ;;  %v7120_v22 = vpop.eup %7119  ;;  %v4855_v11 = vand.u32 2147483648, %v12485_v9 }
 0xb76   :  { %v5816_v58 = vadd.f32 %v7116_v52, %v5815_v27  ;;  %7127 = vlog2.f32 %v5859_v6  ;;  %vm5819_vm15 = vmor %vm5817_vm2, %vm5818_vm12  ;;  %v5824_v42 = vor.u32 1.1754944e-38, %v5823_v15  ;;  %v4634_v48 = vmul.f32 1.442695, %v4620_v4 }
 0xb77   :  { %v7122_v0 = vpop.eup %7121  ;;  %v5860_v2 = vadd.f32 1e-10, %v12674_v49  ;;  %vm5822_vm9 = vcmp.eq.f32.partialorder %v5821_v36, 8.507059e+37  ;;  %v4853_v10 = vand.u32 2147483647, %v12485_v9  ;;  %v12691_v19 = vmul.f32 %v5810_v61, %v13721_v18 }
 0xb78   :  { %v5820_v14 = vsel %vm5819_vm15, %v7116_v52, %v5816_v58  ;;  %v12687_v63 = vpop.xlane.xlu2 %5735  ;;  %v7124_v37 = vpop.eup %7123  ;;  %v5828_v52 = vmul.f32 %v7122_v0, %v12642_v13  ;;  %v4837_v56 = vsel %vm12683_vm7, %v12487_v24, %v12583_v23  ;;  %v4847_v21 = vmul.f32 %v12538_v33, %v4846_v8 }
 0xb79   :  { %v5825_v29 = vsel %vm5822_vm9, %v5824_v42, %v5820_v14  ;;  %v5138_v6 = vadd.f32 1e-12, %v12618_v54  ;;  %7129 = vlog2.f32 %v5860_v2  ;;  %v4828_v57 = vmul.f32 %v7124_v37, %v12544_v20  ;;  %v7126_v15 = vpop.eup %7125 }
 0xb7a   :  { %v4876_v43 = vmul.f32 0.6931472, %v7118_v50  ;;  %v12704_v27 = vmul.f32 %v5825_v29, %v13722_v5  ;;  %v5829_v36 = vsub.f32 1.0, %v5828_v52  ;;  %7131 = vpow2.f32 %v4634_v48 }
 0xb7b   :  { %v5868_v45 = vmul.f32 0.6931472, %v7120_v22  ;;  %v4864_v4 = vadd.f32 1e-12, %v4828_v57  ;;  %v5838_v24 = vand.u32 2147483648, %v12642_v13  ;;  %7133 = vrcp.f32 %v12687_v63 }
 0xb7c   :  { %v7128_v32 = vpop.eup %7127  ;;  %v5861_v23 = vadd.f32 1e-10, %v12691_v19  ;;  %v5830_v8 = vmul.f32 %v7122_v0, %v5829_v36  ;;  %vm5833_vm13 = vweird.f32 %v7122_v0  ;;  %v5836_v20 = vand.u32 2147483647, %v12642_v13 }
 0xb7d   :  { %v5866_v54 = vmul.f32 0.6931472, %v7126_v15  ;;  %v5103_v50 = vmul.f32 %v7124_v37, %v12446_v16  ;;  %v4842_v61 = vsel %vm12668_vm8, %v12566_v51, %v4837_v56  ;;  %v12715_v44 = vadd.f32 %v12538_v33, %v4847_v21  ;;  %v13723_v21 = vld [vmem:[#allocation49_spill] sm:$0xff] }
 0xb7e   :  { %vm4850_vm5 = vweird.f32 %v12538_v33  ;;  %v5862_v58 = vadd.f32 1e-10, %v12704_v27  ;;  %7135 = vlog2.f32 %v4864_v4  ;;  %v5831_v22 = vadd.f32 %v7122_v0, %v5830_v8 }
 0xb7f   :  { %vm5832_vm4 = vweird.f32 %v12642_v13  ;;  %v7130_v42 = vpop.eup %7129  ;;  %vm4849_vm10 = vweird.f32 %v12485_v9  ;;  %v5906_v16 = vsub.f32 %v5868_v45, %v12473_v17  ;;  %7137 = vlog2.f32 %v5138_v6 }
 0xb80   :  { %v12722_v48 = vmul.f32 0.6931472, %v7128_v32  ;;  %vm5834_vm14 = vmor %vm5832_vm4, %vm5833_vm13  ;;  %v5839_v51 = vor.u32 1.1754944e-38, %v5838_v24  ;;  %v4613_v1 = vpop.xlane.xlu2 %4612  ;;  %v7132_v2 = vpop.eup %7131  ;;  %7139 = vlog2.f32 %v5861_v23  ;;  %vm5837_vm6 = vcmp.eq.f32.partialorder %v5836_v20, 8.507059e+37 }
 0xb81   :  { %v5835_v14 = vsel %vm5834_vm14, %v7122_v0, %v5831_v22  ;;  %v4890_v59 = vsel %vm1151_vm11, %v4876_v43, 0.0  ;;  %v7134_v37 = vpop.eup %7133  ;;  %v5905_v13 = vsub.f32 %v5866_v54, %v12463_v7  ;;  %v5139_v18 = vadd.f32 1e-12, %v5103_v50  ;;  %vm12748_vm0 = vmor %vm4849_vm10, %vm4850_vm5 }
 0xb82   :  { %v5840_v29 = vsel %vm5837_vm6, %v5839_v51, %v5835_v14  ;;  %v4621_v17 = vmul.f32 %v4613_v1, %v13536_v28  ;;  %7141 = vlog2.f32 %v5862_v58  ;;  %v5118_v52 = vmul.f32 %v7132_v2, %v12449_v39 }
 0xb83   :  { %v5843_v56 = vmul.f32 %v7134_v37, %v12687_v63  ;;  %v12731_v6 = vmul.f32 %v5840_v29, %v13723_v21  ;;  %v5914_v0 = vmul.f32 %v5906_v16, %v12610_v62  ;;  %v5907_v57 = vsub.f32 %v12722_v48, %v12460_v55 }
 0xb84   :  { %v4843_v15 = vmul.f32 %v7132_v2, %v4842_v61  ;;  %v4636_v43 = vmul.f32 1.442695, %v4621_v17  ;;  %v7136_v7 = vpop.eup %7135  ;;  %v5872_v5 = vmul.f32 0.6931472, %v7130_v42  ;;  %v4891_v28 = vadd.f32 %v4890_v59, %v12546_v47 }
 0xb85   :  { %v5844_v36 = vsub.f32 1.0, %v5843_v56  ;;  %v5863_v45 = vadd.f32 1e-10, %v12731_v6  ;;  %v7138_v39 = vpop.eup %7137  ;;  %v5913_v4 = vmul.f32 %v5905_v13, %v12627_v60  ;;  %v5851_v24 = vand.u32 2147483647, %v12687_v63  ;;  %v13726_v13 = vld [vmem:[#allocation56_spill] sm:$0xff] }
 0xb86   :  { %v5853_v32 = vand.u32 2147483648, %v12687_v63  ;;  %v4878_v62 = vmul.f32 0.6931472, %v7136_v7  ;;  %v7140_v23 = vpop.eup %7139  ;;  %7143 = vlog2.f32 %v5139_v18  ;;  %v5140_v55 = vadd.f32 1e-12, %v5118_v52 }
 0xb87   :  { %v5845_v8 = vmul.f32 %v7134_v37, %v5844_v36  ;;  %vm5848_vm3 = vweird.f32 %v7134_v37  ;;  %v4865_v20 = vadd.f32 1e-12, %v4843_v15  ;;  %vm5847_vm12 = vweird.f32 %v12687_v63  ;;  %v5963_v15 = vpop.xlane.xlu0 %5962 }
 0xb88   :  { %7145 = vpow2.f32 %v4636_v43  ;;  %v4892_v47 = vsel %vm1151_vm11, %v4878_v62, 0.0  ;;  %v7142_v54 = vpop.eup %7141  ;;  %v5908_v50 = vsub.f32 %v5872_v5, %v12468_v25  ;;  %v4856_v63 = vor.u32 1.1754944e-38, %v4855_v11  ;;  %vm5849_vm8 = vmor %vm5847_vm12, %vm5848_vm3 }
 0xb89   :  { %v5846_v60 = vadd.f32 %v7134_v37, %v5845_v8  ;;  %v12752_v58 = vadd.f32 %v4892_v47, %v4891_v28  ;;  %7147 = vlog2.f32 %v5863_v45  ;;  %v5874_v22 = vmul.f32 0.6931472, %v7140_v23  ;;  %v5966_v8 = vpop.xlane.xlu2 %5965 }
 0xb8a   :  { %v5854_v42 = vor.u32 1.1754944e-38, %v5853_v32  ;;  %v4852_v25 = vsel %vm12748_vm0, %v12538_v33, %v12715_v44  ;;  %v5921_v16 = vsel %vm5517_vm1, %v5913_v4, 0.0  ;;  %7149 = vlog2.f32 %v5140_v55 }
 0xb8b   :  { %v5850_v48 = vsel %vm5849_vm8, %v7134_v37, %v5846_v60  ;;  %vm5852_vm2 = vcmp.eq.f32.partialorder %v5851_v24, 8.507059e+37  ;;  %7151 = vlog2.f32 %v4865_v20  ;;  %vm4854_vm15 = vcmp.eq.f32.partialorder %v4853_v10, 8.507059e+37  ;;  %v13727_v60 = vld [vmem:[#allocation61_spill] sm:$0xff] }
 0xb8c   :  { %v5855_v51 = vsel %vm5852_vm2, %v5854_v42, %v5850_v48  ;;  %v5876_v1 = vmul.f32 0.6931472, %v7142_v54  ;;  %v7144_v11 = vpop.eup %7143  ;;  %v5922_v2 = vsel %vm5517_vm1, %v5914_v0, 0.0  ;;  %v5915_v14 = vmul.f32 %v5907_v57, %v12635_v34 }
 0xb8d   :  { %v5916_v59 = vmul.f32 %v5908_v50, %v12674_v49  ;;  %v12767_v33 = vmul.f32 %v5855_v51, %v13726_v13  ;;  %v4857_v18 = vsel %vm4854_vm15, %v4856_v63, %v4852_v25  ;;  %v5900_v37 = vmul.f32 0.6931472, %v12492_v38 }
 0xb8e   :  { %v7146_v44 = vpop.eup %7145  ;;  %7153 = vlog2.f32 %v12477_v3  ;;  %v5923_v9 = vadd.f32 %v5922_v2, %v5921_v16  ;;  %v5902_v52 = vmul.f32 0.6931472, %v12588_v35  ;;  %v5909_v34 = vsub.f32 %v5874_v22, %v12523_v31 }
 0xb8f   :  { %v7148_v10 = vpop.eup %7147  ;;  %v4858_v29 = vmul.f32 %v7146_v44, %v4857_v18  ;;  %v5133_v17 = vmul.f32 %v7146_v44, %v12454_v12  ;;  %v5151_v56 = vmul.f32 0.6931472, %v7138_v39  ;;  %v5864_v49 = vadd.f32 1e-10, %v12767_v33  ;;  %v5960_v12 = vpop.xlane.xlu1 %5959 }
 0xb90   :  { %v5878_v21 = vmul.f32 0.6931472, %v7148_v10  ;;  %v5910_v0 = vsub.f32 %v5876_v1, %v5900_v37  ;;  %v7150_v57 = vpop.eup %7149  ;;  %v5924_v3 = vsel %vm5517_vm1, %v5915_v14, 0.0  ;;  %v5926_v7 = vsel %vm5517_vm1, %v5916_v59, 0.0  ;;  %v5972_v1 = vpop.xlane.xlu0 %5971 }
 0xb91   :  { %v4866_v43 = vadd.f32 1e-12, %v4858_v29  ;;  %v5141_v38 = vadd.f32 1e-12, %v5133_v17  ;;  %v7152_v5 = vpop.eup %7151  ;;  %v5982_v36 = vlaneseq  ;;  %v5153_v28 = vmul.f32 0.6931472, %v7144_v11 }
 0xb92   :  { %7155 = vlog2.f32 %v5864_v49  ;;  %v5925_v35 = vadd.f32 %v5924_v3, %v5923_v9  ;;  %v5911_v31 = vsub.f32 %v5878_v21, %v5902_v52  ;;  %v5917_v45 = vmul.f32 %v5909_v34, %v12691_v19 }
 0xb93   :  { %7157 = vlog2.f32 %v5141_v38  ;;  %v5155_v4 = vmul.f32 0.6931472, %v7150_v57  ;;  %v5165_v24 = vsel %vm1151_vm11, %v5151_v56, 0.0  ;;  %v4880_v62 = vmul.f32 0.6931472, %v7152_v5  ;;  %v13729_v57 = vld [vmem:[#allocation62_spill] sm:$0xff] }
 0xb94   :  { %v7154_v39 = vpop.eup %7153  ;;  %7159 = vlog2.f32 %v4866_v43  ;;  %v5927_v32 = vadd.f32 %v5926_v7, %v5925_v35  ;;  %v5918_v23 = vmul.f32 %v5910_v0, %v12704_v27  ;;  %v12780_v55 = vand.u32 127, %v5982_v36  ;;  %v5975_v0 = vpop.xlane.xlu2 %5974 }
 0xb95   :  { %v5167_v20 = vsel %vm1151_vm11, %v5153_v28, 0.0  ;;  %vm5985_vm9 = vcmp.ge.f32.partialorder %v13644_v40, %v5963_v15  ;;  %v5166_v47 = vadd.f32 %v5165_v24, %v12535_v26  ;;  %v5919_v19 = vmul.f32 %v5911_v31, %v12731_v6  ;;  %v13728_v6 = vld [vmem:[#allocation38_spill] sm:$0xff] }
 0xb96   :  { %v5928_v54 = vsel %vm5517_vm1, %v5917_v45, 0.0  ;;  %vm5984_vm7 = vcmp.ge.f32.partialorder %v13727_v60, %v5960_v12  ;;  %v5169_v61 = vsel %vm1151_vm11, %v5155_v4, 0.0  ;;  %v5904_v63 = vmul.f32 0.6931472, %v7154_v39 }
 0xb97   :  { %v5929_v27 = vadd.f32 %v5928_v54, %v5927_v32  ;;  %v5168_v42 = vadd.f32 %v5167_v20, %v5166_v47  ;;  %v4894_v25 = vsel %vm1151_vm11, %v4880_v62, 0.0  ;;  %v5930_v40 = vsel %vm5517_vm1, %v5918_v23, 0.0  ;;  %v5969_v44 = vpop.xlane.xlu1 %5968 }
 0xb98   :  { %v7156_v50 = vpop.eup %7155  ;;  %v5993_v26 = vsel %vm5985_vm9, %v12780_v55, 4  ;;  %vm5986_vm13 = vcmp.ge.f32.partialorder %v13728_v6, %v5966_v8  ;;  %v5932_v59 = vsel %vm5517_vm1, %v5919_v19, 0.0  ;;  %v5992_v13 = vsel %vm5984_vm7, %v12780_v55, 4  ;;  %v5981_v5 = vpop.xlane.xlu0 %5980 }
 0xb99   :  { %v7158_v22 = vpop.eup %7157  ;;  %v5880_v16 = vmul.f32 0.6931472, %v7156_v50  ;;  %v5170_v11 = vadd.f32 %v5169_v61, %v5168_v42  ;;  %v4895_v37 = vadd.f32 %v4894_v25, %v12752_v58  ;;  %v5931_v9 = vadd.f32 %v5930_v40, %v5929_v27 }
 0xb9a   :  { %v7160_v48 = vpop.eup %7159  ;;  %v5157_v51 = vmul.f32 0.6931472, %v7158_v22  ;;  %v12802_v52 = vsel %vm5517_vm1, %v5993_v26, 2147483647  ;;  %v5994_v34 = vsel %vm5986_vm13, %v12780_v55, 4  ;;  %vm5988_vm5 = vcmp.ge.f32.partialorder %v11401_v30, %v5972_v1 }
 0xb9b   :  { %v4882_v2 = vmul.f32 0.6931472, %v7160_v48  ;;  %v5912_v14 = vsub.f32 %v5880_v16, %v5904_v63  ;;  %v5933_v49 = vadd.f32 %v5932_v59, %v5931_v9  ;;  %v12808_v21 = vsel %vm5517_vm1, %v5992_v13, 2147483647 }
 0xb9c   :  { %v5171_v18 = vsel %vm1151_vm11, %v5157_v51, 0.0  ;;  %vm5987_vm4 = vcmp.ge.f32.partialorder %v13729_v57, %v5969_v44  ;;  %v6017_v15 = vshra.s32 %v12802_v52, 16  ;;  %v12815_v43 = vsel %vm5517_vm1, %v5994_v34, 2147483647 }
 0xb9d   :  { %v5172_v10 = vadd.f32 %v5171_v18, %v5170_v11  ;;  %v4896_v29 = vsel %vm1151_vm11, %v4882_v2, 0.0  ;;  %v5920_v17 = vmul.f32 %v5912_v14, %v12767_v33  ;;  %v6002_v38 = vshra.s32 %v12808_v21, 16 }
 0xb9e   :  { %v4897_v56 = vadd.f32 %v4896_v29, %v4895_v37  ;;  %v5996_v3 = vsel %vm5988_vm5, %v12780_v55, 4  ;;  %vm5989_vm10 = vcmp.ge.f32.partialorder %v11408_v53, %v5975_v0  ;;  %v5995_v7 = vsel %vm5987_vm4, %v12780_v55, 4 }
 0xb9f   :  { %5173 = vadd.xlane.f32.xlu2 %v5172_v10  ;;  %v5934_v58 = vsel %vm5517_vm1, %v5920_v17, 0.0  ;;  %v6032_v30 = vshra.s32 %v12815_v43, 16  ;;  %v12822_v36 = vcvt.s32.f32 %v6017_v15  ;;  %v5978_v12 = vpop.xlane.xlu1 %5977  ;;  %v12825_v28 = vsel %vm5517_vm1, %v5996_v3, 2147483647 }
 0xba0   :  { %4898 = vadd.xlane.f32.xlu0 %v4897_v56  ;;  %v5935_v33 = vadd.f32 %v5934_v58, %v5933_v49  ;;  %v5997_v35 = vsel %vm5989_vm10, %v12780_v55, 4  ;;  %v12828_v31 = vcvt.s32.f32 %v6002_v38  ;;  %v12831_v45 = vsel %vm5517_vm1, %v5995_v7, 2147483647 }
 0xba1   :  { %vm5991_vm14 = vcmp.ge.f32.partialorder %v11445_v41, %v5981_v5  ;;  %v12836_v53 = vcvt.s32.f32 %v6032_v30  ;;  %vm5990_vm6 = vcmp.ge.f32.partialorder %v13698_v46, %v5978_v12  ;;  %v6062_v39 = vshra.s32 %v12825_v28, 16 }
 0xba2   :  { %5936 = vadd.xlane.f32.xlu1 %v5935_v33  ;;  %v12841_v4 = vsel %vm5517_vm1, %v5997_v35, 2147483647  ;;  %v6047_v24 = vshra.s32 %v12831_v45, 16  ;;  %v5999_v32 = vsel %vm5991_vm14, %v12780_v55, 4  ;;  %v5998_v62 = vsel %vm5990_vm6, %v12780_v55, 4 }
 0xba3   :  { %v6077_v41 = vshra.s32 %v12841_v4, 16  ;;  %v12848_v23 = vcvt.s32.f32 %v6062_v39  ;;  %v12851_v8 = vsel %vm5517_vm1, %v5999_v32, 2147483647  ;;  %v12856_v20 = vsel %vm5517_vm1, %v5998_v62, 2147483647 }
 0xba4   :  { %v12853_v46 = vcvt.s32.f32 %v6047_v24  ;;  %v6107_v55 = vshra.s32 %v12851_v8, 16  ;;  %v6092_v19 = vshra.s32 %v12856_v20, 16  ;;  %v7210_v11 = vmov 2.0  }
 0xba5   :  { %v12860_v47 = vcvt.s32.f32 %v6077_v41  ;;  %7161 = vrcp.f32 %v7210_v11  ;;  %v6016_v29 = vand.u32 65535, %v12802_v52  ;;  %v6001_v56 = vand.u32 65535, %v12808_v21 }
 0xba6   :  { %v12865_v50 = vcvt.s32.f32 %v6107_v55  ;;  %v12867_v61 = vcvt.s32.f32 %v6092_v19  ;;  %v6031_v57 = vand.u32 65535, %v12815_v43  ;;  %v6046_v19 = vand.u32 65535, %v12831_v45 }
 0xba7   :  { %6020 = vmin.xlane.f32.xlu2 %v12822_v36  ;;  %v6018_v7 = vcvt.s32.f32 %v6016_v29  ;;  %v6003_v5 = vcvt.s32.f32 %v6001_v56 }
 0xba8   :  { %6005 = vmin.xlane.f32.xlu0 %v12828_v31  ;;  %v6033_v32 = vcvt.s32.f32 %v6031_v57  ;;  %v6048_v45 = vcvt.s32.f32 %v6046_v19 }
 0xbaa   :  { %6035 = vmin.xlane.f32.xlu1 %v12836_v53 }
 0xbab   :  { %v7162_v2 = vpop.eup %7161 }
 0xbac   :  { %v4560_v54 = vpop.xlane.xlu1 %4559  ;;  %v5197_v14 = vmul.f32 2.0, %v7162_v2  ;;  %vm5201_vm12 = vweird.f32 %v7162_v2 }
 0xbad   :  { %v4561_v60 = vrot.slane %v4560_v54, 4 }
 0xbae   :  { %v5198_v18 = vsub.f32 1.0, %v5197_v14 }
 0xbaf   :  { %6065 = vmin.xlane.f32.xlu2 %v12848_v23  ;;  %v4562_v63 = vadd.f32 %v4561_v60, %v4560_v54 }
 0xbb0   :  { %6050 = vmin.xlane.f32.xlu0 %v12853_v46  ;;  %v5199_v58 = vmul.f32 %v7162_v2, %v5198_v18 }
 0xbb1   :  { %v4563_v27 = vrot.slane %v4562_v63, 2 }
 0xbb2   :  { %6080 = vmin.xlane.f32.xlu1 %v12860_v47  ;;  %v5200_v21 = vadd.f32 %v7162_v2, %v5199_v58 }
 0xbb3   :  { %v4564_v16 = vadd.f32 %v4563_v27, %v4562_v63  ;;  %v6076_v63 = vand.u32 65535, %v12841_v4 }
 0xbb4   :  { %v5202_v54 = vsel %vm5201_vm12, %v7162_v2, %v5200_v21 }
 0xbb5   :  { %v4565_v26 = vrot.slane %v4564_v16, 1 }
 0xbb7   :  { %6110 = vmin.xlane.f32.xlu2 %v12865_v50  ;;  %v4566_v1 = vadd.f32 %v4565_v26, %v4564_v16  ;;  %v6078_v16 = vcvt.s32.f32 %v6076_v63 }
 0xbb8   :  { %6095 = vmin.xlane.f32.xlu0 %v12867_v61 }
 0xbbe   :  { %v4285_v22 = vpop.xlane.xlu2 %4284 }
 0xbbf   :  { %v4286_v42 = vrot.slane %v4285_v22, 4 }
 0xbc1   :  { %v4287_v25 = vadd.f32 %v4286_v42, %v4285_v22 }
 0xbc3   :  { %v4288_v40 = vrot.slane %v4287_v25, 2 }
 0xbc5   :  { %v4289_v48 = vadd.f32 %v4288_v40, %v4287_v25  ;;  %v6106_v40 = vand.u32 65535, %v12851_v8 }
 0xbc7   :  { %v4290_v6 = vrot.slane %v4289_v48, 1 }
 0xbc9   :  { %v4291_v51 = vadd.f32 %v4290_v6, %v4289_v48  ;;  %v6108_v6 = vcvt.s32.f32 %v6106_v40 }
 0xbcb   :  { %6376 = vpush %v4291_v51 }
 0xbcc   :  { %6378 = vpush %v4566_v1 }
 0xbfc   :  { %s6377_s24 = spop %6376 }
 0xbfd   :  { %s6379_s28 = spop %6378  ;;  %s4301_s4 = smul.f32 %s6377_s24, %s12913_s1 }
 0xbfe   :  { %s4576_s11 = smul.f32 %s6379_s28, %s12913_s1 }
 0xbff   :  { %s4302_s10 = ssub.f32 0.0, %s4301_s4 }
 0xc00   :  { %s4577_s0 = ssub.f32 0.0, %s4576_s11 }
 0xc01   :  { %s4578_s30 = smul.f32 0.5, %s4302_s10 }
 0xc02   :  { %s4579_s18 = smul.f32 0.5, %s4577_s0  ;;  %s6133_s0 = sshll.u32 %s12986_s16, 4  ;;  %s6134_s0 = int_to_ptr.hbm [resolvable:$true] %s6133_s0 }
 0xc04   :  { %s4580_s22 = sadd.f32 %s4579_s18, %s4578_s30  ;;  %s7211_s30 = smov [#allocation2]  }
 0xc06   :  { %s4581_s12 = sadd.f32 %s4580_s22, %s2937_s15 }
 0xc12   :  { %v5174_v59 = vpop.xlane.xlu2 %5173 }
 0xc13   :  { %v5175_v13 = vrot.slane %v5174_v59, 4  ;;  %v4899_v44 = vpop.xlane.xlu0 %4898 }
 0xc14   :  { %v4900_v37 = vrot.slane %v4899_v44, 4 }
 0xc15   :  { %v5176_v9 = vadd.f32 %v5175_v13, %v5174_v59  ;;  %v5937_v10 = vpop.xlane.xlu1 %5936 }
 0xc16   :  { %v4901_v17 = vadd.f32 %v4900_v37, %v4899_v44  ;;  %v5938_v34 = vrot.slane %v5937_v10, 4 }
 0xc17   :  { %v5177_v49 = vrot.slane %v5176_v9, 2 }
 0xc18   :  { %v4902_v0 = vrot.slane %v4901_v17, 2  ;;  %v5939_v33 = vadd.f32 %v5938_v34, %v5937_v10 }
 0xc19   :  { %v5178_v15 = vadd.f32 %v5177_v49, %v5176_v9 }
 0xc1a   :  { %v5940_v38 = vrot.slane %v5939_v33, 2  ;;  %v12874_v3 = vpop.xlane.xlu2 %6020  ;;  %v4903_v30 = vadd.f32 %v4902_v0, %v4901_v17 }
 0xc1b   :  { %vm6022_vm1 = vcmp.eq.f32.partialorder %v12822_v36, %v12874_v3  ;;  %v12878_v52 = vpop.xlane.xlu0 %6005  ;;  %v5179_v12 = vrot.slane %v5178_v15, 1  ;;  %v6061_v36 = vand.u32 65535, %v12825_v28 }
 0xc1c   :  { %vm6007_vm3 = vcmp.eq.f32.partialorder %v12828_v31, %v12878_v52  ;;  %v6023_v35 = vsel %vm6022_vm1, %v6018_v7, inf  ;;  %v4904_v39 = vrot.slane %v4903_v30, 1  ;;  %v5941_v41 = vadd.f32 %v5940_v38, %v5939_v33 }
 0xc1d   :  { %v12882_v43 = vpop.xlane.xlu1 %6035  ;;  %6024 = vmin.xlane.f32.xlu0 %v6023_v35  ;;  %v6008_v24 = vsel %vm6007_vm3, %v6003_v5, inf  ;;  %v5180_v62 = vadd.f32 %v5179_v12, %v5178_v15  ;;  %v6063_v28 = vcvt.s32.f32 %v6061_v36 }
 0xc1e   :  { %vm6037_vm0 = vcmp.eq.f32.partialorder %v12836_v53, %v12882_v43  ;;  %6009 = vmin.xlane.f32.xlu1 %v6008_v24  ;;  %v4905_v55 = vadd.f32 %v4904_v39, %v4903_v30  ;;  %v5942_v60 = vrot.slane %v5941_v41, 1 }
 0xc1f   :  { %v6038_v31 = vsel %vm6037_vm0, %v6033_v32, inf }
 0xc20   :  { %6039 = vmin.xlane.f32.xlu2 %v6038_v31  ;;  %6380 = vpush %v4905_v55  ;;  %v5943_v27 = vadd.f32 %v5942_v60, %v5941_v41 }
 0xc21   :  { %6382 = vpush %v5180_v62 }
 0xc22   :  { %6384 = vpush %v5202_v54  ;;  %v12889_v22 = vpop.xlane.xlu2 %6065 }
 0xc23   :  { %6386 = vpush %v5943_v27  ;;  %vm6067_vm8 = vcmp.eq.f32.partialorder %v12848_v23, %v12889_v22  ;;  %v12893_v53 = vpop.xlane.xlu0 %6050  ;;  %v6091_v23 = vand.u32 65535, %v12856_v20  ;;  %v6027_v20 = vcvt.f32.s32 %v12874_v3  ;;  %v6072_v29 = vcvt.f32.s32 %v12889_v22 }
 0xc24   :  { %vm6052_vm2 = vcmp.eq.f32.partialorder %v12853_v46, %v12893_v53  ;;  %v6068_v42 = vsel %vm6067_vm8, %v6063_v28, inf  ;;  %v6057_v17 = vcvt.f32.s32 %v12893_v53 }
 0xc25   :  { %v12897_v25 = vpop.xlane.xlu1 %6080  ;;  %6069 = vmin.xlane.f32.xlu0 %v6068_v42  ;;  %v6053_v4 = vsel %vm6052_vm2, %v6048_v45, inf  ;;  %v6093_v51 = vcvt.s32.f32 %v6091_v23  ;;  %v6028_v11 = vshll.u32 %v6027_v20, 16  ;;  %v6073_v58 = vshll.u32 %v6072_v29, 16 }
 0xc26   :  { %vm6082_vm15 = vcmp.eq.f32.partialorder %v12860_v47, %v12897_v25  ;;  %6054 = vmin.xlane.f32.xlu1 %v6053_v4  ;;  %v6087_v56 = vcvt.f32.s32 %v12897_v25  ;;  %v6058_v57 = vshll.u32 %v6057_v17, 16 }
 0xc27   :  { %v6083_v48 = vsel %vm6082_vm15, %v6078_v16, inf }
 0xc28   :  { %6084 = vmin.xlane.f32.xlu2 %v6083_v48  ;;  %v6088_v7 = vshll.u32 %v6087_v56, 16 }
 0xc2a   :  { %v12903_v26 = vpop.xlane.xlu2 %6110 }
 0xc2b   :  { %vm6112_vm9 = vcmp.eq.f32.partialorder %v12865_v50, %v12903_v26  ;;  %v12907_v46 = vpop.xlane.xlu0 %6095  ;;  %v6012_v50 = vcvt.f32.s32 %v12878_v52  ;;  %v6117_v5 = vcvt.f32.s32 %v12903_v26 }
 0xc2c   :  { %vm6097_vm7 = vcmp.eq.f32.partialorder %v12867_v61, %v12907_v46  ;;  %v6113_v8 = vsel %vm6112_vm9, %v6108_v6, inf  ;;  %v6042_v61 = vcvt.f32.s32 %v12882_v43  ;;  %v6102_v12 = vcvt.f32.s32 %v12907_v46 }
 0xc2d   :  { %6114 = vmin.xlane.f32.xlu0 %v6113_v8  ;;  %v6098_v47 = vsel %vm6097_vm7, %v6093_v51, inf  ;;  %v6013_v59 = vshll.u32 %v6012_v50, 16  ;;  %v6118_v39 = vshll.u32 %v6117_v5, 16 }
 0xc2e   :  { %6099 = vmin.xlane.f32.xlu1 %v6098_v47  ;;  %v6043_v37 = vshll.u32 %v6042_v61, 16  ;;  %v6103_v32 = vshll.u32 %v6102_v12, 16 }
 0xc51   :  { %s6381_s5 = spop %6380 }
 0xc52   :  { %s4915_s23 = smul.f32 %s6381_s5, %s12913_s1  ;;  %s6383_s24 = spop %6382 }
 0xc53   :  { %s5190_s25 = smul.f32 %s6383_s24, %s12913_s1  ;;  %s6385_s9 = spop %6384 }
 0xc54   :  { %s4916_s28 = ssub.f32 0.0, %s4915_s23  ;;  %s5204_s8 = smul.f32 %s6385_s9, %s3483_s21 }
 0xc55   :  { %s5191_s7 = ssub.f32 0.0, %s5190_s25  ;;  %s6387_s4 = spop %6386 }
 0xc56   :  { %s5192_s11 = smul.f32 0.5, %s4916_s28 }
 0xc57   :  { %s5193_s27 = smul.f32 0.5, %s5191_s7 }
 0xc58   :  { %s5953_s10 = smul.f32 %s6387_s4, %s12913_s1 }
 0xc59   :  { %s5194_s6 = sadd.f32 %s5193_s27, %s5192_s11 }
 0xc5a   :  { %s5954_s2 = sadd.f32 %s5953_s10, %s5204_s8 }
 0xc5b   :  { %s5195_s13 = sadd.f32 %s5194_s6, %s4581_s12 }
 0xc5d   :  { %s5955_s14 = sadd.f32 %s5954_s2, %s5195_s13 }
 0xc5f   :  { %5957 = sst [smem:[#allocation2]] %s5955_s14 }
 0xc60   :  { %6136 = dma.smem_to_hbm %s7211_s30, 16, %s6134_s0, [#allocation3]  }
 0xc90   :  { %v6025_v1 = vpop.xlane.xlu0 %6024 }
 0xc91   :  { %v6010_v2 = vpop.xlane.xlu1 %6009  ;;  %v6026_v14 = vcvt.f32.s32 %v6025_v1 }
 0xc92   :  { %v6011_v13 = vcvt.f32.s32 %v6010_v2 }
 0xc93   :  { %v6029_v44 = vadd.s32 %v6028_v11, %v6026_v14  ;;  %v6040_v18 = vpop.xlane.xlu2 %6039 }
 0xc94   :  { %v6014_v9 = vadd.s32 %v6013_v59, %v6011_v13  ;;  %v6041_v10 = vcvt.f32.s32 %v6040_v18 }
 0xc95   :  { %6121 = vst.msk [vmem:[%s12987_s17 + $0x8] sm:$0xff] %vm1151_vm11, %v6029_v44 }
 0xc96   :  { %6120 = vst.msk [vmem:[%s12987_s17] sm:$0xff] %vm1151_vm11, %v6014_v9  ;;  %v6044_v34 = vadd.s32 %v6043_v37, %v6041_v10 }
 0xc98   :  { %6122 = vst.msk [vmem:[%s12987_s17 + $0x10] sm:$0xff] %vm1151_vm11, %v6044_v34  ;;  %v6070_v49 = vpop.xlane.xlu0 %6069 }
 0xc99   :  { %v6055_v0 = vpop.xlane.xlu1 %6054  ;;  %v6071_v33 = vcvt.f32.s32 %v6070_v49 }
 0xc9a   :  { %v6056_v15 = vcvt.f32.s32 %v6055_v0 }
 0xc9b   :  { %v6074_v38 = vadd.s32 %v6073_v58, %v6071_v33  ;;  %v6085_v3 = vpop.xlane.xlu2 %6084 }
 0xc9c   :  { %v6059_v30 = vadd.s32 %v6058_v57, %v6056_v15  ;;  %v6086_v52 = vcvt.f32.s32 %v6085_v3 }
 0xc9d   :  { %6124 = vst.msk [vmem:[%s12987_s17 + $0x20] sm:$0xff] %vm1151_vm11, %v6074_v38 }
 0xc9e   :  { %6123 = vst.msk [vmem:[%s12987_s17 + $0x18] sm:$0xff] %vm1151_vm11, %v6059_v30  ;;  %v6089_v21 = vadd.s32 %v6088_v7, %v6086_v52 }
 0xca0   :  { %6125 = vst.msk [vmem:[%s12987_s17 + $0x28] sm:$0xff] %vm1151_vm11, %v6089_v21  ;;  %v6115_v35 = vpop.xlane.xlu0 %6114 }
 0xca1   :  { %v6100_v43 = vpop.xlane.xlu1 %6099  ;;  %v6116_v24 = vcvt.f32.s32 %v6115_v35 }
 0xca2   :  { %v6101_v62 = vcvt.f32.s32 %v6100_v43 }
 0xca3   :  { %v6119_v41 = vadd.s32 %v6118_v39, %v6116_v24 }
 0xca4   :  { %v6104_v36 = vadd.s32 %v6103_v32, %v6101_v62 }
 0xca5   :  { %6127 = vst.msk [vmem:[%s12987_s17 + $0x38] sm:$0xff] %vm1151_vm11, %v6119_v41 }
 0xca6   :  { %6126 = vst.msk [vmem:[%s12987_s17 + $0x30] sm:$0xff] %vm1151_vm11, %v6104_v36 }
 0xca7   :  { %7202 = dma.done.wait [#allocation3], 16  }
 0xca8   :  { %7203 = vsyncadd [#allocation3], 4294967280 }
 0xca9   :  { %6145 = sfence }
 0xcaa   :  { %6146 = vsyncpa [#allocation3], 1 }

</bundles_post_ra>
